<compile_context>
chip_gen: v7x
topology: tpu7x:2x2x1
jax: 0.10.0
libtpu: 0.0.40
codegen_flags: <defaults>
</compile_context>

<pallas_src>
import functools

import jax
import jax.numpy as jnp
from jax import lax
from jax.experimental import pallas as pl
from jax.experimental.pallas import tpu as pltpu

K_TAPS = 5          # Conv3d kernel size (5, 5, 5)
K2_PAD = 32         # 25 (kh, kw) taps padded to 32 (sublane-friendly)
CO_PAD = 16         # 6 output channels padded to 16 (clean bf16 (16,128) tiles)
POOL = 4            # MaxPool3d(4, 4)


# ----------------------------------------------------------------------------
# Pallas kernel: fused conv1 (+bias+ReLU) with depth-direction max pooling.
# ----------------------------------------------------------------------------
def _conv1_dpool_kernel(w_ref, b_ref, q_ref, o_ref, *, dc):
    """One grid step: sample n (axis 0), output depths [c*dc, (c+1)*dc) (axis 1).

    w_ref: (K_TAPS, CO_PAD, K2_PAD)      bf16  -- W2[kd, co, kh*5+kw]
    b_ref: (CO_PAD, 1)                   f32
    q_ref: (1, D, K2_PAD, HW)            bf16  -- Q[n, d, kh*5+kw, h*Wo+w]
    o_ref: (1, dc // POOL, CO_PAD, HW)   bf16  -- depth-pooled relu(conv1)
    """
    c = pl.program_id(1)
    d0 = c * dc
    co, hw = o_ref.shape[2], o_ref.shape[3]
    bias = b_ref[...]                                       # (co, 1) f32

    for g in range(dc // POOL):                             # pooled depth groups
        pooled = None
        for r in range(POOL):
            j = g * POOL + r                                # depth within chunk
            acc = jnp.zeros((co, hw), jnp.float32)
            for kd in range(K_TAPS):                        # fused depth taps
                acc += jnp.dot(w_ref[kd], q_ref[0, d0 + j + kd],
                               preferred_element_type=jnp.float32)
            act = jnp.maximum(acc + bias, 0.0)              # bias + ReLU (f32)
            pooled = act if pooled is None else jnp.maximum(pooled, act)
        o_ref[0, g] = pooled.astype(o_ref.dtype)            # lane-dense store


def _pick_dc(do, target=12):
    """Largest divisor of `do` that is a multiple of POOL and <= target."""
    best = POOL
    for cand in range(POOL, min(do, target) + 1, POOL):
        if do % cand == 0:
            best = cand
    return best


def conv1_relu_dpool(x_ncdhw, w_torch, b):
    """relu(Conv3d(1->6, 5)(x)), max-pooled over depth groups of 4.

    x: (N, 1, D, H, W) f32; w: (6, 1, 5, 5, 5); b: (6,).
    Returns (N, Do//4, CO_PAD, Ho, Wo) bf16 (extra channels are zero).
    """
    n, cin, d, h, w = x_ncdhw.shape
    assert cin == 1
    k = K_TAPS
    do, ho, wo = d - k + 1, h - k + 1, w - k + 1
    hw = ho * wo
    assert do % POOL == 0 and ho % POOL == 0 and wo % POOL == 0
    assert hw % 128 == 0, hw
    dc = _pick_dc(do)

    # Q[n, t, kh*5+kw, h*Wo+w] = x[n, 0, t, h+kh, w+kw]   (bf16, ~7 MB total).
    xb = x_ncdhw[:, 0].astype(jnp.bfloat16)                 # (N, D, H, W)
    taps = [xb[:, :, kh:kh + ho, kw:kw + wo].reshape(n, d, 1, hw)
            for kh in range(k) for kw in range(k)]
    q = jnp.concatenate(taps, axis=2)                       # (N, D, 25, HW)
    q = jnp.pad(q, ((0, 0), (0, 0), (0, K2_PAD - k * k), (0, 0)))

    # W2[kd, co, kh*5+kw] padded to (K_TAPS, CO_PAD, K2_PAD), bf16; bias column.
    cout = w_torch.shape[0]
    w2 = jnp.transpose(w_torch[:, 0], (1, 0, 2, 3)).reshape(k, cout, k * k)
    w2 = jnp.pad(w2, ((0, 0), (0, CO_PAD - cout), (0, K2_PAD - k * k)))
    w2 = w2.astype(jnp.bfloat16)
    b2 = jnp.pad(b, (0, CO_PAD - cout)).reshape(CO_PAD, 1).astype(jnp.float32)

    grid = (n, do // dc)                                    # (2, 4) = 8 blocks
    out = pl.pallas_call(
        functools.partial(_conv1_dpool_kernel, dc=dc),
        out_shape=jax.ShapeDtypeStruct((n, do // POOL, CO_PAD, hw), jnp.bfloat16),
        grid_spec=pltpu.PrefetchScalarGridSpec(
            num_scalar_prefetch=0,
            grid=grid,
            in_specs=[
                pl.BlockSpec((k, CO_PAD, K2_PAD), lambda i, c: (0, 0, 0)),
                pl.BlockSpec((CO_PAD, 1), lambda i, c: (0, 0)),
                # Full-depth Q slab for sample i: index map ignores the chunk
                # axis, so the 3.4 MB slab is DMA'd once per sample and stays
                # resident while all depth chunks of that sample run.
                pl.BlockSpec((1, d, K2_PAD, hw), lambda i, c: (i, 0, 0, 0)),
            ],
            out_specs=pl.BlockSpec((1, dc // POOL, CO_PAD, hw),
                                   lambda i, c: (i, c, 0, 0)),
        ),
        compiler_params=pltpu.CompilerParams(
            dimension_semantics=("parallel", "parallel")),
    )(w2, b2, q)
    return out.reshape(n, do // POOL, CO_PAD, ho, wo)


# ----------------------------------------------------------------------------
# Net3d6 forward.
# ----------------------------------------------------------------------------
def net3d6_forward(x_ncdhw, params):
    # Pallas: conv1 + bias + ReLU + depth part of pool1.
    y = conv1_relu_dpool(x_ncdhw, params["conv1_w"], params["conv1_b"])
    # Finish pool1: 4x4 reduction over (Ho, Wo) -- tiny, pure XLA.
    nb, dp, cp, ho, wo = y.shape
    y = y.reshape(nb, dp, cp, ho // POOL, POOL, wo // POOL, POOL)
    y = jnp.max(y, axis=(4, 6))                             # (N, 12, 16, 8, 8)
    # Drop channel padding, go to NCDHW f32 for the tiny tail.
    y = jnp.transpose(y[:, :, :6], (0, 2, 1, 3, 4)).astype(jnp.float32)

    # conv2 / pool2 / fc1: a few tens of KB -> plain XLA (per perf review).
    dn = ("NCDHW", "OIDHW", "NCDHW")
    y = lax.conv_general_dilated(y, params["conv2_w"], (1, 1, 1), "VALID",
                                 dimension_numbers=dn)
    y = jax.nn.relu(y + params["conv2_b"].reshape(1, -1, 1, 1, 1))
    nb, c2, dd, hh, ww = y.shape
    y = y[:, :, :dd - dd % POOL, :hh - hh % POOL, :ww - ww % POOL]
    y = y.reshape(nb, c2, dd // POOL, POOL, hh // POOL, POOL, ww // POOL, POOL)
    y = jnp.max(y, axis=(3, 5, 7))                          # (N, 16, 2, 1, 1)
    emb = y.reshape(-1, 32)                                 # matches x.view(-1, 32)
    return emb @ params["fc1_w"].T + params["fc1_b"]


# ----------------------------------------------------------------------------
# Pure-XLA f32 reference (numerical sanity check).
# ----------------------------------------------------------------------------
def reference_forward(x_ncdhw, params):
    dn = ("NCDHW", "OIDHW", "NCDHW")
    y = lax.conv_general_dilated(x_ncdhw, params["conv1_w"], (1, 1, 1),
                                 "VALID", dimension_numbers=dn)
    y = jax.nn.relu(y + params["conv1_b"].reshape(1, -1, 1, 1, 1))
    y = lax.reduce_window(y, -jnp.inf, lax.max,
                          (1, 1, 4, 4, 4), (1, 1, 4, 4, 4), "VALID")
    y = lax.conv_general_dilated(y, params["conv2_w"], (1, 1, 1),
                                 "VALID", dimension_numbers=dn)
    y = jax.nn.relu(y + params["conv2_b"].reshape(1, -1, 1, 1, 1))
    y = lax.reduce_window(y, -jnp.inf, lax.max,
                          (1, 1, 4, 4, 4), (1, 1, 4, 4, 4), "VALID")
    y = y.reshape(-1, 32)
    return y @ params["fc1_w"].T + params["fc1_b"]


def init_params(key):
    ks = jax.random.split(key, 6)

    def w_init(k, shape, fan_in):
        return jax.random.normal(k, shape, jnp.float32) / jnp.sqrt(float(fan_in))

    return {
        "conv1_w": w_init(ks[0], (6, 1, 5, 5, 5), 1 * 125),
        "conv1_b": 0.01 * jax.random.normal(ks[1], (6,), jnp.float32),
        "conv2_w": w_init(ks[2], (16, 6, 5, 5, 5), 6 * 125),
        "conv2_b": 0.01 * jax.random.normal(ks[3], (16,), jnp.float32),
        "fc1_w": w_init(ks[4], (2, 32), 32),
        "fc1_b": 0.01 * jax.random.normal(ks[5], (2,), jnp.float32),
    }


if __name__ == "__main__":
    key = jax.random.PRNGKey(0)
    k_x, k_p = jax.random.split(key)

    # Smallest spatial sizes consistent with lin_dim=32:
    # conv(5)->pool(4)->conv(5)->pool(4) maps 52 -> 2 and 36 -> 1, so the
    # flattened per-sample features are 16 * 2 * 1 * 1 = 32.
    x = jax.random.normal(k_x, (2, 1, 52, 36, 36), jnp.float32)  # NCDHW, Cin=1
    params = init_params(k_p)

    fwd = jax.jit(net3d6_forward)
    out = jax.block_until_ready(fwd(x, params))

    assert out.shape == (2, 2), out.shape
    assert bool(jnp.all(jnp.isfinite(out)))

    ref = jax.block_until_ready(jax.jit(reference_forward)(x, params))
    err = float(jnp.max(jnp.abs(out - ref)) / (jnp.max(jnp.abs(ref)) + 1e-6))
    assert err < 0.1, f"mismatch vs f32 reference: rel-err={err}"

    print("KERNEL_OK")
</pallas_src>

<mosaic_0001>
module attributes {stable_mosaic.version = 11 : i64} {
  func.func @_conv1_dpool_kernel(%arg0: i32, %arg1: i32, %arg2: memref<5x16x32xbf16, #tpu.memory_space<vmem>>, %arg3: memref<16x1xf32, #tpu.memory_space<vmem>>, %arg4: memref<1x52x32x1024xbf16, #tpu.memory_space<vmem>>, %arg5: memref<1x3x16x1024xbf16, #tpu.memory_space<vmem>>) attributes {dimension_semantics = [#tpu.dimension_semantics<parallel>, #tpu.dimension_semantics<parallel>], iteration_bounds = array<i64: 2, 4>, scalar_prefetch = 0 : i64, scratch_operands = 0 : i64, tpu.core_type = #tpu.core_type<tc>, window_params = [{pipeline_mode = #tpu.pipeline_mode<synchronous>, transform_indices = @transform_0, window_bounds = array<i64: 5, 16, 32>}, {pipeline_mode = #tpu.pipeline_mode<synchronous>, transform_indices = @transform_1, window_bounds = array<i64: 16, 1>}, {transform_indices = @transform_2, window_bounds = array<i64: 1, 52, 32, 1024>}, {transform_indices = @transform_3, window_bounds = array<i64: 1, 3, 16, 1024>}]} {
    %c12_i32 = arith.constant 12 : i32
    %0 = arith.muli %arg1, %c12_i32 : i32
    %c0 = arith.constant 0 : index
    %c0_0 = arith.constant 0 : index
    %1 = vector.load %arg3[%c0, %c0_0] : memref<16x1xf32, #tpu.memory_space<vmem>>, vector<16x1xf32>
    %cst = arith.constant 0.000000e+00 : f32
    %2 = vector.broadcast %cst : f32 to vector<16x1024xf32>
    %c0_1 = arith.constant 0 : index
    %c0_2 = arith.constant 0 : index
    %c0_3 = arith.constant 0 : index
    %3 = vector.load %arg2[%c0_1, %c0_2, %c0_3] : memref<5x16x32xbf16, #tpu.memory_space<vmem>>, vector<1x16x32xbf16>
    %4 = vector.shape_cast %3 : vector<1x16x32xbf16> to vector<16x32xbf16>
    %c0_i32 = arith.constant 0 : i32
    %5 = arith.addi %0, %c0_i32 : i32
    %c0_i32_4 = arith.constant 0 : i32
    %6 = arith.addi %5, %c0_i32_4 : i32
    %c0_5 = arith.constant 0 : index
    %7 = arith.index_cast %6 : i32 to index
    %c0_6 = arith.constant 0 : index
    %c0_7 = arith.constant 0 : index
    %8 = vector.load %arg4[%c0_5, %7, %c0_6, %c0_7] : memref<1x52x32x1024xbf16, #tpu.memory_space<vmem>>, vector<1x1x32x1024xbf16>
    %9 = vector.shape_cast %8 : vector<1x1x32x1024xbf16> to vector<32x1024xbf16>
    %cst_8 = arith.constant dense<0.000000e+00> : vector<16x1024xf32>
    %10 = tpu.matmul %4, %9, %cst_8 {dimension_numbers = #tpu.dot_dimension_numbers<[1], [0], [0], [1], [0, 0, 1, 1], [], []>} : vector<16x32xbf16>, vector<32x1024xbf16>, vector<16x1024xf32> -> vector<16x1024xf32>
    %11 = arith.addf %2, %10 : vector<16x1024xf32>
    %c1 = arith.constant 1 : index
    %c0_9 = arith.constant 0 : index
    %c0_10 = arith.constant 0 : index
    %12 = vector.load %arg2[%c1, %c0_9, %c0_10] : memref<5x16x32xbf16, #tpu.memory_space<vmem>>, vector<1x16x32xbf16>
    %13 = vector.shape_cast %12 : vector<1x16x32xbf16> to vector<16x32xbf16>
    %c0_i32_11 = arith.constant 0 : i32
    %14 = arith.addi %0, %c0_i32_11 : i32
    %c1_i32 = arith.constant 1 : i32
    %15 = arith.addi %14, %c1_i32 : i32
    %c0_12 = arith.constant 0 : index
    %16 = arith.index_cast %15 : i32 to index
    %c0_13 = arith.constant 0 : index
    %c0_14 = arith.constant 0 : index
    %17 = vector.load %arg4[%c0_12, %16, %c0_13, %c0_14] : memref<1x52x32x1024xbf16, #tpu.memory_space<vmem>>, vector<1x1x32x1024xbf16>
    %18 = vector.shape_cast %17 : vector<1x1x32x1024xbf16> to vector<32x1024xbf16>
    %cst_15 = arith.constant dense<0.000000e+00> : vector<16x1024xf32>
    %19 = tpu.matmul %13, %18, %cst_15 {dimension_numbers = #tpu.dot_dimension_numbers<[1], [0], [0], [1], [0, 0, 1, 1], [], []>} : vector<16x32xbf16>, vector<32x1024xbf16>, vector<16x1024xf32> -> vector<16x1024xf32>
    %20 = arith.addf %11, %19 : vector<16x1024xf32>
    %c2 = arith.constant 2 : index
    %c0_16 = arith.constant 0 : index
    %c0_17 = arith.constant 0 : index
    %21 = vector.load %arg2[%c2, %c0_16, %c0_17] : memref<5x16x32xbf16, #tpu.memory_space<vmem>>, vector<1x16x32xbf16>
    %22 = vector.shape_cast %21 : vector<1x16x32xbf16> to vector<16x32xbf16>
    %c0_i32_18 = arith.constant 0 : i32
    %23 = arith.addi %0, %c0_i32_18 : i32
    %c2_i32 = arith.constant 2 : i32
    %24 = arith.addi %23, %c2_i32 : i32
    %c0_19 = arith.constant 0 : index
    %25 = arith.index_cast %24 : i32 to index
    %c0_20 = arith.constant 0 : index
    %c0_21 = arith.constant 0 : index
    %26 = vector.load %arg4[%c0_19, %25, %c0_20, %c0_21] : memref<1x52x32x1024xbf16, #tpu.memory_space<vmem>>, vector<1x1x32x1024xbf16>
    %27 = vector.shape_cast %26 : vector<1x1x32x1024xbf16> to vector<32x1024xbf16>
    %cst_22 = arith.constant dense<0.000000e+00> : vector<16x1024xf32>
    %28 = tpu.matmul %22, %27, %cst_22 {dimension_numbers = #tpu.dot_dimension_numbers<[1], [0], [0], [1], [0, 0, 1, 1], [], []>} : vector<16x32xbf16>, vector<32x1024xbf16>, vector<16x1024xf32> -> vector<16x1024xf32>
    %29 = arith.addf %20, %28 : vector<16x1024xf32>
    %c3 = arith.constant 3 : index
    %c0_23 = arith.constant 0 : index
    %c0_24 = arith.constant 0 : index
    %30 = vector.load %arg2[%c3, %c0_23, %c0_24] : memref<5x16x32xbf16, #tpu.memory_space<vmem>>, vector<1x16x32xbf16>
    %31 = vector.shape_cast %30 : vector<1x16x32xbf16> to vector<16x32xbf16>
    %c0_i32_25 = arith.constant 0 : i32
    %32 = arith.addi %0, %c0_i32_25 : i32
    %c3_i32 = arith.constant 3 : i32
    %33 = arith.addi %32, %c3_i32 : i32
    %c0_26 = arith.constant 0 : index
    %34 = arith.index_cast %33 : i32 to index
    %c0_27 = arith.constant 0 : index
    %c0_28 = arith.constant 0 : index
    %35 = vector.load %arg4[%c0_26, %34, %c0_27, %c0_28] : memref<1x52x32x1024xbf16, #tpu.memory_space<vmem>>, vector<1x1x32x1024xbf16>
    %36 = vector.shape_cast %35 : vector<1x1x32x1024xbf16> to vector<32x1024xbf16>
    %cst_29 = arith.constant dense<0.000000e+00> : vector<16x1024xf32>
    %37 = tpu.matmul %31, %36, %cst_29 {dimension_numbers = #tpu.dot_dimension_numbers<[1], [0], [0], [1], [0, 0, 1, 1], [], []>} : vector<16x32xbf16>, vector<32x1024xbf16>, vector<16x1024xf32> -> vector<16x1024xf32>
    %38 = arith.addf %29, %37 : vector<16x1024xf32>
    %c4 = arith.constant 4 : index
    %c0_30 = arith.constant 0 : index
    %c0_31 = arith.constant 0 : index
    %39 = vector.load %arg2[%c4, %c0_30, %c0_31] : memref<5x16x32xbf16, #tpu.memory_space<vmem>>, vector<1x16x32xbf16>
    %40 = vector.shape_cast %39 : vector<1x16x32xbf16> to vector<16x32xbf16>
    %c0_i32_32 = arith.constant 0 : i32
    %41 = arith.addi %0, %c0_i32_32 : i32
    %c4_i32 = arith.constant 4 : i32
    %42 = arith.addi %41, %c4_i32 : i32
    %c0_33 = arith.constant 0 : index
    %43 = arith.index_cast %42 : i32 to index
    %c0_34 = arith.constant 0 : index
    %c0_35 = arith.constant 0 : index
    %44 = vector.load %arg4[%c0_33, %43, %c0_34, %c0_35] : memref<1x52x32x1024xbf16, #tpu.memory_space<vmem>>, vector<1x1x32x1024xbf16>
    %45 = vector.shape_cast %44 : vector<1x1x32x1024xbf16> to vector<32x1024xbf16>
    %cst_36 = arith.constant dense<0.000000e+00> : vector<16x1024xf32>
    %46 = tpu.matmul %40, %45, %cst_36 {dimension_numbers = #tpu.dot_dimension_numbers<[1], [0], [0], [1], [0, 0, 1, 1], [], []>} : vector<16x32xbf16>, vector<32x1024xbf16>, vector<16x1024xf32> -> vector<16x1024xf32>
    %47 = arith.addf %38, %46 : vector<16x1024xf32>
    %48 = vector.broadcast %1 : vector<16x1xf32> to vector<16x1024xf32>
    %49 = arith.addf %47, %48 : vector<16x1024xf32>
    %cst_37 = arith.constant 0.000000e+00 : f32
    %50 = vector.broadcast %cst_37 : f32 to vector<16x1024xf32>
    %51 = arith.maximumf %49, %50 : vector<16x1024xf32>
    %cst_38 = arith.constant 0.000000e+00 : f32
    %52 = vector.broadcast %cst_38 : f32 to vector<16x1024xf32>
    %c0_39 = arith.constant 0 : index
    %c0_40 = arith.constant 0 : index
    %c0_41 = arith.constant 0 : index
    %53 = vector.load %arg2[%c0_39, %c0_40, %c0_41] : memref<5x16x32xbf16, #tpu.memory_space<vmem>>, vector<1x16x32xbf16>
    %54 = vector.shape_cast %53 : vector<1x16x32xbf16> to vector<16x32xbf16>
    %c1_i32_42 = arith.constant 1 : i32
    %55 = arith.addi %0, %c1_i32_42 : i32
    %c0_i32_43 = arith.constant 0 : i32
    %56 = arith.addi %55, %c0_i32_43 : i32
    %c0_44 = arith.constant 0 : index
    %57 = arith.index_cast %56 : i32 to index
    %c0_45 = arith.constant 0 : index
    %c0_46 = arith.constant 0 : index
    %58 = vector.load %arg4[%c0_44, %57, %c0_45, %c0_46] : memref<1x52x32x1024xbf16, #tpu.memory_space<vmem>>, vector<1x1x32x1024xbf16>
    %59 = vector.shape_cast %58 : vector<1x1x32x1024xbf16> to vector<32x1024xbf16>
    %cst_47 = arith.constant dense<0.000000e+00> : vector<16x1024xf32>
    %60 = tpu.matmul %54, %59, %cst_47 {dimension_numbers = #tpu.dot_dimension_numbers<[1], [0], [0], [1], [0, 0, 1, 1], [], []>} : vector<16x32xbf16>, vector<32x1024xbf16>, vector<16x1024xf32> -> vector<16x1024xf32>
    %61 = arith.addf %52, %60 : vector<16x1024xf32>
    %c1_48 = arith.constant 1 : index
    %c0_49 = arith.constant 0 : index
    %c0_50 = arith.constant 0 : index
    %62 = vector.load %arg2[%c1_48, %c0_49, %c0_50] : memref<5x16x32xbf16, #tpu.memory_space<vmem>>, vector<1x16x32xbf16>
    %63 = vector.shape_cast %62 : vector<1x16x32xbf16> to vector<16x32xbf16>
    %c1_i32_51 = arith.constant 1 : i32
    %64 = arith.addi %0, %c1_i32_51 : i32
    %c1_i32_52 = arith.constant 1 : i32
    %65 = arith.addi %64, %c1_i32_52 : i32
    %c0_53 = arith.constant 0 : index
    %66 = arith.index_cast %65 : i32 to index
    %c0_54 = arith.constant 0 : index
    %c0_55 = arith.constant 0 : index
    %67 = vector.load %arg4[%c0_53, %66, %c0_54, %c0_55] : memref<1x52x32x1024xbf16, #tpu.memory_space<vmem>>, vector<1x1x32x1024xbf16>
    %68 = vector.shape_cast %67 : vector<1x1x32x1024xbf16> to vector<32x1024xbf16>
    %cst_56 = arith.constant dense<0.000000e+00> : vector<16x1024xf32>
    %69 = tpu.matmul %63, %68, %cst_56 {dimension_numbers = #tpu.dot_dimension_numbers<[1], [0], [0], [1], [0, 0, 1, 1], [], []>} : vector<16x32xbf16>, vector<32x1024xbf16>, vector<16x1024xf32> -> vector<16x1024xf32>
    %70 = arith.addf %61, %69 : vector<16x1024xf32>
    %c2_57 = arith.constant 2 : index
    %c0_58 = arith.constant 0 : index
    %c0_59 = arith.constant 0 : index
    %71 = vector.load %arg2[%c2_57, %c0_58, %c0_59] : memref<5x16x32xbf16, #tpu.memory_space<vmem>>, vector<1x16x32xbf16>
    %72 = vector.shape_cast %71 : vector<1x16x32xbf16> to vector<16x32xbf16>
    %c1_i32_60 = arith.constant 1 : i32
    %73 = arith.addi %0, %c1_i32_60 : i32
    %c2_i32_61 = arith.constant 2 : i32
    %74 = arith.addi %73, %c2_i32_61 : i32
    %c0_62 = arith.constant 0 : index
    %75 = arith.index_cast %74 : i32 to index
    %c0_63 = arith.constant 0 : index
    %c0_64 = arith.constant 0 : index
    %76 = vector.load %arg4[%c0_62, %75, %c0_63, %c0_64] : memref<1x52x32x1024xbf16, #tpu.memory_space<vmem>>, vector<1x1x32x1024xbf16>
    %77 = vector.shape_cast %76 : vector<1x1x32x1024xbf16> to vector<32x1024xbf16>
    %cst_65 = arith.constant dense<0.000000e+00> : vector<16x1024xf32>
    %78 = tpu.matmul %72, %77, %cst_65 {dimension_numbers = #tpu.dot_dimension_numbers<[1], [0], [0], [1], [0, 0, 1, 1], [], []>} : vector<16x32xbf16>, vector<32x1024xbf16>, vector<16x1024xf32> -> vector<16x1024xf32>
    %79 = arith.addf %70, %78 : vector<16x1024xf32>
    %c3_66 = arith.constant 3 : index
    %c0_67 = arith.constant 0 : index
    %c0_68 = arith.constant 0 : index
    %80 = vector.load %arg2[%c3_66, %c0_67, %c0_68] : memref<5x16x32xbf16, #tpu.memory_space<vmem>>, vector<1x16x32xbf16>
    %81 = vector.shape_cast %80 : vector<1x16x32xbf16> to vector<16x32xbf16>
    %c1_i32_69 = arith.constant 1 : i32
    %82 = arith.addi %0, %c1_i32_69 : i32
    %c3_i32_70 = arith.constant 3 : i32
    %83 = arith.addi %82, %c3_i32_70 : i32
    %c0_71 = arith.constant 0 : index
    %84 = arith.index_cast %83 : i32 to index
    %c0_72 = arith.constant 0 : index
    %c0_73 = arith.constant 0 : index
    %85 = vector.load %arg4[%c0_71, %84, %c0_72, %c0_73] : memref<1x52x32x1024xbf16, #tpu.memory_space<vmem>>, vector<1x1x32x1024xbf16>
    %86 = vector.shape_cast %85 : vector<1x1x32x1024xbf16> to vector<32x1024xbf16>
    %cst_74 = arith.constant dense<0.000000e+00> : vector<16x1024xf32>
    %87 = tpu.matmul %81, %86, %cst_74 {dimension_numbers = #tpu.dot_dimension_numbers<[1], [0], [0], [1], [0, 0, 1, 1], [], []>} : vector<16x32xbf16>, vector<32x1024xbf16>, vector<16x1024xf32> -> vector<16x1024xf32>
    %88 = arith.addf %79, %87 : vector<16x1024xf32>
    %c4_75 = arith.constant 4 : index
    %c0_76 = arith.constant 0 : index
    %c0_77 = arith.constant 0 : index
    %89 = vector.load %arg2[%c4_75, %c0_76, %c0_77] : memref<5x16x32xbf16, #tpu.memory_space<vmem>>, vector<1x16x32xbf16>
    %90 = vector.shape_cast %89 : vector<1x16x32xbf16> to vector<16x32xbf16>
    %c1_i32_78 = arith.constant 1 : i32
    %91 = arith.addi %0, %c1_i32_78 : i32
    %c4_i32_79 = arith.constant 4 : i32
    %92 = arith.addi %91, %c4_i32_79 : i32
    %c0_80 = arith.constant 0 : index
    %93 = arith.index_cast %92 : i32 to index
    %c0_81 = arith.constant 0 : index
    %c0_82 = arith.constant 0 : index
    %94 = vector.load %arg4[%c0_80, %93, %c0_81, %c0_82] : memref<1x52x32x1024xbf16, #tpu.memory_space<vmem>>, vector<1x1x32x1024xbf16>
    %95 = vector.shape_cast %94 : vector<1x1x32x1024xbf16> to vector<32x1024xbf16>
    %cst_83 = arith.constant dense<0.000000e+00> : vector<16x1024xf32>
    %96 = tpu.matmul %90, %95, %cst_83 {dimension_numbers = #tpu.dot_dimension_numbers<[1], [0], [0], [1], [0, 0, 1, 1], [], []>} : vector<16x32xbf16>, vector<32x1024xbf16>, vector<16x1024xf32> -> vector<16x1024xf32>
    %97 = arith.addf %88, %96 : vector<16x1024xf32>
    %98 = vector.broadcast %1 : vector<16x1xf32> to vector<16x1024xf32>
    %99 = arith.addf %97, %98 : vector<16x1024xf32>
    %cst_84 = arith.constant 0.000000e+00 : f32
    %100 = vector.broadcast %cst_84 : f32 to vector<16x1024xf32>
    %101 = arith.maximumf %99, %100 : vector<16x1024xf32>
    %102 = arith.maximumf %51, %101 : vector<16x1024xf32>
    %cst_85 = arith.constant 0.000000e+00 : f32
    %103 = vector.broadcast %cst_85 : f32 to vector<16x1024xf32>
    %c0_86 = arith.constant 0 : index
    %c0_87 = arith.constant 0 : index
    %c0_88 = arith.constant 0 : index
    %104 = vector.load %arg2[%c0_86, %c0_87, %c0_88] : memref<5x16x32xbf16, #tpu.memory_space<vmem>>, vector<1x16x32xbf16>
    %105 = vector.shape_cast %104 : vector<1x16x32xbf16> to vector<16x32xbf16>
    %c2_i32_89 = arith.constant 2 : i32
    %106 = arith.addi %0, %c2_i32_89 : i32
    %c0_i32_90 = arith.constant 0 : i32
    %107 = arith.addi %106, %c0_i32_90 : i32
    %c0_91 = arith.constant 0 : index
    %108 = arith.index_cast %107 : i32 to index
    %c0_92 = arith.constant 0 : index
    %c0_93 = arith.constant 0 : index
    %109 = vector.load %arg4[%c0_91, %108, %c0_92, %c0_93] : memref<1x52x32x1024xbf16, #tpu.memory_space<vmem>>, vector<1x1x32x1024xbf16>
    %110 = vector.shape_cast %109 : vector<1x1x32x1024xbf16> to vector<32x1024xbf16>
    %cst_94 = arith.constant dense<0.000000e+00> : vector<16x1024xf32>
    %111 = tpu.matmul %105, %110, %cst_94 {dimension_numbers = #tpu.dot_dimension_numbers<[1], [0], [0], [1], [0, 0, 1, 1], [], []>} : vector<16x32xbf16>, vector<32x1024xbf16>, vector<16x1024xf32> -> vector<16x1024xf32>
    %112 = arith.addf %103, %111 : vector<16x1024xf32>
    %c1_95 = arith.constant 1 : index
    %c0_96 = arith.constant 0 : index
    %c0_97 = arith.constant 0 : index
    %113 = vector.load %arg2[%c1_95, %c0_96, %c0_97] : memref<5x16x32xbf16, #tpu.memory_space<vmem>>, vector<1x16x32xbf16>
    %114 = vector.shape_cast %113 : vector<1x16x32xbf16> to vector<16x32xbf16>
    %c2_i32_98 = arith.constant 2 : i32
    %115 = arith.addi %0, %c2_i32_98 : i32
    %c1_i32_99 = arith.constant 1 : i32
    %116 = arith.addi %115, %c1_i32_99 : i32
    %c0_100 = arith.constant 0 : index
    %117 = arith.index_cast %116 : i32 to index
    %c0_101 = arith.constant 0 : index
    %c0_102 = arith.constant 0 : index
    %118 = vector.load %arg4[%c0_100, %117, %c0_101, %c0_102] : memref<1x52x32x1024xbf16, #tpu.memory_space<vmem>>, vector<1x1x32x1024xbf16>
    %119 = vector.shape_cast %118 : vector<1x1x32x1024xbf16> to vector<32x1024xbf16>
    %cst_103 = arith.constant dense<0.000000e+00> : vector<16x1024xf32>
    %120 = tpu.matmul %114, %119, %cst_103 {dimension_numbers = #tpu.dot_dimension_numbers<[1], [0], [0], [1], [0, 0, 1, 1], [], []>} : vector<16x32xbf16>, vector<32x1024xbf16>, vector<16x1024xf32> -> vector<16x1024xf32>
    %121 = arith.addf %112, %120 : vector<16x1024xf32>
    %c2_104 = arith.constant 2 : index
    %c0_105 = arith.constant 0 : index
    %c0_106 = arith.constant 0 : index
    %122 = vector.load %arg2[%c2_104, %c0_105, %c0_106] : memref<5x16x32xbf16, #tpu.memory_space<vmem>>, vector<1x16x32xbf16>
    %123 = vector.shape_cast %122 : vector<1x16x32xbf16> to vector<16x32xbf16>
    %c2_i32_107 = arith.constant 2 : i32
    %124 = arith.addi %0, %c2_i32_107 : i32
    %c2_i32_108 = arith.constant 2 : i32
    %125 = arith.addi %124, %c2_i32_108 : i32
    %c0_109 = arith.constant 0 : index
    %126 = arith.index_cast %125 : i32 to index
    %c0_110 = arith.constant 0 : index
    %c0_111 = arith.constant 0 : index
    %127 = vector.load %arg4[%c0_109, %126, %c0_110, %c0_111] : memref<1x52x32x1024xbf16, #tpu.memory_space<vmem>>, vector<1x1x32x1024xbf16>
    %128 = vector.shape_cast %127 : vector<1x1x32x1024xbf16> to vector<32x1024xbf16>
    %cst_112 = arith.constant dense<0.000000e+00> : vector<16x1024xf32>
    %129 = tpu.matmul %123, %128, %cst_112 {dimension_numbers = #tpu.dot_dimension_numbers<[1], [0], [0], [1], [0, 0, 1, 1], [], []>} : vector<16x32xbf16>, vector<32x1024xbf16>, vector<16x1024xf32> -> vector<16x1024xf32>
    %130 = arith.addf %121, %129 : vector<16x1024xf32>
    %c3_113 = arith.constant 3 : index
    %c0_114 = arith.constant 0 : index
    %c0_115 = arith.constant 0 : index
    %131 = vector.load %arg2[%c3_113, %c0_114, %c0_115] : memref<5x16x32xbf16, #tpu.memory_space<vmem>>, vector<1x16x32xbf16>
    %132 = vector.shape_cast %131 : vector<1x16x32xbf16> to vector<16x32xbf16>
    %c2_i32_116 = arith.constant 2 : i32
    %133 = arith.addi %0, %c2_i32_116 : i32
    %c3_i32_117 = arith.constant 3 : i32
    %134 = arith.addi %133, %c3_i32_117 : i32
    %c0_118 = arith.constant 0 : index
    %135 = arith.index_cast %134 : i32 to index
    %c0_119 = arith.constant 0 : index
    %c0_120 = arith.constant 0 : index
    %136 = vector.load %arg4[%c0_118, %135, %c0_119, %c0_120] : memref<1x52x32x1024xbf16, #tpu.memory_space<vmem>>, vector<1x1x32x1024xbf16>
    %137 = vector.shape_cast %136 : vector<1x1x32x1024xbf16> to vector<32x1024xbf16>
    %cst_121 = arith.constant dense<0.000000e+00> : vector<16x1024xf32>
    %138 = tpu.matmul %132, %137, %cst_121 {dimension_numbers = #tpu.dot_dimension_numbers<[1], [0], [0], [1], [0, 0, 1, 1], [], []>} : vector<16x32xbf16>, vector<32x1024xbf16>, vector<16x1024xf32> -> vector<16x1024xf32>
    %139 = arith.addf %130, %138 : vector<16x1024xf32>
    %c4_122 = arith.constant 4 : index
    %c0_123 = arith.constant 0 : index
    %c0_124 = arith.constant 0 : index
    %140 = vector.load %arg2[%c4_122, %c0_123, %c0_124] : memref<5x16x32xbf16, #tpu.memory_space<vmem>>, vector<1x16x32xbf16>
    %141 = vector.shape_cast %140 : vector<1x16x32xbf16> to vector<16x32xbf16>
    %c2_i32_125 = arith.constant 2 : i32
    %142 = arith.addi %0, %c2_i32_125 : i32
    %c4_i32_126 = arith.constant 4 : i32
    %143 = arith.addi %142, %c4_i32_126 : i32
    %c0_127 = arith.constant 0 : index
    %144 = arith.index_cast %143 : i32 to index
    %c0_128 = arith.constant 0 : index
    %c0_129 = arith.constant 0 : index
    %145 = vector.load %arg4[%c0_127, %144, %c0_128, %c0_129] : memref<1x52x32x1024xbf16, #tpu.memory_space<vmem>>, vector<1x1x32x1024xbf16>
    %146 = vector.shape_cast %145 : vector<1x1x32x1024xbf16> to vector<32x1024xbf16>
    %cst_130 = arith.constant dense<0.000000e+00> : vector<16x1024xf32>
    %147 = tpu.matmul %141, %146, %cst_130 {dimension_numbers = #tpu.dot_dimension_numbers<[1], [0], [0], [1], [0, 0, 1, 1], [], []>} : vector<16x32xbf16>, vector<32x1024xbf16>, vector<16x1024xf32> -> vector<16x1024xf32>
    %148 = arith.addf %139, %147 : vector<16x1024xf32>
    %149 = vector.broadcast %1 : vector<16x1xf32> to vector<16x1024xf32>
    %150 = arith.addf %148, %149 : vector<16x1024xf32>
    %cst_131 = arith.constant 0.000000e+00 : f32
    %151 = vector.broadcast %cst_131 : f32 to vector<16x1024xf32>
    %152 = arith.maximumf %150, %151 : vector<16x1024xf32>
    %153 = arith.maximumf %102, %152 : vector<16x1024xf32>
    %cst_132 = arith.constant 0.000000e+00 : f32
    %154 = vector.broadcast %cst_132 : f32 to vector<16x1024xf32>
    %c0_133 = arith.constant 0 : index
    %c0_134 = arith.constant 0 : index
    %c0_135 = arith.constant 0 : index
    %155 = vector.load %arg2[%c0_133, %c0_134, %c0_135] : memref<5x16x32xbf16, #tpu.memory_space<vmem>>, vector<1x16x32xbf16>
    %156 = vector.shape_cast %155 : vector<1x16x32xbf16> to vector<16x32xbf16>
    %c3_i32_136 = arith.constant 3 : i32
    %157 = arith.addi %0, %c3_i32_136 : i32
    %c0_i32_137 = arith.constant 0 : i32
    %158 = arith.addi %157, %c0_i32_137 : i32
    %c0_138 = arith.constant 0 : index
    %159 = arith.index_cast %158 : i32 to index
    %c0_139 = arith.constant 0 : index
    %c0_140 = arith.constant 0 : index
    %160 = vector.load %arg4[%c0_138, %159, %c0_139, %c0_140] : memref<1x52x32x1024xbf16, #tpu.memory_space<vmem>>, vector<1x1x32x1024xbf16>
    %161 = vector.shape_cast %160 : vector<1x1x32x1024xbf16> to vector<32x1024xbf16>
    %cst_141 = arith.constant dense<0.000000e+00> : vector<16x1024xf32>
    %162 = tpu.matmul %156, %161, %cst_141 {dimension_numbers = #tpu.dot_dimension_numbers<[1], [0], [0], [1], [0, 0, 1, 1], [], []>} : vector<16x32xbf16>, vector<32x1024xbf16>, vector<16x1024xf32> -> vector<16x1024xf32>
    %163 = arith.addf %154, %162 : vector<16x1024xf32>
    %c1_142 = arith.constant 1 : index
    %c0_143 = arith.constant 0 : index
    %c0_144 = arith.constant 0 : index
    %164 = vector.load %arg2[%c1_142, %c0_143, %c0_144] : memref<5x16x32xbf16, #tpu.memory_space<vmem>>, vector<1x16x32xbf16>
    %165 = vector.shape_cast %164 : vector<1x16x32xbf16> to vector<16x32xbf16>
    %c3_i32_145 = arith.constant 3 : i32
    %166 = arith.addi %0, %c3_i32_145 : i32
    %c1_i32_146 = arith.constant 1 : i32
    %167 = arith.addi %166, %c1_i32_146 : i32
    %c0_147 = arith.constant 0 : index
    %168 = arith.index_cast %167 : i32 to index
    %c0_148 = arith.constant 0 : index
    %c0_149 = arith.constant 0 : index
    %169 = vector.load %arg4[%c0_147, %168, %c0_148, %c0_149] : memref<1x52x32x1024xbf16, #tpu.memory_space<vmem>>, vector<1x1x32x1024xbf16>
    %170 = vector.shape_cast %169 : vector<1x1x32x1024xbf16> to vector<32x1024xbf16>
    %cst_150 = arith.constant dense<0.000000e+00> : vector<16x1024xf32>
    %171 = tpu.matmul %165, %170, %cst_150 {dimension_numbers = #tpu.dot_dimension_numbers<[1], [0], [0], [1], [0, 0, 1, 1], [], []>} : vector<16x32xbf16>, vector<32x1024xbf16>, vector<16x1024xf32> -> vector<16x1024xf32>
    %172 = arith.addf %163, %171 : vector<16x1024xf32>
    %c2_151 = arith.constant 2 : index
    %c0_152 = arith.constant 0 : index
    %c0_153 = arith.constant 0 : index
    %173 = vector.load %arg2[%c2_151, %c0_152, %c0_153] : memref<5x16x32xbf16, #tpu.memory_space<vmem>>, vector<1x16x32xbf16>
    %174 = vector.shape_cast %173 : vector<1x16x32xbf16> to vector<16x32xbf16>
    %c3_i32_154 = arith.constant 3 : i32
    %175 = arith.addi %0, %c3_i32_154 : i32
    %c2_i32_155 = arith.constant 2 : i32
    %176 = arith.addi %175, %c2_i32_155 : i32
    %c0_156 = arith.constant 0 : index
    %177 = arith.index_cast %176 : i32 to index
    %c0_157 = arith.constant 0 : index
    %c0_158 = arith.constant 0 : index
    %178 = vector.load %arg4[%c0_156, %177, %c0_157, %c0_158] : memref<1x52x32x1024xbf16, #tpu.memory_space<vmem>>, vector<1x1x32x1024xbf16>
    %179 = vector.shape_cast %178 : vector<1x1x32x1024xbf16> to vector<32x1024xbf16>
    %cst_159 = arith.constant dense<0.000000e+00> : vector<16x1024xf32>
    %180 = tpu.matmul %174, %179, %cst_159 {dimension_numbers = #tpu.dot_dimension_numbers<[1], [0], [0], [1], [0, 0, 1, 1], [], []>} : vector<16x32xbf16>, vector<32x1024xbf16>, vector<16x1024xf32> -> vector<16x1024xf32>
    %181 = arith.addf %172, %180 : vector<16x1024xf32>
    %c3_160 = arith.constant 3 : index
    %c0_161 = arith.constant 0 : index
    %c0_162 = arith.constant 0 : index
    %182 = vector.load %arg2[%c3_160, %c0_161, %c0_162] : memref<5x16x32xbf16, #tpu.memory_space<vmem>>, vector<1x16x32xbf16>
    %183 = vector.shape_cast %182 : vector<1x16x32xbf16> to vector<16x32xbf16>
    %c3_i32_163 = arith.constant 3 : i32
    %184 = arith.addi %0, %c3_i32_163 : i32
    %c3_i32_164 = arith.constant 3 : i32
    %185 = arith.addi %184, %c3_i32_164 : i32
    %c0_165 = arith.constant 0 : index
    %186 = arith.index_cast %185 : i32 to index
    %c0_166 = arith.constant 0 : index
    %c0_167 = arith.constant 0 : index
    %187 = vector.load %arg4[%c0_165, %186, %c0_166, %c0_167] : memref<1x52x32x1024xbf16, #tpu.memory_space<vmem>>, vector<1x1x32x1024xbf16>
    %188 = vector.shape_cast %187 : vector<1x1x32x1024xbf16> to vector<32x1024xbf16>
    %cst_168 = arith.constant dense<0.000000e+00> : vector<16x1024xf32>
    %189 = tpu.matmul %183, %188, %cst_168 {dimension_numbers = #tpu.dot_dimension_numbers<[1], [0], [0], [1], [0, 0, 1, 1], [], []>} : vector<16x32xbf16>, vector<32x1024xbf16>, vector<16x1024xf32> -> vector<16x1024xf32>
    %190 = arith.addf %181, %189 : vector<16x1024xf32>
    %c4_169 = arith.constant 4 : index
    %c0_170 = arith.constant 0 : index
    %c0_171 = arith.constant 0 : index
    %191 = vector.load %arg2[%c4_169, %c0_170, %c0_171] : memref<5x16x32xbf16, #tpu.memory_space<vmem>>, vector<1x16x32xbf16>
    %192 = vector.shape_cast %191 : vector<1x16x32xbf16> to vector<16x32xbf16>
    %c3_i32_172 = arith.constant 3 : i32
    %193 = arith.addi %0, %c3_i32_172 : i32
    %c4_i32_173 = arith.constant 4 : i32
    %194 = arith.addi %193, %c4_i32_173 : i32
    %c0_174 = arith.constant 0 : index
    %195 = arith.index_cast %194 : i32 to index
    %c0_175 = arith.constant 0 : index
    %c0_176 = arith.constant 0 : index
    %196 = vector.load %arg4[%c0_174, %195, %c0_175, %c0_176] : memref<1x52x32x1024xbf16, #tpu.memory_space<vmem>>, vector<1x1x32x1024xbf16>
    %197 = vector.shape_cast %196 : vector<1x1x32x1024xbf16> to vector<32x1024xbf16>
    %cst_177 = arith.constant dense<0.000000e+00> : vector<16x1024xf32>
    %198 = tpu.matmul %192, %197, %cst_177 {dimension_numbers = #tpu.dot_dimension_numbers<[1], [0], [0], [1], [0, 0, 1, 1], [], []>} : vector<16x32xbf16>, vector<32x1024xbf16>, vector<16x1024xf32> -> vector<16x1024xf32>
    %199 = arith.addf %190, %198 : vector<16x1024xf32>
    %200 = vector.broadcast %1 : vector<16x1xf32> to vector<16x1024xf32>
    %201 = arith.addf %199, %200 : vector<16x1024xf32>
    %cst_178 = arith.constant 0.000000e+00 : f32
    %202 = vector.broadcast %cst_178 : f32 to vector<16x1024xf32>
    %203 = arith.maximumf %201, %202 : vector<16x1024xf32>
    %204 = arith.maximumf %153, %203 : vector<16x1024xf32>
    %205 = arith.truncf %204 : vector<16x1024xf32> to vector<16x1024xbf16>
    %c0_179 = arith.constant 0 : index
    %c0_180 = arith.constant 0 : index
    %c0_181 = arith.constant 0 : index
    %c0_182 = arith.constant 0 : index
    %206 = vector.load %arg5[%c0_179, %c0_180, %c0_181, %c0_182] : memref<1x3x16x1024xbf16, #tpu.memory_space<vmem>>, vector<1x1x16x1024xbf16>
    %207 = vector.shape_cast %206 : vector<1x1x16x1024xbf16> to vector<16x1024xbf16>
    %208 = vector.shape_cast %205 : vector<16x1024xbf16> to vector<1x1x16x1024xbf16>
    tpu.vector_store %arg5[%c0_179, %c0_180, %c0_181, %c0_182], %208 {strides = array<i32>} : memref<1x3x16x1024xbf16, #tpu.memory_space<vmem>>, vector<1x1x16x1024xbf16>,
    %cst_183 = arith.constant 0.000000e+00 : f32
    %209 = vector.broadcast %cst_183 : f32 to vector<16x1024xf32>
    %c0_184 = arith.constant 0 : index
    %c0_185 = arith.constant 0 : index
    %c0_186 = arith.constant 0 : index
    %210 = vector.load %arg2[%c0_184, %c0_185, %c0_186] : memref<5x16x32xbf16, #tpu.memory_space<vmem>>, vector<1x16x32xbf16>
    %211 = vector.shape_cast %210 : vector<1x16x32xbf16> to vector<16x32xbf16>
    %c4_i32_187 = arith.constant 4 : i32
    %212 = arith.addi %0, %c4_i32_187 : i32
    %c0_i32_188 = arith.constant 0 : i32
    %213 = arith.addi %212, %c0_i32_188 : i32
    %c0_189 = arith.constant 0 : index
    %214 = arith.index_cast %213 : i32 to index
    %c0_190 = arith.constant 0 : index
    %c0_191 = arith.constant 0 : index
    %215 = vector.load %arg4[%c0_189, %214, %c0_190, %c0_191] : memref<1x52x32x1024xbf16, #tpu.memory_space<vmem>>, vector<1x1x32x1024xbf16>
    %216 = vector.shape_cast %215 : vector<1x1x32x1024xbf16> to vector<32x1024xbf16>
    %cst_192 = arith.constant dense<0.000000e+00> : vector<16x1024xf32>
    %217 = tpu.matmul %211, %216, %cst_192 {dimension_numbers = #tpu.dot_dimension_numbers<[1], [0], [0], [1], [0, 0, 1, 1], [], []>} : vector<16x32xbf16>, vector<32x1024xbf16>, vector<16x1024xf32> -> vector<16x1024xf32>
    %218 = arith.addf %209, %217 : vector<16x1024xf32>
    %c1_193 = arith.constant 1 : index
    %c0_194 = arith.constant 0 : index
    %c0_195 = arith.constant 0 : index
    %219 = vector.load %arg2[%c1_193, %c0_194, %c0_195] : memref<5x16x32xbf16, #tpu.memory_space<vmem>>, vector<1x16x32xbf16>
    %220 = vector.shape_cast %219 : vector<1x16x32xbf16> to vector<16x32xbf16>
    %c4_i32_196 = arith.constant 4 : i32
    %221 = arith.addi %0, %c4_i32_196 : i32
    %c1_i32_197 = arith.constant 1 : i32
    %222 = arith.addi %221, %c1_i32_197 : i32
    %c0_198 = arith.constant 0 : index
    %223 = arith.index_cast %222 : i32 to index
    %c0_199 = arith.constant 0 : index
    %c0_200 = arith.constant 0 : index
    %224 = vector.load %arg4[%c0_198, %223, %c0_199, %c0_200] : memref<1x52x32x1024xbf16, #tpu.memory_space<vmem>>, vector<1x1x32x1024xbf16>
    %225 = vector.shape_cast %224 : vector<1x1x32x1024xbf16> to vector<32x1024xbf16>
    %cst_201 = arith.constant dense<0.000000e+00> : vector<16x1024xf32>
    %226 = tpu.matmul %220, %225, %cst_201 {dimension_numbers = #tpu.dot_dimension_numbers<[1], [0], [0], [1], [0, 0, 1, 1], [], []>} : vector<16x32xbf16>, vector<32x1024xbf16>, vector<16x1024xf32> -> vector<16x1024xf32>
    %227 = arith.addf %218, %226 : vector<16x1024xf32>
    %c2_202 = arith.constant 2 : index
    %c0_203 = arith.constant 0 : index
    %c0_204 = arith.constant 0 : index
    %228 = vector.load %arg2[%c2_202, %c0_203, %c0_204] : memref<5x16x32xbf16, #tpu.memory_space<vmem>>, vector<1x16x32xbf16>
    %229 = vector.shape_cast %228 : vector<1x16x32xbf16> to vector<16x32xbf16>
    %c4_i32_205 = arith.constant 4 : i32
    %230 = arith.addi %0, %c4_i32_205 : i32
    %c2_i32_206 = arith.constant 2 : i32
    %231 = arith.addi %230, %c2_i32_206 : i32
    %c0_207 = arith.constant 0 : index
    %232 = arith.index_cast %231 : i32 to index
    %c0_208 = arith.constant 0 : index
    %c0_209 = arith.constant 0 : index
    %233 = vector.load %arg4[%c0_207, %232, %c0_208, %c0_209] : memref<1x52x32x1024xbf16, #tpu.memory_space<vmem>>, vector<1x1x32x1024xbf16>
    %234 = vector.shape_cast %233 : vector<1x1x32x1024xbf16> to vector<32x1024xbf16>
    %cst_210 = arith.constant dense<0.000000e+00> : vector<16x1024xf32>
    %235 = tpu.matmul %229, %234, %cst_210 {dimension_numbers = #tpu.dot_dimension_numbers<[1], [0], [0], [1], [0, 0, 1, 1], [], []>} : vector<16x32xbf16>, vector<32x1024xbf16>, vector<16x1024xf32> -> vector<16x1024xf32>
    %236 = arith.addf %227, %235 : vector<16x1024xf32>
    %c3_211 = arith.constant 3 : index
    %c0_212 = arith.constant 0 : index
    %c0_213 = arith.constant 0 : index
    %237 = vector.load %arg2[%c3_211, %c0_212, %c0_213] : memref<5x16x32xbf16, #tpu.memory_space<vmem>>, vector<1x16x32xbf16>
    %238 = vector.shape_cast %237 : vector<1x16x32xbf16> to vector<16x32xbf16>
    %c4_i32_214 = arith.constant 4 : i32
    %239 = arith.addi %0, %c4_i32_214 : i32
    %c3_i32_215 = arith.constant 3 : i32
    %240 = arith.addi %239, %c3_i32_215 : i32
    %c0_216 = arith.constant 0 : index
    %241 = arith.index_cast %240 : i32 to index
    %c0_217 = arith.constant 0 : index
    %c0_218 = arith.constant 0 : index
    %242 = vector.load %arg4[%c0_216, %241, %c0_217, %c0_218] : memref<1x52x32x1024xbf16, #tpu.memory_space<vmem>>, vector<1x1x32x1024xbf16>
    %243 = vector.shape_cast %242 : vector<1x1x32x1024xbf16> to vector<32x1024xbf16>
    %cst_219 = arith.constant dense<0.000000e+00> : vector<16x1024xf32>
    %244 = tpu.matmul %238, %243, %cst_219 {dimension_numbers = #tpu.dot_dimension_numbers<[1], [0], [0], [1], [0, 0, 1, 1], [], []>} : vector<16x32xbf16>, vector<32x1024xbf16>, vector<16x1024xf32> -> vector<16x1024xf32>
    %245 = arith.addf %236, %244 : vector<16x1024xf32>
    %c4_220 = arith.constant 4 : index
    %c0_221 = arith.constant 0 : index
    %c0_222 = arith.constant 0 : index
    %246 = vector.load %arg2[%c4_220, %c0_221, %c0_222] : memref<5x16x32xbf16, #tpu.memory_space<vmem>>, vector<1x16x32xbf16>
    %247 = vector.shape_cast %246 : vector<1x16x32xbf16> to vector<16x32xbf16>
    %c4_i32_223 = arith.constant 4 : i32
    %248 = arith.addi %0, %c4_i32_223 : i32
    %c4_i32_224 = arith.constant 4 : i32
    %249 = arith.addi %248, %c4_i32_224 : i32
    %c0_225 = arith.constant 0 : index
    %250 = arith.index_cast %249 : i32 to index
    %c0_226 = arith.constant 0 : index
    %c0_227 = arith.constant 0 : index
    %251 = vector.load %arg4[%c0_225, %250, %c0_226, %c0_227] : memref<1x52x32x1024xbf16, #tpu.memory_space<vmem>>, vector<1x1x32x1024xbf16>
    %252 = vector.shape_cast %251 : vector<1x1x32x1024xbf16> to vector<32x1024xbf16>
    %cst_228 = arith.constant dense<0.000000e+00> : vector<16x1024xf32>
    %253 = tpu.matmul %247, %252, %cst_228 {dimension_numbers = #tpu.dot_dimension_numbers<[1], [0], [0], [1], [0, 0, 1, 1], [], []>} : vector<16x32xbf16>, vector<32x1024xbf16>, vector<16x1024xf32> -> vector<16x1024xf32>
    %254 = arith.addf %245, %253 : vector<16x1024xf32>
    %255 = vector.broadcast %1 : vector<16x1xf32> to vector<16x1024xf32>
    %256 = arith.addf %254, %255 : vector<16x1024xf32>
    %cst_229 = arith.constant 0.000000e+00 : f32
    %257 = vector.broadcast %cst_229 : f32 to vector<16x1024xf32>
    %258 = arith.maximumf %256, %257 : vector<16x1024xf32>
    %cst_230 = arith.constant 0.000000e+00 : f32
    %259 = vector.broadcast %cst_230 : f32 to vector<16x1024xf32>
    %c0_231 = arith.constant 0 : index
    %c0_232 = arith.constant 0 : index
    %c0_233 = arith.constant 0 : index
    %260 = vector.load %arg2[%c0_231, %c0_232, %c0_233] : memref<5x16x32xbf16, #tpu.memory_space<vmem>>, vector<1x16x32xbf16>
    %261 = vector.shape_cast %260 : vector<1x16x32xbf16> to vector<16x32xbf16>
    %c5_i32 = arith.constant 5 : i32
    %262 = arith.addi %0, %c5_i32 : i32
    %c0_i32_234 = arith.constant 0 : i32
    %263 = arith.addi %262, %c0_i32_234 : i32
    %c0_235 = arith.constant 0 : index
    %264 = arith.index_cast %263 : i32 to index
    %c0_236 = arith.constant 0 : index
    %c0_237 = arith.constant 0 : index
    %265 = vector.load %arg4[%c0_235, %264, %c0_236, %c0_237] : memref<1x52x32x1024xbf16, #tpu.memory_space<vmem>>, vector<1x1x32x1024xbf16>
    %266 = vector.shape_cast %265 : vector<1x1x32x1024xbf16> to vector<32x1024xbf16>
    %cst_238 = arith.constant dense<0.000000e+00> : vector<16x1024xf32>
    %267 = tpu.matmul %261, %266, %cst_238 {dimension_numbers = #tpu.dot_dimension_numbers<[1], [0], [0], [1], [0, 0, 1, 1], [], []>} : vector<16x32xbf16>, vector<32x1024xbf16>, vector<16x1024xf32> -> vector<16x1024xf32>
    %268 = arith.addf %259, %267 : vector<16x1024xf32>
    %c1_239 = arith.constant 1 : index
    %c0_240 = arith.constant 0 : index
    %c0_241 = arith.constant 0 : index
    %269 = vector.load %arg2[%c1_239, %c0_240, %c0_241] : memref<5x16x32xbf16, #tpu.memory_space<vmem>>, vector<1x16x32xbf16>
    %270 = vector.shape_cast %269 : vector<1x16x32xbf16> to vector<16x32xbf16>
    %c5_i32_242 = arith.constant 5 : i32
    %271 = arith.addi %0, %c5_i32_242 : i32
    %c1_i32_243 = arith.constant 1 : i32
    %272 = arith.addi %271, %c1_i32_243 : i32
    %c0_244 = arith.constant 0 : index
    %273 = arith.index_cast %272 : i32 to index
    %c0_245 = arith.constant 0 : index
    %c0_246 = arith.constant 0 : index
    %274 = vector.load %arg4[%c0_244, %273, %c0_245, %c0_246] : memref<1x52x32x1024xbf16, #tpu.memory_space<vmem>>, vector<1x1x32x1024xbf16>
    %275 = vector.shape_cast %274 : vector<1x1x32x1024xbf16> to vector<32x1024xbf16>
    %cst_247 = arith.constant dense<0.000000e+00> : vector<16x1024xf32>
    %276 = tpu.matmul %270, %275, %cst_247 {dimension_numbers = #tpu.dot_dimension_numbers<[1], [0], [0], [1], [0, 0, 1, 1], [], []>} : vector<16x32xbf16>, vector<32x1024xbf16>, vector<16x1024xf32> -> vector<16x1024xf32>
    %277 = arith.addf %268, %276 : vector<16x1024xf32>
    %c2_248 = arith.constant 2 : index
    %c0_249 = arith.constant 0 : index
    %c0_250 = arith.constant 0 : index
    %278 = vector.load %arg2[%c2_248, %c0_249, %c0_250] : memref<5x16x32xbf16, #tpu.memory_space<vmem>>, vector<1x16x32xbf16>
    %279 = vector.shape_cast %278 : vector<1x16x32xbf16> to vector<16x32xbf16>
    %c5_i32_251 = arith.constant 5 : i32
    %280 = arith.addi %0, %c5_i32_251 : i32
    %c2_i32_252 = arith.constant 2 : i32
    %281 = arith.addi %280, %c2_i32_252 : i32
    %c0_253 = arith.constant 0 : index
    %282 = arith.index_cast %281 : i32 to index
    %c0_254 = arith.constant 0 : index
    %c0_255 = arith.constant 0 : index
    %283 = vector.load %arg4[%c0_253, %282, %c0_254, %c0_255] : memref<1x52x32x1024xbf16, #tpu.memory_space<vmem>>, vector<1x1x32x1024xbf16>
    %284 = vector.shape_cast %283 : vector<1x1x32x1024xbf16> to vector<32x1024xbf16>
    %cst_256 = arith.constant dense<0.000000e+00> : vector<16x1024xf32>
    %285 = tpu.matmul %279, %284, %cst_256 {dimension_numbers = #tpu.dot_dimension_numbers<[1], [0], [0], [1], [0, 0, 1, 1], [], []>} : vector<16x32xbf16>, vector<32x1024xbf16>, vector<16x1024xf32> -> vector<16x1024xf32>
    %286 = arith.addf %277, %285 : vector<16x1024xf32>
    %c3_257 = arith.constant 3 : index
    %c0_258 = arith.constant 0 : index
    %c0_259 = arith.constant 0 : index
    %287 = vector.load %arg2[%c3_257, %c0_258, %c0_259] : memref<5x16x32xbf16, #tpu.memory_space<vmem>>, vector<1x16x32xbf16>
    %288 = vector.shape_cast %287 : vector<1x16x32xbf16> to vector<16x32xbf16>
    %c5_i32_260 = arith.constant 5 : i32
    %289 = arith.addi %0, %c5_i32_260 : i32
    %c3_i32_261 = arith.constant 3 : i32
    %290 = arith.addi %289, %c3_i32_261 : i32
    %c0_262 = arith.constant 0 : index
    %291 = arith.index_cast %290 : i32 to index
    %c0_263 = arith.constant 0 : index
    %c0_264 = arith.constant 0 : index
    %292 = vector.load %arg4[%c0_262, %291, %c0_263, %c0_264] : memref<1x52x32x1024xbf16, #tpu.memory_space<vmem>>, vector<1x1x32x1024xbf16>
    %293 = vector.shape_cast %292 : vector<1x1x32x1024xbf16> to vector<32x1024xbf16>
    %cst_265 = arith.constant dense<0.000000e+00> : vector<16x1024xf32>
    %294 = tpu.matmul %288, %293, %cst_265 {dimension_numbers = #tpu.dot_dimension_numbers<[1], [0], [0], [1], [0, 0, 1, 1], [], []>} : vector<16x32xbf16>, vector<32x1024xbf16>, vector<16x1024xf32> -> vector<16x1024xf32>
    %295 = arith.addf %286, %294 : vector<16x1024xf32>
    %c4_266 = arith.constant 4 : index
    %c0_267 = arith.constant 0 : index
    %c0_268 = arith.constant 0 : index
    %296 = vector.load %arg2[%c4_266, %c0_267, %c0_268] : memref<5x16x32xbf16, #tpu.memory_space<vmem>>, vector<1x16x32xbf16>
    %297 = vector.shape_cast %296 : vector<1x16x32xbf16> to vector<16x32xbf16>
    %c5_i32_269 = arith.constant 5 : i32
    %298 = arith.addi %0, %c5_i32_269 : i32
    %c4_i32_270 = arith.constant 4 : i32
    %299 = arith.addi %298, %c4_i32_270 : i32
    %c0_271 = arith.constant 0 : index
    %300 = arith.index_cast %299 : i32 to index
    %c0_272 = arith.constant 0 : index
    %c0_273 = arith.constant 0 : index
    %301 = vector.load %arg4[%c0_271, %300, %c0_272, %c0_273] : memref<1x52x32x1024xbf16, #tpu.memory_space<vmem>>, vector<1x1x32x1024xbf16>
    %302 = vector.shape_cast %301 : vector<1x1x32x1024xbf16> to vector<32x1024xbf16>
    %cst_274 = arith.constant dense<0.000000e+00> : vector<16x1024xf32>
    %303 = tpu.matmul %297, %302, %cst_274 {dimension_numbers = #tpu.dot_dimension_numbers<[1], [0], [0], [1], [0, 0, 1, 1], [], []>} : vector<16x32xbf16>, vector<32x1024xbf16>, vector<16x1024xf32> -> vector<16x1024xf32>
    %304 = arith.addf %295, %303 : vector<16x1024xf32>
    %305 = vector.broadcast %1 : vector<16x1xf32> to vector<16x1024xf32>
    %306 = arith.addf %304, %305 : vector<16x1024xf32>
    %cst_275 = arith.constant 0.000000e+00 : f32
    %307 = vector.broadcast %cst_275 : f32 to vector<16x1024xf32>
    %308 = arith.maximumf %306, %307 : vector<16x1024xf32>
    %309 = arith.maximumf %258, %308 : vector<16x1024xf32>
    %cst_276 = arith.constant 0.000000e+00 : f32
    %310 = vector.broadcast %cst_276 : f32 to vector<16x1024xf32>
    %c0_277 = arith.constant 0 : index
    %c0_278 = arith.constant 0 : index
    %c0_279 = arith.constant 0 : index
    %311 = vector.load %arg2[%c0_277, %c0_278, %c0_279] : memref<5x16x32xbf16, #tpu.memory_space<vmem>>, vector<1x16x32xbf16>
    %312 = vector.shape_cast %311 : vector<1x16x32xbf16> to vector<16x32xbf16>
    %c6_i32 = arith.constant 6 : i32
    %313 = arith.addi %0, %c6_i32 : i32
    %c0_i32_280 = arith.constant 0 : i32
    %314 = arith.addi %313, %c0_i32_280 : i32
    %c0_281 = arith.constant 0 : index
    %315 = arith.index_cast %314 : i32 to index
    %c0_282 = arith.constant 0 : index
    %c0_283 = arith.constant 0 : index
    %316 = vector.load %arg4[%c0_281, %315, %c0_282, %c0_283] : memref<1x52x32x1024xbf16, #tpu.memory_space<vmem>>, vector<1x1x32x1024xbf16>
    %317 = vector.shape_cast %316 : vector<1x1x32x1024xbf16> to vector<32x1024xbf16>
    %cst_284 = arith.constant dense<0.000000e+00> : vector<16x1024xf32>
    %318 = tpu.matmul %312, %317, %cst_284 {dimension_numbers = #tpu.dot_dimension_numbers<[1], [0], [0], [1], [0, 0, 1, 1], [], []>} : vector<16x32xbf16>, vector<32x1024xbf16>, vector<16x1024xf32> -> vector<16x1024xf32>
    %319 = arith.addf %310, %318 : vector<16x1024xf32>
    %c1_285 = arith.constant 1 : index
    %c0_286 = arith.constant 0 : index
    %c0_287 = arith.constant 0 : index
    %320 = vector.load %arg2[%c1_285, %c0_286, %c0_287] : memref<5x16x32xbf16, #tpu.memory_space<vmem>>, vector<1x16x32xbf16>
    %321 = vector.shape_cast %320 : vector<1x16x32xbf16> to vector<16x32xbf16>
    %c6_i32_288 = arith.constant 6 : i32
    %322 = arith.addi %0, %c6_i32_288 : i32
    %c1_i32_289 = arith.constant 1 : i32
    %323 = arith.addi %322, %c1_i32_289 : i32
    %c0_290 = arith.constant 0 : index
    %324 = arith.index_cast %323 : i32 to index
    %c0_291 = arith.constant 0 : index
    %c0_292 = arith.constant 0 : index
    %325 = vector.load %arg4[%c0_290, %324, %c0_291, %c0_292] : memref<1x52x32x1024xbf16, #tpu.memory_space<vmem>>, vector<1x1x32x1024xbf16>
    %326 = vector.shape_cast %325 : vector<1x1x32x1024xbf16> to vector<32x1024xbf16>
    %cst_293 = arith.constant dense<0.000000e+00> : vector<16x1024xf32>
    %327 = tpu.matmul %321, %326, %cst_293 {dimension_numbers = #tpu.dot_dimension_numbers<[1], [0], [0], [1], [0, 0, 1, 1], [], []>} : vector<16x32xbf16>, vector<32x1024xbf16>, vector<16x1024xf32> -> vector<16x1024xf32>
    %328 = arith.addf %319, %327 : vector<16x1024xf32>
    %c2_294 = arith.constant 2 : index
    %c0_295 = arith.constant 0 : index
    %c0_296 = arith.constant 0 : index
    %329 = vector.load %arg2[%c2_294, %c0_295, %c0_296] : memref<5x16x32xbf16, #tpu.memory_space<vmem>>, vector<1x16x32xbf16>
    %330 = vector.shape_cast %329 : vector<1x16x32xbf16> to vector<16x32xbf16>
    %c6_i32_297 = arith.constant 6 : i32
    %331 = arith.addi %0, %c6_i32_297 : i32
    %c2_i32_298 = arith.constant 2 : i32
    %332 = arith.addi %331, %c2_i32_298 : i32
    %c0_299 = arith.constant 0 : index
    %333 = arith.index_cast %332 : i32 to index
    %c0_300 = arith.constant 0 : index
    %c0_301 = arith.constant 0 : index
    %334 = vector.load %arg4[%c0_299, %333, %c0_300, %c0_301] : memref<1x52x32x1024xbf16, #tpu.memory_space<vmem>>, vector<1x1x32x1024xbf16>
    %335 = vector.shape_cast %334 : vector<1x1x32x1024xbf16> to vector<32x1024xbf16>
    %cst_302 = arith.constant dense<0.000000e+00> : vector<16x1024xf32>
    %336 = tpu.matmul %330, %335, %cst_302 {dimension_numbers = #tpu.dot_dimension_numbers<[1], [0], [0], [1], [0, 0, 1, 1], [], []>} : vector<16x32xbf16>, vector<32x1024xbf16>, vector<16x1024xf32> -> vector<16x1024xf32>
    %337 = arith.addf %328, %336 : vector<16x1024xf32>
    %c3_303 = arith.constant 3 : index
    %c0_304 = arith.constant 0 : index
    %c0_305 = arith.constant 0 : index
    %338 = vector.load %arg2[%c3_303, %c0_304, %c0_305] : memref<5x16x32xbf16, #tpu.memory_space<vmem>>, vector<1x16x32xbf16>
    %339 = vector.shape_cast %338 : vector<1x16x32xbf16> to vector<16x32xbf16>
    %c6_i32_306 = arith.constant 6 : i32
    %340 = arith.addi %0, %c6_i32_306 : i32
    %c3_i32_307 = arith.constant 3 : i32
    %341 = arith.addi %340, %c3_i32_307 : i32
    %c0_308 = arith.constant 0 : index
    %342 = arith.index_cast %341 : i32 to index
    %c0_309 = arith.constant 0 : index
    %c0_310 = arith.constant 0 : index
    %343 = vector.load %arg4[%c0_308, %342, %c0_309, %c0_310] : memref<1x52x32x1024xbf16, #tpu.memory_space<vmem>>, vector<1x1x32x1024xbf16>
    %344 = vector.shape_cast %343 : vector<1x1x32x1024xbf16> to vector<32x1024xbf16>
    %cst_311 = arith.constant dense<0.000000e+00> : vector<16x1024xf32>
    %345 = tpu.matmul %339, %344, %cst_311 {dimension_numbers = #tpu.dot_dimension_numbers<[1], [0], [0], [1], [0, 0, 1, 1], [], []>} : vector<16x32xbf16>, vector<32x1024xbf16>, vector<16x1024xf32> -> vector<16x1024xf32>
    %346 = arith.addf %337, %345 : vector<16x1024xf32>
    %c4_312 = arith.constant 4 : index
    %c0_313 = arith.constant 0 : index
    %c0_314 = arith.constant 0 : index
    %347 = vector.load %arg2[%c4_312, %c0_313, %c0_314] : memref<5x16x32xbf16, #tpu.memory_space<vmem>>, vector<1x16x32xbf16>
    %348 = vector.shape_cast %347 : vector<1x16x32xbf16> to vector<16x32xbf16>
    %c6_i32_315 = arith.constant 6 : i32
    %349 = arith.addi %0, %c6_i32_315 : i32
    %c4_i32_316 = arith.constant 4 : i32
    %350 = arith.addi %349, %c4_i32_316 : i32
    %c0_317 = arith.constant 0 : index
    %351 = arith.index_cast %350 : i32 to index
    %c0_318 = arith.constant 0 : index
    %c0_319 = arith.constant 0 : index
    %352 = vector.load %arg4[%c0_317, %351, %c0_318, %c0_319] : memref<1x52x32x1024xbf16, #tpu.memory_space<vmem>>, vector<1x1x32x1024xbf16>
    %353 = vector.shape_cast %352 : vector<1x1x32x1024xbf16> to vector<32x1024xbf16>
    %cst_320 = arith.constant dense<0.000000e+00> : vector<16x1024xf32>
    %354 = tpu.matmul %348, %353, %cst_320 {dimension_numbers = #tpu.dot_dimension_numbers<[1], [0], [0], [1], [0, 0, 1, 1], [], []>} : vector<16x32xbf16>, vector<32x1024xbf16>, vector<16x1024xf32> -> vector<16x1024xf32>
    %355 = arith.addf %346, %354 : vector<16x1024xf32>
    %356 = vector.broadcast %1 : vector<16x1xf32> to vector<16x1024xf32>
    %357 = arith.addf %355, %356 : vector<16x1024xf32>
    %cst_321 = arith.constant 0.000000e+00 : f32
    %358 = vector.broadcast %cst_321 : f32 to vector<16x1024xf32>
    %359 = arith.maximumf %357, %358 : vector<16x1024xf32>
    %360 = arith.maximumf %309, %359 : vector<16x1024xf32>
    %cst_322 = arith.constant 0.000000e+00 : f32
    %361 = vector.broadcast %cst_322 : f32 to vector<16x1024xf32>
    %c0_323 = arith.constant 0 : index
    %c0_324 = arith.constant 0 : index
    %c0_325 = arith.constant 0 : index
    %362 = vector.load %arg2[%c0_323, %c0_324, %c0_325] : memref<5x16x32xbf16, #tpu.memory_space<vmem>>, vector<1x16x32xbf16>
    %363 = vector.shape_cast %362 : vector<1x16x32xbf16> to vector<16x32xbf16>
    %c7_i32 = arith.constant 7 : i32
    %364 = arith.addi %0, %c7_i32 : i32
    %c0_i32_326 = arith.constant 0 : i32
    %365 = arith.addi %364, %c0_i32_326 : i32
    %c0_327 = arith.constant 0 : index
    %366 = arith.index_cast %365 : i32 to index
    %c0_328 = arith.constant 0 : index
    %c0_329 = arith.constant 0 : index
    %367 = vector.load %arg4[%c0_327, %366, %c0_328, %c0_329] : memref<1x52x32x1024xbf16, #tpu.memory_space<vmem>>, vector<1x1x32x1024xbf16>
    %368 = vector.shape_cast %367 : vector<1x1x32x1024xbf16> to vector<32x1024xbf16>
    %cst_330 = arith.constant dense<0.000000e+00> : vector<16x1024xf32>
    %369 = tpu.matmul %363, %368, %cst_330 {dimension_numbers = #tpu.dot_dimension_numbers<[1], [0], [0], [1], [0, 0, 1, 1], [], []>} : vector<16x32xbf16>, vector<32x1024xbf16>, vector<16x1024xf32> -> vector<16x1024xf32>
    %370 = arith.addf %361, %369 : vector<16x1024xf32>
    %c1_331 = arith.constant 1 : index
    %c0_332 = arith.constant 0 : index
    %c0_333 = arith.constant 0 : index
    %371 = vector.load %arg2[%c1_331, %c0_332, %c0_333] : memref<5x16x32xbf16, #tpu.memory_space<vmem>>, vector<1x16x32xbf16>
    %372 = vector.shape_cast %371 : vector<1x16x32xbf16> to vector<16x32xbf16>
    %c7_i32_334 = arith.constant 7 : i32
    %373 = arith.addi %0, %c7_i32_334 : i32
    %c1_i32_335 = arith.constant 1 : i32
    %374 = arith.addi %373, %c1_i32_335 : i32
    %c0_336 = arith.constant 0 : index
    %375 = arith.index_cast %374 : i32 to index
    %c0_337 = arith.constant 0 : index
    %c0_338 = arith.constant 0 : index
    %376 = vector.load %arg4[%c0_336, %375, %c0_337, %c0_338] : memref<1x52x32x1024xbf16, #tpu.memory_space<vmem>>, vector<1x1x32x1024xbf16>
    %377 = vector.shape_cast %376 : vector<1x1x32x1024xbf16> to vector<32x1024xbf16>
    %cst_339 = arith.constant dense<0.000000e+00> : vector<16x1024xf32>
    %378 = tpu.matmul %372, %377, %cst_339 {dimension_numbers = #tpu.dot_dimension_numbers<[1], [0], [0], [1], [0, 0, 1, 1], [], []>} : vector<16x32xbf16>, vector<32x1024xbf16>, vector<16x1024xf32> -> vector<16x1024xf32>
    %379 = arith.addf %370, %378 : vector<16x1024xf32>
    %c2_340 = arith.constant 2 : index
    %c0_341 = arith.constant 0 : index
    %c0_342 = arith.constant 0 : index
    %380 = vector.load %arg2[%c2_340, %c0_341, %c0_342] : memref<5x16x32xbf16, #tpu.memory_space<vmem>>, vector<1x16x32xbf16>
    %381 = vector.shape_cast %380 : vector<1x16x32xbf16> to vector<16x32xbf16>
    %c7_i32_343 = arith.constant 7 : i32
    %382 = arith.addi %0, %c7_i32_343 : i32
    %c2_i32_344 = arith.constant 2 : i32
    %383 = arith.addi %382, %c2_i32_344 : i32
    %c0_345 = arith.constant 0 : index
    %384 = arith.index_cast %383 : i32 to index
    %c0_346 = arith.constant 0 : index
    %c0_347 = arith.constant 0 : index
    %385 = vector.load %arg4[%c0_345, %384, %c0_346, %c0_347] : memref<1x52x32x1024xbf16, #tpu.memory_space<vmem>>, vector<1x1x32x1024xbf16>
    %386 = vector.shape_cast %385 : vector<1x1x32x1024xbf16> to vector<32x1024xbf16>
    %cst_348 = arith.constant dense<0.000000e+00> : vector<16x1024xf32>
    %387 = tpu.matmul %381, %386, %cst_348 {dimension_numbers = #tpu.dot_dimension_numbers<[1], [0], [0], [1], [0, 0, 1, 1], [], []>} : vector<16x32xbf16>, vector<32x1024xbf16>, vector<16x1024xf32> -> vector<16x1024xf32>
    %388 = arith.addf %379, %387 : vector<16x1024xf32>
    %c3_349 = arith.constant 3 : index
    %c0_350 = arith.constant 0 : index
    %c0_351 = arith.constant 0 : index
    %389 = vector.load %arg2[%c3_349, %c0_350, %c0_351] : memref<5x16x32xbf16, #tpu.memory_space<vmem>>, vector<1x16x32xbf16>
    %390 = vector.shape_cast %389 : vector<1x16x32xbf16> to vector<16x32xbf16>
    %c7_i32_352 = arith.constant 7 : i32
    %391 = arith.addi %0, %c7_i32_352 : i32
    %c3_i32_353 = arith.constant 3 : i32
    %392 = arith.addi %391, %c3_i32_353 : i32
    %c0_354 = arith.constant 0 : index
    %393 = arith.index_cast %392 : i32 to index
    %c0_355 = arith.constant 0 : index
    %c0_356 = arith.constant 0 : index
    %394 = vector.load %arg4[%c0_354, %393, %c0_355, %c0_356] : memref<1x52x32x1024xbf16, #tpu.memory_space<vmem>>, vector<1x1x32x1024xbf16>
    %395 = vector.shape_cast %394 : vector<1x1x32x1024xbf16> to vector<32x1024xbf16>
    %cst_357 = arith.constant dense<0.000000e+00> : vector<16x1024xf32>
    %396 = tpu.matmul %390, %395, %cst_357 {dimension_numbers = #tpu.dot_dimension_numbers<[1], [0], [0], [1], [0, 0, 1, 1], [], []>} : vector<16x32xbf16>, vector<32x1024xbf16>, vector<16x1024xf32> -> vector<16x1024xf32>
    %397 = arith.addf %388, %396 : vector<16x1024xf32>
    %c4_358 = arith.constant 4 : index
    %c0_359 = arith.constant 0 : index
    %c0_360 = arith.constant 0 : index
    %398 = vector.load %arg2[%c4_358, %c0_359, %c0_360] : memref<5x16x32xbf16, #tpu.memory_space<vmem>>, vector<1x16x32xbf16>
    %399 = vector.shape_cast %398 : vector<1x16x32xbf16> to vector<16x32xbf16>
    %c7_i32_361 = arith.constant 7 : i32
    %400 = arith.addi %0, %c7_i32_361 : i32
    %c4_i32_362 = arith.constant 4 : i32
    %401 = arith.addi %400, %c4_i32_362 : i32
    %c0_363 = arith.constant 0 : index
    %402 = arith.index_cast %401 : i32 to index
    %c0_364 = arith.constant 0 : index
    %c0_365 = arith.constant 0 : index
    %403 = vector.load %arg4[%c0_363, %402, %c0_364, %c0_365] : memref<1x52x32x1024xbf16, #tpu.memory_space<vmem>>, vector<1x1x32x1024xbf16>
    %404 = vector.shape_cast %403 : vector<1x1x32x1024xbf16> to vector<32x1024xbf16>
    %cst_366 = arith.constant dense<0.000000e+00> : vector<16x1024xf32>
    %405 = tpu.matmul %399, %404, %cst_366 {dimension_numbers = #tpu.dot_dimension_numbers<[1], [0], [0], [1], [0, 0, 1, 1], [], []>} : vector<16x32xbf16>, vector<32x1024xbf16>, vector<16x1024xf32> -> vector<16x1024xf32>
    %406 = arith.addf %397, %405 : vector<16x1024xf32>
    %407 = vector.broadcast %1 : vector<16x1xf32> to vector<16x1024xf32>
    %408 = arith.addf %406, %407 : vector<16x1024xf32>
    %cst_367 = arith.constant 0.000000e+00 : f32
    %409 = vector.broadcast %cst_367 : f32 to vector<16x1024xf32>
    %410 = arith.maximumf %408, %409 : vector<16x1024xf32>
    %411 = arith.maximumf %360, %410 : vector<16x1024xf32>
    %412 = arith.truncf %411 : vector<16x1024xf32> to vector<16x1024xbf16>
    %c0_368 = arith.constant 0 : index
    %c1_369 = arith.constant 1 : index
    %c0_370 = arith.constant 0 : index
    %c0_371 = arith.constant 0 : index
    %413 = vector.load %arg5[%c0_368, %c1_369, %c0_370, %c0_371] : memref<1x3x16x1024xbf16, #tpu.memory_space<vmem>>, vector<1x1x16x1024xbf16>
    %414 = vector.shape_cast %413 : vector<1x1x16x1024xbf16> to vector<16x1024xbf16>
    %415 = vector.shape_cast %412 : vector<16x1024xbf16> to vector<1x1x16x1024xbf16>
    tpu.vector_store %arg5[%c0_368, %c1_369, %c0_370, %c0_371], %415 {strides = array<i32>} : memref<1x3x16x1024xbf16, #tpu.memory_space<vmem>>, vector<1x1x16x1024xbf16>,
    %cst_372 = arith.constant 0.000000e+00 : f32
    %416 = vector.broadcast %cst_372 : f32 to vector<16x1024xf32>
    %c0_373 = arith.constant 0 : index
    %c0_374 = arith.constant 0 : index
    %c0_375 = arith.constant 0 : index
    %417 = vector.load %arg2[%c0_373, %c0_374, %c0_375] : memref<5x16x32xbf16, #tpu.memory_space<vmem>>, vector<1x16x32xbf16>
    %418 = vector.shape_cast %417 : vector<1x16x32xbf16> to vector<16x32xbf16>
    %c8_i32 = arith.constant 8 : i32
    %419 = arith.addi %0, %c8_i32 : i32
    %c0_i32_376 = arith.constant 0 : i32
    %420 = arith.addi %419, %c0_i32_376 : i32
    %c0_377 = arith.constant 0 : index
    %421 = arith.index_cast %420 : i32 to index
    %c0_378 = arith.constant 0 : index
    %c0_379 = arith.constant 0 : index
    %422 = vector.load %arg4[%c0_377, %421, %c0_378, %c0_379] : memref<1x52x32x1024xbf16, #tpu.memory_space<vmem>>, vector<1x1x32x1024xbf16>
    %423 = vector.shape_cast %422 : vector<1x1x32x1024xbf16> to vector<32x1024xbf16>
    %cst_380 = arith.constant dense<0.000000e+00> : vector<16x1024xf32>
    %424 = tpu.matmul %418, %423, %cst_380 {dimension_numbers = #tpu.dot_dimension_numbers<[1], [0], [0], [1], [0, 0, 1, 1], [], []>} : vector<16x32xbf16>, vector<32x1024xbf16>, vector<16x1024xf32> -> vector<16x1024xf32>
    %425 = arith.addf %416, %424 : vector<16x1024xf32>
    %c1_381 = arith.constant 1 : index
    %c0_382 = arith.constant 0 : index
    %c0_383 = arith.constant 0 : index
    %426 = vector.load %arg2[%c1_381, %c0_382, %c0_383] : memref<5x16x32xbf16, #tpu.memory_space<vmem>>, vector<1x16x32xbf16>
    %427 = vector.shape_cast %426 : vector<1x16x32xbf16> to vector<16x32xbf16>
    %c8_i32_384 = arith.constant 8 : i32
    %428 = arith.addi %0, %c8_i32_384 : i32
    %c1_i32_385 = arith.constant 1 : i32
    %429 = arith.addi %428, %c1_i32_385 : i32
    %c0_386 = arith.constant 0 : index
    %430 = arith.index_cast %429 : i32 to index
    %c0_387 = arith.constant 0 : index
    %c0_388 = arith.constant 0 : index
    %431 = vector.load %arg4[%c0_386, %430, %c0_387, %c0_388] : memref<1x52x32x1024xbf16, #tpu.memory_space<vmem>>, vector<1x1x32x1024xbf16>
    %432 = vector.shape_cast %431 : vector<1x1x32x1024xbf16> to vector<32x1024xbf16>
    %cst_389 = arith.constant dense<0.000000e+00> : vector<16x1024xf32>
    %433 = tpu.matmul %427, %432, %cst_389 {dimension_numbers = #tpu.dot_dimension_numbers<[1], [0], [0], [1], [0, 0, 1, 1], [], []>} : vector<16x32xbf16>, vector<32x1024xbf16>, vector<16x1024xf32> -> vector<16x1024xf32>
    %434 = arith.addf %425, %433 : vector<16x1024xf32>
    %c2_390 = arith.constant 2 : index
    %c0_391 = arith.constant 0 : index
    %c0_392 = arith.constant 0 : index
    %435 = vector.load %arg2[%c2_390, %c0_391, %c0_392] : memref<5x16x32xbf16, #tpu.memory_space<vmem>>, vector<1x16x32xbf16>
    %436 = vector.shape_cast %435 : vector<1x16x32xbf16> to vector<16x32xbf16>
    %c8_i32_393 = arith.constant 8 : i32
    %437 = arith.addi %0, %c8_i32_393 : i32
    %c2_i32_394 = arith.constant 2 : i32
    %438 = arith.addi %437, %c2_i32_394 : i32
    %c0_395 = arith.constant 0 : index
    %439 = arith.index_cast %438 : i32 to index
    %c0_396 = arith.constant 0 : index
    %c0_397 = arith.constant 0 : index
    %440 = vector.load %arg4[%c0_395, %439, %c0_396, %c0_397] : memref<1x52x32x1024xbf16, #tpu.memory_space<vmem>>, vector<1x1x32x1024xbf16>
    %441 = vector.shape_cast %440 : vector<1x1x32x1024xbf16> to vector<32x1024xbf16>
    %cst_398 = arith.constant dense<0.000000e+00> : vector<16x1024xf32>
    %442 = tpu.matmul %436, %441, %cst_398 {dimension_numbers = #tpu.dot_dimension_numbers<[1], [0], [0], [1], [0, 0, 1, 1], [], []>} : vector<16x32xbf16>, vector<32x1024xbf16>, vector<16x1024xf32> -> vector<16x1024xf32>
    %443 = arith.addf %434, %442 : vector<16x1024xf32>
    %c3_399 = arith.constant 3 : index
    %c0_400 = arith.constant 0 : index
    %c0_401 = arith.constant 0 : index
    %444 = vector.load %arg2[%c3_399, %c0_400, %c0_401] : memref<5x16x32xbf16, #tpu.memory_space<vmem>>, vector<1x16x32xbf16>
    %445 = vector.shape_cast %444 : vector<1x16x32xbf16> to vector<16x32xbf16>
    %c8_i32_402 = arith.constant 8 : i32
    %446 = arith.addi %0, %c8_i32_402 : i32
    %c3_i32_403 = arith.constant 3 : i32
    %447 = arith.addi %446, %c3_i32_403 : i32
    %c0_404 = arith.constant 0 : index
    %448 = arith.index_cast %447 : i32 to index
    %c0_405 = arith.constant 0 : index
    %c0_406 = arith.constant 0 : index
    %449 = vector.load %arg4[%c0_404, %448, %c0_405, %c0_406] : memref<1x52x32x1024xbf16, #tpu.memory_space<vmem>>, vector<1x1x32x1024xbf16>
    %450 = vector.shape_cast %449 : vector<1x1x32x1024xbf16> to vector<32x1024xbf16>
    %cst_407 = arith.constant dense<0.000000e+00> : vector<16x1024xf32>
    %451 = tpu.matmul %445, %450, %cst_407 {dimension_numbers = #tpu.dot_dimension_numbers<[1], [0], [0], [1], [0, 0, 1, 1], [], []>} : vector<16x32xbf16>, vector<32x1024xbf16>, vector<16x1024xf32> -> vector<16x1024xf32>
    %452 = arith.addf %443, %451 : vector<16x1024xf32>
    %c4_408 = arith.constant 4 : index
    %c0_409 = arith.constant 0 : index
    %c0_410 = arith.constant 0 : index
    %453 = vector.load %arg2[%c4_408, %c0_409, %c0_410] : memref<5x16x32xbf16, #tpu.memory_space<vmem>>, vector<1x16x32xbf16>
    %454 = vector.shape_cast %453 : vector<1x16x32xbf16> to vector<16x32xbf16>
    %c8_i32_411 = arith.constant 8 : i32
    %455 = arith.addi %0, %c8_i32_411 : i32
    %c4_i32_412 = arith.constant 4 : i32
    %456 = arith.addi %455, %c4_i32_412 : i32
    %c0_413 = arith.constant 0 : index
    %457 = arith.index_cast %456 : i32 to index
    %c0_414 = arith.constant 0 : index
    %c0_415 = arith.constant 0 : index
    %458 = vector.load %arg4[%c0_413, %457, %c0_414, %c0_415] : memref<1x52x32x1024xbf16, #tpu.memory_space<vmem>>, vector<1x1x32x1024xbf16>
    %459 = vector.shape_cast %458 : vector<1x1x32x1024xbf16> to vector<32x1024xbf16>
    %cst_416 = arith.constant dense<0.000000e+00> : vector<16x1024xf32>
    %460 = tpu.matmul %454, %459, %cst_416 {dimension_numbers = #tpu.dot_dimension_numbers<[1], [0], [0], [1], [0, 0, 1, 1], [], []>} : vector<16x32xbf16>, vector<32x1024xbf16>, vector<16x1024xf32> -> vector<16x1024xf32>
    %461 = arith.addf %452, %460 : vector<16x1024xf32>
    %462 = vector.broadcast %1 : vector<16x1xf32> to vector<16x1024xf32>
    %463 = arith.addf %461, %462 : vector<16x1024xf32>
    %cst_417 = arith.constant 0.000000e+00 : f32
    %464 = vector.broadcast %cst_417 : f32 to vector<16x1024xf32>
    %465 = arith.maximumf %463, %464 : vector<16x1024xf32>
    %cst_418 = arith.constant 0.000000e+00 : f32
    %466 = vector.broadcast %cst_418 : f32 to vector<16x1024xf32>
    %c0_419 = arith.constant 0 : index
    %c0_420 = arith.constant 0 : index
    %c0_421 = arith.constant 0 : index
    %467 = vector.load %arg2[%c0_419, %c0_420, %c0_421] : memref<5x16x32xbf16, #tpu.memory_space<vmem>>, vector<1x16x32xbf16>
    %468 = vector.shape_cast %467 : vector<1x16x32xbf16> to vector<16x32xbf16>
    %c9_i32 = arith.constant 9 : i32
    %469 = arith.addi %0, %c9_i32 : i32
    %c0_i32_422 = arith.constant 0 : i32
    %470 = arith.addi %469, %c0_i32_422 : i32
    %c0_423 = arith.constant 0 : index
    %471 = arith.index_cast %470 : i32 to index
    %c0_424 = arith.constant 0 : index
    %c0_425 = arith.constant 0 : index
    %472 = vector.load %arg4[%c0_423, %471, %c0_424, %c0_425] : memref<1x52x32x1024xbf16, #tpu.memory_space<vmem>>, vector<1x1x32x1024xbf16>
    %473 = vector.shape_cast %472 : vector<1x1x32x1024xbf16> to vector<32x1024xbf16>
    %cst_426 = arith.constant dense<0.000000e+00> : vector<16x1024xf32>
    %474 = tpu.matmul %468, %473, %cst_426 {dimension_numbers = #tpu.dot_dimension_numbers<[1], [0], [0], [1], [0, 0, 1, 1], [], []>} : vector<16x32xbf16>, vector<32x1024xbf16>, vector<16x1024xf32> -> vector<16x1024xf32>
    %475 = arith.addf %466, %474 : vector<16x1024xf32>
    %c1_427 = arith.constant 1 : index
    %c0_428 = arith.constant 0 : index
    %c0_429 = arith.constant 0 : index
    %476 = vector.load %arg2[%c1_427, %c0_428, %c0_429] : memref<5x16x32xbf16, #tpu.memory_space<vmem>>, vector<1x16x32xbf16>
    %477 = vector.shape_cast %476 : vector<1x16x32xbf16> to vector<16x32xbf16>
    %c9_i32_430 = arith.constant 9 : i32
    %478 = arith.addi %0, %c9_i32_430 : i32
    %c1_i32_431 = arith.constant 1 : i32
    %479 = arith.addi %478, %c1_i32_431 : i32
    %c0_432 = arith.constant 0 : index
    %480 = arith.index_cast %479 : i32 to index
    %c0_433 = arith.constant 0 : index
    %c0_434 = arith.constant 0 : index
    %481 = vector.load %arg4[%c0_432, %480, %c0_433, %c0_434] : memref<1x52x32x1024xbf16, #tpu.memory_space<vmem>>, vector<1x1x32x1024xbf16>
    %482 = vector.shape_cast %481 : vector<1x1x32x1024xbf16> to vector<32x1024xbf16>
    %cst_435 = arith.constant dense<0.000000e+00> : vector<16x1024xf32>
    %483 = tpu.matmul %477, %482, %cst_435 {dimension_numbers = #tpu.dot_dimension_numbers<[1], [0], [0], [1], [0, 0, 1, 1], [], []>} : vector<16x32xbf16>, vector<32x1024xbf16>, vector<16x1024xf32> -> vector<16x1024xf32>
    %484 = arith.addf %475, %483 : vector<16x1024xf32>
    %c2_436 = arith.constant 2 : index
    %c0_437 = arith.constant 0 : index
    %c0_438 = arith.constant 0 : index
    %485 = vector.load %arg2[%c2_436, %c0_437, %c0_438] : memref<5x16x32xbf16, #tpu.memory_space<vmem>>, vector<1x16x32xbf16>
    %486 = vector.shape_cast %485 : vector<1x16x32xbf16> to vector<16x32xbf16>
    %c9_i32_439 = arith.constant 9 : i32
    %487 = arith.addi %0, %c9_i32_439 : i32
    %c2_i32_440 = arith.constant 2 : i32
    %488 = arith.addi %487, %c2_i32_440 : i32
    %c0_441 = arith.constant 0 : index
    %489 = arith.index_cast %488 : i32 to index
    %c0_442 = arith.constant 0 : index
    %c0_443 = arith.constant 0 : index
    %490 = vector.load %arg4[%c0_441, %489, %c0_442, %c0_443] : memref<1x52x32x1024xbf16, #tpu.memory_space<vmem>>, vector<1x1x32x1024xbf16>
    %491 = vector.shape_cast %490 : vector<1x1x32x1024xbf16> to vector<32x1024xbf16>
    %cst_444 = arith.constant dense<0.000000e+00> : vector<16x1024xf32>
    %492 = tpu.matmul %486, %491, %cst_444 {dimension_numbers = #tpu.dot_dimension_numbers<[1], [0], [0], [1], [0, 0, 1, 1], [], []>} : vector<16x32xbf16>, vector<32x1024xbf16>, vector<16x1024xf32> -> vector<16x1024xf32>
    %493 = arith.addf %484, %492 : vector<16x1024xf32>
    %c3_445 = arith.constant 3 : index
    %c0_446 = arith.constant 0 : index
    %c0_447 = arith.constant 0 : index
    %494 = vector.load %arg2[%c3_445, %c0_446, %c0_447] : memref<5x16x32xbf16, #tpu.memory_space<vmem>>, vector<1x16x32xbf16>
    %495 = vector.shape_cast %494 : vector<1x16x32xbf16> to vector<16x32xbf16>
    %c9_i32_448 = arith.constant 9 : i32
    %496 = arith.addi %0, %c9_i32_448 : i32
    %c3_i32_449 = arith.constant 3 : i32
    %497 = arith.addi %496, %c3_i32_449 : i32
    %c0_450 = arith.constant 0 : index
    %498 = arith.index_cast %497 : i32 to index
    %c0_451 = arith.constant 0 : index
    %c0_452 = arith.constant 0 : index
    %499 = vector.load %arg4[%c0_450, %498, %c0_451, %c0_452] : memref<1x52x32x1024xbf16, #tpu.memory_space<vmem>>, vector<1x1x32x1024xbf16>
    %500 = vector.shape_cast %499 : vector<1x1x32x1024xbf16> to vector<32x1024xbf16>
    %cst_453 = arith.constant dense<0.000000e+00> : vector<16x1024xf32>
    %501 = tpu.matmul %495, %500, %cst_453 {dimension_numbers = #tpu.dot_dimension_numbers<[1], [0], [0], [1], [0, 0, 1, 1], [], []>} : vector<16x32xbf16>, vector<32x1024xbf16>, vector<16x1024xf32> -> vector<16x1024xf32>
    %502 = arith.addf %493, %501 : vector<16x1024xf32>
    %c4_454 = arith.constant 4 : index
    %c0_455 = arith.constant 0 : index
    %c0_456 = arith.constant 0 : index
    %503 = vector.load %arg2[%c4_454, %c0_455, %c0_456] : memref<5x16x32xbf16, #tpu.memory_space<vmem>>, vector<1x16x32xbf16>
    %504 = vector.shape_cast %503 : vector<1x16x32xbf16> to vector<16x32xbf16>
    %c9_i32_457 = arith.constant 9 : i32
    %505 = arith.addi %0, %c9_i32_457 : i32
    %c4_i32_458 = arith.constant 4 : i32
    %506 = arith.addi %505, %c4_i32_458 : i32
    %c0_459 = arith.constant 0 : index
    %507 = arith.index_cast %506 : i32 to index
    %c0_460 = arith.constant 0 : index
    %c0_461 = arith.constant 0 : index
    %508 = vector.load %arg4[%c0_459, %507, %c0_460, %c0_461] : memref<1x52x32x1024xbf16, #tpu.memory_space<vmem>>, vector<1x1x32x1024xbf16>
    %509 = vector.shape_cast %508 : vector<1x1x32x1024xbf16> to vector<32x1024xbf16>
    %cst_462 = arith.constant dense<0.000000e+00> : vector<16x1024xf32>
    %510 = tpu.matmul %504, %509, %cst_462 {dimension_numbers = #tpu.dot_dimension_numbers<[1], [0], [0], [1], [0, 0, 1, 1], [], []>} : vector<16x32xbf16>, vector<32x1024xbf16>, vector<16x1024xf32> -> vector<16x1024xf32>
    %511 = arith.addf %502, %510 : vector<16x1024xf32>
    %512 = vector.broadcast %1 : vector<16x1xf32> to vector<16x1024xf32>
    %513 = arith.addf %511, %512 : vector<16x1024xf32>
    %cst_463 = arith.constant 0.000000e+00 : f32
    %514 = vector.broadcast %cst_463 : f32 to vector<16x1024xf32>
    %515 = arith.maximumf %513, %514 : vector<16x1024xf32>
    %516 = arith.maximumf %465, %515 : vector<16x1024xf32>
    %cst_464 = arith.constant 0.000000e+00 : f32
    %517 = vector.broadcast %cst_464 : f32 to vector<16x1024xf32>
    %c0_465 = arith.constant 0 : index
    %c0_466 = arith.constant 0 : index
    %c0_467 = arith.constant 0 : index
    %518 = vector.load %arg2[%c0_465, %c0_466, %c0_467] : memref<5x16x32xbf16, #tpu.memory_space<vmem>>, vector<1x16x32xbf16>
    %519 = vector.shape_cast %518 : vector<1x16x32xbf16> to vector<16x32xbf16>
    %c10_i32 = arith.constant 10 : i32
    %520 = arith.addi %0, %c10_i32 : i32
    %c0_i32_468 = arith.constant 0 : i32
    %521 = arith.addi %520, %c0_i32_468 : i32
    %c0_469 = arith.constant 0 : index
    %522 = arith.index_cast %521 : i32 to index
    %c0_470 = arith.constant 0 : index
    %c0_471 = arith.constant 0 : index
    %523 = vector.load %arg4[%c0_469, %522, %c0_470, %c0_471] : memref<1x52x32x1024xbf16, #tpu.memory_space<vmem>>, vector<1x1x32x1024xbf16>
    %524 = vector.shape_cast %523 : vector<1x1x32x1024xbf16> to vector<32x1024xbf16>
    %cst_472 = arith.constant dense<0.000000e+00> : vector<16x1024xf32>
    %525 = tpu.matmul %519, %524, %cst_472 {dimension_numbers = #tpu.dot_dimension_numbers<[1], [0], [0], [1], [0, 0, 1, 1], [], []>} : vector<16x32xbf16>, vector<32x1024xbf16>, vector<16x1024xf32> -> vector<16x1024xf32>
    %526 = arith.addf %517, %525 : vector<16x1024xf32>
    %c1_473 = arith.constant 1 : index
    %c0_474 = arith.constant 0 : index
    %c0_475 = arith.constant 0 : index
    %527 = vector.load %arg2[%c1_473, %c0_474, %c0_475] : memref<5x16x32xbf16, #tpu.memory_space<vmem>>, vector<1x16x32xbf16>
    %528 = vector.shape_cast %527 : vector<1x16x32xbf16> to vector<16x32xbf16>
    %c10_i32_476 = arith.constant 10 : i32
    %529 = arith.addi %0, %c10_i32_476 : i32
    %c1_i32_477 = arith.constant 1 : i32
    %530 = arith.addi %529, %c1_i32_477 : i32
    %c0_478 = arith.constant 0 : index
    %531 = arith.index_cast %530 : i32 to index
    %c0_479 = arith.constant 0 : index
    %c0_480 = arith.constant 0 : index
    %532 = vector.load %arg4[%c0_478, %531, %c0_479, %c0_480] : memref<1x52x32x1024xbf16, #tpu.memory_space<vmem>>, vector<1x1x32x1024xbf16>
    %533 = vector.shape_cast %532 : vector<1x1x32x1024xbf16> to vector<32x1024xbf16>
    %cst_481 = arith.constant dense<0.000000e+00> : vector<16x1024xf32>
    %534 = tpu.matmul %528, %533, %cst_481 {dimension_numbers = #tpu.dot_dimension_numbers<[1], [0], [0], [1], [0, 0, 1, 1], [], []>} : vector<16x32xbf16>, vector<32x1024xbf16>, vector<16x1024xf32> -> vector<16x1024xf32>
    %535 = arith.addf %526, %534 : vector<16x1024xf32>
    %c2_482 = arith.constant 2 : index
    %c0_483 = arith.constant 0 : index
    %c0_484 = arith.constant 0 : index
    %536 = vector.load %arg2[%c2_482, %c0_483, %c0_484] : memref<5x16x32xbf16, #tpu.memory_space<vmem>>, vector<1x16x32xbf16>
    %537 = vector.shape_cast %536 : vector<1x16x32xbf16> to vector<16x32xbf16>
    %c10_i32_485 = arith.constant 10 : i32
    %538 = arith.addi %0, %c10_i32_485 : i32
    %c2_i32_486 = arith.constant 2 : i32
    %539 = arith.addi %538, %c2_i32_486 : i32
    %c0_487 = arith.constant 0 : index
    %540 = arith.index_cast %539 : i32 to index
    %c0_488 = arith.constant 0 : index
    %c0_489 = arith.constant 0 : index
    %541 = vector.load %arg4[%c0_487, %540, %c0_488, %c0_489] : memref<1x52x32x1024xbf16, #tpu.memory_space<vmem>>, vector<1x1x32x1024xbf16>
    %542 = vector.shape_cast %541 : vector<1x1x32x1024xbf16> to vector<32x1024xbf16>
    %cst_490 = arith.constant dense<0.000000e+00> : vector<16x1024xf32>
    %543 = tpu.matmul %537, %542, %cst_490 {dimension_numbers = #tpu.dot_dimension_numbers<[1], [0], [0], [1], [0, 0, 1, 1], [], []>} : vector<16x32xbf16>, vector<32x1024xbf16>, vector<16x1024xf32> -> vector<16x1024xf32>
    %544 = arith.addf %535, %543 : vector<16x1024xf32>
    %c3_491 = arith.constant 3 : index
    %c0_492 = arith.constant 0 : index
    %c0_493 = arith.constant 0 : index
    %545 = vector.load %arg2[%c3_491, %c0_492, %c0_493] : memref<5x16x32xbf16, #tpu.memory_space<vmem>>, vector<1x16x32xbf16>
    %546 = vector.shape_cast %545 : vector<1x16x32xbf16> to vector<16x32xbf16>
    %c10_i32_494 = arith.constant 10 : i32
    %547 = arith.addi %0, %c10_i32_494 : i32
    %c3_i32_495 = arith.constant 3 : i32
    %548 = arith.addi %547, %c3_i32_495 : i32
    %c0_496 = arith.constant 0 : index
    %549 = arith.index_cast %548 : i32 to index
    %c0_497 = arith.constant 0 : index
    %c0_498 = arith.constant 0 : index
    %550 = vector.load %arg4[%c0_496, %549, %c0_497, %c0_498] : memref<1x52x32x1024xbf16, #tpu.memory_space<vmem>>, vector<1x1x32x1024xbf16>
    %551 = vector.shape_cast %550 : vector<1x1x32x1024xbf16> to vector<32x1024xbf16>
    %cst_499 = arith.constant dense<0.000000e+00> : vector<16x1024xf32>
    %552 = tpu.matmul %546, %551, %cst_499 {dimension_numbers = #tpu.dot_dimension_numbers<[1], [0], [0], [1], [0, 0, 1, 1], [], []>} : vector<16x32xbf16>, vector<32x1024xbf16>, vector<16x1024xf32> -> vector<16x1024xf32>
    %553 = arith.addf %544, %552 : vector<16x1024xf32>
    %c4_500 = arith.constant 4 : index
    %c0_501 = arith.constant 0 : index
    %c0_502 = arith.constant 0 : index
    %554 = vector.load %arg2[%c4_500, %c0_501, %c0_502] : memref<5x16x32xbf16, #tpu.memory_space<vmem>>, vector<1x16x32xbf16>
    %555 = vector.shape_cast %554 : vector<1x16x32xbf16> to vector<16x32xbf16>
    %c10_i32_503 = arith.constant 10 : i32
    %556 = arith.addi %0, %c10_i32_503 : i32
    %c4_i32_504 = arith.constant 4 : i32
    %557 = arith.addi %556, %c4_i32_504 : i32
    %c0_505 = arith.constant 0 : index
    %558 = arith.index_cast %557 : i32 to index
    %c0_506 = arith.constant 0 : index
    %c0_507 = arith.constant 0 : index
    %559 = vector.load %arg4[%c0_505, %558, %c0_506, %c0_507] : memref<1x52x32x1024xbf16, #tpu.memory_space<vmem>>, vector<1x1x32x1024xbf16>
    %560 = vector.shape_cast %559 : vector<1x1x32x1024xbf16> to vector<32x1024xbf16>
    %cst_508 = arith.constant dense<0.000000e+00> : vector<16x1024xf32>
    %561 = tpu.matmul %555, %560, %cst_508 {dimension_numbers = #tpu.dot_dimension_numbers<[1], [0], [0], [1], [0, 0, 1, 1], [], []>} : vector<16x32xbf16>, vector<32x1024xbf16>, vector<16x1024xf32> -> vector<16x1024xf32>
    %562 = arith.addf %553, %561 : vector<16x1024xf32>
    %563 = vector.broadcast %1 : vector<16x1xf32> to vector<16x1024xf32>
    %564 = arith.addf %562, %563 : vector<16x1024xf32>
    %cst_509 = arith.constant 0.000000e+00 : f32
    %565 = vector.broadcast %cst_509 : f32 to vector<16x1024xf32>
    %566 = arith.maximumf %564, %565 : vector<16x1024xf32>
    %567 = arith.maximumf %516, %566 : vector<16x1024xf32>
    %cst_510 = arith.constant 0.000000e+00 : f32
    %568 = vector.broadcast %cst_510 : f32 to vector<16x1024xf32>
    %c0_511 = arith.constant 0 : index
    %c0_512 = arith.constant 0 : index
    %c0_513 = arith.constant 0 : index
    %569 = vector.load %arg2[%c0_511, %c0_512, %c0_513] : memref<5x16x32xbf16, #tpu.memory_space<vmem>>, vector<1x16x32xbf16>
    %570 = vector.shape_cast %569 : vector<1x16x32xbf16> to vector<16x32xbf16>
    %c11_i32 = arith.constant 11 : i32
    %571 = arith.addi %0, %c11_i32 : i32
    %c0_i32_514 = arith.constant 0 : i32
    %572 = arith.addi %571, %c0_i32_514 : i32
    %c0_515 = arith.constant 0 : index
    %573 = arith.index_cast %572 : i32 to index
    %c0_516 = arith.constant 0 : index
    %c0_517 = arith.constant 0 : index
    %574 = vector.load %arg4[%c0_515, %573, %c0_516, %c0_517] : memref<1x52x32x1024xbf16, #tpu.memory_space<vmem>>, vector<1x1x32x1024xbf16>
    %575 = vector.shape_cast %574 : vector<1x1x32x1024xbf16> to vector<32x1024xbf16>
    %cst_518 = arith.constant dense<0.000000e+00> : vector<16x1024xf32>
    %576 = tpu.matmul %570, %575, %cst_518 {dimension_numbers = #tpu.dot_dimension_numbers<[1], [0], [0], [1], [0, 0, 1, 1], [], []>} : vector<16x32xbf16>, vector<32x1024xbf16>, vector<16x1024xf32> -> vector<16x1024xf32>
    %577 = arith.addf %568, %576 : vector<16x1024xf32>
    %c1_519 = arith.constant 1 : index
    %c0_520 = arith.constant 0 : index
    %c0_521 = arith.constant 0 : index
    %578 = vector.load %arg2[%c1_519, %c0_520, %c0_521] : memref<5x16x32xbf16, #tpu.memory_space<vmem>>, vector<1x16x32xbf16>
    %579 = vector.shape_cast %578 : vector<1x16x32xbf16> to vector<16x32xbf16>
    %c11_i32_522 = arith.constant 11 : i32
    %580 = arith.addi %0, %c11_i32_522 : i32
    %c1_i32_523 = arith.constant 1 : i32
    %581 = arith.addi %580, %c1_i32_523 : i32
    %c0_524 = arith.constant 0 : index
    %582 = arith.index_cast %581 : i32 to index
    %c0_525 = arith.constant 0 : index
    %c0_526 = arith.constant 0 : index
    %583 = vector.load %arg4[%c0_524, %582, %c0_525, %c0_526] : memref<1x52x32x1024xbf16, #tpu.memory_space<vmem>>, vector<1x1x32x1024xbf16>
    %584 = vector.shape_cast %583 : vector<1x1x32x1024xbf16> to vector<32x1024xbf16>
    %cst_527 = arith.constant dense<0.000000e+00> : vector<16x1024xf32>
    %585 = tpu.matmul %579, %584, %cst_527 {dimension_numbers = #tpu.dot_dimension_numbers<[1], [0], [0], [1], [0, 0, 1, 1], [], []>} : vector<16x32xbf16>, vector<32x1024xbf16>, vector<16x1024xf32> -> vector<16x1024xf32>
    %586 = arith.addf %577, %585 : vector<16x1024xf32>
    %c2_528 = arith.constant 2 : index
    %c0_529 = arith.constant 0 : index
    %c0_530 = arith.constant 0 : index
    %587 = vector.load %arg2[%c2_528, %c0_529, %c0_530] : memref<5x16x32xbf16, #tpu.memory_space<vmem>>, vector<1x16x32xbf16>
    %588 = vector.shape_cast %587 : vector<1x16x32xbf16> to vector<16x32xbf16>
    %c11_i32_531 = arith.constant 11 : i32
    %589 = arith.addi %0, %c11_i32_531 : i32
    %c2_i32_532 = arith.constant 2 : i32
    %590 = arith.addi %589, %c2_i32_532 : i32
    %c0_533 = arith.constant 0 : index
    %591 = arith.index_cast %590 : i32 to index
    %c0_534 = arith.constant 0 : index
    %c0_535 = arith.constant 0 : index
    %592 = vector.load %arg4[%c0_533, %591, %c0_534, %c0_535] : memref<1x52x32x1024xbf16, #tpu.memory_space<vmem>>, vector<1x1x32x1024xbf16>
    %593 = vector.shape_cast %592 : vector<1x1x32x1024xbf16> to vector<32x1024xbf16>
    %cst_536 = arith.constant dense<0.000000e+00> : vector<16x1024xf32>
    %594 = tpu.matmul %588, %593, %cst_536 {dimension_numbers = #tpu.dot_dimension_numbers<[1], [0], [0], [1], [0, 0, 1, 1], [], []>} : vector<16x32xbf16>, vector<32x1024xbf16>, vector<16x1024xf32> -> vector<16x1024xf32>
    %595 = arith.addf %586, %594 : vector<16x1024xf32>
    %c3_537 = arith.constant 3 : index
    %c0_538 = arith.constant 0 : index
    %c0_539 = arith.constant 0 : index
    %596 = vector.load %arg2[%c3_537, %c0_538, %c0_539] : memref<5x16x32xbf16, #tpu.memory_space<vmem>>, vector<1x16x32xbf16>
    %597 = vector.shape_cast %596 : vector<1x16x32xbf16> to vector<16x32xbf16>
    %c11_i32_540 = arith.constant 11 : i32
    %598 = arith.addi %0, %c11_i32_540 : i32
    %c3_i32_541 = arith.constant 3 : i32
    %599 = arith.addi %598, %c3_i32_541 : i32
    %c0_542 = arith.constant 0 : index
    %600 = arith.index_cast %599 : i32 to index
    %c0_543 = arith.constant 0 : index
    %c0_544 = arith.constant 0 : index
    %601 = vector.load %arg4[%c0_542, %600, %c0_543, %c0_544] : memref<1x52x32x1024xbf16, #tpu.memory_space<vmem>>, vector<1x1x32x1024xbf16>
    %602 = vector.shape_cast %601 : vector<1x1x32x1024xbf16> to vector<32x1024xbf16>
    %cst_545 = arith.constant dense<0.000000e+00> : vector<16x1024xf32>
    %603 = tpu.matmul %597, %602, %cst_545 {dimension_numbers = #tpu.dot_dimension_numbers<[1], [0], [0], [1], [0, 0, 1, 1], [], []>} : vector<16x32xbf16>, vector<32x1024xbf16>, vector<16x1024xf32> -> vector<16x1024xf32>
    %604 = arith.addf %595, %603 : vector<16x1024xf32>
    %c4_546 = arith.constant 4 : index
    %c0_547 = arith.constant 0 : index
    %c0_548 = arith.constant 0 : index
    %605 = vector.load %arg2[%c4_546, %c0_547, %c0_548] : memref<5x16x32xbf16, #tpu.memory_space<vmem>>, vector<1x16x32xbf16>
    %606 = vector.shape_cast %605 : vector<1x16x32xbf16> to vector<16x32xbf16>
    %c11_i32_549 = arith.constant 11 : i32
    %607 = arith.addi %0, %c11_i32_549 : i32
    %c4_i32_550 = arith.constant 4 : i32
    %608 = arith.addi %607, %c4_i32_550 : i32
    %c0_551 = arith.constant 0 : index
    %609 = arith.index_cast %608 : i32 to index
    %c0_552 = arith.constant 0 : index
    %c0_553 = arith.constant 0 : index
    %610 = vector.load %arg4[%c0_551, %609, %c0_552, %c0_553] : memref<1x52x32x1024xbf16, #tpu.memory_space<vmem>>, vector<1x1x32x1024xbf16>
    %611 = vector.shape_cast %610 : vector<1x1x32x1024xbf16> to vector<32x1024xbf16>
    %cst_554 = arith.constant dense<0.000000e+00> : vector<16x1024xf32>
    %612 = tpu.matmul %606, %611, %cst_554 {dimension_numbers = #tpu.dot_dimension_numbers<[1], [0], [0], [1], [0, 0, 1, 1], [], []>} : vector<16x32xbf16>, vector<32x1024xbf16>, vector<16x1024xf32> -> vector<16x1024xf32>
    %613 = arith.addf %604, %612 : vector<16x1024xf32>
    %614 = vector.broadcast %1 : vector<16x1xf32> to vector<16x1024xf32>
    %615 = arith.addf %613, %614 : vector<16x1024xf32>
    %cst_555 = arith.constant 0.000000e+00 : f32
    %616 = vector.broadcast %cst_555 : f32 to vector<16x1024xf32>
    %617 = arith.maximumf %615, %616 : vector<16x1024xf32>
    %618 = arith.maximumf %567, %617 : vector<16x1024xf32>
    %619 = arith.truncf %618 : vector<16x1024xf32> to vector<16x1024xbf16>
    %c0_556 = arith.constant 0 : index
    %c2_557 = arith.constant 2 : index
    %c0_558 = arith.constant 0 : index
    %c0_559 = arith.constant 0 : index
    %620 = vector.load %arg5[%c0_556, %c2_557, %c0_558, %c0_559] : memref<1x3x16x1024xbf16, #tpu.memory_space<vmem>>, vector<1x1x16x1024xbf16>
    %621 = vector.shape_cast %620 : vector<1x1x16x1024xbf16> to vector<16x1024xbf16>
    %622 = vector.shape_cast %619 : vector<16x1024xbf16> to vector<1x1x16x1024xbf16>
    tpu.vector_store %arg5[%c0_556, %c2_557, %c0_558, %c0_559], %622 {strides = array<i32>} : memref<1x3x16x1024xbf16, #tpu.memory_space<vmem>>, vector<1x1x16x1024xbf16>,
    return
  }
  func.func @transform_0(%arg0: i32, %arg1: i32) -> (i32, i32, i32) {
    %c0_i32 = arith.constant 0 : i32
    %c0_i32_0 = arith.constant 0 : i32
    %c0_i32_1 = arith.constant 0 : i32
    %c0_i32_2 = arith.constant 0 : i32
    return %c0_i32, %c0_i32_0, %c0_i32_1 : i32, i32, i32
  }
  func.func @transform_1(%arg0: i32, %arg1: i32) -> (i32, i32) {
    %c0_i32 = arith.constant 0 : i32
    %c0_i32_0 = arith.constant 0 : i32
    %c0_i32_1 = arith.constant 0 : i32
    return %c0_i32, %c0_i32_0 : i32, i32
  }
  func.func @transform_2(%arg0: i32, %arg1: i32) -> (i32, i32, i32, i32) {
    %c0_i32 = arith.constant 0 : i32
    %c0_i32_0 = arith.constant 0 : i32
    %c0_i32_1 = arith.constant 0 : i32
    %c0_i32_2 = arith.constant 0 : i32
    return %arg0, %c0_i32, %c0_i32_0, %c0_i32_1 : i32, i32, i32, i32
  }
  func.func @transform_3(%arg0: i32, %arg1: i32) -> (i32, i32, i32, i32) {
    %c0_i32 = arith.constant 0 : i32
    %c0_i32_0 = arith.constant 0 : i32
    %c0_i32_1 = arith.constant 0 : i32
    return %arg0, %arg1, %c0_i32, %c0_i32_0 : i32, i32, i32, i32
  }
}

</mosaic_0001>

<bundles_post_ra>
// kernel: net3d6_forward.1
= control target key start
LH: loop header
LB: loop body
LE: loop exit
PB: predicated region body
PF: predicated region fallthrough
CT: control target
= control target key end

     0   :  { %s16503_s12 = smov 0   ;;  %s16505_s13 = smov 0   ;;  %s19815_s0 = inlined_call_operand.vmem [shape: bf16[5,16,32], index: 0, kind: input, shape index: {}]   ;;  %s19816_s1 = inlined_call_operand.vmem [shape: f32[16,1], index: 1, kind: input, shape index: {}]   ;;  %s19817_s2 = inlined_call_operand.vmem [shape: bf16[2,52,32,1024], index: 2, kind: input, shape index: {}]   ;;  %s19818_s3 = inlined_call_operand.vmem [shape: bf16[2,12,16,1024], index: 3, kind: output, shape index: {}]  }
   0x1   :  { %s16507_s14 = smov 0   ;;  %s16509_s15 = smov 0  }
   0x2   :  { %s16511_s16 = smov 0  }
   0x3 LB: > { %s22_s17 = sadd.s32 1, %s16472_s14  ;;  %s25_s18 = sadd.s32 1, %s16476_s15  ;;  %s16480_s16 = sphi %s16511_s16, %s13_s16   ;;  %s16476_s15 = sphi %s16509_s15, %s20410_s15   ;;  %s16472_s14 = sphi %s16507_s14, %s20409_s14   ;;  %s16468_s13 = sphi %s16505_s13, %s20408_s13   ;;  %s16464_s12 = sphi %s16503_s12, %s20407_s12  }
   0x4   : > { %p23_p0 = scmp.ge.s32.totalorder %s22_s17, 4  ;;  %p14482_p1 = scmp.ge.s32.totalorder %s16480_s16, 1 }
   0x5   : > { %p151_p2 = scmp.lt.s32.totalorder %s16480_s16, 9 }
   0x6   : > { %s20412_s17 = smov (%p23_p0, %s22_s17), 0  ;;  %s20414_s18 = smov (!%p23_p0, %s25_s18), %s16476_s15 }
   0x7   : > { %p152_p3 = pnand %p14482_p1, %p151_p2  ;;  %p27_p4 = scmp.ge.s32.totalorder %s20414_s18, 2 }
   0x9   : > { %s20416_s18 = smov (%p27_p4, %s20414_s18), 0  ;;  %155 = sbr.rel (%p152_p3) target bundleno = 1212 (0x4bc), region = 32 }
  0x10   : > { %p180_p5 = scmp.lt.s32.totalorder %s16468_s13, 1  ;;  %s15576_s19 = smul.u32 1536, %s16464_s12  ;;  %v19825_v0 = vmov 0   ;;  %v16590_v25 = vld [vmem:[%s19815_s0 + $0x8] sm:$0xff]   ;;  %vm329_vm0 = vcmask 261120   ;;  %v16645_v58 = vld [vmem:[%s19815_s0] sm:$0xff]  }
  0x11   : > { %365 = vmatprep.mubr.bf16.mxu0 %v19825_v0  ;;  %408 = vmatprep.mubr.bf16.mxu1 %v19825_v0 }
  0x12   : > { %s20418_s13 = smov (!%p180_p5, %s16468_s13), 1  ;;  %16412 = vset.pattern.permute.xlu0 %v19825_v0 }
  0x13   : > { %s16369_s20 = smul.u32 6656, %s20418_s13 }
  0x15   : > { %s184_s23 = scalar_lea.vmem %s19817_s2, %s16369_s20  ;;  %s185_s20 = smul.u32 3, %s16464_s12 }
  0x16   : > { %s16545_s24 = scalar_lea.vmem %s184_s23, %s15576_s19  ;;  %s16370_s12 = smul.u32 192, %s20418_s13 }
  0x17   : > { %v14491_v1 = vld [vmem:[%s16545_s24 + $0x80] sm:$0xff]  ;;  %v14492_v3 = vld [vmem:[%s16545_s24 + $0x88] sm:$0xff]  ;;  %v14493_v14 = vld [vmem:[%s16545_s24 + $0x90] sm:$0xff]  ;;  %p188_p6 = scmp.lt.s32.totalorder %s185_s20, 11 }
  0x18   : > { %v14495_v2 = vld [vmem:[%s16545_s24 + $0xa0] sm:$0xff]  ;;  %v14496_v5 = vld [vmem:[%s16545_s24 + $0xa8] sm:$0xff]  ;;  %v14497_v16 = vld [vmem:[%s16545_s24 + $0xb0] sm:$0xff] }
  0x19   : > { %v16550_v4 = vcombine.high %v14491_v1, %v14495_v2  ;;  %v16553_v6 = vcombine.low %v14491_v1, %v14495_v2  ;;  %v14499_v7 = vld [vmem:[%s16545_s24 + $0xc0] sm:$0xff]  ;;  %v16557_v9 = vcombine.high %v14492_v3, %v14496_v5  ;;  %v16559_v10 = vcombine.low %v14492_v3, %v14496_v5  ;;  %v14500_v12 = vld [vmem:[%s16545_s24 + $0xc8] sm:$0xff]  ;;  %v14494_v17 = vld [vmem:[%s16545_s24 + $0x98] sm:$0xff]  ;;  %s20420_s20 = smov (!%p188_p6, %s185_s20), 11 }
  0x1a   : > { %v14503_v8 = vld [vmem:[%s16545_s24 + $0xe0] sm:$0xff]  ;;  %v14504_v13 = vld [vmem:[%s16545_s24 + $0xe8] sm:$0xff]  ;;  %v14498_v18 = vld [vmem:[%s16545_s24 + $0xb8] sm:$0xff]  ;;  %v16580_v21 = vcombine.high %v14493_v14, %v14497_v16  ;;  %v16595_v28 = vcombine.low %v14493_v14, %v14497_v16  ;;  %s14484_s21 = sshll.u32 %s20420_s20, 4 }
  0x1b   : > { %v16561_v11 = vcombine.high %v14499_v7, %v14503_v8  ;;  %333 = vmatprep.subr.bf16.mxu0 %v16550_v4  ;;  %v16567_v15 = vcombine.high %v14500_v12, %v14504_v13  ;;  %376 = vmatprep.subr.bf16.mxu1 %v16557_v9  ;;  %v16574_v19 = vcombine.low %v14499_v7, %v14503_v8  ;;  %v14501_v23 = vld [vmem:[%s16545_s24 + $0xd0] sm:$0xff]  ;;  %v14502_v26 = vld [vmem:[%s16545_s24 + $0xd8] sm:$0xff]  ;;  %v205_v32 = vld [vmem:[%s16545_s24] sm:$0xff]  ;;  %s18190_s22 = sadd.s32 %s16370_s12, %s14484_s21 }
  0x1c   : > { %334 = vmatpush1.bf16.msra.mxu0 %v16553_v6  ;;  %377 = vmatpush1.bf16.msra.mxu1 %v16559_v10  ;;  %v16578_v20 = vcombine.low %v14500_v12, %v14504_v13  ;;  %v16583_v22 = vcombine.high %v14494_v17, %v14498_v18  ;;  %v14505_v24 = vld [vmem:[%s16545_s24 + $0xf0] sm:$0xff]  ;;  %v14506_v27 = vld [vmem:[%s16545_s24 + $0xf8] sm:$0xff]  ;;  %v16599_v29 = vcombine.low %v14494_v17, %v14498_v18  ;;  %v209_v33 = vld [vmem:[%s16545_s24 + $0x20] sm:$0xff]  ;;  %s14485_s13 = sshll.u32 %s18190_s22, 2 }
  0x1d   : > { %335 = vmatprep.subr.bf16.mxu0 %v16561_v11  ;;  %378 = vmatprep.subr.bf16.mxu1 %v16567_v15  ;;  %v16601_v30 = vcombine.high %v14501_v23, %v14505_v24  ;;  %v16604_v31 = vcombine.high %v14502_v26, %v14506_v27  ;;  %v206_v34 = vld [vmem:[%s16545_s24 + $0x8] sm:$0xff]  ;;  %v16615_v36 = vcombine.low %v14501_v23, %v14505_v24  ;;  %v213_v40 = vld [vmem:[%s16545_s24 + $0x40] sm:$0xff]  ;;  %v207_v48 = vld [vmem:[%s16545_s24 + $0x10] sm:$0xff]  ;;  %s18221_s28 = scalar_lea.vmem %s19818_s3, %s14485_s13 }
  0x1e   : > { %v210_v35 = vld [vmem:[%s16545_s24 + $0x28] sm:$0xff]  ;;  %v16619_v37 = vcombine.low %v14502_v26, %v14506_v27  ;;  %v14530_v38 = vcombine.high %v205_v32, %v209_v33  ;;  %v217_v41 = vld [vmem:[%s16545_s24 + $0x60] sm:$0xff]  ;;  %v14529_v44 = vcombine.low %v205_v32, %v209_v33  ;;  %v211_v49 = vld [vmem:[%s16545_s24 + $0x30] sm:$0xff] }
  0x1f   : > { %v14532_v39 = vcombine.high %v206_v34, %v210_v35  ;;  %v214_v42 = vld [vmem:[%s16545_s24 + $0x48] sm:$0xff]  ;;  %v14531_v45 = vcombine.low %v206_v34, %v210_v35  ;;  %v14538_v46 = vcombine.high %v213_v40, %v217_v41  ;;  %v208_v50 = vld [vmem:[%s16545_s24 + $0x18] sm:$0xff]  ;;  %v14537_v52 = vcombine.low %v213_v40, %v217_v41  ;;  %v215_v56 = vld [vmem:[%s16545_s24 + $0x50] sm:$0xff] }
  0x20   : > { %336 = vmatpush1.bf16.msra.mxu0 %v16574_v19  ;;  %379 = vmatpush1.bf16.msra.mxu1 %v16578_v20  ;;  %v218_v43 = vld [vmem:[%s16545_s24 + $0x68] sm:$0xff]  ;;  %v212_v51 = vld [vmem:[%s16545_s24 + $0x38] sm:$0xff]  ;;  %v14534_v54 = vcombine.high %v207_v48, %v211_v49  ;;  %v219_v57 = vld [vmem:[%s16545_s24 + $0x70] sm:$0xff]  ;;  %v14533_v61 = vcombine.low %v207_v48, %v211_v49 }
  0x21   : > { %419 = vmatprep.subr.bf16.mxu0 %v16580_v21  ;;  %462 = vmatprep.subr.bf16.mxu1 %v16583_v22  ;;  %v14540_v47 = vcombine.high %v214_v42, %v218_v43  ;;  %v14539_v53 = vcombine.low %v214_v42, %v218_v43  ;;  %v14536_v55 = vcombine.high %v208_v50, %v212_v51  ;;  %v216_v59 = vld [vmem:[%s16545_s24 + $0x58] sm:$0xff]  ;;  %v14552_v2 = vld [vmem:[%s16545_s24 + $0x100] sm:$0xff]  ;;  %v14553_v5 = vld [vmem:[%s16545_s24 + $0x108] sm:$0xff] }
  0x22   : > { %v220_v60 = vld [vmem:[%s16545_s24 + $0x78] sm:$0xff]  ;;  %v14535_v62 = vcombine.low %v208_v50, %v212_v51  ;;  %v14542_v63 = vcombine.high %v215_v56, %v219_v57  ;;  %v14556_v3 = vld [vmem:[%s16545_s24 + $0x120] sm:$0xff]  ;;  %v14557_v7 = vld [vmem:[%s16545_s24 + $0x128] sm:$0xff]  ;;  %v14541_v8 = vcombine.low %v215_v56, %v219_v57 }
  0x23   : > { %14524 = vmatmul.mubr.msk.bf16.vlgmr.msra.gmra.mrb[0].mxu0 %vm329_vm0, %v16590_v25  ;;  %14525 = vmatmul.mubr.msk.bf16.vlgmr.msra.gmra.mrb[0].mxu1 %vm329_vm0, %v16590_v25  ;;  %v14544_v1 = vcombine.high %v216_v59, %v220_v60  ;;  %v14543_v12 = vcombine.low %v216_v59, %v220_v60  ;;  %v16657_v13 = vcombine.high %v14552_v2, %v14556_v3  ;;  %v14560_v16 = vld [vmem:[%s16545_s24 + $0x140] sm:$0xff]  ;;  %v14561_v23 = vld [vmem:[%s16545_s24 + $0x148] sm:$0xff]  ;;  %v14554_v27 = vld [vmem:[%s16545_s24 + $0x110] sm:$0xff] }
  0x24   : > { %420 = vmatpush1.bf16.msra.mxu0 %v16595_v28  ;;  %463 = vmatpush1.bf16.msra.mxu1 %v16599_v29  ;;  %v16660_v14 = vcombine.high %v14553_v5, %v14557_v7  ;;  %v14564_v17 = vld [vmem:[%s16545_s24 + $0x160] sm:$0xff]  ;;  %v14565_v24 = vld [vmem:[%s16545_s24 + $0x168] sm:$0xff]  ;;  %v16670_v26 = vcombine.low %v14552_v2, %v14556_v3  ;;  %v14558_v32 = vld [vmem:[%s16545_s24 + $0x130] sm:$0xff]  ;;  %v16675_v33 = vcombine.low %v14553_v5, %v14557_v7 }
  0x25   : > { %421 = vmatprep.subr.bf16.mxu0 %v16601_v30  ;;  %464 = vmatprep.subr.bf16.mxu1 %v16604_v31  ;;  %v198_v18 = vld [vmem:[%s19816_s1] sm:$0xff]  ;;  %v16677_v34 = vcombine.high %v14560_v16, %v14564_v17  ;;  %v14555_v35 = vld [vmem:[%s16545_s24 + $0x118] sm:$0xff]  ;;  %v16685_v40 = vcombine.high %v14561_v23, %v14565_v24  ;;  %v16692_v41 = vcombine.low %v14560_v16, %v14564_v17  ;;  %v14593_v56 = vld [vmem:[%s16545_s24 + $0x188] sm:$0xff] }
  0x26   : > { %451 = vmatprep.mubr.bf16.mxu0 %v19825_v0  ;;  %494 = vmatprep.mubr.bf16.mxu1 %v19825_v0  ;;  %v16696_v42 = vcombine.low %v14561_v23, %v14565_v24  ;;  %v16698_v43 = vcombine.high %v14554_v27, %v14558_v32  ;;  %v14563_v48 = vld [vmem:[%s16545_s24 + $0x158] sm:$0xff]  ;;  %v16715_v50 = vcombine.low %v14554_v27, %v14558_v32  ;;  %v14597_v57 = vld [vmem:[%s16545_s24 + $0x1a8] sm:$0xff]  ;;  %v14594_v16 = vld [vmem:[%s16545_s24 + $0x190] sm:$0xff] }
  0x27   : > { %1664 = vperm.xlu0 %16412, %v198_v18   ;;  %v14567_v49 = vld [vmem:[%s16545_s24 + $0x178] sm:$0xff]  ;;  %v14601_v2 = vld [vmem:[%s16545_s24 + $0x1c8] sm:$0xff]  ;;  %v16757_v7 = vcombine.low %v14593_v56, %v14597_v57  ;;  %v14598_v17 = vld [vmem:[%s16545_s24 + $0x1b0] sm:$0xff] }
  0x28   : > { %422 = vmatpush1.bf16.msra.mxu0 %v16615_v36  ;;  %465 = vmatpush1.bf16.msra.mxu1 %v16619_v37  ;;  %v16739_v60 = vcombine.low %v14563_v48, %v14567_v49  ;;  %v14605_v3 = vld [vmem:[%s16545_s24 + $0x1e8] sm:$0xff]  ;;  %v14595_v18 = vld [vmem:[%s16545_s24 + $0x198] sm:$0xff]  ;;  %v16779_v32 = vcombine.high %v14594_v16, %v14598_v17 }
  0x29   : > { %593 = vmatprep.subr.bf16.mxu0 %v14530_v38  ;;  %636 = vmatprep.subr.bf16.mxu1 %v14532_v39  ;;  %v14559_v38 = vld [vmem:[%s16545_s24 + $0x138] sm:$0xff]  ;;  %v199_v39 = vld [vmem:[%s19816_s1 + $0x8] sm:$0xff]  ;;  %v16777_v27 = vcombine.low %v14601_v2, %v14605_v3 }
  0x2a   : > { %v16719_v51 = vcombine.low %v14555_v35, %v14559_v38  ;;  %v14599_v23 = vld [vmem:[%s16545_s24 + $0x1b8] sm:$0xff] }
  0x2b   : > { %14526 = vmatmul.mubr.msk.bf16.vlgmr.msra.gmra.mrb[4].mxu0 %vm329_vm0, %v16590_v25  ;;  %14527 = vmatmul.mubr.msk.bf16.vlgmr.msra.gmra.mrb[4].mxu1 %vm329_vm0, %v16590_v25 }
  0x2c   : > { %594 = vmatpush1.bf16.msra.mxu0 %v14529_v44  ;;  %637 = vmatpush1.bf16.msra.mxu1 %v14531_v45  ;;  %v16702_v44 = vcombine.high %v14555_v35, %v14559_v38  ;;  %v14562_v45 = vld [vmem:[%s16545_s24 + $0x150] sm:$0xff]  ;;  %v16783_v35 = vcombine.high %v14595_v18, %v14599_v23 }
  0x2d   : > { %595 = vmatprep.subr.bf16.mxu0 %v14538_v46  ;;  %638 = vmatprep.subr.bf16.mxu1 %v14540_v47  ;;  %v14566_v46 = vld [vmem:[%s16545_s24 + $0x170] sm:$0xff] }
  0x2e   : > { %625 = vmatprep.mubr.bf16.mxu0 %v19825_v0  ;;  %668 = vmatprep.mubr.bf16.mxu1 %v19825_v0  ;;  %v16710_v47 = vld [vmem:[%s19815_s0 + $0x10] sm:$0xff]   ;;  %v16735_v59 = vcombine.low %v14562_v45, %v14566_v46 }
  0x2f   : > { %1669 = vperm.xlu0 %16412, %v199_v39   ;;  %20029 = vst [vmem:[#allocation2_spill] sm:$0xff] %v16710_v47  ;;  %v14602_v38 = vld [vmem:[%s16545_s24 + $0x1d0] sm:$0xff] }
  0x30   : > { %596 = vmatpush1.bf16.msra.mxu0 %v14537_v52  ;;  %639 = vmatpush1.bf16.msra.mxu1 %v14539_v53  ;;  %v16721_v52 = vcombine.high %v14562_v45, %v14566_v46  ;;  %v16724_v53 = vcombine.high %v14563_v48, %v14567_v49  ;;  %v14606_v39 = vld [vmem:[%s16545_s24 + $0x1f0] sm:$0xff]  ;;  %v16791_v45 = vld [vmem:[%s19815_s0 + $0x18] sm:$0xff]   ;;  %v16796_v49 = vcombine.low %v14594_v16, %v14598_v17 }
  0x31   : > { %679 = vmatprep.subr.bf16.mxu0 %v14534_v54  ;;  %722 = vmatprep.subr.bf16.mxu1 %v14536_v55  ;;  %v14592_v54 = vld [vmem:[%s16545_s24 + $0x180] sm:$0xff]  ;;  %20030 = vst [vmem:[#allocation3_spill] sm:$0xff] %v16791_v45  ;;  %v14603_v46 = vld [vmem:[%s16545_s24 + $0x1d8] sm:$0xff] }
  0x32   : > { %v14596_v55 = vld [vmem:[%s16545_s24 + $0x1a0] sm:$0xff]  ;;  %v14607_v48 = vld [vmem:[%s16545_s24 + $0x1f8] sm:$0xff]  ;;  %20031 = vst [vmem:[#allocation4_spill] sm:$0xff] %v16796_v49 }
  0x33   : > { %14545 = vmatmul.mubr.msk.bf16.vlgmr.msra.gmra.mrb[0].mxu0 %vm329_vm0, %v16645_v58  ;;  %14546 = vmatmul.mubr.msk.bf16.vlgmr.msra.gmra.mrb[0].mxu1 %vm329_vm0, %v16645_v58  ;;  %v16753_v5 = vcombine.low %v14592_v54, %v14596_v55  ;;  %v16820_v16 = vcombine.low %v14603_v46, %v14607_v48 }
  0x34   : > { %680 = vmatpush1.bf16.msra.mxu0 %v14533_v61  ;;  %723 = vmatpush1.bf16.msra.mxu1 %v14535_v62  ;;  %v16741_v61 = vcombine.high %v14592_v54, %v14596_v55  ;;  %v16745_v62 = vcombine.high %v14593_v56, %v14597_v57  ;;  %v16800_v54 = vcombine.low %v14595_v18, %v14599_v23  ;;  %v14632_v57 = vld [vmem:[%s16545_s24 + $0x200] sm:$0xff] }
  0x35   : > { %681 = vmatprep.subr.bf16.mxu0 %v14542_v63  ;;  %724 = vmatprep.subr.bf16.mxu1 %v14544_v1  ;;  %v14600_v63 = vld [vmem:[%s16545_s24 + $0x1c0] sm:$0xff]  ;;  %v16802_v55 = vcombine.high %v14602_v38, %v14606_v39  ;;  %v16805_v56 = vcombine.high %v14603_v46, %v14607_v48  ;;  %20036 = vst [vmem:[#allocation9_spill] sm:$0xff] %v16820_v16 }
  0x36   : > { %711 = vmatprep.mubr.bf16.mxu0 %v19825_v0  ;;  %754 = vmatprep.mubr.bf16.mxu1 %v19825_v0  ;;  %v14604_v1 = vld [vmem:[%s16545_s24 + $0x1e0] sm:$0xff]  ;;  %20032 = vst [vmem:[#allocation5_spill] sm:$0xff] %v16800_v54 }
  0x37   : > { %v16773_v24 = vcombine.low %v14600_v63, %v14604_v1  ;;  %20033 = vst [vmem:[#allocation6_spill] sm:$0xff] %v16802_v55  ;;  %20034 = vst [vmem:[#allocation7_spill] sm:$0xff] %v16805_v56  ;;  %v14640_v23 = vld [vmem:[%s16545_s24 + $0x240] sm:$0xff] }
  0x38   : > { %682 = vmatpush1.bf16.msra.mxu0 %v14541_v8  ;;  %725 = vmatpush1.bf16.msra.mxu1 %v14543_v12  ;;  %v16759_v8 = vcombine.high %v14600_v63, %v14604_v1  ;;  %v16762_v12 = vcombine.high %v14601_v2, %v14605_v3  ;;  %v14636_v63 = vld [vmem:[%s16545_s24 + $0x220] sm:$0xff]  ;;  %v14633_v1 = vld [vmem:[%s16545_s24 + $0x208] sm:$0xff]  ;;  %v16816_v3 = vcombine.low %v14602_v38, %v14606_v39 }
  0x39   : > { %876 = vmatprep.subr.bf16.mxu0 %v16657_v13  ;;  %919 = vmatprep.subr.bf16.mxu1 %v16660_v14  ;;  %v14637_v2 = vld [vmem:[%s16545_s24 + $0x228] sm:$0xff]  ;;  %v16822_v17 = vcombine.high %v14632_v57, %v14636_v63  ;;  %v14644_v38 = vld [vmem:[%s16545_s24 + $0x260] sm:$0xff]  ;;  %v16834_v46 = vcombine.low %v14632_v57, %v14636_v63  ;;  %v14635_v57 = vld [vmem:[%s16545_s24 + $0x218] sm:$0xff] }
  0x3a   : > { %20035 = vst [vmem:[#allocation8_spill] sm:$0xff] %v16816_v3  ;;  %v16826_v18 = vcombine.high %v14633_v1, %v14637_v2  ;;  %v14641_v39 = vld [vmem:[%s16545_s24 + $0x248] sm:$0xff]  ;;  %v16838_v48 = vcombine.low %v14633_v1, %v14637_v2  ;;  %v14639_v63 = vld [vmem:[%s16545_s24 + $0x238] sm:$0xff]  ;;  %v16854_v1 = vcombine.low %v14640_v23, %v14644_v38 }
  0x3b   : > { %14547 = vmatmul.mubr.msk.bf16.vlgmr.msra.gmra.mrb[4].mxu0 %vm329_vm0, %v16645_v58  ;;  %14548 = vmatmul.mubr.msk.bf16.vlgmr.msra.gmra.mrb[4].mxu1 %vm329_vm0, %v16645_v58  ;;  %20037 = vst [vmem:[#allocation10_spill] sm:$0xff] %v16822_v17 }
  0x3c   : > { %877 = vmatpush1.bf16.msra.mxu0 %v16670_v26  ;;  %920 = vmatpush1.bf16.msra.mxu1 %v16675_v33  ;;  %20038 = vst [vmem:[#allocation11_spill] sm:$0xff] %v16826_v18  ;;  %20039 = vst [vmem:[#allocation12_spill] sm:$0xff] %v16838_v48 }
  0x3d   : > { %878 = vmatprep.subr.bf16.mxu0 %v16677_v34  ;;  %921 = vmatprep.subr.bf16.mxu1 %v16685_v40 }
  0x3e   : > { %908 = vmatprep.mubr.bf16.mxu0 %v19825_v0  ;;  %951 = vmatprep.mubr.bf16.mxu1 %v19825_v0 }
  0x40   : > { %879 = vmatpush1.bf16.msra.mxu0 %v16692_v41  ;;  %922 = vmatpush1.bf16.msra.mxu1 %v16696_v42 }
  0x41   : > { %962 = vmatprep.subr.bf16.mxu0 %v16698_v43  ;;  %1005 = vmatprep.subr.bf16.mxu1 %v16702_v44 }
  0x43   : > { %14585 = vmatmul.mubr.msk.bf16.vlgmr.msra.gmra.mrb[0].mxu0 %vm329_vm0, %v16710_v47  ;;  %14586 = vmatmul.mubr.msk.bf16.vlgmr.msra.gmra.mrb[0].mxu1 %vm329_vm0, %v16710_v47 }
  0x44   : > { %963 = vmatpush1.bf16.msra.mxu0 %v16715_v50  ;;  %1006 = vmatpush1.bf16.msra.mxu1 %v16719_v51 }
  0x45   : > { %964 = vmatprep.subr.bf16.mxu0 %v16721_v52  ;;  %1007 = vmatprep.subr.bf16.mxu1 %v16724_v53 }
  0x46   : > { %994 = vmatprep.mubr.bf16.mxu0 %v19825_v0  ;;  %1037 = vmatprep.mubr.bf16.mxu1 %v19825_v0 }
  0x48   : > { %965 = vmatpush1.bf16.msra.mxu0 %v16735_v59  ;;  %1008 = vmatpush1.bf16.msra.mxu1 %v16739_v60 }
  0x49   : > { %1175 = vmatprep.subr.bf16.mxu0 %v16741_v61  ;;  %1218 = vmatprep.subr.bf16.mxu1 %v16745_v62 }
  0x4b   : > { %14587 = vmatmul.mubr.msk.bf16.vlgmr.msra.gmra.mrb[4].mxu0 %vm329_vm0, %v16710_v47  ;;  %14588 = vmatmul.mubr.msk.bf16.vlgmr.msra.gmra.mrb[4].mxu1 %vm329_vm0, %v16710_v47 }
  0x4c   : > { %1176 = vmatpush1.bf16.msra.mxu0 %v16753_v5  ;;  %1219 = vmatpush1.bf16.msra.mxu1 %v16757_v7 }
  0x4d   : > { %1177 = vmatprep.subr.bf16.mxu0 %v16759_v8  ;;  %1220 = vmatprep.subr.bf16.mxu1 %v16762_v12 }
  0x4e   : > { %1207 = vmatprep.mubr.bf16.mxu0 %v19825_v0  ;;  %1250 = vmatprep.mubr.bf16.mxu1 %v19825_v0 }
  0x50   : > { %1178 = vmatpush1.bf16.msra.mxu0 %v16773_v24  ;;  %1221 = vmatpush1.bf16.msra.mxu1 %v16777_v27 }
  0x51   : > { %1261 = vmatprep.subr.bf16.mxu0 %v16779_v32  ;;  %1304 = vmatprep.subr.bf16.mxu1 %v16783_v35 }
  0x53   : > { %14625 = vmatmul.mubr.msk.bf16.vlgmr.msra.gmra.mrb[0].mxu0 %vm329_vm0, %v16791_v45  ;;  %14626 = vmatmul.mubr.msk.bf16.vlgmr.msra.gmra.mrb[0].mxu1 %vm329_vm0, %v16791_v45 }
  0x54   : > { %1262 = vmatpush1.bf16.msra.mxu0 %v16796_v49  ;;  %1305 = vmatpush1.bf16.msra.mxu1 %v16800_v54  ;;  %v14638_v49 = vld [vmem:[%s16545_s24 + $0x230] sm:$0xff] }
  0x55   : > { %1263 = vmatprep.subr.bf16.mxu0 %v16802_v55  ;;  %1306 = vmatprep.subr.bf16.mxu1 %v16805_v56  ;;  %v14645_v55 = vld [vmem:[%s16545_s24 + $0x268] sm:$0xff]  ;;  %v16840_v56 = vcombine.high %v14640_v23, %v14644_v38  ;;  %v16872_v23 = vld [vmem:[%s19815_s0 + $0x20] sm:$0xff]   ;;  %v14643_v38 = vld [vmem:[%s16545_s24 + $0x258] sm:$0xff] }
  0x56   : > { %1293 = vmatprep.mubr.bf16.mxu0 %v19825_v0  ;;  %1336 = vmatprep.mubr.bf16.mxu1 %v19825_v0  ;;  %v16843_v54 = vcombine.high %v14641_v39, %v14645_v55  ;;  %v14634_v0 = vld [vmem:[%s16545_s24 + $0x210] sm:$0xff]  ;;  %v16858_v2 = vcombine.low %v14641_v39, %v14645_v55  ;;  %v14647_v55 = vld [vmem:[%s16545_s24 + $0x278] sm:$0xff] }
  0x57   : > { %20040 = vst [vmem:[#allocation13_spill] sm:$0xff] %v16840_v56  ;;  %v16877_v39 = vcombine.low %v14634_v0, %v14638_v49 }
  0x58   : > { %1264 = vmatpush1.bf16.msra.mxu0 %v16816_v3  ;;  %1307 = vmatpush1.bf16.msra.mxu1 %v16820_v16  ;;  %20041 = vst [vmem:[#allocation14_spill] sm:$0xff] %v16843_v54  ;;  %v16864_v16 = vcombine.high %v14635_v57, %v14639_v63  ;;  %v14642_v3 = vld [vmem:[%s16545_s24 + $0x250] sm:$0xff] }
  0x59   : > { %1474 = vmatprep.subr.bf16.mxu0 %v16822_v17  ;;  %1517 = vmatprep.subr.bf16.mxu1 %v16826_v18  ;;  %v16860_v18 = vcombine.high %v14634_v0, %v14638_v49  ;;  %v20042_v17 = vmov 0   ;;  %20044 = vst [vmem:[#allocation16_spill] sm:$0xff] %v16877_v39  ;;  %v16897_v49 = vcombine.low %v14643_v38, %v14647_v55 }
  0x5a   : > { %20043 = vst [vmem:[#allocation15_spill] sm:$0xff] %v16864_v16 }
  0x5b   : > { %14627 = vmatmul.mubr.msk.bf16.vlgmr.msra.gmra.mrb[4].mxu0 %vm329_vm0, %v16791_v45  ;;  %14628 = vmatmul.mubr.msk.bf16.vlgmr.msra.gmra.mrb[4].mxu1 %vm329_vm0, %v16791_v45  ;;  %v14646_v45 = vld [vmem:[%s16545_s24 + $0x270] sm:$0xff]  ;;  %20048 = vst [vmem:[#allocation20_spill] sm:$0xff] %v16897_v49 }
  0x5c   : > { %1475 = vmatpush1.bf16.msra.mxu0 %v16834_v46  ;;  %1518 = vmatpush1.bf16.msra.mxu1 %v16838_v48  ;;  %v16886_v48 = vcombine.high %v14643_v38, %v14647_v55  ;;  %v16893_v0 = vcombine.low %v14642_v3, %v14646_v45  ;;  %v14695_v38 = vld [vmem:[%s16545_s24 + $0x2c8] sm:$0xff] }
  0x5d   : > { %1476 = vmatprep.subr.bf16.mxu0 %v16840_v56  ;;  %1519 = vmatprep.subr.bf16.mxu1 %v16843_v54  ;;  %v16881_v54 = vcombine.low %v14635_v57, %v14639_v63  ;;  %v16883_v56 = vcombine.high %v14642_v3, %v14646_v45  ;;  %v14694_v57 = vld [vmem:[%s16545_s24 + $0x2c0] sm:$0xff]  ;;  %v14699_v55 = vld [vmem:[%s16545_s24 + $0x2e8] sm:$0xff] }
  0x5e   : > { %1506 = vmatprep.mubr.bf16.mxu0 %v20042_v17  ;;  %1549 = vmatprep.mubr.bf16.mxu1 %v20042_v17  ;;  %20047 = vst [vmem:[#allocation19_spill] sm:$0xff] %v16886_v48  ;;  %v14698_v63 = vld [vmem:[%s16545_s24 + $0x2e0] sm:$0xff] }
  0x5f   : > { %20045 = vst [vmem:[#allocation17_spill] sm:$0xff] %v16881_v54  ;;  %20046 = vst [vmem:[#allocation18_spill] sm:$0xff] %v16883_v56 }
  0x60   : > { %1477 = vmatpush1.bf16.msra.mxu0 %v16854_v1  ;;  %1520 = vmatpush1.bf16.msra.mxu1 %v16858_v2 }
  0x61   : > { %1560 = vmatprep.subr.bf16.mxu0 %v16860_v18  ;;  %1603 = vmatprep.subr.bf16.mxu1 %v16864_v16 }
  0x63   : > { %14665 = vmatmul.mubr.msk.bf16.vlgmr.msra.gmra.mrb[0].mxu0 %vm329_vm0, %v16872_v23  ;;  %14666 = vmatmul.mubr.msk.bf16.vlgmr.msra.gmra.mrb[0].mxu1 %vm329_vm0, %v16872_v23 }
  0x64   : > { %1561 = vmatpush1.bf16.msra.mxu0 %v16877_v39  ;;  %1604 = vmatpush1.bf16.msra.mxu1 %v16881_v54 }
  0x65   : > { %1562 = vmatprep.subr.bf16.mxu0 %v16883_v56  ;;  %1605 = vmatprep.subr.bf16.mxu1 %v16886_v48 }
  0x66   : > { %1592 = vmatprep.mubr.bf16.mxu0 %v20042_v17  ;;  %1635 = vmatprep.mubr.bf16.mxu1 %v20042_v17 }
  0x68   : > { %1563 = vmatpush1.bf16.msra.mxu0 %v16893_v0  ;;  %1606 = vmatpush1.bf16.msra.mxu1 %v16897_v49 }
  0x69   : > { %1704 = vmatprep.subr.bf16.mxu0 %v16657_v13  ;;  %1747 = vmatprep.subr.bf16.mxu1 %v16660_v14 }
  0x6b   : > { %14667 = vmatmul.mubr.msk.bf16.vlgmr.msra.gmra.mrb[4].mxu0 %vm329_vm0, %v16872_v23  ;;  %14668 = vmatmul.mubr.msk.bf16.vlgmr.msra.gmra.mrb[4].mxu1 %vm329_vm0, %v16872_v23 }
  0x6c   : > { %1705 = vmatpush1.bf16.msra.mxu0 %v16670_v26  ;;  %1748 = vmatpush1.bf16.msra.mxu1 %v16675_v33 }
  0x6d   : > { %1706 = vmatprep.subr.bf16.mxu0 %v16677_v34  ;;  %1749 = vmatprep.subr.bf16.mxu1 %v16685_v40 }
  0x6e   : > { %1736 = vmatprep.mubr.bf16.mxu0 %v20042_v17  ;;  %1779 = vmatprep.mubr.bf16.mxu1 %v20042_v17 }
  0x70   : > { %1707 = vmatpush1.bf16.msra.mxu0 %v16692_v41  ;;  %1750 = vmatpush1.bf16.msra.mxu1 %v16696_v42 }
  0x71   : > { %1790 = vmatprep.subr.bf16.mxu0 %v16698_v43  ;;  %1833 = vmatprep.subr.bf16.mxu1 %v16702_v44 }
  0x73   : > { %14669 = vmatmul.mubr.msk.bf16.vlgmr.msra.gmra.mrb[8].mxu0 %vm329_vm0, %v16590_v25  ;;  %14670 = vmatmul.mubr.msk.bf16.vlgmr.msra.gmra.mrb[8].mxu1 %vm329_vm0, %v16590_v25 }
  0x74   : > { %1791 = vmatpush1.bf16.msra.mxu0 %v16715_v50  ;;  %1834 = vmatpush1.bf16.msra.mxu1 %v16719_v51 }
  0x75   : > { %1792 = vmatprep.subr.bf16.mxu0 %v16721_v52  ;;  %1835 = vmatprep.subr.bf16.mxu1 %v16724_v53 }
  0x76   : > { %1822 = vmatprep.mubr.bf16.mxu0 %v20042_v17  ;;  %1865 = vmatprep.mubr.bf16.mxu1 %v20042_v17 }
  0x78   : > { %1793 = vmatpush1.bf16.msra.mxu0 %v16735_v59  ;;  %1836 = vmatpush1.bf16.msra.mxu1 %v16739_v60 }
  0x79   : > { %1876 = vmatprep.subr.bf16.mxu0 %v16550_v4  ;;  %1919 = vmatprep.subr.bf16.mxu1 %v16557_v9  ;;  %v20049_v4 = vld [vmem:[#allocation4_spill] sm:$0xff]  ;;  %v20051_v9 = vld [vmem:[#allocation6_spill] sm:$0xff] }
  0x7b   : > { %14671 = vmatmul.mubr.msk.bf16.vlgmr.msra.gmra.mrb[12].mxu0 %vm329_vm0, %v16590_v25  ;;  %14672 = vmatmul.mubr.msk.bf16.vlgmr.msra.gmra.mrb[12].mxu1 %vm329_vm0, %v16590_v25 }
  0x7c   : > { %1877 = vmatpush1.bf16.msra.mxu0 %v16553_v6  ;;  %1920 = vmatpush1.bf16.msra.mxu1 %v16559_v10  ;;  %v20050_v6 = vld [vmem:[#allocation5_spill] sm:$0xff]  ;;  %v20052_v10 = vld [vmem:[#allocation7_spill] sm:$0xff] }
  0x7d   : > { %1878 = vmatprep.subr.bf16.mxu0 %v16561_v11  ;;  %1921 = vmatprep.subr.bf16.mxu1 %v16567_v15  ;;  %v20053_v11 = vld [vmem:[#allocation8_spill] sm:$0xff]  ;;  %v20054_v15 = vld [vmem:[#allocation9_spill] sm:$0xff] }
  0x7e   : > { %1908 = vmatprep.mubr.bf16.mxu0 %v20042_v17  ;;  %1951 = vmatprep.mubr.bf16.mxu1 %v20042_v17 }
  0x80   : > { %1879 = vmatpush1.bf16.msra.mxu0 %v16574_v19  ;;  %1922 = vmatpush1.bf16.msra.mxu1 %v16578_v20  ;;  %v20055_v19 = vld [vmem:[#allocation10_spill] sm:$0xff]  ;;  %v20056_v20 = vld [vmem:[#allocation11_spill] sm:$0xff] }
  0x81   : > { %1962 = vmatprep.subr.bf16.mxu0 %v16580_v21  ;;  %2005 = vmatprep.subr.bf16.mxu1 %v16583_v22  ;;  %v20057_v21 = vld [vmem:[#allocation12_spill] sm:$0xff]  ;;  %v20058_v22 = vld [vmem:[#allocation13_spill] sm:$0xff] }
  0x83   : > { %14673 = vmatmul.mubr.msk.bf16.vlgmr.msra.gmra.mrb[8].mxu0 %vm329_vm0, %v16645_v58  ;;  %14674 = vmatmul.mubr.msk.bf16.vlgmr.msra.gmra.mrb[8].mxu1 %vm329_vm0, %v16645_v58 }
  0x84   : > { %1963 = vmatpush1.bf16.msra.mxu0 %v16595_v28  ;;  %2006 = vmatpush1.bf16.msra.mxu1 %v16599_v29  ;;  %v20059_v28 = vld [vmem:[#allocation14_spill] sm:$0xff] }
  0x85   : > { %1964 = vmatprep.subr.bf16.mxu0 %v16601_v30  ;;  %2007 = vmatprep.subr.bf16.mxu1 %v16604_v31  ;;  %v14686_v29 = vld [vmem:[%s16545_s24 + $0x280] sm:$0xff]  ;;  %v20060_v31 = vld [vmem:[#allocation3_spill] sm:$0xff] }
  0x86   : > { %1994 = vmatprep.mubr.bf16.mxu0 %v20042_v17  ;;  %2037 = vmatprep.mubr.bf16.mxu1 %v20042_v17  ;;  %v14690_v30 = vld [vmem:[%s16545_s24 + $0x2a0] sm:$0xff] }
  0x87   : > { %v17015_v45 = vcombine.high %v14686_v29, %v14690_v30 }
  0x88   : > { %1965 = vmatpush1.bf16.msra.mxu0 %v16615_v36  ;;  %2008 = vmatpush1.bf16.msra.mxu1 %v16619_v37  ;;  %v14687_v36 = vld [vmem:[%s16545_s24 + $0x288] sm:$0xff] }
  0x89   : > { %2048 = vmatprep.subr.bf16.mxu0 %v16741_v61  ;;  %2091 = vmatprep.subr.bf16.mxu1 %v16745_v62  ;;  %v14691_v37 = vld [vmem:[%s16545_s24 + $0x2a8] sm:$0xff]  ;;  %20061 = vst [vmem:[#allocation4_spill] sm:$0xff] %v17015_v45 }
  0x8a   : > { %v17019_v3 = vcombine.high %v14687_v36, %v14691_v37 }
  0x8b   : > { %14675 = vmatmul.mubr.msk.bf16.vlgmr.msra.gmra.mrb[12].mxu0 %vm329_vm0, %v16645_v58  ;;  %14676 = vmatmul.mubr.msk.bf16.vlgmr.msra.gmra.mrb[12].mxu1 %vm329_vm0, %v16645_v58 }
  0x8c   : > { %2049 = vmatpush1.bf16.msra.mxu0 %v16753_v5  ;;  %2092 = vmatpush1.bf16.msra.mxu1 %v16757_v7  ;;  %20062 = vst [vmem:[#allocation5_spill] sm:$0xff] %v17019_v3 }
  0x8d   : > { %2050 = vmatprep.subr.bf16.mxu0 %v16759_v8  ;;  %2093 = vmatprep.subr.bf16.mxu1 %v16762_v12 }
  0x8e   : > { %2080 = vmatprep.mubr.bf16.mxu0 %v20042_v17  ;;  %2123 = vmatprep.mubr.bf16.mxu1 %v20042_v17 }
  0x90   : > { %2051 = vmatpush1.bf16.msra.mxu0 %v16773_v24  ;;  %2094 = vmatpush1.bf16.msra.mxu1 %v16777_v27 }
  0x91   : > { %2134 = vmatprep.subr.bf16.mxu0 %v16779_v32  ;;  %2177 = vmatprep.subr.bf16.mxu1 %v16783_v35 }
  0x93   : > { %14677 = vmatmul.mubr.msk.bf16.vlgmr.msra.gmra.mrb[8].mxu0 %vm329_vm0, %v16710_v47  ;;  %14678 = vmatmul.mubr.msk.bf16.vlgmr.msra.gmra.mrb[8].mxu1 %vm329_vm0, %v16710_v47 }
  0x94   : > { %2135 = vmatpush1.bf16.msra.mxu0 %v20049_v4  ;;  %2178 = vmatpush1.bf16.msra.mxu1 %v20050_v6 }
  0x95   : > { %2136 = vmatprep.subr.bf16.mxu0 %v20051_v9  ;;  %2179 = vmatprep.subr.bf16.mxu1 %v20052_v10 }
  0x96   : > { %2166 = vmatprep.mubr.bf16.mxu0 %v20042_v17  ;;  %2209 = vmatprep.mubr.bf16.mxu1 %v20042_v17 }
  0x98   : > { %2137 = vmatpush1.bf16.msra.mxu0 %v20053_v11  ;;  %2180 = vmatpush1.bf16.msra.mxu1 %v20054_v15 }
  0x99   : > { %2236 = vmatprep.subr.bf16.mxu0 %v20055_v19  ;;  %2279 = vmatprep.subr.bf16.mxu1 %v20056_v20 }
  0x9b   : > { %14679 = vmatmul.mubr.msk.bf16.vlgmr.msra.gmra.mrb[12].mxu0 %vm329_vm0, %v16710_v47  ;;  %14680 = vmatmul.mubr.msk.bf16.vlgmr.msra.gmra.mrb[12].mxu1 %vm329_vm0, %v16710_v47  ;;  %v14688_v47 = vld [vmem:[%s16545_s24 + $0x290] sm:$0xff] }
  0x9c   : > { %2237 = vmatpush1.bf16.msra.mxu0 %v16834_v46  ;;  %2280 = vmatpush1.bf16.msra.mxu1 %v20057_v21 }
  0x9d   : > { %2238 = vmatprep.subr.bf16.mxu0 %v20058_v22  ;;  %2281 = vmatprep.subr.bf16.mxu1 %v20059_v28 }
  0x9e   : > { %2268 = vmatprep.mubr.bf16.mxu0 %v20042_v17  ;;  %2311 = vmatprep.mubr.bf16.mxu1 %v20042_v17 }
  0xa0   : > { %2239 = vmatpush1.bf16.msra.mxu0 %v16854_v1  ;;  %2282 = vmatpush1.bf16.msra.mxu1 %v16858_v2 }
  0xa1   : > { %2322 = vmatprep.subr.bf16.mxu0 %v16860_v18  ;;  %2365 = vmatprep.subr.bf16.mxu1 %v16864_v16  ;;  %v14692_v16 = vld [vmem:[%s16545_s24 + $0x2b0] sm:$0xff] }
  0xa3   : > { %14681 = vmatmul.mubr.msk.bf16.vlgmr.msra.gmra.mrb[8].mxu0 %vm329_vm0, %v20060_v31  ;;  %14682 = vmatmul.mubr.msk.bf16.vlgmr.msra.gmra.mrb[8].mxu1 %vm329_vm0, %v20060_v31 }
  0xa4   : > { %2323 = vmatpush1.bf16.msra.mxu0 %v16877_v39  ;;  %2366 = vmatpush1.bf16.msra.mxu1 %v16881_v54  ;;  %v17033_v54 = vcombine.high %v14694_v57, %v14698_v63  ;;  %v17036_v39 = vcombine.high %v14695_v38, %v14699_v55 }
  0xa5   : > { %2324 = vmatprep.subr.bf16.mxu0 %v16883_v56  ;;  %2367 = vmatprep.subr.bf16.mxu1 %v16886_v48  ;;  %v17027_v56 = vcombine.low %v14686_v29, %v14690_v30  ;;  %v17031_v48 = vcombine.low %v14687_v36, %v14691_v37  ;;  %v14689_v29 = vld [vmem:[%s16545_s24 + $0x298] sm:$0xff]  ;;  %v17047_v36 = vcombine.low %v14694_v57, %v14698_v63 }
  0xa6   : > { %2354 = vmatprep.mubr.bf16.mxu0 %v20042_v17  ;;  %2397 = vmatprep.mubr.bf16.mxu1 %v20042_v17  ;;  %20065 = vst [vmem:[#allocation8_spill] sm:$0xff] %v17033_v54  ;;  %20066 = vst [vmem:[#allocation9_spill] sm:$0xff] %v17036_v39  ;;  %v14693_v30 = vld [vmem:[%s16545_s24 + $0x2b8] sm:$0xff]  ;;  %v17051_v37 = vcombine.low %v14695_v38, %v14699_v55 }
  0xa7   : > { %20063 = vst [vmem:[#allocation6_spill] sm:$0xff] %v17027_v56  ;;  %20064 = vst [vmem:[#allocation7_spill] sm:$0xff] %v17031_v48  ;;  %v14697_v57 = vld [vmem:[%s16545_s24 + $0x2d8] sm:$0xff]  ;;  %v17069_v38 = vcombine.low %v14689_v29, %v14693_v30 }
  0xa8   : > { %2325 = vmatpush1.bf16.msra.mxu0 %v16893_v0  ;;  %2368 = vmatpush1.bf16.msra.mxu1 %v16897_v49  ;;  %20067 = vst [vmem:[#allocation10_spill] sm:$0xff] %v17047_v36  ;;  %20068 = vst [vmem:[#allocation11_spill] sm:$0xff] %v17051_v37  ;;  %v14696_v49 = vld [vmem:[%s16545_s24 + $0x2d0] sm:$0xff]  ;;  %v14701_v63 = vld [vmem:[%s16545_s24 + $0x2f8] sm:$0xff] }
  0xa9   : > { %2524 = vmatprep.subr.bf16.mxu0 %v17015_v45  ;;  %2567 = vmatprep.subr.bf16.mxu1 %v17019_v3  ;;  %v17053_v3 = vcombine.high %v14688_v47, %v14692_v16  ;;  %v17057_v45 = vcombine.high %v14689_v29, %v14693_v30  ;;  %20072 = vst [vmem:[#allocation21_spill] sm:$0xff] %v17069_v38  ;;  %v14748_v29 = vld [vmem:[%s16545_s24 + $0x348] sm:$0xff] }
  0xaa   : > { %v14752_v30 = vld [vmem:[%s16545_s24 + $0x368] sm:$0xff] }
  0xab   : > { %14683 = vmatmul.mubr.msk.bf16.vlgmr.msra.gmra.mrb[12].mxu0 %vm329_vm0, %v20060_v31  ;;  %14684 = vmatmul.mubr.msk.bf16.vlgmr.msra.gmra.mrb[12].mxu1 %vm329_vm0, %v20060_v31  ;;  %20069 = vst [vmem:[#allocation12_spill] sm:$0xff] %v17053_v3  ;;  %20070 = vst [vmem:[#allocation13_spill] sm:$0xff] %v17057_v45  ;;  %v14700_v31 = vld [vmem:[%s16545_s24 + $0x2f0] sm:$0xff] }
  0xac   : > { %2525 = vmatpush1.bf16.msra.mxu0 %v17027_v56  ;;  %2568 = vmatpush1.bf16.msra.mxu1 %v17031_v48  ;;  %v17065_v48 = vcombine.low %v14688_v47, %v14692_v16  ;;  %v17071_v55 = vcombine.high %v14696_v49, %v14700_v31  ;;  %v17081_v47 = vcombine.low %v14696_v49, %v14700_v31  ;;  %v14747_v49 = vld [vmem:[%s16545_s24 + $0x340] sm:$0xff] }
  0xad   : > { %2526 = vmatprep.subr.bf16.mxu0 %v17033_v54  ;;  %2569 = vmatprep.subr.bf16.mxu1 %v17036_v39  ;;  %v17074_v39 = vcombine.high %v14697_v57, %v14701_v63  ;;  %v17085_v16 = vcombine.low %v14697_v57, %v14701_v63  ;;  %v14751_v31 = vld [vmem:[%s16545_s24 + $0x360] sm:$0xff] }
  0xae   : > { %2556 = vmatprep.mubr.bf16.mxu0 %v20042_v17  ;;  %2599 = vmatprep.mubr.bf16.mxu1 %v20042_v17  ;;  %20071 = vst [vmem:[#allocation14_spill] sm:$0xff] %v17065_v48  ;;  %20073 = vst [vmem:[#allocation22_spill] sm:$0xff] %v17071_v55 }
  0xaf   : > { %20074 = vst [vmem:[#allocation23_spill] sm:$0xff] %v17074_v39  ;;  %20075 = vst [vmem:[#allocation24_spill] sm:$0xff] %v17081_v47 }
  0xb0   : > { %2527 = vmatpush1.bf16.msra.mxu0 %v17047_v36  ;;  %2570 = vmatpush1.bf16.msra.mxu1 %v17051_v37  ;;  %20076 = vst [vmem:[#allocation25_spill] sm:$0xff] %v17085_v16 }
  0xb1   : > { %2610 = vmatprep.subr.bf16.mxu0 %v17053_v3  ;;  %2653 = vmatprep.subr.bf16.mxu1 %v17057_v45 }
  0xb3   : > { %14718 = vmatmul.mubr.msk.bf16.vlgmr.msra.gmra.mrb[8].mxu0 %vm329_vm0, %v16872_v23  ;;  %14719 = vmatmul.mubr.msk.bf16.vlgmr.msra.gmra.mrb[8].mxu1 %vm329_vm0, %v16872_v23 }
  0xb4   : > { %2611 = vmatpush1.bf16.msra.mxu0 %v17065_v48  ;;  %2654 = vmatpush1.bf16.msra.mxu1 %v17069_v38 }
  0xb5   : > { %2612 = vmatprep.subr.bf16.mxu0 %v17071_v55  ;;  %2655 = vmatprep.subr.bf16.mxu1 %v17074_v39 }
  0xb6   : > { %2642 = vmatprep.mubr.bf16.mxu0 %v20042_v17  ;;  %2685 = vmatprep.mubr.bf16.mxu1 %v20042_v17 }
  0xb8   : > { %2613 = vmatpush1.bf16.msra.mxu0 %v17081_v47  ;;  %2656 = vmatpush1.bf16.msra.mxu1 %v17085_v16 }
  0xb9   : > { %2760 = vmatprep.subr.bf16.mxu0 %v16741_v61  ;;  %2803 = vmatprep.subr.bf16.mxu1 %v16745_v62 }
  0xbb   : > { %14720 = vmatmul.mubr.msk.bf16.vlgmr.msra.gmra.mrb[12].mxu0 %vm329_vm0, %v16872_v23  ;;  %14721 = vmatmul.mubr.msk.bf16.vlgmr.msra.gmra.mrb[12].mxu1 %vm329_vm0, %v16872_v23 }
  0xbc   : > { %2761 = vmatpush1.bf16.msra.mxu0 %v16753_v5  ;;  %2804 = vmatpush1.bf16.msra.mxu1 %v16757_v7 }
  0xbd   : > { %2762 = vmatprep.subr.bf16.mxu0 %v16759_v8  ;;  %2805 = vmatprep.subr.bf16.mxu1 %v16762_v12 }
  0xbe   : > { %2792 = vmatprep.mubr.bf16.mxu0 %v20042_v17  ;;  %2835 = vmatprep.mubr.bf16.mxu1 %v20042_v17 }
  0xc0   : > { %2763 = vmatpush1.bf16.msra.mxu0 %v16773_v24  ;;  %2806 = vmatpush1.bf16.msra.mxu1 %v16777_v27 }
  0xc1   : > { %2846 = vmatprep.subr.bf16.mxu0 %v16779_v32  ;;  %2889 = vmatprep.subr.bf16.mxu1 %v16783_v35 }
  0xc3   : > { %14722 = vmatmul.mubr.msk.bf16.vlgmr.msra.gmra.mrb[16].mxu0 %vm329_vm0, %v16590_v25  ;;  %14723 = vmatmul.mubr.msk.bf16.vlgmr.msra.gmra.mrb[16].mxu1 %vm329_vm0, %v16590_v25 }
  0xc4   : > { %2847 = vmatpush1.bf16.msra.mxu0 %v20049_v4  ;;  %2890 = vmatpush1.bf16.msra.mxu1 %v20050_v6 }
  0xc5   : > { %2848 = vmatprep.subr.bf16.mxu0 %v20051_v9  ;;  %2891 = vmatprep.subr.bf16.mxu1 %v20052_v10 }
  0xc6   : > { %2878 = vmatprep.mubr.bf16.mxu0 %v20042_v17  ;;  %2921 = vmatprep.mubr.bf16.mxu1 %v20042_v17 }
  0xc8   : > { %2849 = vmatpush1.bf16.msra.mxu0 %v20053_v11  ;;  %2892 = vmatpush1.bf16.msra.mxu1 %v20054_v15 }
  0xc9   : > { %2932 = vmatprep.subr.bf16.mxu0 %v16657_v13  ;;  %2975 = vmatprep.subr.bf16.mxu1 %v16660_v14  ;;  %v20079_v13 = vld [vmem:[#allocation16_spill] sm:$0xff]  ;;  %v20080_v14 = vld [vmem:[#allocation17_spill] sm:$0xff] }
  0xcb   : > { %14724 = vmatmul.mubr.msk.bf16.vlgmr.msra.gmra.mrb[20].mxu0 %vm329_vm0, %v16590_v25  ;;  %14725 = vmatmul.mubr.msk.bf16.vlgmr.msra.gmra.mrb[20].mxu1 %vm329_vm0, %v16590_v25  ;;  %v20077_v25 = vld [vmem:[#allocation15_spill] sm:$0xff] }
  0xcc   : > { %2933 = vmatpush1.bf16.msra.mxu0 %v16670_v26  ;;  %2976 = vmatpush1.bf16.msra.mxu1 %v16675_v33  ;;  %v20081_v26 = vld [vmem:[#allocation18_spill] sm:$0xff]  ;;  %v20082_v33 = vld [vmem:[#allocation19_spill] sm:$0xff] }
  0xcd   : > { %2934 = vmatprep.subr.bf16.mxu0 %v16677_v34  ;;  %2977 = vmatprep.subr.bf16.mxu1 %v16685_v40  ;;  %v20083_v34 = vld [vmem:[#allocation20_spill] sm:$0xff] }
  0xce   : > { %2964 = vmatprep.mubr.bf16.mxu0 %v20042_v17  ;;  %3007 = vmatprep.mubr.bf16.mxu1 %v20042_v17  ;;  %v20084_v40 = vld [vmem:[#allocation4_spill] sm:$0xff] }
  0xd0   : > { %2935 = vmatpush1.bf16.msra.mxu0 %v16692_v41  ;;  %2978 = vmatpush1.bf16.msra.mxu1 %v16696_v42  ;;  %v20085_v41 = vld [vmem:[#allocation5_spill] sm:$0xff]  ;;  %v20086_v42 = vld [vmem:[#allocation7_spill] sm:$0xff] }
  0xd1   : > { %3018 = vmatprep.subr.bf16.mxu0 %v16698_v43  ;;  %3061 = vmatprep.subr.bf16.mxu1 %v16702_v44  ;;  %v20087_v43 = vld [vmem:[#allocation9_spill] sm:$0xff]  ;;  %v14739_v44 = vld [vmem:[%s16545_s24 + $0x300] sm:$0xff] }
  0xd3   : > { %14726 = vmatmul.mubr.msk.bf16.vlgmr.msra.gmra.mrb[16].mxu0 %vm329_vm0, %v16645_v58  ;;  %14727 = vmatmul.mubr.msk.bf16.vlgmr.msra.gmra.mrb[16].mxu1 %vm329_vm0, %v16645_v58 }
  0xd4   : > { %3019 = vmatpush1.bf16.msra.mxu0 %v16715_v50  ;;  %3062 = vmatpush1.bf16.msra.mxu1 %v16719_v51  ;;  %v14743_v50 = vld [vmem:[%s16545_s24 + $0x320] sm:$0xff]  ;;  %v20088_v51 = vld [vmem:[#allocation3_spill] sm:$0xff] }
  0xd5   : > { %3020 = vmatprep.subr.bf16.mxu0 %v16721_v52  ;;  %3063 = vmatprep.subr.bf16.mxu1 %v16724_v53  ;;  %v14740_v52 = vld [vmem:[%s16545_s24 + $0x308] sm:$0xff]  ;;  %v17215_v57 = vcombine.low %v14739_v44, %v14743_v50 }
  0xd6   : > { %3050 = vmatprep.mubr.bf16.mxu0 %v20042_v17  ;;  %3093 = vmatprep.mubr.bf16.mxu1 %v20042_v17  ;;  %v14744_v53 = vld [vmem:[%s16545_s24 + $0x328] sm:$0xff] }
  0xd7   : > { %20091 = vst [vmem:[#allocation16_spill] sm:$0xff] %v17215_v57  ;;  %v17219_v63 = vcombine.low %v14740_v52, %v14744_v53 }
  0xd8   : > { %3021 = vmatpush1.bf16.msra.mxu0 %v16735_v59  ;;  %3064 = vmatpush1.bf16.msra.mxu1 %v16739_v60  ;;  %v17203_v59 = vcombine.high %v14739_v44, %v14743_v50  ;;  %v17207_v60 = vcombine.high %v14740_v52, %v14744_v53  ;;  %v14742_v44 = vld [vmem:[%s16545_s24 + $0x318] sm:$0xff]  ;;  %v17235_v52 = vcombine.low %v14747_v49, %v14751_v31 }
  0xd9   : > { %3104 = vmatprep.subr.bf16.mxu0 %v20055_v19  ;;  %3147 = vmatprep.subr.bf16.mxu1 %v20056_v20  ;;  %20092 = vst [vmem:[#allocation17_spill] sm:$0xff] %v17219_v63  ;;  %v14746_v50 = vld [vmem:[%s16545_s24 + $0x338] sm:$0xff]  ;;  %v17239_v53 = vcombine.low %v14748_v29, %v14752_v30 }
  0xda   : > { %20089 = vst [vmem:[#allocation15_spill] sm:$0xff] %v17203_v59  ;;  %20095 = vst [vmem:[#allocation20_spill] sm:$0xff] %v17235_v52 }
  0xdb   : > { %14728 = vmatmul.mubr.msk.bf16.vlgmr.msra.gmra.mrb[20].mxu0 %vm329_vm0, %v16645_v58  ;;  %14729 = vmatmul.mubr.msk.bf16.vlgmr.msra.gmra.mrb[20].mxu1 %vm329_vm0, %v16645_v58  ;;  %v20078_v58 = vld [vmem:[#allocation2_spill] sm:$0xff]  ;;  %20096 = vst [vmem:[#allocation26_spill] sm:$0xff] %v17239_v53 }
  0xdc   : > { %3105 = vmatpush1.bf16.msra.mxu0 %v16834_v46  ;;  %3148 = vmatpush1.bf16.msra.mxu1 %v20057_v21  ;;  %20090 = vst [vmem:[#allocation2_spill] sm:$0xff] %v17207_v60 }
  0xdd   : > { %3106 = vmatprep.subr.bf16.mxu0 %v20058_v22  ;;  %3149 = vmatprep.subr.bf16.mxu1 %v20059_v28 }
  0xde   : > { %3136 = vmatprep.mubr.bf16.mxu0 %v20042_v17  ;;  %3179 = vmatprep.mubr.bf16.mxu1 %v20042_v17 }
  0xe0   : > { %3107 = vmatpush1.bf16.msra.mxu0 %v16854_v1  ;;  %3150 = vmatpush1.bf16.msra.mxu1 %v16858_v2 }
  0xe1   : > { %3190 = vmatprep.subr.bf16.mxu0 %v16860_v18  ;;  %3233 = vmatprep.subr.bf16.mxu1 %v20077_v25 }
  0xe3   : > { %14730 = vmatmul.mubr.msk.bf16.vlgmr.msra.gmra.mrb[16].mxu0 %vm329_vm0, %v20078_v58  ;;  %14731 = vmatmul.mubr.msk.bf16.vlgmr.msra.gmra.mrb[16].mxu1 %vm329_vm0, %v20078_v58 }
  0xe4   : > { %3191 = vmatpush1.bf16.msra.mxu0 %v20079_v13  ;;  %3234 = vmatpush1.bf16.msra.mxu1 %v20080_v14 }
  0xe5   : > { %3192 = vmatprep.subr.bf16.mxu0 %v20081_v26  ;;  %3235 = vmatprep.subr.bf16.mxu1 %v20082_v33 }
  0xe6   : > { %3222 = vmatprep.mubr.bf16.mxu0 %v20042_v17  ;;  %3265 = vmatprep.mubr.bf16.mxu1 %v20042_v17 }
  0xe8   : > { %3193 = vmatpush1.bf16.msra.mxu0 %v16893_v0  ;;  %3236 = vmatpush1.bf16.msra.mxu1 %v20083_v34 }
  0xe9   : > { %3292 = vmatprep.subr.bf16.mxu0 %v20084_v40  ;;  %3335 = vmatprep.subr.bf16.mxu1 %v20085_v41 }
  0xeb   : > { %14732 = vmatmul.mubr.msk.bf16.vlgmr.msra.gmra.mrb[20].mxu0 %vm329_vm0, %v20078_v58  ;;  %14733 = vmatmul.mubr.msk.bf16.vlgmr.msra.gmra.mrb[20].mxu1 %vm329_vm0, %v20078_v58 }
  0xec   : > { %3293 = vmatpush1.bf16.msra.mxu0 %v17027_v56  ;;  %3336 = vmatpush1.bf16.msra.mxu1 %v20086_v42 }
  0xed   : > { %3294 = vmatprep.subr.bf16.mxu0 %v17033_v54  ;;  %3337 = vmatprep.subr.bf16.mxu1 %v20087_v43 }
  0xee   : > { %3324 = vmatprep.mubr.bf16.mxu0 %v20042_v17  ;;  %3367 = vmatprep.mubr.bf16.mxu1 %v20042_v17 }
  0xf0   : > { %3295 = vmatpush1.bf16.msra.mxu0 %v17047_v36  ;;  %3338 = vmatpush1.bf16.msra.mxu1 %v17051_v37 }
  0xf1   : > { %3378 = vmatprep.subr.bf16.mxu0 %v17053_v3  ;;  %3421 = vmatprep.subr.bf16.mxu1 %v17057_v45 }
  0xf3   : > { %14734 = vmatmul.mubr.msk.bf16.vlgmr.msra.gmra.mrb[16].mxu0 %vm329_vm0, %v20088_v51  ;;  %14735 = vmatmul.mubr.msk.bf16.vlgmr.msra.gmra.mrb[16].mxu1 %vm329_vm0, %v20088_v51 }
  0xf4   : > { %3379 = vmatpush1.bf16.msra.mxu0 %v17065_v48  ;;  %3422 = vmatpush1.bf16.msra.mxu1 %v17069_v38  ;;  %v14741_v38 = vld [vmem:[%s16545_s24 + $0x310] sm:$0xff] }
  0xf5   : > { %3380 = vmatprep.subr.bf16.mxu0 %v17071_v55  ;;  %3423 = vmatprep.subr.bf16.mxu1 %v17074_v39  ;;  %v17221_v39 = vcombine.high %v14747_v49, %v14751_v31  ;;  %v17224_v55 = vcombine.high %v14748_v29, %v14752_v30  ;;  %v14745_v48 = vld [vmem:[%s16545_s24 + $0x330] sm:$0xff]  ;;  %v14750_v49 = vld [vmem:[%s16545_s24 + $0x358] sm:$0xff]  ;;  %v17257_v29 = vcombine.low %v14742_v44, %v14746_v50 }
  0xf6   : > { %3410 = vmatprep.mubr.bf16.mxu0 %v20042_v17  ;;  %3453 = vmatprep.mubr.bf16.mxu1 %v20042_v17  ;;  %v14754_v31 = vld [vmem:[%s16545_s24 + $0x378] sm:$0xff] }
  0xf7   : > { %20093 = vst [vmem:[#allocation18_spill] sm:$0xff] %v17221_v39  ;;  %20094 = vst [vmem:[#allocation19_spill] sm:$0xff] %v17224_v55 }
  0xf8   : > { %3381 = vmatpush1.bf16.msra.mxu0 %v17081_v47  ;;  %3424 = vmatpush1.bf16.msra.mxu1 %v17085_v16  ;;  %v14749_v16 = vld [vmem:[%s16545_s24 + $0x350] sm:$0xff]  ;;  %20100 = vst [vmem:[#allocation30_spill] sm:$0xff] %v17257_v29 }
  0xf9   : > { %3580 = vmatprep.subr.bf16.mxu0 %v17203_v59  ;;  %3623 = vmatprep.subr.bf16.mxu1 %v17207_v60  ;;  %v17241_v60 = vcombine.high %v14741_v38, %v14745_v48  ;;  %v17245_v59 = vcombine.high %v14742_v44, %v14746_v50  ;;  %v14800_v44 = vld [vmem:[%s16545_s24 + $0x3c0] sm:$0xff] }
  0xfa   : > { %v14804_v50 = vld [vmem:[%s16545_s24 + $0x3e0] sm:$0xff] }
  0xfb   : > { %14736 = vmatmul.mubr.msk.bf16.vlgmr.msra.gmra.mrb[20].mxu0 %vm329_vm0, %v20088_v51  ;;  %14737 = vmatmul.mubr.msk.bf16.vlgmr.msra.gmra.mrb[20].mxu1 %vm329_vm0, %v20088_v51  ;;  %20097 = vst [vmem:[#allocation27_spill] sm:$0xff] %v17241_v60  ;;  %20098 = vst [vmem:[#allocation28_spill] sm:$0xff] %v17245_v59  ;;  %v14753_v51 = vld [vmem:[%s16545_s24 + $0x370] sm:$0xff] }
  0xfc   : > { %3581 = vmatpush1.bf16.msra.mxu0 %v17215_v57  ;;  %3624 = vmatpush1.bf16.msra.mxu1 %v17219_v63  ;;  %v17253_v63 = vcombine.low %v14741_v38, %v14745_v48  ;;  %v17259_v30 = vcombine.high %v14749_v16, %v14753_v51  ;;  %v17269_v48 = vcombine.low %v14749_v16, %v14753_v51 }
  0xfd   : > { %3582 = vmatprep.subr.bf16.mxu0 %v17221_v39  ;;  %3625 = vmatprep.subr.bf16.mxu1 %v17224_v55  ;;  %v17262_v55 = vcombine.high %v14750_v49, %v14754_v31  ;;  %v17273_v38 = vcombine.low %v14750_v49, %v14754_v31  ;;  %v14801_v49 = vld [vmem:[%s16545_s24 + $0x3c8] sm:$0xff] }
  0xfe   : > { %3612 = vmatprep.mubr.bf16.mxu0 %v20042_v17  ;;  %3655 = vmatprep.mubr.bf16.mxu1 %v20042_v17  ;;  %20099 = vst [vmem:[#allocation29_spill] sm:$0xff] %v17253_v63  ;;  %20101 = vst [vmem:[#allocation31_spill] sm:$0xff] %v17259_v30  ;;  %v14805_v31 = vld [vmem:[%s16545_s24 + $0x3e8] sm:$0xff] }
  0xff   : > { %20102 = vst [vmem:[#allocation32_spill] sm:$0xff] %v17262_v55  ;;  %20103 = vst [vmem:[#allocation33_spill] sm:$0xff] %v17269_v48 }
 0x100   : > { %3583 = vmatpush1.bf16.msra.mxu0 %v17235_v52  ;;  %3626 = vmatpush1.bf16.msra.mxu1 %v17239_v53  ;;  %20104 = vst [vmem:[#allocation34_spill] sm:$0xff] %v17273_v38 }
 0x101   : > { %3666 = vmatprep.subr.bf16.mxu0 %v17241_v60  ;;  %3709 = vmatprep.subr.bf16.mxu1 %v17245_v59 }
 0x103   : > { %14771 = vmatmul.mubr.msk.bf16.vlgmr.msra.gmra.mrb[16].mxu0 %vm329_vm0, %v16872_v23  ;;  %14772 = vmatmul.mubr.msk.bf16.vlgmr.msra.gmra.mrb[16].mxu1 %vm329_vm0, %v16872_v23 }
 0x104   : > { %3667 = vmatpush1.bf16.msra.mxu0 %v17253_v63  ;;  %3710 = vmatpush1.bf16.msra.mxu1 %v17257_v29 }
 0x105   : > { %3668 = vmatprep.subr.bf16.mxu0 %v17259_v30  ;;  %3711 = vmatprep.subr.bf16.mxu1 %v17262_v55 }
 0x106   : > { %3698 = vmatprep.mubr.bf16.mxu0 %v20042_v17  ;;  %3741 = vmatprep.mubr.bf16.mxu1 %v20042_v17 }
 0x108   : > { %3669 = vmatpush1.bf16.msra.mxu0 %v17269_v48  ;;  %3712 = vmatpush1.bf16.msra.mxu1 %v17273_v38 }
 0x109   : > { %3816 = vmatprep.subr.bf16.mxu0 %v20055_v19  ;;  %3859 = vmatprep.subr.bf16.mxu1 %v20056_v20 }
 0x10b   : > { %14773 = vmatmul.mubr.msk.bf16.vlgmr.msra.gmra.mrb[20].mxu0 %vm329_vm0, %v16872_v23  ;;  %14774 = vmatmul.mubr.msk.bf16.vlgmr.msra.gmra.mrb[20].mxu1 %vm329_vm0, %v16872_v23 }
 0x10c   : > { %3817 = vmatpush1.bf16.msra.mxu0 %v16834_v46  ;;  %3860 = vmatpush1.bf16.msra.mxu1 %v20057_v21  ;;  %v16428_v46 = vld [vmem:[%s19815_s0 + $0x8] sm:$0xff]  }
 0x10d   : > { %3818 = vmatprep.subr.bf16.mxu0 %v20058_v22  ;;  %3861 = vmatprep.subr.bf16.mxu1 %v20059_v28 }
 0x10e   : > { %3848 = vmatprep.mubr.bf16.mxu0 %v20042_v17  ;;  %3891 = vmatprep.mubr.bf16.mxu1 %v20042_v17 }
 0x110   : > { %3819 = vmatpush1.bf16.msra.mxu0 %v16854_v1  ;;  %3862 = vmatpush1.bf16.msra.mxu1 %v16858_v2  ;;  %v20109_v1 = vld [vmem:[#allocation25_spill] sm:$0xff] }
 0x111   : > { %3902 = vmatprep.subr.bf16.mxu0 %v16860_v18  ;;  %3945 = vmatprep.subr.bf16.mxu1 %v20077_v25 }
 0x113   : > { %14775 = vmatmul.mubr.msk.bf16.vlgmr.msra.gmra.mrb[24].mxu0 %vm329_vm0, %v16428_v46  ;;  %14776 = vmatmul.mubr.msk.bf16.vlgmr.msra.gmra.mrb[24].mxu1 %vm329_vm0, %v16428_v46 }
 0x114   : > { %3903 = vmatpush1.bf16.msra.mxu0 %v20079_v13  ;;  %3946 = vmatpush1.bf16.msra.mxu1 %v20080_v14  ;;  %v14796_v13 = vld [vmem:[%s16545_s24 + $0x3a0] sm:$0xff]  ;;  %v20117_v14 = vld [vmem:[#allocation3_spill] sm:$0xff] }
 0x115   : > { %3904 = vmatprep.subr.bf16.mxu0 %v20081_v26  ;;  %3947 = vmatprep.subr.bf16.mxu1 %v20082_v33  ;;  %v14793_v26 = vld [vmem:[%s16545_s24 + $0x388] sm:$0xff] }
 0x116   : > { %3934 = vmatprep.mubr.bf16.mxu0 %v20042_v17  ;;  %3977 = vmatprep.mubr.bf16.mxu1 %v20042_v17  ;;  %v14797_v33 = vld [vmem:[%s16545_s24 + $0x3a8] sm:$0xff] }
 0x117   : > { %v17426_v51 = vcombine.high %v14793_v26, %v14797_v33 }
 0x118   : > { %3905 = vmatpush1.bf16.msra.mxu0 %v16893_v0  ;;  %3948 = vmatpush1.bf16.msra.mxu1 %v20083_v34  ;;  %v20110_v0 = vld [vmem:[#allocation15_spill] sm:$0xff] }
 0x119   : > { %3988 = vmatprep.subr.bf16.mxu0 %v16741_v61  ;;  %4031 = vmatprep.subr.bf16.mxu1 %v16745_v62  ;;  %v16429_v61 = vld [vmem:[%s19815_s0] sm:$0xff]   ;;  %20119 = vst [vmem:[#allocation38_spill] sm:$0xff] %v17426_v51 }
 0x11a   : > { %v20105_v62 = vld [vmem:[#allocation14_spill] sm:$0xff] }
 0x11b   : > { %14777 = vmatmul.mubr.msk.bf16.vlgmr.msra.gmra.mrb[28].mxu0 %vm329_vm0, %v16428_v46  ;;  %14778 = vmatmul.mubr.msk.bf16.vlgmr.msra.gmra.mrb[28].mxu1 %vm329_vm0, %v16428_v46 }
 0x11c   : > { %3989 = vmatpush1.bf16.msra.mxu0 %v16753_v5  ;;  %4032 = vmatpush1.bf16.msra.mxu1 %v16757_v7  ;;  %v20106_v5 = vld [vmem:[#allocation21_spill] sm:$0xff]  ;;  %v20107_v7 = vld [vmem:[#allocation22_spill] sm:$0xff] }
 0x11d   : > { %3990 = vmatprep.subr.bf16.mxu0 %v16759_v8  ;;  %4033 = vmatprep.subr.bf16.mxu1 %v16762_v12  ;;  %v20108_v12 = vld [vmem:[#allocation23_spill] sm:$0xff] }
 0x11e   : > { %4020 = vmatprep.mubr.bf16.mxu0 %v20042_v17  ;;  %4063 = vmatprep.mubr.bf16.mxu1 %v20042_v17 }
 0x120   : > { %3991 = vmatpush1.bf16.msra.mxu0 %v16773_v24  ;;  %4034 = vmatpush1.bf16.msra.mxu1 %v16777_v27 }
 0x121   : > { %4074 = vmatprep.subr.bf16.mxu0 %v16779_v32  ;;  %4117 = vmatprep.subr.bf16.mxu1 %v16783_v35 }
 0x123   : > { %14779 = vmatmul.mubr.msk.bf16.vlgmr.msra.gmra.mrb[24].mxu0 %vm329_vm0, %v16429_v61  ;;  %14780 = vmatmul.mubr.msk.bf16.vlgmr.msra.gmra.mrb[24].mxu1 %vm329_vm0, %v16429_v61 }
 0x124   : > { %4075 = vmatpush1.bf16.msra.mxu0 %v20049_v4  ;;  %4118 = vmatpush1.bf16.msra.mxu1 %v20050_v6  ;;  %v20111_v6 = vld [vmem:[#allocation2_spill] sm:$0xff] }
 0x125   : > { %4076 = vmatprep.subr.bf16.mxu0 %v20051_v9  ;;  %4119 = vmatprep.subr.bf16.mxu1 %v20052_v10  ;;  %v16430_v9 = vld [vmem:[%s19815_s0 + $0x10] sm:$0xff]   ;;  %v20112_v10 = vld [vmem:[#allocation17_spill] sm:$0xff] }
 0x126   : > { %4106 = vmatprep.mubr.bf16.mxu0 %v20042_v17  ;;  %4149 = vmatprep.mubr.bf16.mxu1 %v20042_v17 }
 0x128   : > { %4077 = vmatpush1.bf16.msra.mxu0 %v20053_v11  ;;  %4120 = vmatpush1.bf16.msra.mxu1 %v20054_v15  ;;  %v20113_v15 = vld [vmem:[#allocation19_spill] sm:$0xff] }
 0x129   : > { %4160 = vmatprep.subr.bf16.mxu0 %v20084_v40  ;;  %4203 = vmatprep.subr.bf16.mxu1 %v20085_v41 }
 0x12b   : > { %14781 = vmatmul.mubr.msk.bf16.vlgmr.msra.gmra.mrb[28].mxu0 %vm329_vm0, %v16429_v61  ;;  %14782 = vmatmul.mubr.msk.bf16.vlgmr.msra.gmra.mrb[28].mxu1 %vm329_vm0, %v16429_v61  ;;  %v17438_v61 = vcombine.low %v14793_v26, %v14797_v33  ;;  %v14799_v26 = vld [vmem:[%s16545_s24 + $0x3b8] sm:$0xff]  ;;  %v17455_v33 = vcombine.low %v14800_v44, %v14804_v50 }
 0x12c   : > { %4161 = vmatpush1.bf16.msra.mxu0 %v17027_v56  ;;  %4204 = vmatpush1.bf16.msra.mxu1 %v20086_v42 }
 0x12d   : > { %4162 = vmatprep.subr.bf16.mxu0 %v17033_v54  ;;  %4205 = vmatprep.subr.bf16.mxu1 %v20087_v43  ;;  %20120 = vst [vmem:[#allocation39_spill] sm:$0xff] %v17438_v61  ;;  %20123 = vst [vmem:[#allocation42_spill] sm:$0xff] %v17455_v33 }
 0x12e   : > { %4192 = vmatprep.mubr.bf16.mxu0 %v20042_v17  ;;  %4235 = vmatprep.mubr.bf16.mxu1 %v20042_v17 }
 0x130   : > { %4163 = vmatpush1.bf16.msra.mxu0 %v17047_v36  ;;  %4206 = vmatpush1.bf16.msra.mxu1 %v17051_v37 }
 0x131   : > { %4246 = vmatprep.subr.bf16.mxu0 %v17053_v3  ;;  %4289 = vmatprep.subr.bf16.mxu1 %v17057_v45 }
 0x133   : > { %14783 = vmatmul.mubr.msk.bf16.vlgmr.msra.gmra.mrb[24].mxu0 %vm329_vm0, %v20078_v58  ;;  %14784 = vmatmul.mubr.msk.bf16.vlgmr.msra.gmra.mrb[24].mxu1 %vm329_vm0, %v20078_v58  ;;  %v14792_v58 = vld [vmem:[%s16545_s24 + $0x380] sm:$0xff] }
 0x134   : > { %4247 = vmatpush1.bf16.msra.mxu0 %v20105_v62  ;;  %4290 = vmatpush1.bf16.msra.mxu1 %v20106_v5  ;;  %v17422_v34 = vcombine.high %v14792_v58, %v14796_v13  ;;  %v17434_v46 = vcombine.low %v14792_v58, %v14796_v13  ;;  %v16431_v58 = vld [vmem:[%s19815_s0 + $0x18] sm:$0xff]  }
 0x135   : > { %4248 = vmatprep.subr.bf16.mxu0 %v20107_v7  ;;  %4291 = vmatprep.subr.bf16.mxu1 %v20108_v12  ;;  %v14795_v13 = vld [vmem:[%s16545_s24 + $0x398] sm:$0xff] }
 0x136   : > { %v17357_v8 = vpop.f32.mrb[0].mxu0  ;;  %4278 = vmatprep.mubr.bf16.mxu0 %v20042_v17  ;;  %v17361_v24 = vpop.f32.mrb[0].mxu1  ;;  %4321 = vmatprep.mubr.bf16.mxu1 %v20042_v17  ;;  %20118 = vst [vmem:[#allocation3_spill] sm:$0xff] %v17422_v34 }
 0x137   : > { %v17363_v27 = vpop.f32.mrb[1].mxu0  ;;  %v17366_v32 = vpop.f32.mrb[1].mxu1 }
 0x138   : > { %v17368_v35 = vpop.f32.mrb[2].mxu0  ;;  %4249 = vmatpush1.bf16.msra.mxu0 %v17081_v47  ;;  %v17371_v18 = vpop.f32.mrb[2].mxu1  ;;  %4292 = vmatpush1.bf16.msra.mxu1 %v20109_v1 }
 0x139   : > { %v17374_v2 = vpop.f32.mrb[3].mxu0  ;;  %4348 = vmatprep.subr.bf16.mxu0 %v20110_v0  ;;  %v17377_v4 = vpop.f32.mrb[3].mxu1  ;;  %4391 = vmatprep.subr.bf16.mxu1 %v20111_v6 }
 0x13b   : > { %14785 = vmatmul.mubr.msk.bf16.vlgmr.msra.gmra.mrb[28].mxu0 %vm329_vm0, %v16430_v9  ;;  %14786 = vmatmul.mubr.msk.bf16.vlgmr.msra.gmra.mrb[28].mxu1 %vm329_vm0, %v16430_v9  ;;  %v17440_v9 = vcombine.high %v14800_v44, %v14804_v50  ;;  %v14803_v44 = vld [vmem:[%s16545_s24 + $0x3d8] sm:$0xff] }
 0x13c   : > { %4349 = vmatpush1.bf16.msra.mxu0 %v17215_v57  ;;  %4392 = vmatpush1.bf16.msra.mxu1 %v20112_v10  ;;  %v14807_v50 = vld [vmem:[%s16545_s24 + $0x3f8] sm:$0xff] }
 0x13d   : > { %4350 = vmatprep.subr.bf16.mxu0 %v17221_v39  ;;  %4393 = vmatprep.subr.bf16.mxu1 %v20113_v15  ;;  %20121 = vst [vmem:[#allocation40_spill] sm:$0xff] %v17440_v9 }
 0x13e   : > { %v17388_v11 = vpop.f32.mrb[4].mxu0  ;;  %4380 = vmatprep.mubr.bf16.mxu0 %v20042_v17  ;;  %v17392_v19 = vpop.f32.mrb[4].mxu1  ;;  %4423 = vmatprep.mubr.bf16.mxu1 %v20042_v17 }
 0x13f   : > { %v17394_v20 = vpop.f32.mrb[5].mxu0  ;;  %v17397_v21 = vpop.f32.mrb[5].mxu1 }
 0x140   : > { %v17399_v22 = vpop.f32.mrb[6].mxu0  ;;  %4351 = vmatpush1.bf16.msra.mxu0 %v17235_v52  ;;  %v17402_v28 = vpop.f32.mrb[6].mxu1  ;;  %4394 = vmatpush1.bf16.msra.mxu1 %v17239_v53 }
 0x141   : > { %20114 = vst [vmem:[#allocation35_spill] sm:$0xff] %v17402_v28  ;;  %v17405_v16 = vpop.f32.mrb[7].mxu0  ;;  %4434 = vmatprep.subr.bf16.mxu0 %v17241_v60  ;;  %v17408_v25 = vpop.f32.mrb[7].mxu1  ;;  %4477 = vmatprep.subr.bf16.mxu1 %v17245_v59  ;;  %v14802_v28 = vld [vmem:[%s16545_s24 + $0x3d0] sm:$0xff] }
 0x142   : > { %20115 = vst [vmem:[#allocation36_spill] sm:$0xff] %v17405_v16  ;;  %20116 = vst [vmem:[#allocation37_spill] sm:$0xff] %v17408_v25  ;;  %v14794_v25 = vld [vmem:[%s16545_s24 + $0x390] sm:$0xff] }
 0x143   : > { %14787 = vmatmul.mubr.msk.bf16.vlgmr.msra.gmra.mrb[24].mxu0 %vm329_vm0, %v20117_v14  ;;  %14788 = vmatmul.mubr.msk.bf16.vlgmr.msra.gmra.mrb[24].mxu1 %vm329_vm0, %v20117_v14  ;;  %v17443_v14 = vcombine.high %v14801_v49, %v14805_v31  ;;  %v14798_v16 = vld [vmem:[%s16545_s24 + $0x3b0] sm:$0xff] }
 0x144   : > { %4435 = vmatpush1.bf16.msra.mxu0 %v17253_v63  ;;  %4478 = vmatpush1.bf16.msra.mxu1 %v17257_v29 }
 0x145   : > { %4436 = vmatprep.subr.bf16.mxu0 %v17259_v30  ;;  %4479 = vmatprep.subr.bf16.mxu1 %v17262_v55  ;;  %20122 = vst [vmem:[#allocation41_spill] sm:$0xff] %v17443_v14 }
 0x146   : > { %4466 = vmatprep.mubr.bf16.mxu0 %v20042_v17  ;;  %4509 = vmatprep.mubr.bf16.mxu1 %v20042_v17 }
 0x148   : > { %4437 = vmatpush1.bf16.msra.mxu0 %v17269_v48  ;;  %4480 = vmatpush1.bf16.msra.mxu1 %v17273_v38  ;;  %v17465_v38 = vcombine.high %v14795_v13, %v14799_v26 }
 0x149   : > { %4636 = vmatprep.subr.bf16.mxu0 %v17422_v34  ;;  %4679 = vmatprep.subr.bf16.mxu1 %v17426_v51  ;;  %v17459_v51 = vcombine.low %v14801_v49, %v14805_v31  ;;  %v17461_v34 = vcombine.high %v14794_v25, %v14798_v16  ;;  %v17477_v49 = vcombine.low %v14795_v13, %v14799_v26  ;;  %v14840_v13 = vld [vmem:[%s16545_s24 + $0x220] sm:$0xff]  ;;  %v14837_v26 = vld [vmem:[%s16545_s24 + $0x208] sm:$0xff] }
 0x14a   : > { %20126 = vst [vmem:[#allocation45_spill] sm:$0xff] %v17465_v38 }
 0x14b   : > { %14789 = vmatmul.mubr.msk.bf16.vlgmr.msra.gmra.mrb[28].mxu0 %vm329_vm0, %v16431_v58  ;;  %14790 = vmatmul.mubr.msk.bf16.vlgmr.msra.gmra.mrb[28].mxu1 %vm329_vm0, %v16431_v58  ;;  %20124 = vst [vmem:[#allocation43_spill] sm:$0xff] %v17459_v51  ;;  %20125 = vst [vmem:[#allocation44_spill] sm:$0xff] %v17461_v34  ;;  %v14806_v58 = vld [vmem:[%s16545_s24 + $0x3f0] sm:$0xff] }
 0x14c   : > { %4637 = vmatpush1.bf16.msra.mxu0 %v17434_v46  ;;  %4680 = vmatpush1.bf16.msra.mxu1 %v17438_v61  ;;  %v17473_v61 = vcombine.low %v14794_v25, %v14798_v16  ;;  %20128 = vst [vmem:[#allocation47_spill] sm:$0xff] %v17477_v49  ;;  %v17479_v31 = vcombine.high %v14802_v28, %v14806_v58 }
 0x14d   : > { %4638 = vmatprep.subr.bf16.mxu0 %v17440_v9  ;;  %4681 = vmatprep.subr.bf16.mxu1 %v17443_v14  ;;  %v17482_v14 = vcombine.high %v14803_v44, %v14807_v50  ;;  %v17489_v16 = vcombine.low %v14802_v28, %v14806_v58  ;;  %v17493_v25 = vcombine.low %v14803_v44, %v14807_v50  ;;  %v17515_v28 = vld [vmem:[%s19815_s0 + $0x8] sm:$0xff]  }
 0x14e   : > { %4668 = vmatprep.mubr.bf16.mxu0 %v20042_v17  ;;  %4711 = vmatprep.mubr.bf16.mxu1 %v20042_v17  ;;  %20127 = vst [vmem:[#allocation46_spill] sm:$0xff] %v17473_v61  ;;  %20129 = vst [vmem:[#allocation48_spill] sm:$0xff] %v17479_v31  ;;  %v14841_v58 = vld [vmem:[%s16545_s24 + $0x228] sm:$0xff] }
 0x14f   : > { %20130 = vst [vmem:[#allocation49_spill] sm:$0xff] %v17482_v14  ;;  %20131 = vst [vmem:[#allocation50_spill] sm:$0xff] %v17489_v16  ;;  %v14895_v50 = vcombine.high %v14837_v26, %v14841_v58 }
 0x150   : > { %4639 = vmatpush1.bf16.msra.mxu0 %v17455_v33  ;;  %4682 = vmatpush1.bf16.msra.mxu1 %v17459_v51  ;;  %20132 = vst [vmem:[#allocation51_spill] sm:$0xff] %v17493_v25 }
 0x151   : > { %4722 = vmatprep.subr.bf16.mxu0 %v17461_v34  ;;  %4765 = vmatprep.subr.bf16.mxu1 %v17465_v38 }
 0x153   : > { %14824 = vmatmul.mubr.msk.bf16.vlgmr.msra.gmra.mrb[24].mxu0 %vm329_vm0, %v16872_v23  ;;  %14825 = vmatmul.mubr.msk.bf16.vlgmr.msra.gmra.mrb[24].mxu1 %vm329_vm0, %v16872_v23 }
 0x154   : > { %4723 = vmatpush1.bf16.msra.mxu0 %v17473_v61  ;;  %4766 = vmatpush1.bf16.msra.mxu1 %v17477_v49 }
 0x155   : > { %4724 = vmatprep.subr.bf16.mxu0 %v17479_v31  ;;  %4767 = vmatprep.subr.bf16.mxu1 %v17482_v14 }
 0x156   : > { %4754 = vmatprep.mubr.bf16.mxu0 %v20042_v17  ;;  %4797 = vmatprep.mubr.bf16.mxu1 %v20042_v17 }
 0x158   : > { %4725 = vmatpush1.bf16.msra.mxu0 %v17489_v16  ;;  %4768 = vmatpush1.bf16.msra.mxu1 %v17493_v25 }
 0x159   : > { %5052 = vmatprep.subr.bf16.mxu0 %v20084_v40  ;;  %5095 = vmatprep.subr.bf16.mxu1 %v20085_v41 }
 0x15b   : > { %14826 = vmatmul.mubr.msk.bf16.vlgmr.msra.gmra.mrb[28].mxu0 %vm329_vm0, %v16872_v23  ;;  %14827 = vmatmul.mubr.msk.bf16.vlgmr.msra.gmra.mrb[28].mxu1 %vm329_vm0, %v16872_v23  ;;  %v14836_v23 = vld [vmem:[%s16545_s24 + $0x200] sm:$0xff] }
 0x15c   : > { %5053 = vmatpush1.bf16.msra.mxu0 %v17027_v56  ;;  %5096 = vmatpush1.bf16.msra.mxu1 %v20086_v42  ;;  %v14893_v44 = vcombine.high %v14836_v23, %v14840_v13  ;;  %v14839_v42 = vld [vmem:[%s16545_s24 + $0x218] sm:$0xff] }
 0x15d   : > { %5054 = vmatprep.subr.bf16.mxu0 %v17033_v54  ;;  %5097 = vmatprep.subr.bf16.mxu1 %v20087_v43  ;;  %v14838_v43 = vld [vmem:[%s16545_s24 + $0x210] sm:$0xff]  ;;  %v14843_v56 = vld [vmem:[%s16545_s24 + $0x238] sm:$0xff] }
 0x15e   : > { %5084 = vmatprep.mubr.bf16.mxu0 %v20042_v17  ;;  %5127 = vmatprep.mubr.bf16.mxu1 %v20042_v17  ;;  %v14842_v54 = vld [vmem:[%s16545_s24 + $0x230] sm:$0xff] }
 0x160   : > { %5055 = vmatpush1.bf16.msra.mxu0 %v17047_v36  ;;  %5098 = vmatpush1.bf16.msra.mxu1 %v17051_v37  ;;  %v14845_v37 = vld [vmem:[%s16545_s24 + $0x248] sm:$0xff] }
 0x161   : > { %5138 = vmatprep.subr.bf16.mxu0 %v17053_v3  ;;  %5181 = vmatprep.subr.bf16.mxu1 %v17057_v45  ;;  %v14844_v45 = vld [vmem:[%s16545_s24 + $0x240] sm:$0xff] }
 0x162   : > { %v14848_v3 = vld [vmem:[%s16545_s24 + $0x260] sm:$0xff] }
 0x163   : > { %14887 = vmatmul.mubr.msk.bf16.vlgmr.msra.gmra.mrb[32].mxu0 %vm329_vm0, %v17515_v28  ;;  %14888 = vmatmul.mubr.msk.bf16.vlgmr.msra.gmra.mrb[32].mxu1 %vm329_vm0, %v17515_v28 }
 0x164   : > { %5139 = vmatpush1.bf16.msra.mxu0 %v20105_v62  ;;  %5182 = vmatpush1.bf16.msra.mxu1 %v20106_v5  ;;  %v14849_v62 = vld [vmem:[%s16545_s24 + $0x268] sm:$0xff]  ;;  %v14892_v5 = vcombine.low %v14836_v23, %v14840_v13  ;;  %v14900_v23 = vcombine.low %v14844_v45, %v14848_v3 }
 0x165   : > { %5140 = vmatprep.subr.bf16.mxu0 %v20107_v7  ;;  %5183 = vmatprep.subr.bf16.mxu1 %v20108_v12  ;;  %v14894_v12 = vcombine.low %v14837_v26, %v14841_v58  ;;  %v14901_v7 = vcombine.high %v14844_v45, %v14848_v3  ;;  %v14903_v36 = vcombine.high %v14845_v37, %v14849_v62 }
 0x166   : > { %5170 = vmatprep.mubr.bf16.mxu0 %v20042_v17  ;;  %5213 = vmatprep.mubr.bf16.mxu1 %v20042_v17  ;;  %v14902_v13 = vcombine.low %v14845_v37, %v14849_v62  ;;  %v14897_v26 = vcombine.high %v14838_v43, %v14842_v54  ;;  %v14899_v58 = vcombine.high %v14839_v42, %v14843_v56 }
 0x167   : > { %v14896_v45 = vcombine.low %v14838_v43, %v14842_v54  ;;  %v14898_v3 = vcombine.low %v14839_v42, %v14843_v56  ;;  %v17566_v54 = vpop.permute.xlu0 %1664 }
 0x168   : > { %5141 = vmatpush1.bf16.msra.mxu0 %v17081_v47  ;;  %5184 = vmatpush1.bf16.msra.mxu1 %v20109_v1  ;;  %v17556_v1 = vld [vmem:[%s19815_s0] sm:$0xff]   ;;  %v14847_v47 = vld [vmem:[%s16545_s24 + $0x258] sm:$0xff]  ;;  %20134 = vst [vmem:[#allocation53_spill] sm:$0xff] %v17566_v54  ;;  %v1672_v42 = vadd.f32 %v17566_v54, %v17357_v8  ;;  %v17592_v43 = vadd.f32 %v17566_v54, %v17361_v24 }
 0x169   : > { %5312 = vmatprep.subr.bf16.mxu0 %v14893_v44  ;;  %5355 = vmatprep.subr.bf16.mxu1 %v14895_v50  ;;  %v14846_v44 = vld [vmem:[%s16545_s24 + $0x250] sm:$0xff]  ;;  %20133 = vst [vmem:[#allocation52_spill] sm:$0xff] %v17556_v1  ;;  %v17608_v8 = vld [vmem:[%s16545_s24 + $0x420] sm:$0xff] }
 0x16a   : > { %v14850_v50 = vld [vmem:[%s16545_s24 + $0x270] sm:$0xff] }
 0x16b   : > { %14889 = vmatmul.mubr.msk.bf16.vlgmr.msra.gmra.mrb[36].mxu0 %vm329_vm0, %v17515_v28  ;;  %14890 = vmatmul.mubr.msk.bf16.vlgmr.msra.gmra.mrb[36].mxu1 %vm329_vm0, %v17515_v28  ;;  %v14904_v62 = vcombine.low %v14846_v44, %v14850_v50  ;;  %v17579_v56 = vpop.permute.xlu0 %1669 }
 0x16c   : > { %5313 = vmatpush1.bf16.msra.mxu0 %v14892_v5  ;;  %5356 = vmatpush1.bf16.msra.mxu1 %v14894_v12  ;;  %v14851_v5 = vld [vmem:[%s16545_s24 + $0x278] sm:$0xff]  ;;  %v17596_v12 = vadd.f32 %v17566_v54, %v17363_v27  ;;  %v17612_v24 = vadd.f32 %v17579_v56, %v17368_v35  ;;  %v17616_v27 = vadd.f32 %v17579_v56, %v17371_v18  ;;  %v1688_v18 = vmax.f32 %v1672_v42, 0.0 }
 0x16d   : > { %5314 = vmatprep.subr.bf16.mxu0 %v14901_v7  ;;  %5357 = vmatprep.subr.bf16.mxu1 %v14903_v36  ;;  %v14905_v36 = vcombine.high %v14846_v44, %v14850_v50  ;;  %v14907_v37 = vcombine.high %v14847_v47, %v14851_v5  ;;  %v14906_v7 = vcombine.low %v14847_v47, %v14851_v5  ;;  %v17585_v47 = vld [vmem:[%s19815_s0 + $0x10] sm:$0xff]  }
 0x16e   : > { %5344 = vmatprep.mubr.bf16.mxu0 %v20042_v17  ;;  %5387 = vmatprep.mubr.bf16.mxu1 %v20042_v17  ;;  %v1696_v44 = vmax.f32 %v17612_v24, 0.0  ;;  %v1698_v50 = vmax.f32 %v17616_v27, 0.0 }
 0x170   : > { %5315 = vmatpush1.bf16.msra.mxu0 %v14900_v23  ;;  %5358 = vmatpush1.bf16.msra.mxu1 %v14902_v13  ;;  %v17600_v23 = vadd.f32 %v17566_v54, %v17366_v32  ;;  %v17605_v13 = vld [vmem:[%s16545_s24 + $0x400] sm:$0xff]  ;;  %v17620_v32 = vadd.f32 %v17579_v56, %v17374_v2  ;;  %v1690_v2 = vmax.f32 %v17592_v43, 0.0 }
 0x171   : > { %5398 = vmatprep.subr.bf16.mxu0 %v14897_v26  ;;  %5441 = vmatprep.subr.bf16.mxu1 %v14899_v58  ;;  %v17624_v26 = vadd.f32 %v17579_v56, %v17377_v4  ;;  %v17629_v58 = vadd.f32 %v17566_v54, %v17388_v11  ;;  %v17638_v35 = vcombine.high %v17605_v13, %v17608_v8  ;;  %v1689_v4 = vmax.f32 %v17596_v12, 0.0 }
 0x172   : > { %v1691_v11 = vmax.f32 %v17600_v23, 0.0  ;;  %v1697_v5 = vmax.f32 %v17620_v32, 0.0  ;;  %v17664_v12 = vadd.f32 %v17566_v54, %v17397_v21  ;;  %v17668_v23 = vadd.f32 %v17579_v56, %v17399_v22  ;;  %v20136_v32 = vld [vmem:[#allocation35_spill] sm:$0xff]  ;;  %v20137_v22 = vld [vmem:[#allocation34_spill] sm:$0xff] }
 0x173   : > { %14908 = vmatmul.mubr.msk.bf16.vlgmr.msra.gmra.mrb[32].mxu0 %vm329_vm0, %v17556_v1  ;;  %14909 = vmatmul.mubr.msk.bf16.vlgmr.msra.gmra.mrb[32].mxu1 %vm329_vm0, %v17556_v1  ;;  %20135 = vst [vmem:[#allocation54_spill] sm:$0xff] %v17638_v35 }
 0x174   : > { %5399 = vmatpush1.bf16.msra.mxu0 %v14896_v45  ;;  %5442 = vmatpush1.bf16.msra.mxu1 %v14898_v3  ;;  %v1699_v45 = vmax.f32 %v17624_v26, 0.0  ;;  %v17675_v26 = vadd.f32 %v17579_v56, %v20136_v32  ;;  %v20139_v32 = vld [vmem:[#allocation38_spill] sm:$0xff] }
 0x175   : > { %5400 = vmatprep.subr.bf16.mxu0 %v14905_v36  ;;  %5443 = vmatprep.subr.bf16.mxu1 %v14907_v37  ;;  %v17654_v37 = vadd.f32 %v17566_v54, %v17392_v19 }
 0x176   : > { %5430 = vmatprep.mubr.bf16.mxu0 %v20042_v17  ;;  %5473 = vmatprep.mubr.bf16.mxu1 %v20042_v17 }
 0x178   : > { %5401 = vmatpush1.bf16.msra.mxu0 %v14904_v62  ;;  %5444 = vmatpush1.bf16.msra.mxu1 %v14906_v7  ;;  %v17658_v62 = vadd.f32 %v17566_v54, %v17394_v20 }
 0x179   : > { %5590 = vmatprep.subr.bf16.mxu0 %v20110_v0  ;;  %5633 = vmatprep.subr.bf16.mxu1 %v20111_v6 }
 0x17b   : > { %14910 = vmatmul.mubr.msk.bf16.vlgmr.msra.gmra.mrb[36].mxu0 %vm329_vm0, %v17556_v1  ;;  %14911 = vmatmul.mubr.msk.bf16.vlgmr.msra.gmra.mrb[36].mxu1 %vm329_vm0, %v17556_v1 }
 0x17c   : > { %5591 = vmatpush1.bf16.msra.mxu0 %v17215_v57  ;;  %5634 = vmatpush1.bf16.msra.mxu1 %v20112_v10 }
 0x17d   : > { %5592 = vmatprep.subr.bf16.mxu0 %v17221_v39  ;;  %5635 = vmatprep.subr.bf16.mxu1 %v20113_v15 }
 0x17e   : > { %5622 = vmatprep.mubr.bf16.mxu0 %v20042_v17  ;;  %5665 = vmatprep.mubr.bf16.mxu1 %v20042_v17 }
 0x180   : > { %5593 = vmatpush1.bf16.msra.mxu0 %v17235_v52  ;;  %5636 = vmatpush1.bf16.msra.mxu1 %v17239_v53 }
 0x181   : > { %5676 = vmatprep.subr.bf16.mxu0 %v17241_v60  ;;  %5719 = vmatprep.subr.bf16.mxu1 %v17245_v59 }
 0x183   : > { %14947 = vmatmul.mubr.msk.bf16.vlgmr.msra.gmra.mrb[32].mxu0 %vm329_vm0, %v17585_v47  ;;  %14948 = vmatmul.mubr.msk.bf16.vlgmr.msra.gmra.mrb[32].mxu1 %vm329_vm0, %v17585_v47 }
 0x184   : > { %5677 = vmatpush1.bf16.msra.mxu0 %v17253_v63  ;;  %5720 = vmatpush1.bf16.msra.mxu1 %v17257_v29 }
 0x185   : > { %5678 = vmatprep.subr.bf16.mxu0 %v17259_v30  ;;  %5721 = vmatprep.subr.bf16.mxu1 %v17262_v55 }
 0x186   : > { %v2558_v3 = vpop.f32.mrb[8].mxu0  ;;  %5708 = vmatprep.mubr.bf16.mxu0 %v20042_v17  ;;  %v2601_v42 = vpop.f32.mrb[8].mxu1  ;;  %5751 = vmatprep.mubr.bf16.mxu1 %v20042_v17 }
 0x187   : > { %v2712_v7 = vadd.f32 %v2558_v3, %v17566_v54  ;;  %v2560_v43 = vpop.f32.mrb[9].mxu0  ;;  %v2714_v19 = vadd.f32 %v2601_v42, %v17566_v54  ;;  %v2603_v20 = vpop.f32.mrb[9].mxu1  ;;  %v20138_v42 = vld [vmem:[#allocation3_spill] sm:$0xff] }
 0x188   : > { %v2713_v24 = vadd.f32 %v2560_v43, %v17566_v54  ;;  %v2562_v27 = vpop.f32.mrb[10].mxu0  ;;  %5679 = vmatpush1.bf16.msra.mxu0 %v17269_v48  ;;  %v2715_v21 = vadd.f32 %v2603_v20, %v17566_v54  ;;  %v2605_v1 = vpop.f32.mrb[10].mxu1  ;;  %5722 = vmatpush1.bf16.msra.mxu1 %v20137_v22 }
 0x189   : > { %v2728_v3 = vmax.f32 %v2712_v7, 0.0  ;;  %v2720_v36 = vadd.f32 %v2562_v27, %v17579_v56  ;;  %v2564_v41 = vpop.f32.mrb[11].mxu0  ;;  %5884 = vmatprep.subr.bf16.mxu0 %v20138_v42  ;;  %v2730_v43 = vmax.f32 %v2714_v19, 0.0  ;;  %v2722_v55 = vadd.f32 %v2605_v1, %v17579_v56  ;;  %v2607_v30 = vpop.f32.mrb[11].mxu1  ;;  %5927 = vmatprep.subr.bf16.mxu1 %v20139_v32 }
 0x18a   : > { %v2729_v40 = vmax.f32 %v2713_v24, 0.0  ;;  %v2721_v48 = vadd.f32 %v2564_v41, %v17579_v56  ;;  %v2731_v20 = vmax.f32 %v2715_v21, 0.0  ;;  %v2723_v27 = vadd.f32 %v2607_v30, %v17579_v56  ;;  %v20142_v41 = vld [vmem:[#allocation36_spill] sm:$0xff] }
 0x18b   : > { %v17684_v7 = vmax.f32 %v1688_v18, %v2728_v3  ;;  %v2736_v29 = vmax.f32 %v2720_v36, 0.0  ;;  %14949 = vmatmul.mubr.msk.bf16.vlgmr.msra.gmra.mrb[36].mxu0 %vm329_vm0, %v17585_v47  ;;  %v17689_v22 = vmax.f32 %v1690_v2, %v2730_v43  ;;  %v2738_v24 = vmax.f32 %v2722_v55, 0.0  ;;  %14950 = vmatmul.mubr.msk.bf16.vlgmr.msra.gmra.mrb[36].mxu1 %vm329_vm0, %v17585_v47  ;;  %v20145_v2 = vld [vmem:[#allocation39_spill] sm:$0xff]  ;;  %v20148_v43 = vld [vmem:[#allocation41_spill] sm:$0xff] }
 0x18c   : > { %v17691_v19 = vmax.f32 %v1689_v4, %v2729_v40  ;;  %v2737_v1 = vmax.f32 %v2721_v48, 0.0  ;;  %5885 = vmatpush1.bf16.msra.mxu0 %v17434_v46  ;;  %v17698_v18 = vadd.f32 %v17579_v56, %v20142_v41  ;;  %v17700_v36 = vmax.f32 %v1691_v11, %v2731_v20  ;;  %5928 = vmatpush1.bf16.msra.mxu1 %v20145_v2 }
 0x18d   : > { %20140 = vst [vmem:[#allocation35_spill] sm:$0xff] %v17689_v22  ;;  %v17702_v30 = vmax.f32 %v1696_v44, %v2736_v29  ;;  %v2739_v3 = vmax.f32 %v2723_v27, 0.0  ;;  %5886 = vmatprep.subr.bf16.mxu0 %v17440_v9  ;;  %v1694_v55 = vmax.f32 %v17654_v37, 0.0  ;;  %v1693_v40 = vmax.f32 %v17658_v62, 0.0  ;;  %5929 = vmatprep.subr.bf16.mxu1 %v20148_v43  ;;  %v20150_v62 = vld [vmem:[#allocation37_spill] sm:$0xff] }
 0x18e   : > { %20141 = vst [vmem:[#allocation3_spill] sm:$0xff] %v17691_v19  ;;  %20143 = vst [vmem:[#allocation38_spill] sm:$0xff] %v17700_v36  ;;  %v17708_v48 = vmax.f32 %v1698_v50, %v2738_v24  ;;  %v17710_v4 = vmax.f32 %v1697_v5, %v2737_v1  ;;  %v2644_v21 = vpop.f32.mrb[12].mxu0  ;;  %5916 = vmatprep.mubr.bf16.mxu0 %v20042_v17  ;;  %v1695_v29 = vmax.f32 %v17664_v12, 0.0  ;;  %v1700_v11 = vmax.f32 %v17668_v23, 0.0  ;;  %v2687_v37 = vpop.f32.mrb[12].mxu1 }
 0x18f   : > { %20144 = vst [vmem:[#allocation36_spill] sm:$0xff] %v17702_v30  ;;  %v17716_v44 = vmax.f32 %v1699_v45, %v2739_v3  ;;  %v2716_v20 = vadd.f32 %v2644_v21, %v17566_v54  ;;  %v2646_v27 = vpop.f32.mrb[13].mxu0  ;;  %5959 = vmatprep.mubr.bf16.mxu1 %v20042_v17  ;;  %v17723_v50 = vld [vmem:[%s19815_s0 + $0x18] sm:$0xff]   ;;  %v1702_v5 = vmax.f32 %v17675_v26, 0.0  ;;  %v1687_v12 = vadd.f32 %v17579_v56, %v20150_v62  ;;  %v2689_v24 = vpop.f32.mrb[13].mxu1 }
 0x190   : > { %20146 = vst [vmem:[#allocation39_spill] sm:$0xff] %v17708_v48  ;;  %20147 = vst [vmem:[#allocation55_spill] sm:$0xff] %v17710_v4  ;;  %v2718_v23 = vadd.f32 %v2687_v37, %v17566_v54  ;;  %v2717_v45 = vadd.f32 %v2646_v27, %v17566_v54  ;;  %v2648_v1 = vpop.f32.mrb[14].mxu0  ;;  %5887 = vmatpush1.bf16.msra.mxu0 %v17455_v33  ;;  %v1701_v41 = vmax.f32 %v17698_v18, 0.0  ;;  %v2691_v26 = vpop.f32.mrb[14].mxu1  ;;  %5930 = vmatpush1.bf16.msra.mxu1 %v17459_v51 }
 0x191   : > { %20149 = vst [vmem:[#allocation56_spill] sm:$0xff] %v17716_v44  ;;  %v2732_v3 = vmax.f32 %v2716_v20, 0.0  ;;  %v2719_v21 = vadd.f32 %v2689_v24, %v17566_v54  ;;  %v2724_v44 = vadd.f32 %v2648_v1, %v17579_v56  ;;  %v2650_v62 = vpop.f32.mrb[15].mxu0  ;;  %5970 = vmatprep.subr.bf16.mxu0 %v17461_v34  ;;  %v2726_v4 = vadd.f32 %v2691_v26, %v17579_v56  ;;  %v2693_v18 = vpop.f32.mrb[15].mxu1 }
 0x192   : > { %v2734_v37 = vmax.f32 %v2718_v23, 0.0  ;;  %v2733_v27 = vmax.f32 %v2717_v45, 0.0  ;;  %v2725_v48 = vadd.f32 %v2650_v62, %v17579_v56  ;;  %6013 = vmatprep.subr.bf16.mxu1 %v17465_v38  ;;  %v20151_v20 = vmax.f32 %v17629_v58, 0.0  ;;  %v14994_v23 = vld [vmem:[%s16545_s24 + $0x408] sm:$0xff] }
 0x193   : > { %v2735_v1 = vmax.f32 %v2719_v21, 0.0  ;;  %v2740_v30 = vmax.f32 %v2724_v44, 0.0  ;;  %v2727_v36 = vadd.f32 %v2693_v18, %v17579_v56  ;;  %14986 = vmatmul.mubr.msk.bf16.vlgmr.msra.gmra.mrb[32].mxu0 %vm329_vm0, %v17723_v50  ;;  %v14998_v45 = vld [vmem:[%s16545_s24 + $0x428] sm:$0xff]  ;;  %v2742_v62 = vmax.f32 %v2726_v4, 0.0  ;;  %14987 = vmatmul.mubr.msk.bf16.vlgmr.msra.gmra.mrb[32].mxu1 %vm329_vm0, %v17723_v50 }
 0x194   : > { %v17741_v24 = vmax.f32 %v20151_v20, %v2732_v3  ;;  %v17748_v19 = vmax.f32 %v1694_v55, %v2734_v37  ;;  %v17750_v26 = vmax.f32 %v1693_v40, %v2733_v27  ;;  %v2741_v22 = vmax.f32 %v2725_v48, 0.0  ;;  %5971 = vmatpush1.bf16.msra.mxu0 %v17473_v61  ;;  %6014 = vmatpush1.bf16.msra.mxu1 %v17477_v49  ;;  %v14995_v37 = vld [vmem:[%s16545_s24 + $0x410] sm:$0xff] }
 0x195   : > { %v1703_v58 = vmax.f32 %v1687_v12, 0.0  ;;  %v17755_v44 = vmax.f32 %v1695_v29, %v2735_v1  ;;  %v17757_v3 = vmax.f32 %v1700_v11, %v2740_v30  ;;  %v2743_v55 = vmax.f32 %v2727_v36, 0.0  ;;  %5972 = vmatprep.subr.bf16.mxu0 %v17479_v31  ;;  %6015 = vmatprep.subr.bf16.mxu1 %v17482_v14  ;;  %v15001_v29 = vld [vmem:[%s16545_s24 + $0x440] sm:$0xff]  ;;  %v15002_v11 = vld [vmem:[%s16545_s24 + $0x448] sm:$0xff]  ;;  %v14999_v27 = vld [vmem:[%s16545_s24 + $0x430] sm:$0xff] }
 0x196   : > { %v17761_v40 = vmax.f32 %v1702_v5, %v2742_v62  ;;  %v17763_v48 = vmax.f32 %v1701_v41, %v2741_v22  ;;  %6002 = vmatprep.mubr.bf16.mxu0 %v20042_v17  ;;  %v17767_v4 = vcombine.high %v14994_v23, %v14998_v45  ;;  %v15005_v30 = vld [vmem:[%s16545_s24 + $0x460] sm:$0xff]  ;;  %6045 = vmatprep.mubr.bf16.mxu1 %v20042_v17  ;;  %v15006_v5 = vld [vmem:[%s16545_s24 + $0x468] sm:$0xff]  ;;  %v15007_v62 = vld [vmem:[%s16545_s24 + $0x470] sm:$0xff] }
 0x197   : > { %v17771_v36 = vmax.f32 %v1703_v58, %v2743_v55  ;;  %v17779_v22 = vcombine.low %v17605_v13, %v17608_v8  ;;  %v17783_v12 = vcombine.low %v14994_v23, %v14998_v45  ;;  %v17785_v41 = vcombine.high %v15001_v29, %v15005_v30  ;;  %v14996_v13 = vld [vmem:[%s16545_s24 + $0x418] sm:$0xff]  ;;  %v15003_v45 = vld [vmem:[%s16545_s24 + $0x450] sm:$0xff]  ;;  %v17817_v58 = vld [vmem:[%s19815_s0 + $0x20] sm:$0xff]  }
 0x198   : > { %5973 = vmatpush1.bf16.msra.mxu0 %v17489_v16  ;;  %6016 = vmatpush1.bf16.msra.mxu1 %v17493_v25  ;;  %v17788_v21 = vcombine.high %v15002_v11, %v15006_v5  ;;  %v15000_v8 = vld [vmem:[%s16545_s24 + $0x438] sm:$0xff]  ;;  %v17799_v18 = vcombine.low %v15001_v29, %v15005_v30  ;;  %v17803_v20 = vcombine.low %v15002_v11, %v15006_v5 }
 0x199   : > { %20152 = vst [vmem:[#allocation37_spill] sm:$0xff] %v17771_v36  ;;  %6182 = vmatprep.subr.bf16.mxu0 %v17638_v35  ;;  %6225 = vmatprep.subr.bf16.mxu1 %v17767_v4  ;;  %v17805_v1 = vcombine.high %v14995_v37, %v14999_v27  ;;  %v17809_v23 = vcombine.high %v14996_v13, %v15000_v8  ;;  %v15004_v55 = vld [vmem:[%s16545_s24 + $0x458] sm:$0xff] }
 0x19a   : > { %v15008_v29 = vld [vmem:[%s16545_s24 + $0x478] sm:$0xff]  ;;  %v17822_v30 = vcombine.low %v14995_v37, %v14999_v27  ;;  %v17826_v11 = vcombine.low %v14996_v13, %v15000_v8  ;;  %v17828_v5 = vcombine.high %v15003_v45, %v15007_v62  ;;  %v17838_v37 = vcombine.low %v15003_v45, %v15007_v62  ;;  %v20153_v13 = vld [vmem:[#allocation30_spill] sm:$0xff]  ;;  %v20154_v8 = vld [vmem:[#allocation31_spill] sm:$0xff] }
 0x19b   : > { %14988 = vmatmul.mubr.msk.bf16.vlgmr.msra.gmra.mrb[36].mxu0 %vm329_vm0, %v17723_v50  ;;  %14989 = vmatmul.mubr.msk.bf16.vlgmr.msra.gmra.mrb[36].mxu1 %vm329_vm0, %v17723_v50  ;;  %v17831_v36 = vcombine.high %v15004_v55, %v15008_v29  ;;  %v17842_v27 = vcombine.low %v15004_v55, %v15008_v29  ;;  %v20155_v45 = vld [vmem:[#allocation32_spill] sm:$0xff]  ;;  %v20156_v62 = vld [vmem:[#allocation33_spill] sm:$0xff]  ;;  %v20157_v55 = vld [vmem:[#allocation34_spill] sm:$0xff] }
 0x19c   : > { %6183 = vmatpush1.bf16.msra.mxu0 %v17779_v22  ;;  %6226 = vmatpush1.bf16.msra.mxu1 %v17783_v12  ;;  %v20158_v29 = vld [vmem:[#allocation4_spill] sm:$0xff] }
 0x19d   : > { %6184 = vmatprep.subr.bf16.mxu0 %v17785_v41  ;;  %6227 = vmatprep.subr.bf16.mxu1 %v17788_v21 }
 0x19e   : > { %6214 = vmatprep.mubr.bf16.mxu0 %v20042_v17  ;;  %6257 = vmatprep.mubr.bf16.mxu1 %v20042_v17 }
 0x1a0   : > { %6185 = vmatpush1.bf16.msra.mxu0 %v17799_v18  ;;  %6228 = vmatpush1.bf16.msra.mxu1 %v17803_v20 }
 0x1a1   : > { %6268 = vmatprep.subr.bf16.mxu0 %v17805_v1  ;;  %6311 = vmatprep.subr.bf16.mxu1 %v17809_v23 }
 0x1a3   : > { %15026 = vmatmul.mubr.msk.bf16.vlgmr.msra.gmra.mrb[32].mxu0 %vm329_vm0, %v17817_v58  ;;  %15027 = vmatmul.mubr.msk.bf16.vlgmr.msra.gmra.mrb[32].mxu1 %vm329_vm0, %v17817_v58 }
 0x1a4   : > { %6269 = vmatpush1.bf16.msra.mxu0 %v17822_v30  ;;  %6312 = vmatpush1.bf16.msra.mxu1 %v17826_v11 }
 0x1a5   : > { %6270 = vmatprep.subr.bf16.mxu0 %v17828_v5  ;;  %6313 = vmatprep.subr.bf16.mxu1 %v17831_v36 }
 0x1a6   : > { %6300 = vmatprep.mubr.bf16.mxu0 %v20042_v17  ;;  %6343 = vmatprep.mubr.bf16.mxu1 %v20042_v17 }
 0x1a8   : > { %6271 = vmatpush1.bf16.msra.mxu0 %v17838_v37  ;;  %6314 = vmatpush1.bf16.msra.mxu1 %v17842_v27 }
 0x1a9   : > { %6402 = vmatprep.subr.bf16.mxu0 %v20110_v0  ;;  %6445 = vmatprep.subr.bf16.mxu1 %v20111_v6 }
 0x1ab   : > { %15028 = vmatmul.mubr.msk.bf16.vlgmr.msra.gmra.mrb[36].mxu0 %vm329_vm0, %v17817_v58  ;;  %15029 = vmatmul.mubr.msk.bf16.vlgmr.msra.gmra.mrb[36].mxu1 %vm329_vm0, %v17817_v58 }
 0x1ac   : > { %6403 = vmatpush1.bf16.msra.mxu0 %v17215_v57  ;;  %6446 = vmatpush1.bf16.msra.mxu1 %v20112_v10 }
 0x1ad   : > { %6404 = vmatprep.subr.bf16.mxu0 %v17221_v39  ;;  %6447 = vmatprep.subr.bf16.mxu1 %v20113_v15 }
 0x1ae   : > { %6434 = vmatprep.mubr.bf16.mxu0 %v20042_v17  ;;  %6477 = vmatprep.mubr.bf16.mxu1 %v20042_v17 }
 0x1b0   : > { %6405 = vmatpush1.bf16.msra.mxu0 %v17235_v52  ;;  %6448 = vmatpush1.bf16.msra.mxu1 %v17239_v53 }
 0x1b1   : > { %6488 = vmatprep.subr.bf16.mxu0 %v17241_v60  ;;  %6531 = vmatprep.subr.bf16.mxu1 %v17245_v59  ;;  %v20159_v59 = vld [vmem:[#allocation5_spill] sm:$0xff]  ;;  %v20168_v60 = vld [vmem:[#allocation52_spill] sm:$0xff] }
 0x1b3   : > { %15030 = vmatmul.mubr.msk.bf16.vlgmr.msra.gmra.mrb[40].mxu0 %vm329_vm0, %v17515_v28  ;;  %15031 = vmatmul.mubr.msk.bf16.vlgmr.msra.gmra.mrb[40].mxu1 %vm329_vm0, %v17515_v28 }
 0x1b4   : > { %6489 = vmatpush1.bf16.msra.mxu0 %v17253_v63  ;;  %6532 = vmatpush1.bf16.msra.mxu1 %v20153_v13  ;;  %v20162_v13 = vld [vmem:[#allocation8_spill] sm:$0xff]  ;;  %v20163_v63 = vld [vmem:[#allocation9_spill] sm:$0xff] }
 0x1b5   : > { %6490 = vmatprep.subr.bf16.mxu0 %v20154_v8  ;;  %6533 = vmatprep.subr.bf16.mxu1 %v20155_v45  ;;  %v20160_v8 = vld [vmem:[#allocation6_spill] sm:$0xff]  ;;  %v20161_v45 = vld [vmem:[#allocation7_spill] sm:$0xff] }
 0x1b6   : > { %6520 = vmatprep.mubr.bf16.mxu0 %v20042_v17  ;;  %6563 = vmatprep.mubr.bf16.mxu1 %v20042_v17 }
 0x1b8   : > { %6491 = vmatpush1.bf16.msra.mxu0 %v20156_v62  ;;  %6534 = vmatpush1.bf16.msra.mxu1 %v20157_v55  ;;  %v20166_v55 = vld [vmem:[#allocation12_spill] sm:$0xff]  ;;  %v20167_v62 = vld [vmem:[#allocation13_spill] sm:$0xff] }
 0x1b9   : > { %6574 = vmatprep.subr.bf16.mxu0 %v20158_v29  ;;  %6617 = vmatprep.subr.bf16.mxu1 %v20159_v59  ;;  %v20164_v29 = vld [vmem:[#allocation10_spill] sm:$0xff]  ;;  %v20165_v59 = vld [vmem:[#allocation11_spill] sm:$0xff] }
 0x1bb   : > { %15032 = vmatmul.mubr.msk.bf16.vlgmr.msra.gmra.mrb[44].mxu0 %vm329_vm0, %v17515_v28  ;;  %15033 = vmatmul.mubr.msk.bf16.vlgmr.msra.gmra.mrb[44].mxu1 %vm329_vm0, %v17515_v28 }
 0x1bc   : > { %6575 = vmatpush1.bf16.msra.mxu0 %v20160_v8  ;;  %6618 = vmatpush1.bf16.msra.mxu1 %v20161_v45  ;;  %v20171_v8 = vld [vmem:[#allocation22_spill] sm:$0xff]  ;;  %v20172_v45 = vld [vmem:[#allocation23_spill] sm:$0xff] }
 0x1bd   : > { %6576 = vmatprep.subr.bf16.mxu0 %v20162_v13  ;;  %6619 = vmatprep.subr.bf16.mxu1 %v20163_v63  ;;  %v20169_v13 = vld [vmem:[#allocation14_spill] sm:$0xff]  ;;  %v20170_v63 = vld [vmem:[#allocation21_spill] sm:$0xff] }
 0x1be   : > { %6606 = vmatprep.mubr.bf16.mxu0 %v20042_v17  ;;  %6649 = vmatprep.mubr.bf16.mxu1 %v20042_v17 }
 0x1c0   : > { %6577 = vmatpush1.bf16.msra.mxu0 %v20164_v29  ;;  %6620 = vmatpush1.bf16.msra.mxu1 %v20165_v59 }
 0x1c1   : > { %6660 = vmatprep.subr.bf16.mxu0 %v20166_v55  ;;  %6703 = vmatprep.subr.bf16.mxu1 %v20167_v62  ;;  %v20173_v55 = vld [vmem:[#allocation24_spill] sm:$0xff]  ;;  %v20174_v62 = vld [vmem:[#allocation25_spill] sm:$0xff] }
 0x1c3   : > { %15034 = vmatmul.mubr.msk.bf16.vlgmr.msra.gmra.mrb[40].mxu0 %vm329_vm0, %v20168_v60  ;;  %15035 = vmatmul.mubr.msk.bf16.vlgmr.msra.gmra.mrb[40].mxu1 %vm329_vm0, %v20168_v60 }
 0x1c4   : > { %6661 = vmatpush1.bf16.msra.mxu0 %v20169_v13  ;;  %6704 = vmatpush1.bf16.msra.mxu1 %v20170_v63 }
 0x1c5   : > { %6662 = vmatprep.subr.bf16.mxu0 %v20171_v8  ;;  %6705 = vmatprep.subr.bf16.mxu1 %v20172_v45 }
 0x1c6   : > { %6692 = vmatprep.mubr.bf16.mxu0 %v20042_v17  ;;  %6735 = vmatprep.mubr.bf16.mxu1 %v20042_v17 }
 0x1c8   : > { %6663 = vmatpush1.bf16.msra.mxu0 %v20173_v55  ;;  %6706 = vmatpush1.bf16.msra.mxu1 %v20174_v62 }
 0x1c9   : > { %6746 = vmatprep.subr.bf16.mxu0 %v20138_v42  ;;  %6789 = vmatprep.subr.bf16.mxu1 %v20139_v32 }
 0x1cb   : > { %15036 = vmatmul.mubr.msk.bf16.vlgmr.msra.gmra.mrb[44].mxu0 %vm329_vm0, %v20168_v60  ;;  %15037 = vmatmul.mubr.msk.bf16.vlgmr.msra.gmra.mrb[44].mxu1 %vm329_vm0, %v20168_v60 }
 0x1cc   : > { %6747 = vmatpush1.bf16.msra.mxu0 %v17434_v46  ;;  %6790 = vmatpush1.bf16.msra.mxu1 %v20145_v2 }
 0x1cd   : > { %6748 = vmatprep.subr.bf16.mxu0 %v17440_v9  ;;  %6791 = vmatprep.subr.bf16.mxu1 %v20148_v43 }
 0x1ce   : > { %6778 = vmatprep.mubr.bf16.mxu0 %v20042_v17  ;;  %6821 = vmatprep.mubr.bf16.mxu1 %v20042_v17 }
 0x1d0   : > { %6749 = vmatpush1.bf16.msra.mxu0 %v17455_v33  ;;  %6792 = vmatpush1.bf16.msra.mxu1 %v17459_v51 }
 0x1d1   : > { %6832 = vmatprep.subr.bf16.mxu0 %v17461_v34  ;;  %6875 = vmatprep.subr.bf16.mxu1 %v17465_v38 }
 0x1d3   : > { %15038 = vmatmul.mubr.msk.bf16.vlgmr.msra.gmra.mrb[40].mxu0 %vm329_vm0, %v17585_v47  ;;  %15039 = vmatmul.mubr.msk.bf16.vlgmr.msra.gmra.mrb[40].mxu1 %vm329_vm0, %v17585_v47 }
 0x1d4   : > { %6833 = vmatpush1.bf16.msra.mxu0 %v17473_v61  ;;  %6876 = vmatpush1.bf16.msra.mxu1 %v17477_v49 }
 0x1d5   : > { %6834 = vmatprep.subr.bf16.mxu0 %v17479_v31  ;;  %6877 = vmatprep.subr.bf16.mxu1 %v17482_v14 }
 0x1d6   : > { %v3614_v29 = vpop.f32.mrb[16].mxu0  ;;  %6864 = vmatprep.mubr.bf16.mxu0 %v20042_v17  ;;  %v3657_v13 = vpop.f32.mrb[16].mxu1  ;;  %6907 = vmatprep.mubr.bf16.mxu1 %v20042_v17 }
 0x1d7   : > { %v3768_v59 = vadd.f32 %v3614_v29, %v17566_v54  ;;  %v3616_v63 = vpop.f32.mrb[17].mxu0  ;;  %v3770_v8 = vadd.f32 %v3657_v13, %v17566_v54  ;;  %v3659_v55 = vpop.f32.mrb[17].mxu1 }
 0x1d8   : > { %v3769_v45 = vadd.f32 %v3616_v63, %v17566_v54  ;;  %v3618_v62 = vpop.f32.mrb[18].mxu0  ;;  %6835 = vmatpush1.bf16.msra.mxu0 %v17489_v16  ;;  %v3771_v53 = vadd.f32 %v3659_v55, %v17566_v54  ;;  %v3661_v15 = vpop.f32.mrb[18].mxu1  ;;  %6878 = vmatpush1.bf16.msra.mxu1 %v17493_v25 }
 0x1d9   : > { %v3784_v60 = vmax.f32 %v3768_v59, 0.0  ;;  %v3776_v52 = vadd.f32 %v3618_v62, %v17579_v56  ;;  %v3620_v29 = vpop.f32.mrb[19].mxu0  ;;  %6934 = vmatprep.subr.bf16.mxu0 %v17638_v35  ;;  %v3786_v39 = vmax.f32 %v3770_v8, 0.0  ;;  %v3778_v13 = vadd.f32 %v3661_v15, %v17579_v56  ;;  %v3663_v57 = vpop.f32.mrb[19].mxu1  ;;  %6977 = vmatprep.subr.bf16.mxu1 %v17767_v4  ;;  %v20176_v35 = vld [vmem:[#allocation35_spill] sm:$0xff] }
 0x1da   : > { %v3785_v10 = vmax.f32 %v3769_v45, 0.0  ;;  %v3777_v63 = vadd.f32 %v3620_v29, %v17579_v56  ;;  %v3787_v55 = vmax.f32 %v3771_v53, 0.0  ;;  %v3779_v6 = vadd.f32 %v3663_v57, %v17579_v56  ;;  %v20178_v45 = vld [vmem:[#allocation3_spill] sm:$0xff]  ;;  %v20182_v57 = vld [vmem:[#allocation36_spill] sm:$0xff] }
 0x1db   : > { %v17943_v59 = vmax.f32 %v17684_v7, %v3784_v60  ;;  %v3792_v62 = vmax.f32 %v3776_v52, 0.0  ;;  %15040 = vmatmul.mubr.msk.bf16.vlgmr.msra.gmra.mrb[44].mxu0 %vm329_vm0, %v17585_v47  ;;  %v17949_v8 = vmax.f32 %v20176_v35, %v3786_v39  ;;  %v3794_v29 = vmax.f32 %v3778_v13, 0.0  ;;  %15041 = vmatmul.mubr.msk.bf16.vlgmr.msra.gmra.mrb[44].mxu1 %vm329_vm0, %v17585_v47  ;;  %v20180_v60 = vld [vmem:[#allocation38_spill] sm:$0xff]  ;;  %v20184_v39 = vld [vmem:[#allocation39_spill] sm:$0xff] }
 0x1dc   : > { %v17952_v15 = vmax.f32 %v20178_v45, %v3785_v10  ;;  %v3793_v0 = vmax.f32 %v3777_v63, 0.0  ;;  %6935 = vmatpush1.bf16.msra.mxu0 %v17779_v22  ;;  %v17958_v52 = vmax.f32 %v20180_v60, %v3787_v55  ;;  %v3795_v7 = vmax.f32 %v3779_v6, 0.0  ;;  %6978 = vmatpush1.bf16.msra.mxu1 %v17783_v12  ;;  %v20186_v35 = vld [vmem:[#allocation55_spill] sm:$0xff]  ;;  %v20188_v55 = vld [vmem:[#allocation56_spill] sm:$0xff] }
 0x1dd   : > { %20175 = vst [vmem:[#allocation4_spill] sm:$0xff] %v17943_v59  ;;  %20177 = vst [vmem:[#allocation5_spill] sm:$0xff] %v17949_v8  ;;  %v17961_v53 = vmax.f32 %v20182_v57, %v3792_v62  ;;  %6936 = vmatprep.subr.bf16.mxu0 %v17785_v41  ;;  %v17966_v10 = vmax.f32 %v20184_v39, %v3794_v29  ;;  %6979 = vmatprep.subr.bf16.mxu1 %v17788_v21 }
 0x1de   : > { %20179 = vst [vmem:[#allocation6_spill] sm:$0xff] %v17952_v15  ;;  %20181 = vst [vmem:[#allocation7_spill] sm:$0xff] %v17958_v52  ;;  %v17969_v13 = vmax.f32 %v20186_v35, %v3793_v0  ;;  %v3700_v63 = vpop.f32.mrb[20].mxu0  ;;  %6966 = vmatprep.mubr.bf16.mxu0 %v20042_v17  ;;  %v17974_v45 = vmax.f32 %v20188_v55, %v3795_v7  ;;  %v3743_v62 = vpop.f32.mrb[20].mxu1  ;;  %7009 = vmatprep.mubr.bf16.mxu1 %v20042_v17 }
 0x1df   : > { %20183 = vst [vmem:[#allocation8_spill] sm:$0xff] %v17961_v53  ;;  %20185 = vst [vmem:[#allocation9_spill] sm:$0xff] %v17966_v10  ;;  %v3772_v6 = vadd.f32 %v3700_v63, %v17566_v54  ;;  %v3702_v60 = vpop.f32.mrb[21].mxu0  ;;  %v3774_v29 = vadd.f32 %v3743_v62, %v17566_v54  ;;  %v3745_v0 = vpop.f32.mrb[21].mxu1 }
 0x1e0   : > { %20187 = vst [vmem:[#allocation10_spill] sm:$0xff] %v17969_v13  ;;  %20189 = vst [vmem:[#allocation11_spill] sm:$0xff] %v17974_v45  ;;  %v3773_v57 = vadd.f32 %v3702_v60, %v17566_v54  ;;  %v3704_v39 = vpop.f32.mrb[22].mxu0  ;;  %6937 = vmatpush1.bf16.msra.mxu0 %v17799_v18  ;;  %v3775_v7 = vadd.f32 %v3745_v0, %v17566_v54  ;;  %v3747_v63 = vpop.f32.mrb[22].mxu1  ;;  %6980 = vmatpush1.bf16.msra.mxu1 %v17803_v20  ;;  %v15051_v0 = vld [vmem:[%s16545_s24 + $0x4a0] sm:$0xff] }
 0x1e1   : > { %v3788_v35 = vmax.f32 %v3772_v6, 0.0  ;;  %v3780_v55 = vadd.f32 %v3704_v39, %v17579_v56  ;;  %v3706_v45 = vpop.f32.mrb[23].mxu0  ;;  %7020 = vmatprep.subr.bf16.mxu0 %v17805_v1  ;;  %v3790_v62 = vmax.f32 %v3774_v29, 0.0  ;;  %v3782_v13 = vadd.f32 %v3747_v63, %v17579_v56  ;;  %v3749_v53 = vpop.f32.mrb[23].mxu1  ;;  %7063 = vmatprep.subr.bf16.mxu1 %v17809_v23  ;;  %v15047_v6 = vld [vmem:[%s16545_s24 + $0x480] sm:$0xff]  ;;  %v15048_v29 = vld [vmem:[%s16545_s24 + $0x488] sm:$0xff] }
 0x1e2   : > { %v3789_v60 = vmax.f32 %v3773_v57, 0.0  ;;  %v3781_v10 = vadd.f32 %v3706_v45, %v17579_v56  ;;  %v3791_v52 = vmax.f32 %v3775_v7, 0.0  ;;  %v3783_v8 = vadd.f32 %v3749_v53, %v17579_v56  ;;  %v15052_v57 = vld [vmem:[%s16545_s24 + $0x4a8] sm:$0xff] }
 0x1e3   : > { %v17991_v39 = vmax.f32 %v17741_v24, %v3788_v35  ;;  %v3796_v15 = vmax.f32 %v3780_v55, 0.0  ;;  %15042 = vmatmul.mubr.msk.bf16.vlgmr.msra.gmra.mrb[40].mxu0 %vm329_vm0, %v17723_v50  ;;  %v17999_v63 = vmax.f32 %v17748_v19, %v3790_v62  ;;  %v3798_v59 = vmax.f32 %v3782_v13, 0.0  ;;  %15043 = vmatmul.mubr.msk.bf16.vlgmr.msra.gmra.mrb[40].mxu1 %vm329_vm0, %v17723_v50 }
 0x1e4   : > { %v18002_v45 = vmax.f32 %v17750_v26, %v3789_v60  ;;  %v3797_v24 = vmax.f32 %v3781_v10, 0.0  ;;  %7021 = vmatpush1.bf16.msra.mxu0 %v17822_v30  ;;  %v18008_v53 = vmax.f32 %v17755_v44, %v3791_v52  ;;  %v3799_v35 = vmax.f32 %v3783_v8, 0.0  ;;  %7064 = vmatpush1.bf16.msra.mxu1 %v17826_v11  ;;  %v15059_v8 = vld [vmem:[%s16545_s24 + $0x4e0] sm:$0xff]  ;;  %v15049_v60 = vld [vmem:[%s16545_s24 + $0x490] sm:$0xff] }
 0x1e5   : > { %v18011_v19 = vmax.f32 %v17757_v3, %v3796_v15  ;;  %7022 = vmatprep.subr.bf16.mxu0 %v17828_v5  ;;  %v18015_v26 = vcombine.high %v15047_v6, %v15051_v0  ;;  %v18018_v10 = vmax.f32 %v17761_v40, %v3798_v59  ;;  %7065 = vmatprep.subr.bf16.mxu1 %v17831_v36  ;;  %v15055_v3 = vld [vmem:[%s16545_s24 + $0x4c0] sm:$0xff]  ;;  %v20195_v15 = vld [vmem:[#allocation37_spill] sm:$0xff]  ;;  %v15056_v40 = vld [vmem:[%s16545_s24 + $0x4c8] sm:$0xff] }
 0x1e6   : > { %v18021_v13 = vmax.f32 %v17763_v48, %v3797_v24  ;;  %7052 = vmatprep.mubr.bf16.mxu0 %v20042_v17  ;;  %v18025_v44 = vcombine.high %v15048_v29, %v15052_v57  ;;  %v18030_v52 = vmax.f32 %v20195_v15, %v3799_v35  ;;  %7095 = vmatprep.mubr.bf16.mxu1 %v20042_v17  ;;  %v15060_v48 = vld [vmem:[%s16545_s24 + $0x4e8] sm:$0xff]  ;;  %v15053_v24 = vld [vmem:[%s16545_s24 + $0x4b0] sm:$0xff] }
 0x1e7   : > { %20190 = vst [vmem:[#allocation12_spill] sm:$0xff] %v18011_v19  ;;  %20191 = vst [vmem:[#allocation13_spill] sm:$0xff] %v18015_v26  ;;  %v18036_v59 = vcombine.low %v15047_v6, %v15051_v0  ;;  %v18040_v7 = vcombine.low %v15048_v29, %v15052_v57  ;;  %v18042_v55 = vcombine.high %v15055_v3, %v15059_v8  ;;  %v15050_v6 = vld [vmem:[%s16545_s24 + $0x498] sm:$0xff] }
 0x1e8   : > { %20192 = vst [vmem:[#allocation14_spill] sm:$0xff] %v18018_v10  ;;  %20193 = vst [vmem:[#allocation21_spill] sm:$0xff] %v18021_v13  ;;  %7023 = vmatpush1.bf16.msra.mxu0 %v17838_v37  ;;  %7066 = vmatpush1.bf16.msra.mxu1 %v17842_v27  ;;  %v18045_v62 = vcombine.high %v15056_v40, %v15060_v48  ;;  %v15054_v0 = vld [vmem:[%s16545_s24 + $0x4b8] sm:$0xff]  ;;  %v18056_v29 = vcombine.low %v15055_v3, %v15059_v8  ;;  %v15061_v13 = vld [vmem:[%s16545_s24 + $0x4f0] sm:$0xff] }
 0x1e9   : > { %20194 = vst [vmem:[#allocation22_spill] sm:$0xff] %v18025_v44  ;;  %20196 = vst [vmem:[#allocation23_spill] sm:$0xff] %v18030_v52  ;;  %7222 = vmatprep.subr.bf16.mxu0 %v18015_v26  ;;  %7265 = vmatprep.subr.bf16.mxu1 %v18025_v44  ;;  %v18060_v57 = vcombine.low %v15056_v40, %v15060_v48  ;;  %v18062_v35 = vcombine.high %v15049_v60, %v15053_v24  ;;  %v15057_v52 = vld [vmem:[%s16545_s24 + $0x4d0] sm:$0xff]  ;;  %v15058_v3 = vld [vmem:[%s16545_s24 + $0x4d8] sm:$0xff] }
 0x1ea   : > { %20197 = vst [vmem:[#allocation24_spill] sm:$0xff] %v18036_v59  ;;  %20198 = vst [vmem:[#allocation25_spill] sm:$0xff] %v18040_v7  ;;  %v18066_v15 = vcombine.high %v15050_v6, %v15054_v0  ;;  %v15062_v8 = vld [vmem:[%s16545_s24 + $0x4f8] sm:$0xff]  ;;  %v18074_v10 = vcombine.low %v15049_v60, %v15053_v24  ;;  %v18078_v40 = vcombine.low %v15050_v6, %v15054_v0  ;;  %v20213_v6 = vld [vmem:[#allocation16_spill] sm:$0xff] }
 0x1eb   : > { %20199 = vst [vmem:[#allocation35_spill] sm:$0xff] %v18042_v55  ;;  %20200 = vst [vmem:[#allocation3_spill] sm:$0xff] %v18045_v62  ;;  %15044 = vmatmul.mubr.msk.bf16.vlgmr.msra.gmra.mrb[44].mxu0 %vm329_vm0, %v17723_v50  ;;  %15045 = vmatmul.mubr.msk.bf16.vlgmr.msra.gmra.mrb[44].mxu1 %vm329_vm0, %v17723_v50  ;;  %v18080_v48 = vcombine.high %v15057_v52, %v15061_v13  ;;  %v18083_v19 = vcombine.high %v15058_v3, %v15062_v8  ;;  %v20214_v0 = vld [vmem:[#allocation17_spill] sm:$0xff] }
 0x1ec   : > { %7223 = vmatpush1.bf16.msra.mxu0 %v18036_v59  ;;  %20201 = vst [vmem:[#allocation38_spill] sm:$0xff] %v18056_v29  ;;  %7266 = vmatpush1.bf16.msra.mxu1 %v18040_v7  ;;  %20202 = vst [vmem:[#allocation36_spill] sm:$0xff] %v18060_v57  ;;  %v18090_v60 = vcombine.low %v15057_v52, %v15061_v13  ;;  %v18094_v24 = vcombine.low %v15058_v3, %v15062_v8  ;;  %v20211_v13 = vld [vmem:[#allocation15_spill] sm:$0xff]  ;;  %v20212_v52 = vld [vmem:[#allocation2_spill] sm:$0xff] }
 0x1ed   : > { %7224 = vmatprep.subr.bf16.mxu0 %v18042_v55  ;;  %20203 = vst [vmem:[#allocation39_spill] sm:$0xff] %v18062_v35  ;;  %7267 = vmatprep.subr.bf16.mxu1 %v18045_v62  ;;  %20204 = vst [vmem:[#allocation55_spill] sm:$0xff] %v18066_v15  ;;  %v20215_v3 = vld [vmem:[#allocation18_spill] sm:$0xff]  ;;  %v20216_v8 = vld [vmem:[#allocation19_spill] sm:$0xff] }
 0x1ee   : > { %7254 = vmatprep.mubr.bf16.mxu0 %v20042_v17  ;;  %7297 = vmatprep.mubr.bf16.mxu1 %v20042_v17  ;;  %20205 = vst [vmem:[#allocation56_spill] sm:$0xff] %v18074_v10  ;;  %20206 = vst [vmem:[#allocation37_spill] sm:$0xff] %v18078_v40 }
 0x1ef   : > { %20207 = vst [vmem:[#allocation57_spill] sm:$0xff] %v18080_v48  ;;  %20208 = vst [vmem:[#allocation58_spill] sm:$0xff] %v18083_v19 }
 0x1f0   : > { %7225 = vmatpush1.bf16.msra.mxu0 %v18056_v29  ;;  %7268 = vmatpush1.bf16.msra.mxu1 %v18060_v57  ;;  %20209 = vst [vmem:[#allocation59_spill] sm:$0xff] %v18090_v60  ;;  %20210 = vst [vmem:[#allocation60_spill] sm:$0xff] %v18094_v24 }
 0x1f1   : > { %7308 = vmatprep.subr.bf16.mxu0 %v18062_v35  ;;  %7351 = vmatprep.subr.bf16.mxu1 %v18066_v15 }
 0x1f3   : > { %15079 = vmatmul.mubr.msk.bf16.vlgmr.msra.gmra.mrb[40].mxu0 %vm329_vm0, %v17817_v58  ;;  %15080 = vmatmul.mubr.msk.bf16.vlgmr.msra.gmra.mrb[40].mxu1 %vm329_vm0, %v17817_v58 }
 0x1f4   : > { %7309 = vmatpush1.bf16.msra.mxu0 %v18074_v10  ;;  %7352 = vmatpush1.bf16.msra.mxu1 %v18078_v40 }
 0x1f5   : > { %7310 = vmatprep.subr.bf16.mxu0 %v18080_v48  ;;  %7353 = vmatprep.subr.bf16.mxu1 %v18083_v19 }
 0x1f6   : > { %7340 = vmatprep.mubr.bf16.mxu0 %v20042_v17  ;;  %7383 = vmatprep.mubr.bf16.mxu1 %v20042_v17 }
 0x1f8   : > { %7311 = vmatpush1.bf16.msra.mxu0 %v18090_v60  ;;  %7354 = vmatpush1.bf16.msra.mxu1 %v18094_v24 }
 0x1f9   : > { %7458 = vmatprep.subr.bf16.mxu0 %v20138_v42  ;;  %7501 = vmatprep.subr.bf16.mxu1 %v20139_v32 }
 0x1fb   : > { %15081 = vmatmul.mubr.msk.bf16.vlgmr.msra.gmra.mrb[44].mxu0 %vm329_vm0, %v17817_v58  ;;  %15082 = vmatmul.mubr.msk.bf16.vlgmr.msra.gmra.mrb[44].mxu1 %vm329_vm0, %v17817_v58 }
 0x1fc   : > { %7459 = vmatpush1.bf16.msra.mxu0 %v17434_v46  ;;  %7502 = vmatpush1.bf16.msra.mxu1 %v20145_v2 }
 0x1fd   : > { %7460 = vmatprep.subr.bf16.mxu0 %v17440_v9  ;;  %7503 = vmatprep.subr.bf16.mxu1 %v20148_v43 }
 0x1fe   : > { %7490 = vmatprep.mubr.bf16.mxu0 %v20042_v17  ;;  %7533 = vmatprep.mubr.bf16.mxu1 %v20042_v17 }
 0x200   : > { %7461 = vmatpush1.bf16.msra.mxu0 %v17455_v33  ;;  %7504 = vmatpush1.bf16.msra.mxu1 %v17459_v51 }
 0x201   : > { %7544 = vmatprep.subr.bf16.mxu0 %v17461_v34  ;;  %7587 = vmatprep.subr.bf16.mxu1 %v17465_v38 }
 0x203   : > { %15083 = vmatmul.mubr.msk.bf16.vlgmr.msra.gmra.mrb[48].mxu0 %vm329_vm0, %v17515_v28  ;;  %15084 = vmatmul.mubr.msk.bf16.vlgmr.msra.gmra.mrb[48].mxu1 %vm329_vm0, %v17515_v28  ;;  %v18134_v28 = vld [vmem:[%s19815_s0 + $0x8] sm:$0xff]  }
 0x204   : > { %7545 = vmatpush1.bf16.msra.mxu0 %v17473_v61  ;;  %7588 = vmatpush1.bf16.msra.mxu1 %v17477_v49 }
 0x205   : > { %7546 = vmatprep.subr.bf16.mxu0 %v17479_v31  ;;  %7589 = vmatprep.subr.bf16.mxu1 %v17482_v14  ;;  %v20225_v14 = vld [vmem:[#allocation32_spill] sm:$0xff] }
 0x206   : > { %7576 = vmatprep.mubr.bf16.mxu0 %v20042_v17  ;;  %7619 = vmatprep.mubr.bf16.mxu1 %v20042_v17 }
 0x208   : > { %7547 = vmatpush1.bf16.msra.mxu0 %v17489_v16  ;;  %7590 = vmatpush1.bf16.msra.mxu1 %v17493_v25  ;;  %v20219_v25 = vld [vmem:[#allocation27_spill] sm:$0xff]  ;;  %v20220_v16 = vld [vmem:[#allocation28_spill] sm:$0xff] }
 0x209   : > { %7630 = vmatprep.subr.bf16.mxu0 %v20211_v13  ;;  %7673 = vmatprep.subr.bf16.mxu1 %v20212_v52  ;;  %v20217_v13 = vld [vmem:[#allocation20_spill] sm:$0xff]  ;;  %v20218_v52 = vld [vmem:[#allocation26_spill] sm:$0xff] }
 0x20b   : > { %15085 = vmatmul.mubr.msk.bf16.vlgmr.msra.gmra.mrb[52].mxu0 %vm329_vm0, %v18134_v28  ;;  %15086 = vmatmul.mubr.msk.bf16.vlgmr.msra.gmra.mrb[52].mxu1 %vm329_vm0, %v18134_v28 }
 0x20c   : > { %7631 = vmatpush1.bf16.msra.mxu0 %v20213_v6  ;;  %7674 = vmatpush1.bf16.msra.mxu1 %v20214_v0  ;;  %v20221_v6 = vld [vmem:[#allocation52_spill] sm:$0xff]  ;;  %v20222_v0 = vld [vmem:[#allocation29_spill] sm:$0xff] }
 0x20d   : > { %7632 = vmatprep.subr.bf16.mxu0 %v20215_v3  ;;  %7675 = vmatprep.subr.bf16.mxu1 %v20216_v8  ;;  %v20223_v3 = vld [vmem:[#allocation30_spill] sm:$0xff]  ;;  %v20224_v8 = vld [vmem:[#allocation31_spill] sm:$0xff] }
 0x20e   : > { %7662 = vmatprep.mubr.bf16.mxu0 %v20042_v17  ;;  %7705 = vmatprep.mubr.bf16.mxu1 %v20042_v17 }
 0x210   : > { %7633 = vmatpush1.bf16.msra.mxu0 %v20217_v13  ;;  %7676 = vmatpush1.bf16.msra.mxu1 %v20218_v52  ;;  %v20228_v13 = vld [vmem:[#allocation54_spill] sm:$0xff] }
 0x211   : > { %7716 = vmatprep.subr.bf16.mxu0 %v20219_v25  ;;  %7759 = vmatprep.subr.bf16.mxu1 %v20220_v16  ;;  %v20226_v25 = vld [vmem:[#allocation33_spill] sm:$0xff]  ;;  %v20227_v16 = vld [vmem:[#allocation34_spill] sm:$0xff] }
 0x213   : > { %15087 = vmatmul.mubr.msk.bf16.vlgmr.msra.gmra.mrb[48].mxu0 %vm329_vm0, %v20221_v6  ;;  %15088 = vmatmul.mubr.msk.bf16.vlgmr.msra.gmra.mrb[48].mxu1 %vm329_vm0, %v20221_v6 }
 0x214   : > { %7717 = vmatpush1.bf16.msra.mxu0 %v20222_v0  ;;  %7760 = vmatpush1.bf16.msra.mxu1 %v20223_v3 }
 0x215   : > { %7718 = vmatprep.subr.bf16.mxu0 %v20224_v8  ;;  %7761 = vmatprep.subr.bf16.mxu1 %v20225_v14 }
 0x216   : > { %7748 = vmatprep.mubr.bf16.mxu0 %v20042_v17  ;;  %7791 = vmatprep.mubr.bf16.mxu1 %v20042_v17 }
 0x218   : > { %7719 = vmatpush1.bf16.msra.mxu0 %v20226_v25  ;;  %7762 = vmatpush1.bf16.msra.mxu1 %v20227_v16 }
 0x219   : > { %7802 = vmatprep.subr.bf16.mxu0 %v20228_v13  ;;  %7845 = vmatprep.subr.bf16.mxu1 %v17767_v4 }
 0x21b   : > { %15089 = vmatmul.mubr.msk.bf16.vlgmr.msra.gmra.mrb[52].mxu0 %vm329_vm0, %v20221_v6  ;;  %15090 = vmatmul.mubr.msk.bf16.vlgmr.msra.gmra.mrb[52].mxu1 %vm329_vm0, %v20221_v6 }
 0x21c   : > { %7803 = vmatpush1.bf16.msra.mxu0 %v17779_v22  ;;  %7846 = vmatpush1.bf16.msra.mxu1 %v17783_v12 }
 0x21d   : > { %7804 = vmatprep.subr.bf16.mxu0 %v17785_v41  ;;  %7847 = vmatprep.subr.bf16.mxu1 %v17788_v21 }
 0x21e   : > { %7834 = vmatprep.mubr.bf16.mxu0 %v20042_v17  ;;  %7877 = vmatprep.mubr.bf16.mxu1 %v20042_v17 }
 0x220   : > { %7805 = vmatpush1.bf16.msra.mxu0 %v17799_v18  ;;  %7848 = vmatpush1.bf16.msra.mxu1 %v17803_v20 }
 0x221   : > { %7888 = vmatprep.subr.bf16.mxu0 %v17805_v1  ;;  %7931 = vmatprep.subr.bf16.mxu1 %v17809_v23 }
 0x223   : > { %15091 = vmatmul.mubr.msk.bf16.vlgmr.msra.gmra.mrb[48].mxu0 %vm329_vm0, %v17585_v47  ;;  %15092 = vmatmul.mubr.msk.bf16.vlgmr.msra.gmra.mrb[48].mxu1 %vm329_vm0, %v17585_v47 }
 0x224   : > { %7889 = vmatpush1.bf16.msra.mxu0 %v17822_v30  ;;  %7932 = vmatpush1.bf16.msra.mxu1 %v17826_v11 }
 0x225   : > { %7890 = vmatprep.subr.bf16.mxu0 %v17828_v5  ;;  %7933 = vmatprep.subr.bf16.mxu1 %v17831_v36 }
 0x226   : > { %v4670_v14 = vpop.f32.mrb[24].mxu0  ;;  %7920 = vmatprep.mubr.bf16.mxu0 %v20042_v17  ;;  %v4713_v6 = vpop.f32.mrb[24].mxu1  ;;  %7963 = vmatprep.mubr.bf16.mxu1 %v20042_v17 }
 0x227   : > { %v4824_v52 = vadd.f32 %v4670_v14, %v17566_v54  ;;  %v4672_v0 = vpop.f32.mrb[25].mxu0  ;;  %v4826_v47 = vadd.f32 %v4713_v6, %v17566_v54  ;;  %v4715_v8 = vpop.f32.mrb[25].mxu1 }
 0x228   : > { %v4825_v3 = vadd.f32 %v4672_v0, %v17566_v54  ;;  %v4674_v25 = vpop.f32.mrb[26].mxu0  ;;  %7891 = vmatpush1.bf16.msra.mxu0 %v17838_v37  ;;  %v4827_v31 = vadd.f32 %v4715_v8, %v17566_v54  ;;  %v4717_v49 = vpop.f32.mrb[26].mxu1  ;;  %7934 = vmatpush1.bf16.msra.mxu1 %v17842_v27 }
 0x229   : > { %v4840_v16 = vmax.f32 %v4824_v52, 0.0  ;;  %v4832_v14 = vadd.f32 %v4674_v25, %v17579_v56  ;;  %v4676_v61 = vpop.f32.mrb[27].mxu0  ;;  %7990 = vmatprep.subr.bf16.mxu0 %v18015_v26  ;;  %v4842_v38 = vmax.f32 %v4826_v47, 0.0  ;;  %v4834_v0 = vadd.f32 %v4717_v49, %v17579_v56  ;;  %v4719_v51 = vpop.f32.mrb[27].mxu1  ;;  %8033 = vmatprep.subr.bf16.mxu1 %v18025_v44  ;;  %v20229_v52 = vld [vmem:[#allocation4_spill] sm:$0xff] }
 0x22a   : > { %v4841_v6 = vmax.f32 %v4825_v3, 0.0  ;;  %v4833_v34 = vadd.f32 %v4676_v61, %v17579_v56  ;;  %v4843_v33 = vmax.f32 %v4827_v31, 0.0  ;;  %v4835_v43 = vadd.f32 %v4719_v51, %v17579_v56  ;;  %v18209_v47 = vld [vmem:[%s19815_s0 + $0x10] sm:$0xff]   ;;  %v20231_v61 = vld [vmem:[#allocation5_spill] sm:$0xff]  ;;  %v20232_v3 = vld [vmem:[#allocation6_spill] sm:$0xff] }
 0x22b   : > { %v4856_v8 = vmax.f32 %v20229_v52, %v4840_v16  ;;  %v4848_v25 = vmax.f32 %v4832_v14, 0.0  ;;  %20230 = vst [vmem:[#allocation15_spill] sm:$0xff] %v18209_v47  ;;  %15093 = vmatmul.mubr.msk.bf16.vlgmr.msra.gmra.mrb[52].mxu0 %vm329_vm0, %v18209_v47  ;;  %v4858_v49 = vmax.f32 %v20231_v61, %v4842_v38  ;;  %v4850_v26 = vmax.f32 %v4834_v0, 0.0  ;;  %15094 = vmatmul.mubr.msk.bf16.vlgmr.msra.gmra.mrb[52].mxu1 %vm329_vm0, %v18209_v47  ;;  %v20233_v51 = vld [vmem:[#allocation7_spill] sm:$0xff]  ;;  %v20234_v14 = vld [vmem:[#allocation8_spill] sm:$0xff]  ;;  %v18228_v38 = vld [vmem:[%s16545_s24 + $0x500] sm:$0xff] }
 0x22c   : > { %v4857_v44 = vmax.f32 %v20232_v3, %v4841_v6  ;;  %v4849_v16 = vmax.f32 %v4833_v34, 0.0  ;;  %7991 = vmatpush1.bf16.msra.mxu0 %v18036_v59  ;;  %v4859_v31 = vmax.f32 %v20233_v51, %v4843_v33  ;;  %v4851_v9 = vmax.f32 %v4835_v43, 0.0  ;;  %8034 = vmatpush1.bf16.msra.mxu1 %v18040_v7  ;;  %v18231_v34 = vld [vmem:[%s16545_s24 + $0x520] sm:$0xff]  ;;  %v20235_v0 = vld [vmem:[#allocation9_spill] sm:$0xff]  ;;  %v20237_v43 = vld [vmem:[#allocation11_spill] sm:$0xff] }
 0x22d   : > { %v4864_v52 = vmax.f32 %v20234_v14, %v4848_v25  ;;  %7992 = vmatprep.subr.bf16.mxu0 %v18042_v55  ;;  %v4866_v61 = vmax.f32 %v20235_v0, %v4850_v26  ;;  %v20236_v3 = vld [vmem:[#allocation10_spill] sm:$0xff]  ;;  %8035 = vmatprep.subr.bf16.mxu1 %v18045_v62 }
 0x22e   : > { %v15577_v6 = vpack.c.bf16 %v4857_v44, %v4856_v8  ;;  %v4865_v47 = vmax.f32 %v20236_v3, %v4849_v16  ;;  %v4756_v59 = vpop.f32.mrb[28].mxu0  ;;  %8022 = vmatprep.mubr.bf16.mxu0 %v20042_v17  ;;  %v15578_v33 = vpack.c.bf16 %v4859_v31, %v4858_v49  ;;  %v4867_v25 = vmax.f32 %v20237_v43, %v4851_v9  ;;  %v4799_v14 = vpop.f32.mrb[28].mxu1 }
 0x22f   : > { %v4828_v51 = vadd.f32 %v4756_v59, %v17566_v54  ;;  %v4758_v55 = vpop.f32.mrb[29].mxu0  ;;  %8065 = vmatprep.mubr.bf16.mxu1 %v20042_v17  ;;  %v4830_v26 = vadd.f32 %v4799_v14, %v17566_v54  ;;  %v4801_v16 = vpop.f32.mrb[29].mxu1  ;;  %v18246_v9 = vcombine.high %v18228_v38, %v18231_v34 }
 0x230   : > { %4920 = vst [vmem:[%s18221_s28] sm:$0xff] %v15577_v6  ;;  %v15581_v44 = vpack.c.bf16 %v4865_v47, %v4864_v52  ;;  %v4829_v8 = vadd.f32 %v4758_v55, %v17566_v54  ;;  %v4760_v0 = vpop.f32.mrb[30].mxu0  ;;  %7993 = vmatpush1.bf16.msra.mxu0 %v18056_v29  ;;  %4921 = vst [vmem:[%s18221_s28 + $0x8] sm:$0xff] %v15578_v33  ;;  %v15582_v59 = vpack.c.bf16 %v4867_v25, %v4866_v61  ;;  %v4803_v52 = vpop.f32.mrb[30].mxu1  ;;  %v15101_v25 = vld [vmem:[%s16545_s24 + $0x508] sm:$0xff] }
 0x231   : > { %20238 = vst [vmem:[#allocation2_spill] sm:$0xff] %v18246_v9  ;;  %v4844_v49 = vmax.f32 %v4828_v51, 0.0  ;;  %v4831_v47 = vadd.f32 %v4801_v16, %v17566_v54  ;;  %v4836_v31 = vadd.f32 %v4760_v0, %v17579_v56  ;;  %8036 = vmatpush1.bf16.msra.mxu1 %v18060_v57  ;;  %v4762_v55 = vpop.f32.mrb[31].mxu0  ;;  %8076 = vmatprep.subr.bf16.mxu0 %v18062_v35  ;;  %v4846_v6 = vmax.f32 %v4830_v26, 0.0  ;;  %v4805_v43 = vpop.f32.mrb[31].mxu1  ;;  %v15105_v51 = vld [vmem:[%s16545_s24 + $0x528] sm:$0xff] }
 0x232   : > { %4924 = vst [vmem:[%s18221_s28 + $0x20] sm:$0xff] %v15581_v44  ;;  %v4845_v3 = vmax.f32 %v4829_v8, 0.0  ;;  %v4838_v33 = vadd.f32 %v4803_v52, %v17579_v56  ;;  %v4837_v61 = vadd.f32 %v4762_v55, %v17579_v56  ;;  %8119 = vmatprep.subr.bf16.mxu1 %v18066_v15  ;;  %4925 = vst [vmem:[%s18221_s28 + $0x28] sm:$0xff] %v15582_v59  ;;  %v20239_v59 = vld [vmem:[#allocation12_spill] sm:$0xff]  ;;  %v20242_v55 = vld [vmem:[#allocation21_spill] sm:$0xff] }
 0x233   : > { %v4860_v14 = vmax.f32 %v17991_v39, %v4844_v49  ;;  %v4847_v16 = vmax.f32 %v4831_v47, 0.0  ;;  %v4852_v0 = vmax.f32 %v4836_v31, 0.0  ;;  %v4839_v54 = vadd.f32 %v4805_v43, %v17579_v56  ;;  %15095 = vmatmul.mubr.msk.bf16.vlgmr.msra.gmra.mrb[48].mxu0 %vm329_vm0, %v17723_v50  ;;  %v20241_v31 = vld [vmem:[#allocation14_spill] sm:$0xff]  ;;  %v15109_v43 = vld [vmem:[%s16545_s24 + $0x548] sm:$0xff] }
 0x234   : > { %v4862_v44 = vmax.f32 %v17999_v63, %v4846_v6  ;;  %v4861_v26 = vmax.f32 %v18002_v45, %v4845_v3  ;;  %v4854_v8 = vmax.f32 %v4838_v33, 0.0  ;;  %v4853_v52 = vmax.f32 %v4837_v61, 0.0  ;;  %15096 = vmatmul.mubr.msk.bf16.vlgmr.msra.gmra.mrb[48].mxu1 %vm329_vm0, %v17723_v50  ;;  %8077 = vmatpush1.bf16.msra.mxu0 %v18074_v10  ;;  %v15112_v3 = vld [vmem:[%s16545_s24 + $0x560] sm:$0xff]  ;;  %v20243_v33 = vld [vmem:[#allocation23_spill] sm:$0xff] }
 0x235   : > { %v4863_v39 = vmax.f32 %v18008_v53, %v4847_v16  ;;  %v4868_v49 = vmax.f32 %v20239_v59, %v4852_v0  ;;  %v4855_v47 = vmax.f32 %v4839_v54, 0.0  ;;  %8120 = vmatpush1.bf16.msra.mxu1 %v18078_v40  ;;  %8078 = vmatprep.subr.bf16.mxu0 %v18080_v48  ;;  %v18273_v63 = vcombine.high %v15101_v25, %v15105_v51  ;;  %v15108_v53 = vld [vmem:[%s16545_s24 + $0x540] sm:$0xff]  ;;  %v15106_v59 = vld [vmem:[%s16545_s24 + $0x530] sm:$0xff] }
 0x236   : > { %v15579_v45 = vpack.c.bf16 %v4861_v26, %v4860_v14  ;;  %v4870_v50 = vmax.f32 %v20241_v31, %v4854_v8  ;;  %v4869_v6 = vmax.f32 %v20242_v55, %v4853_v52  ;;  %8121 = vmatprep.subr.bf16.mxu1 %v18083_v19  ;;  %8108 = vmatprep.mubr.bf16.mxu0 %v20042_v17  ;;  %v15113_v14 = vld [vmem:[%s16545_s24 + $0x568] sm:$0xff]  ;;  %v15110_v31 = vld [vmem:[%s16545_s24 + $0x550] sm:$0xff]  ;;  %v15111_v55 = vld [vmem:[%s16545_s24 + $0x558] sm:$0xff] }
 0x237   : > { %20240 = vst [vmem:[#allocation16_spill] sm:$0xff] %v18273_v63  ;;  %v15580_v54 = vpack.c.bf16 %v4863_v39, %v4862_v44  ;;  %v4871_v61 = vmax.f32 %v20243_v33, %v4855_v47  ;;  %8151 = vmatprep.mubr.bf16.mxu1 %v20042_v17  ;;  %v18289_v0 = vcombine.low %v18228_v38, %v18231_v34  ;;  %v15102_v39 = vld [vmem:[%s16545_s24 + $0x510] sm:$0xff]  ;;  %v18308_v38 = vld [vmem:[%s19815_s0 + $0x18] sm:$0xff]  }
 0x238   : > { %4922 = vst [vmem:[%s18221_s28 + $0x10] sm:$0xff] %v15579_v45  ;;  %v15583_v16 = vpack.c.bf16 %v4869_v6, %v4868_v49  ;;  %8079 = vmatpush1.bf16.msra.mxu0 %v18090_v60  ;;  %v18294_v26 = vcombine.low %v15101_v25, %v15105_v51  ;;  %v18296_v8 = vcombine.high %v15108_v53, %v15112_v3  ;;  %v15103_v34 = vld [vmem:[%s16545_s24 + $0x518] sm:$0xff] }
 0x239   : > { %20244 = vst [vmem:[#allocation17_spill] sm:$0xff] %v18289_v0  ;;  %4923 = vst [vmem:[%s18221_s28 + $0x18] sm:$0xff] %v15580_v54  ;;  %v15584_v44 = vpack.c.bf16 %v4871_v61, %v4870_v50  ;;  %8122 = vmatpush1.bf16.msra.mxu1 %v18094_v24  ;;  %8278 = vmatprep.subr.bf16.mxu0 %v18246_v9  ;;  %v18300_v52 = vcombine.high %v15109_v43, %v15113_v14  ;;  %v15107_v25 = vld [vmem:[%s16545_s24 + $0x538] sm:$0xff]  ;;  %v15114_v50 = vld [vmem:[%s16545_s24 + $0x570] sm:$0xff] }
 0x23a   : > { %20245 = vst [vmem:[#allocation18_spill] sm:$0xff] %v18294_v26  ;;  %20246 = vst [vmem:[#allocation19_spill] sm:$0xff] %v18296_v8  ;;  %8321 = vmatprep.subr.bf16.mxu1 %v18273_v63  ;;  %v18317_v51 = vcombine.low %v15108_v53, %v15112_v3  ;;  %v18321_v49 = vcombine.low %v15109_v43, %v15113_v14  ;;  %v18323_v47 = vcombine.high %v15102_v39, %v15106_v59  ;;  %v15115_v6 = vld [vmem:[%s16545_s24 + $0x578] sm:$0xff] }
 0x23b   : > { %4926 = vst [vmem:[%s18221_s28 + $0x30] sm:$0xff] %v15583_v16  ;;  %20247 = vst [vmem:[#allocation20_spill] sm:$0xff] %v18300_v52  ;;  %15097 = vmatmul.mubr.msk.bf16.vlgmr.msra.gmra.mrb[52].mxu0 %vm329_vm0, %v18308_v38  ;;  %v18327_v45 = vcombine.high %v15103_v34, %v15107_v25  ;;  %v18335_v53 = vcombine.low %v15102_v39, %v15106_v59  ;;  %v18339_v3 = vcombine.low %v15103_v34, %v15107_v25 }
 0x23c   : > { %4927 = vst [vmem:[%s18221_s28 + $0x38] sm:$0xff] %v15584_v44  ;;  %15098 = vmatmul.mubr.msk.bf16.vlgmr.msra.gmra.mrb[52].mxu1 %vm329_vm0, %v18308_v38  ;;  %8279 = vmatpush1.bf16.msra.mxu0 %v18289_v0  ;;  %20248 = vst [vmem:[#allocation26_spill] sm:$0xff] %v18317_v51  ;;  %v18341_v54 = vcombine.high %v15110_v31, %v15114_v50  ;;  %v18344_v33 = vcombine.high %v15111_v55, %v15115_v6 }
 0x23d   : > { %8322 = vmatpush1.bf16.msra.mxu1 %v18294_v26  ;;  %8280 = vmatprep.subr.bf16.mxu0 %v18296_v8  ;;  %20249 = vst [vmem:[#allocation27_spill] sm:$0xff] %v18321_v49  ;;  %20250 = vst [vmem:[#allocation28_spill] sm:$0xff] %v18323_v47  ;;  %v18351_v61 = vcombine.low %v15110_v31, %v15114_v50  ;;  %v18355_v43 = vcombine.low %v15111_v55, %v15115_v6 }
 0x23e   : > { %8323 = vmatprep.subr.bf16.mxu1 %v18300_v52  ;;  %8310 = vmatprep.mubr.bf16.mxu0 %v20042_v17  ;;  %20251 = vst [vmem:[#allocation52_spill] sm:$0xff] %v18327_v45  ;;  %20252 = vst [vmem:[#allocation29_spill] sm:$0xff] %v18335_v53 }
 0x23f   : > { %8353 = vmatprep.mubr.bf16.mxu1 %v20042_v17  ;;  %20253 = vst [vmem:[#allocation30_spill] sm:$0xff] %v18339_v3  ;;  %20254 = vst [vmem:[#allocation31_spill] sm:$0xff] %v18341_v54 }
 0x240   : > { %8281 = vmatpush1.bf16.msra.mxu0 %v18317_v51  ;;  %20255 = vst [vmem:[#allocation32_spill] sm:$0xff] %v18344_v33  ;;  %20256 = vst [vmem:[#allocation33_spill] sm:$0xff] %v18351_v61 }
 0x241   : > { %8324 = vmatpush1.bf16.msra.mxu1 %v18321_v49  ;;  %8364 = vmatprep.subr.bf16.mxu0 %v18323_v47  ;;  %20257 = vst [vmem:[#allocation34_spill] sm:$0xff] %v18355_v43 }
 0x242   : > { %8407 = vmatprep.subr.bf16.mxu1 %v18327_v45 }
 0x243   : > { %15132 = vmatmul.mubr.msk.bf16.vlgmr.msra.gmra.mrb[48].mxu0 %vm329_vm0, %v17817_v58 }
 0x244   : > { %15133 = vmatmul.mubr.msk.bf16.vlgmr.msra.gmra.mrb[48].mxu1 %vm329_vm0, %v17817_v58  ;;  %8365 = vmatpush1.bf16.msra.mxu0 %v18335_v53 }
 0x245   : > { %8408 = vmatpush1.bf16.msra.mxu1 %v18339_v3  ;;  %8366 = vmatprep.subr.bf16.mxu0 %v18341_v54 }
 0x246   : > { %8409 = vmatprep.subr.bf16.mxu1 %v18344_v33  ;;  %8396 = vmatprep.mubr.bf16.mxu0 %v20042_v17 }
 0x247   : > { %8439 = vmatprep.mubr.bf16.mxu1 %v20042_v17 }
 0x248   : > { %8367 = vmatpush1.bf16.msra.mxu0 %v18351_v61 }
 0x249   : > { %8410 = vmatpush1.bf16.msra.mxu1 %v18355_v43  ;;  %8514 = vmatprep.subr.bf16.mxu0 %v20228_v13 }
 0x24a   : > { %8557 = vmatprep.subr.bf16.mxu1 %v17767_v4  ;;  %v20258_v4 = vld [vmem:[#allocation40_spill] sm:$0xff] }
 0x24b   : > { %15134 = vmatmul.mubr.msk.bf16.vlgmr.msra.gmra.mrb[52].mxu0 %vm329_vm0, %v17817_v58 }
 0x24c   : > { %15135 = vmatmul.mubr.msk.bf16.vlgmr.msra.gmra.mrb[52].mxu1 %vm329_vm0, %v17817_v58  ;;  %8515 = vmatpush1.bf16.msra.mxu0 %v17779_v22  ;;  %v20262_v22 = vld [vmem:[#allocation44_spill] sm:$0xff]  ;;  %v20271_v58 = vld [vmem:[#allocation22_spill] sm:$0xff] }
 0x24d   : > { %8558 = vmatpush1.bf16.msra.mxu1 %v17783_v12  ;;  %8516 = vmatprep.subr.bf16.mxu0 %v17785_v41  ;;  %v20263_v12 = vld [vmem:[#allocation45_spill] sm:$0xff]  ;;  %v20265_v41 = vld [vmem:[#allocation47_spill] sm:$0xff] }
 0x24e   : > { %8559 = vmatprep.subr.bf16.mxu1 %v17788_v21  ;;  %8546 = vmatprep.mubr.bf16.mxu0 %v20042_v17  ;;  %v20266_v21 = vld [vmem:[#allocation48_spill] sm:$0xff] }
 0x24f   : > { %8589 = vmatprep.mubr.bf16.mxu1 %v20042_v17 }
 0x250   : > { %8517 = vmatpush1.bf16.msra.mxu0 %v17799_v18  ;;  %v20267_v18 = vld [vmem:[#allocation49_spill] sm:$0xff] }
 0x251   : > { %8560 = vmatpush1.bf16.msra.mxu1 %v17803_v20  ;;  %8600 = vmatprep.subr.bf16.mxu0 %v17805_v1  ;;  %v20268_v20 = vld [vmem:[#allocation50_spill] sm:$0xff]  ;;  %v20269_v1 = vld [vmem:[#allocation51_spill] sm:$0xff] }
 0x252   : > { %8643 = vmatprep.subr.bf16.mxu1 %v17809_v23  ;;  %v20270_v23 = vld [vmem:[#allocation13_spill] sm:$0xff] }
 0x253   : > { %15136 = vmatmul.mubr.msk.bf16.vlgmr.msra.gmra.mrb[56].mxu0 %vm329_vm0, %v18134_v28 }
 0x254   : > { %15137 = vmatmul.mubr.msk.bf16.vlgmr.msra.gmra.mrb[56].mxu1 %vm329_vm0, %v18134_v28  ;;  %8601 = vmatpush1.bf16.msra.mxu0 %v17822_v30  ;;  %v20272_v30 = vld [vmem:[#allocation24_spill] sm:$0xff] }
 0x255   : > { %8644 = vmatpush1.bf16.msra.mxu1 %v17826_v11  ;;  %8602 = vmatprep.subr.bf16.mxu0 %v17828_v5  ;;  %v20273_v11 = vld [vmem:[#allocation35_spill] sm:$0xff] }
 0x256   : > { %8645 = vmatprep.subr.bf16.mxu1 %v17831_v36  ;;  %8632 = vmatprep.mubr.bf16.mxu0 %v20042_v17  ;;  %v20259_v36 = vld [vmem:[#allocation41_spill] sm:$0xff]  ;;  %v20274_v5 = vld [vmem:[#allocation15_spill] sm:$0xff] }
 0x257   : > { %8675 = vmatprep.mubr.bf16.mxu1 %v20042_v17 }
 0x258   : > { %8603 = vmatpush1.bf16.msra.mxu0 %v17838_v37 }
 0x259   : > { %8646 = vmatpush1.bf16.msra.mxu1 %v17842_v27  ;;  %8686 = vmatprep.subr.bf16.mxu0 %v20138_v42  ;;  %v20260_v42 = vld [vmem:[#allocation42_spill] sm:$0xff] }
 0x25a   : > { %8729 = vmatprep.subr.bf16.mxu1 %v20139_v32  ;;  %v20261_v32 = vld [vmem:[#allocation43_spill] sm:$0xff] }
 0x25b   : > { %15138 = vmatmul.mubr.msk.bf16.vlgmr.msra.gmra.mrb[60].mxu0 %vm329_vm0, %v18134_v28 }
 0x25c   : > { %15139 = vmatmul.mubr.msk.bf16.vlgmr.msra.gmra.mrb[60].mxu1 %vm329_vm0, %v18134_v28  ;;  %8687 = vmatpush1.bf16.msra.mxu0 %v17434_v46  ;;  %v16435_v46 = vld [vmem:[%s19815_s0] sm:$0xff]  }
 0x25d   : > { %8730 = vmatpush1.bf16.msra.mxu1 %v20145_v2  ;;  %8688 = vmatprep.subr.bf16.mxu0 %v20258_v4  ;;  %v20264_v2 = vld [vmem:[#allocation46_spill] sm:$0xff] }
 0x25e   : > { %8731 = vmatprep.subr.bf16.mxu1 %v20259_v36  ;;  %8718 = vmatprep.mubr.bf16.mxu0 %v20042_v17  ;;  %v15153_v36 = vld [vmem:[%s16545_s24 + $0x580] sm:$0xff] }
 0x25f   : > { %8761 = vmatprep.mubr.bf16.mxu1 %v20042_v17 }
 0x260   : > { %8689 = vmatpush1.bf16.msra.mxu0 %v20260_v42  ;;  %v15157_v42 = vld [vmem:[%s16545_s24 + $0x5a0] sm:$0xff] }
 0x261   : > { %8732 = vmatpush1.bf16.msra.mxu1 %v20261_v32  ;;  %8772 = vmatprep.subr.bf16.mxu0 %v20262_v22  ;;  %v15154_v32 = vld [vmem:[%s16545_s24 + $0x588] sm:$0xff] }
 0x262   : > { %8815 = vmatprep.subr.bf16.mxu1 %v20263_v12  ;;  %v15158_v22 = vld [vmem:[%s16545_s24 + $0x5a8] sm:$0xff]  ;;  %v18504_v12 = vcombine.high %v15153_v36, %v15157_v42 }
 0x263   : > { %15140 = vmatmul.mubr.msk.bf16.vlgmr.msra.gmra.mrb[56].mxu0 %vm329_vm0, %v16435_v46 }
 0x264   : > { %15141 = vmatmul.mubr.msk.bf16.vlgmr.msra.gmra.mrb[56].mxu1 %vm329_vm0, %v16435_v46  ;;  %8773 = vmatpush1.bf16.msra.mxu0 %v20264_v2  ;;  %20278 = vst [vmem:[#allocation6_spill] sm:$0xff] %v18504_v12  ;;  %v15161_v2 = vld [vmem:[%s16545_s24 + $0x5c0] sm:$0xff] }
 0x265   : > { %8816 = vmatpush1.bf16.msra.mxu1 %v20265_v41  ;;  %8774 = vmatprep.subr.bf16.mxu0 %v20266_v21  ;;  %v15165_v41 = vld [vmem:[%s16545_s24 + $0x5e0] sm:$0xff]  ;;  %v15162_v21 = vld [vmem:[%s16545_s24 + $0x5c8] sm:$0xff] }
 0x266   : > { %8817 = vmatprep.subr.bf16.mxu1 %v20267_v18  ;;  %8804 = vmatprep.mubr.bf16.mxu0 %v20042_v17  ;;  %v15166_v18 = vld [vmem:[%s16545_s24 + $0x5e8] sm:$0xff] }
 0x267   : > { %8847 = vmatprep.mubr.bf16.mxu1 %v20042_v17 }
 0x268   : > { %8775 = vmatpush1.bf16.msra.mxu0 %v20268_v20  ;;  %v18516_v20 = vcombine.low %v15153_v36, %v15157_v42  ;;  %v15156_v36 = vld [vmem:[%s16545_s24 + $0x598] sm:$0xff] }
 0x269   : > { %8818 = vmatpush1.bf16.msra.mxu1 %v20269_v1  ;;  %8858 = vmatprep.subr.bf16.mxu0 %v20270_v23  ;;  %v18520_v1 = vcombine.low %v15154_v32, %v15158_v22  ;;  %v15160_v42 = vld [vmem:[%s16545_s24 + $0x5b8] sm:$0xff] }
 0x26a   : > { %8901 = vmatprep.subr.bf16.mxu1 %v20271_v58 }
 0x26b   : > { %15142 = vmatmul.mubr.msk.bf16.vlgmr.msra.gmra.mrb[60].mxu0 %vm329_vm0, %v16435_v46  ;;  %20280 = vst [vmem:[#allocation8_spill] sm:$0xff] %v18520_v1 }
 0x26c   : > { %15143 = vmatmul.mubr.msk.bf16.vlgmr.msra.gmra.mrb[60].mxu1 %vm329_vm0, %v16435_v46  ;;  %8859 = vmatpush1.bf16.msra.mxu0 %v20272_v30  ;;  %v18508_v46 = vcombine.high %v15154_v32, %v15158_v22  ;;  %v18536_v32 = vcombine.low %v15161_v2, %v15165_v41  ;;  %v18540_v22 = vcombine.low %v15162_v21, %v15166_v18 }
 0x26d   : > { %8902 = vmatpush1.bf16.msra.mxu1 %v18040_v7  ;;  %8860 = vmatprep.subr.bf16.mxu0 %v20273_v11 }
 0x26e   : > { %8903 = vmatprep.subr.bf16.mxu1 %v18045_v62  ;;  %8890 = vmatprep.mubr.bf16.mxu0 %v20042_v17  ;;  %20279 = vst [vmem:[#allocation7_spill] sm:$0xff] %v18508_v46  ;;  %20283 = vst [vmem:[#allocation11_spill] sm:$0xff] %v18536_v32 }
 0x26f   : > { %8933 = vmatprep.mubr.bf16.mxu1 %v20042_v17  ;;  %20284 = vst [vmem:[#allocation12_spill] sm:$0xff] %v18540_v22 }
 0x270   : > { %8861 = vmatpush1.bf16.msra.mxu0 %v18056_v29 }
 0x271   : > { %8904 = vmatpush1.bf16.msra.mxu1 %v18060_v57  ;;  %8944 = vmatprep.subr.bf16.mxu0 %v18062_v35 }
 0x272   : > { %8987 = vmatprep.subr.bf16.mxu1 %v18066_v15 }
 0x273   : > { %15144 = vmatmul.mubr.msk.bf16.vlgmr.msra.gmra.mrb[56].mxu0 %vm329_vm0, %v20274_v5 }
 0x274   : > { %15145 = vmatmul.mubr.msk.bf16.vlgmr.msra.gmra.mrb[56].mxu1 %vm329_vm0, %v20274_v5  ;;  %8945 = vmatpush1.bf16.msra.mxu0 %v18074_v10 }
 0x275   : > { %8988 = vmatpush1.bf16.msra.mxu1 %v18078_v40  ;;  %8946 = vmatprep.subr.bf16.mxu0 %v18080_v48 }
 0x276   : > { %v18440_v37 = vpop.f32.mrb[32].mxu0  ;;  %8989 = vmatprep.subr.bf16.mxu1 %v18083_v19  ;;  %8976 = vmatprep.mubr.bf16.mxu0 %v20042_v17  ;;  %v18444_v27 = vpop.f32.mrb[32].mxu1 }
 0x277   : > { %v18446_v28 = vpop.f32.mrb[33].mxu0  ;;  %9019 = vmatprep.mubr.bf16.mxu1 %v20042_v17  ;;  %v18449_v13 = vpop.f32.mrb[33].mxu1 }
 0x278   : > { %v18451_v14 = vpop.f32.mrb[34].mxu0  ;;  %8947 = vmatpush1.bf16.msra.mxu0 %v18090_v60  ;;  %v18454_v16 = vpop.f32.mrb[34].mxu1 }
 0x279   : > { %8990 = vmatpush1.bf16.msra.mxu1 %v18094_v24  ;;  %v18457_v44 = vpop.f32.mrb[35].mxu0  ;;  %9046 = vmatprep.subr.bf16.mxu0 %v18246_v9  ;;  %v18460_v39 = vpop.f32.mrb[35].mxu1 }
 0x27a   : > { %9089 = vmatprep.subr.bf16.mxu1 %v18273_v63 }
 0x27b   : > { %15146 = vmatmul.mubr.msk.bf16.vlgmr.msra.gmra.mrb[60].mxu0 %vm329_vm0, %v20274_v5 }
 0x27c   : > { %15147 = vmatmul.mubr.msk.bf16.vlgmr.msra.gmra.mrb[60].mxu1 %vm329_vm0, %v20274_v5  ;;  %9047 = vmatpush1.bf16.msra.mxu0 %v18289_v0  ;;  %v18522_v5 = vcombine.high %v15161_v2, %v15165_v41  ;;  %v15164_v2 = vld [vmem:[%s16545_s24 + $0x5d8] sm:$0xff] }
 0x27d   : > { %9090 = vmatpush1.bf16.msra.mxu1 %v18294_v26  ;;  %9048 = vmatprep.subr.bf16.mxu0 %v18296_v8  ;;  %v15168_v41 = vld [vmem:[%s16545_s24 + $0x5f8] sm:$0xff] }
 0x27e   : > { %v18470_v59 = vpop.f32.mrb[36].mxu0  ;;  %9091 = vmatprep.subr.bf16.mxu1 %v18300_v52  ;;  %9078 = vmatprep.mubr.bf16.mxu0 %v20042_v17  ;;  %v18474_v34 = vpop.f32.mrb[36].mxu1  ;;  %20281 = vst [vmem:[#allocation9_spill] sm:$0xff] %v18522_v5 }
 0x27f   : > { %v18476_v25 = vpop.f32.mrb[37].mxu0  ;;  %9121 = vmatprep.mubr.bf16.mxu1 %v20042_v17  ;;  %v18479_v31 = vpop.f32.mrb[37].mxu1 }
 0x280   : > { %v18481_v50 = vpop.f32.mrb[38].mxu0  ;;  %9049 = vmatpush1.bf16.msra.mxu0 %v18317_v51  ;;  %v18484_v55 = vpop.f32.mrb[38].mxu1 }
 0x281   : > { %20275 = vst [vmem:[#allocation54_spill] sm:$0xff] %v18484_v55  ;;  %9092 = vmatpush1.bf16.msra.mxu1 %v18321_v49  ;;  %v18487_v6 = vpop.f32.mrb[39].mxu0  ;;  %9132 = vmatprep.subr.bf16.mxu0 %v18323_v47  ;;  %v18490_v4 = vpop.f32.mrb[39].mxu1  ;;  %v15159_v55 = vld [vmem:[%s16545_s24 + $0x5b0] sm:$0xff] }
 0x282   : > { %20276 = vst [vmem:[#allocation4_spill] sm:$0xff] %v18487_v6  ;;  %20277 = vst [vmem:[#allocation5_spill] sm:$0xff] %v18490_v4  ;;  %9175 = vmatprep.subr.bf16.mxu1 %v18327_v45  ;;  %v18525_v4 = vcombine.high %v15162_v21, %v15166_v18  ;;  %v15155_v6 = vld [vmem:[%s16545_s24 + $0x590] sm:$0xff]  ;;  %v18558_v21 = vcombine.low %v15156_v36, %v15160_v42 }
 0x283   : > { %15148 = vmatmul.mubr.msk.bf16.vlgmr.msra.gmra.mrb[56].mxu0 %vm329_vm0, %v18308_v38 }
 0x284   : > { %15149 = vmatmul.mubr.msk.bf16.vlgmr.msra.gmra.mrb[56].mxu1 %vm329_vm0, %v18308_v38  ;;  %9133 = vmatpush1.bf16.msra.mxu0 %v18335_v53  ;;  %20282 = vst [vmem:[#allocation10_spill] sm:$0xff] %v18525_v4  ;;  %20288 = vst [vmem:[#allocation40_spill] sm:$0xff] %v18558_v21 }
 0x285   : > { %9176 = vmatpush1.bf16.msra.mxu1 %v18339_v3  ;;  %9134 = vmatprep.subr.bf16.mxu0 %v18341_v54 }
 0x286   : > { %9177 = vmatprep.subr.bf16.mxu1 %v18344_v33  ;;  %9164 = vmatprep.mubr.bf16.mxu0 %v20042_v17 }
 0x287   : > { %9207 = vmatprep.mubr.bf16.mxu1 %v20042_v17 }
 0x288   : > { %9135 = vmatpush1.bf16.msra.mxu0 %v18351_v61 }
 0x289   : > { %9178 = vmatpush1.bf16.msra.mxu1 %v18355_v43  ;;  %9334 = vmatprep.subr.bf16.mxu0 %v18504_v12  ;;  %v18546_v12 = vcombine.high %v15156_v36, %v15160_v42  ;;  %v15163_v43 = vld [vmem:[%s16545_s24 + $0x5d0] sm:$0xff]  ;;  %v15209_v36 = vld [vmem:[%s16545_s24 + $0x420] sm:$0xff]  ;;  %v15206_v42 = vld [vmem:[%s16545_s24 + $0x408] sm:$0xff] }
 0x28a   : > { %9377 = vmatprep.subr.bf16.mxu1 %v18508_v46  ;;  %v18542_v46 = vcombine.high %v15155_v6, %v15159_v55 }
 0x28b   : > { %15150 = vmatmul.mubr.msk.bf16.vlgmr.msra.gmra.mrb[60].mxu0 %vm329_vm0, %v18308_v38  ;;  %20286 = vst [vmem:[#allocation21_spill] sm:$0xff] %v18546_v12 }
 0x28c   : > { %15151 = vmatmul.mubr.msk.bf16.vlgmr.msra.gmra.mrb[60].mxu1 %vm329_vm0, %v18308_v38  ;;  %9335 = vmatpush1.bf16.msra.mxu0 %v18516_v20  ;;  %20285 = vst [vmem:[#allocation14_spill] sm:$0xff] %v18542_v46  ;;  %v15167_v38 = vld [vmem:[%s16545_s24 + $0x5f0] sm:$0xff] }
 0x28d   : > { %9378 = vmatpush1.bf16.msra.mxu1 %v18520_v1  ;;  %9336 = vmatprep.subr.bf16.mxu0 %v18522_v5  ;;  %v18554_v1 = vcombine.low %v15155_v6, %v15159_v55  ;;  %v18560_v18 = vcombine.high %v15163_v43, %v15167_v38  ;;  %v16436_v5 = vld [vmem:[%s19815_s0 + $0x20] sm:$0xff]   ;;  %v18571_v55 = vcombine.low %v15163_v43, %v15167_v38  ;;  %v18595_v43 = vld [vmem:[%s19815_s0 + $0x8] sm:$0xff]  }
 0x28e   : > { %9379 = vmatprep.subr.bf16.mxu1 %v18525_v4  ;;  %9366 = vmatprep.mubr.bf16.mxu0 %v20042_v17  ;;  %v18563_v4 = vcombine.high %v15164_v2, %v15168_v41  ;;  %v18575_v6 = vcombine.low %v15164_v2, %v15168_v41  ;;  %v15210_v38 = vld [vmem:[%s16545_s24 + $0x428] sm:$0xff] }
 0x28f   : > { %9409 = vmatprep.mubr.bf16.mxu1 %v20042_v17  ;;  %20287 = vst [vmem:[#allocation23_spill] sm:$0xff] %v18554_v1  ;;  %20289 = vst [vmem:[#allocation41_spill] sm:$0xff] %v18560_v18  ;;  %v15264_v41 = vcombine.high %v15206_v42, %v15210_v38 }
 0x290   : > { %9337 = vmatpush1.bf16.msra.mxu0 %v18536_v32  ;;  %20290 = vst [vmem:[#allocation42_spill] sm:$0xff] %v18563_v4  ;;  %20291 = vst [vmem:[#allocation43_spill] sm:$0xff] %v18571_v55 }
 0x291   : > { %9380 = vmatpush1.bf16.msra.mxu1 %v18540_v22  ;;  %9420 = vmatprep.subr.bf16.mxu0 %v18542_v46  ;;  %20292 = vst [vmem:[#allocation44_spill] sm:$0xff] %v18575_v6 }
 0x292   : > { %9463 = vmatprep.subr.bf16.mxu1 %v18546_v12 }
 0x293   : > { %15185 = vmatmul.mubr.msk.bf16.vlgmr.msra.gmra.mrb[56].mxu0 %vm329_vm0, %v16436_v5 }
 0x294   : > { %15186 = vmatmul.mubr.msk.bf16.vlgmr.msra.gmra.mrb[56].mxu1 %vm329_vm0, %v16436_v5  ;;  %9421 = vmatpush1.bf16.msra.mxu0 %v18554_v1 }
 0x295   : > { %9464 = vmatpush1.bf16.msra.mxu1 %v18558_v21  ;;  %9422 = vmatprep.subr.bf16.mxu0 %v18560_v18 }
 0x296   : > { %9465 = vmatprep.subr.bf16.mxu1 %v18563_v4  ;;  %9452 = vmatprep.mubr.bf16.mxu0 %v20042_v17 }
 0x297   : > { %9495 = vmatprep.mubr.bf16.mxu1 %v20042_v17 }
 0x298   : > { %9423 = vmatpush1.bf16.msra.mxu0 %v18571_v55 }
 0x299   : > { %9466 = vmatpush1.bf16.msra.mxu1 %v18575_v6  ;;  %9751 = vmatprep.subr.bf16.mxu0 %v20270_v23 }
 0x29a   : > { %9794 = vmatprep.subr.bf16.mxu1 %v20271_v58 }
 0x29b   : > { %15187 = vmatmul.mubr.msk.bf16.vlgmr.msra.gmra.mrb[60].mxu0 %vm329_vm0, %v16436_v5 }
 0x29c   : > { %15188 = vmatmul.mubr.msk.bf16.vlgmr.msra.gmra.mrb[60].mxu1 %vm329_vm0, %v16436_v5  ;;  %9752 = vmatpush1.bf16.msra.mxu0 %v20272_v30  ;;  %v15205_v5 = vld [vmem:[%s16545_s24 + $0x400] sm:$0xff]  ;;  %v15212_v30 = vld [vmem:[%s16545_s24 + $0x438] sm:$0xff] }
 0x29d   : > { %9795 = vmatpush1.bf16.msra.mxu1 %v18040_v7  ;;  %9753 = vmatprep.subr.bf16.mxu0 %v20273_v11  ;;  %v15262_v2 = vcombine.high %v15205_v5, %v15209_v36  ;;  %v15211_v11 = vld [vmem:[%s16545_s24 + $0x430] sm:$0xff]  ;;  %v15208_v7 = vld [vmem:[%s16545_s24 + $0x418] sm:$0xff] }
 0x29e   : > { %9796 = vmatprep.subr.bf16.mxu1 %v18045_v62  ;;  %9783 = vmatprep.mubr.bf16.mxu0 %v20042_v17  ;;  %v15207_v62 = vld [vmem:[%s16545_s24 + $0x410] sm:$0xff] }
 0x29f   : > { %9826 = vmatprep.mubr.bf16.mxu1 %v20042_v17 }
 0x2a0   : > { %9754 = vmatpush1.bf16.msra.mxu0 %v18056_v29 }
 0x2a1   : > { %9797 = vmatpush1.bf16.msra.mxu1 %v18060_v57  ;;  %9837 = vmatprep.subr.bf16.mxu0 %v18062_v35  ;;  %v15217_v35 = vld [vmem:[%s16545_s24 + $0x460] sm:$0xff]  ;;  %v15214_v57 = vld [vmem:[%s16545_s24 + $0x448] sm:$0xff] }
 0x2a2   : > { %9880 = vmatprep.subr.bf16.mxu1 %v18066_v15  ;;  %v15213_v15 = vld [vmem:[%s16545_s24 + $0x440] sm:$0xff] }
 0x2a3   : > { %15256 = vmatmul.mubr.msk.bf16.vlgmr.msra.gmra.mrb[64].mxu0 %vm329_vm0, %v18595_v43 }
 0x2a4   : > { %15257 = vmatmul.mubr.msk.bf16.vlgmr.msra.gmra.mrb[64].mxu1 %vm329_vm0, %v18595_v43  ;;  %9838 = vmatpush1.bf16.msra.mxu0 %v18074_v10  ;;  %v15218_v10 = vld [vmem:[%s16545_s24 + $0x468] sm:$0xff] }
 0x2a5   : > { %9881 = vmatpush1.bf16.msra.mxu1 %v18078_v40  ;;  %9839 = vmatprep.subr.bf16.mxu0 %v18080_v48  ;;  %v15261_v40 = vcombine.low %v15205_v5, %v15209_v36  ;;  %v15270_v48 = vcombine.high %v15213_v15, %v15217_v35  ;;  %v15272_v29 = vcombine.high %v15214_v57, %v15218_v10 }
 0x2a6   : > { %9882 = vmatprep.subr.bf16.mxu1 %v18083_v19  ;;  %9869 = vmatprep.mubr.bf16.mxu0 %v20042_v17  ;;  %v15263_v19 = vcombine.low %v15206_v42, %v15210_v38  ;;  %v15269_v5 = vcombine.low %v15213_v15, %v15217_v35  ;;  %v15271_v36 = vcombine.low %v15214_v57, %v15218_v10 }
 0x2a7   : > { %9912 = vmatprep.mubr.bf16.mxu1 %v20042_v17  ;;  %v15266_v42 = vcombine.high %v15207_v62, %v15211_v11  ;;  %v15268_v38 = vcombine.high %v15208_v7, %v15212_v30  ;;  %v15267_v10 = vcombine.low %v15208_v7, %v15212_v30  ;;  %v18661_v7 = vld [vmem:[%s19815_s0 + $0x10] sm:$0xff]  }
 0x2a8   : > { %9840 = vmatpush1.bf16.msra.mxu0 %v18090_v60  ;;  %v15216_v60 = vld [vmem:[%s16545_s24 + $0x458] sm:$0xff] }
 0x2a9   : > { %9883 = vmatpush1.bf16.msra.mxu1 %v18094_v24  ;;  %10011 = vmatprep.subr.bf16.mxu0 %v15262_v2  ;;  %v15215_v2 = vld [vmem:[%s16545_s24 + $0x450] sm:$0xff]  ;;  %v18636_v24 = vld [vmem:[%s19815_s0] sm:$0xff]  }
 0x2aa   : > { %10054 = vmatprep.subr.bf16.mxu1 %v15264_v41  ;;  %v15219_v41 = vld [vmem:[%s16545_s24 + $0x470] sm:$0xff]  ;;  %20293 = vst [vmem:[#allocation45_spill] sm:$0xff] %v18636_v24 }
 0x2ab   : > { %15258 = vmatmul.mubr.msk.bf16.vlgmr.msra.gmra.mrb[68].mxu0 %vm329_vm0, %v18595_v43  ;;  %v15273_v35 = vcombine.low %v15215_v2, %v15219_v41 }
 0x2ac   : > { %15259 = vmatmul.mubr.msk.bf16.vlgmr.msra.gmra.mrb[68].mxu1 %vm329_vm0, %v18595_v43  ;;  %10012 = vmatpush1.bf16.msra.mxu0 %v15261_v40  ;;  %v15220_v40 = vld [vmem:[%s16545_s24 + $0x478] sm:$0xff] }
 0x2ad   : > { %10055 = vmatpush1.bf16.msra.mxu1 %v15263_v19  ;;  %10013 = vmatprep.subr.bf16.mxu0 %v15270_v48  ;;  %v15265_v19 = vcombine.low %v15207_v62, %v15211_v11  ;;  %v15276_v57 = vcombine.high %v15216_v60, %v15220_v40  ;;  %v15275_v15 = vcombine.low %v15216_v60, %v15220_v40  ;;  %v20294_v62 = vld [vmem:[#allocation53_spill] sm:$0xff] }
 0x2ae   : > { %10056 = vmatprep.subr.bf16.mxu1 %v15272_v29  ;;  %10043 = vmatprep.mubr.bf16.mxu0 %v20042_v17  ;;  %v15274_v29 = vcombine.high %v15215_v2, %v15219_v41  ;;  %v6370_v48 = vadd.f32 %v18440_v37, %v20294_v62  ;;  %v18668_v60 = vadd.f32 %v18444_v27, %v20294_v62  ;;  %v18684_v37 = vld [vmem:[%s16545_s24 + $0x620] sm:$0xff] }
 0x2af   : > { %10086 = vmatprep.mubr.bf16.mxu1 %v20042_v17  ;;  %v18672_v30 = vadd.f32 %v18446_v28, %v20294_v62  ;;  %v18676_v11 = vadd.f32 %v18449_v13, %v20294_v62  ;;  %v18688_v27 = vadd.f32 %v18451_v14, %v17579_v56  ;;  %v18692_v28 = vadd.f32 %v18454_v16, %v17579_v56 }
 0x2b0   : > { %10014 = vmatpush1.bf16.msra.mxu0 %v15269_v5  ;;  %v18681_v5 = vld [vmem:[%s16545_s24 + $0x600] sm:$0xff]  ;;  %v18696_v13 = vadd.f32 %v18457_v44, %v17579_v56  ;;  %v6386_v16 = vmax.f32 %v6370_v48, 0.0  ;;  %v6388_v44 = vmax.f32 %v18668_v60, 0.0  ;;  %v18740_v60 = vadd.f32 %v18479_v31, %v20294_v62 }
 0x2b1   : > { %10057 = vmatpush1.bf16.msra.mxu1 %v15271_v36  ;;  %10097 = vmatprep.subr.bf16.mxu0 %v15266_v42  ;;  %v18700_v36 = vadd.f32 %v18460_v39, %v17579_v56  ;;  %v18705_v42 = vadd.f32 %v18470_v59, %v20294_v62  ;;  %v18714_v14 = vcombine.high %v18681_v5, %v18684_v37  ;;  %v6387_v39 = vmax.f32 %v18672_v30, 0.0 }
 0x2b2   : > { %10140 = vmatprep.subr.bf16.mxu1 %v15268_v38  ;;  %v6389_v59 = vmax.f32 %v18676_v11, 0.0  ;;  %v6394_v38 = vmax.f32 %v18688_v27, 0.0  ;;  %v6396_v2 = vmax.f32 %v18692_v28, 0.0  ;;  %v6395_v41 = vmax.f32 %v18696_v13, 0.0  ;;  %v20296_v28 = vld [vmem:[#allocation54_spill] sm:$0xff] }
 0x2b3   : > { %15277 = vmatmul.mubr.msk.bf16.vlgmr.msra.gmra.mrb[64].mxu0 %vm329_vm0, %v18636_v24  ;;  %20295 = vst [vmem:[#allocation46_spill] sm:$0xff] %v18714_v14  ;;  %v6397_v40 = vmax.f32 %v18700_v36, 0.0  ;;  %v18744_v30 = vadd.f32 %v18481_v50, %v17579_v56  ;;  %v18751_v13 = vadd.f32 %v20296_v28, %v17579_v56  ;;  %v20297_v50 = vld [vmem:[#allocation34_spill] sm:$0xff]  ;;  %v20299_v28 = vld [vmem:[#allocation7_spill] sm:$0xff] }
 0x2b4   : > { %15278 = vmatmul.mubr.msk.bf16.vlgmr.msra.gmra.mrb[64].mxu1 %vm329_vm0, %v18636_v24  ;;  %10098 = vmatpush1.bf16.msra.mxu0 %v15265_v19 }
 0x2b5   : > { %10141 = vmatpush1.bf16.msra.mxu1 %v15267_v10  ;;  %10099 = vmatprep.subr.bf16.mxu0 %v15274_v29  ;;  %v18730_v29 = vadd.f32 %v18474_v34, %v20294_v62 }
 0x2b6   : > { %10142 = vmatprep.subr.bf16.mxu1 %v15276_v57  ;;  %10129 = vmatprep.mubr.bf16.mxu0 %v20042_v17  ;;  %v18734_v57 = vadd.f32 %v18476_v25, %v20294_v62 }
 0x2b7   : > { %10172 = vmatprep.mubr.bf16.mxu1 %v20042_v17 }
 0x2b8   : > { %10100 = vmatpush1.bf16.msra.mxu0 %v15273_v35 }
 0x2b9   : > { %10143 = vmatpush1.bf16.msra.mxu1 %v15275_v15  ;;  %10289 = vmatprep.subr.bf16.mxu0 %v18246_v9 }
 0x2ba   : > { %10332 = vmatprep.subr.bf16.mxu1 %v18273_v63 }
 0x2bb   : > { %15279 = vmatmul.mubr.msk.bf16.vlgmr.msra.gmra.mrb[68].mxu0 %vm329_vm0, %v18636_v24 }
 0x2bc   : > { %15280 = vmatmul.mubr.msk.bf16.vlgmr.msra.gmra.mrb[68].mxu1 %vm329_vm0, %v18636_v24  ;;  %10290 = vmatpush1.bf16.msra.mxu0 %v18289_v0 }
 0x2bd   : > { %10333 = vmatpush1.bf16.msra.mxu1 %v18294_v26  ;;  %10291 = vmatprep.subr.bf16.mxu0 %v18296_v8 }
 0x2be   : > { %10334 = vmatprep.subr.bf16.mxu1 %v18300_v52  ;;  %10321 = vmatprep.mubr.bf16.mxu0 %v20042_v17 }
 0x2bf   : > { %10364 = vmatprep.mubr.bf16.mxu1 %v20042_v17 }
 0x2c0   : > { %10292 = vmatpush1.bf16.msra.mxu0 %v18317_v51 }
 0x2c1   : > { %10335 = vmatpush1.bf16.msra.mxu1 %v18321_v49  ;;  %10375 = vmatprep.subr.bf16.mxu0 %v18323_v47 }
 0x2c2   : > { %10418 = vmatprep.subr.bf16.mxu1 %v18327_v45 }
 0x2c3   : > { %15316 = vmatmul.mubr.msk.bf16.vlgmr.msra.gmra.mrb[64].mxu0 %vm329_vm0, %v18661_v7 }
 0x2c4   : > { %15317 = vmatmul.mubr.msk.bf16.vlgmr.msra.gmra.mrb[64].mxu1 %vm329_vm0, %v18661_v7  ;;  %10376 = vmatpush1.bf16.msra.mxu0 %v18335_v53 }
 0x2c5   : > { %10419 = vmatpush1.bf16.msra.mxu1 %v18339_v3  ;;  %10377 = vmatprep.subr.bf16.mxu0 %v18341_v54 }
 0x2c6   : > { %v7256_v19 = vpop.f32.mrb[40].mxu0  ;;  %10420 = vmatprep.subr.bf16.mxu1 %v18344_v33  ;;  %10407 = vmatprep.mubr.bf16.mxu0 %v20042_v17  ;;  %v7299_v15 = vpop.f32.mrb[40].mxu1 }
 0x2c7   : > { %v7410_v35 = vadd.f32 %v7256_v19, %v20294_v62  ;;  %v7258_v48 = vpop.f32.mrb[41].mxu0  ;;  %10450 = vmatprep.mubr.bf16.mxu1 %v20042_v17  ;;  %v7412_v34 = vadd.f32 %v7299_v15, %v20294_v62  ;;  %v7301_v25 = vpop.f32.mrb[41].mxu1  ;;  %v20298_v15 = vld [vmem:[#allocation6_spill] sm:$0xff] }
 0x2c8   : > { %v7411_v11 = vadd.f32 %v7258_v48, %v20294_v62  ;;  %v7260_v27 = vpop.f32.mrb[42].mxu0  ;;  %10378 = vmatpush1.bf16.msra.mxu0 %v18351_v61  ;;  %v7413_v31 = vadd.f32 %v7301_v25, %v20294_v62  ;;  %v7303_v10 = vpop.f32.mrb[42].mxu1 }
 0x2c9   : > { %v7426_v36 = vmax.f32 %v7410_v35, 0.0  ;;  %v7418_v19 = vadd.f32 %v7260_v27, %v17579_v56  ;;  %10421 = vmatpush1.bf16.msra.mxu1 %v20297_v50  ;;  %v7262_v24 = vpop.f32.mrb[43].mxu0  ;;  %10583 = vmatprep.subr.bf16.mxu0 %v20298_v15  ;;  %v7428_v48 = vmax.f32 %v7412_v34, 0.0  ;;  %v7420_v23 = vadd.f32 %v7303_v10, %v17579_v56  ;;  %v7305_v33 = vpop.f32.mrb[43].mxu1 }
 0x2ca   : > { %v7427_v58 = vmax.f32 %v7411_v11, 0.0  ;;  %v7419_v61 = vadd.f32 %v7262_v24, %v17579_v56  ;;  %10626 = vmatprep.subr.bf16.mxu1 %v20299_v28  ;;  %v7429_v25 = vmax.f32 %v7413_v31, 0.0  ;;  %v7421_v27 = vadd.f32 %v7305_v33, %v17579_v56  ;;  %v20303_v24 = vld [vmem:[#allocation4_spill] sm:$0xff] }
 0x2cb   : > { %v18760_v35 = vmax.f32 %v6386_v16, %v7426_v36  ;;  %v7434_v54 = vmax.f32 %v7418_v19, 0.0  ;;  %15318 = vmatmul.mubr.msk.bf16.vlgmr.msra.gmra.mrb[68].mxu0 %vm329_vm0, %v18661_v7  ;;  %v18765_v50 = vmax.f32 %v6388_v44, %v7428_v48  ;;  %v7436_v11 = vmax.f32 %v7420_v23, 0.0  ;;  %v20306_v44 = vld [vmem:[#allocation8_spill] sm:$0xff] }
 0x2cc   : > { %v18767_v34 = vmax.f32 %v6387_v39, %v7427_v58  ;;  %v7435_v10 = vmax.f32 %v7419_v61, 0.0  ;;  %15319 = vmatmul.mubr.msk.bf16.vlgmr.msra.gmra.mrb[68].mxu1 %vm329_vm0, %v18661_v7  ;;  %10584 = vmatpush1.bf16.msra.mxu0 %v18516_v20  ;;  %v18774_v16 = vadd.f32 %v20303_v24, %v17579_v56  ;;  %v18776_v36 = vmax.f32 %v6389_v59, %v7429_v25  ;;  %v20307_v58 = vld [vmem:[#allocation9_spill] sm:$0xff]  ;;  %v20310_v24 = vld [vmem:[#allocation10_spill] sm:$0xff] }
 0x2cd   : > { %20300 = vst [vmem:[#allocation47_spill] sm:$0xff] %v18760_v35  ;;  %20301 = vst [vmem:[#allocation48_spill] sm:$0xff] %v18765_v50  ;;  %v18778_v33 = vmax.f32 %v6394_v38, %v7434_v54  ;;  %v7437_v31 = vmax.f32 %v7421_v27, 0.0  ;;  %10627 = vmatpush1.bf16.msra.mxu1 %v20306_v44  ;;  %10585 = vmatprep.subr.bf16.mxu0 %v20307_v58  ;;  %v6392_v61 = vmax.f32 %v18730_v29, 0.0  ;;  %v6391_v23 = vmax.f32 %v18734_v57, 0.0  ;;  %v20312_v57 = vld [vmem:[#allocation5_spill] sm:$0xff] }
 0x2ce   : > { %20302 = vst [vmem:[#allocation49_spill] sm:$0xff] %v18767_v34  ;;  %20304 = vst [vmem:[#allocation50_spill] sm:$0xff] %v18776_v36  ;;  %v18784_v39 = vmax.f32 %v6396_v2, %v7436_v11  ;;  %v18786_v19 = vmax.f32 %v6395_v41, %v7435_v10  ;;  %v7342_v48 = vpop.f32.mrb[44].mxu0  ;;  %10628 = vmatprep.subr.bf16.mxu1 %v20310_v24  ;;  %10615 = vmatprep.mubr.bf16.mxu0 %v20042_v17  ;;  %v6393_v54 = vmax.f32 %v18740_v60, 0.0  ;;  %v7385_v29 = vpop.f32.mrb[44].mxu1  ;;  %v18799_v2 = vld [vmem:[%s19815_s0 + $0x18] sm:$0xff]  }
 0x2cf   : > { %20305 = vst [vmem:[#allocation51_spill] sm:$0xff] %v18778_v33  ;;  %v6398_v59 = vmax.f32 %v18744_v30, 0.0  ;;  %v18792_v38 = vmax.f32 %v6397_v40, %v7437_v31  ;;  %v7414_v25 = vadd.f32 %v7342_v48, %v20294_v62  ;;  %v7344_v27 = vpop.f32.mrb[45].mxu0  ;;  %10658 = vmatprep.mubr.bf16.mxu1 %v20042_v17  ;;  %v6400_v41 = vmax.f32 %v18751_v13, 0.0  ;;  %v7387_v11 = vpop.f32.mrb[45].mxu1 }
 0x2d0   : > { %20308 = vst [vmem:[#allocation15_spill] sm:$0xff] %v18784_v39  ;;  %20309 = vst [vmem:[#allocation54_spill] sm:$0xff] %v18786_v19  ;;  %v6385_v60 = vadd.f32 %v20312_v57, %v17579_v56  ;;  %v7416_v30 = vadd.f32 %v7385_v29, %v20294_v62  ;;  %v7415_v40 = vadd.f32 %v7344_v27, %v20294_v62  ;;  %v7346_v10 = vpop.f32.mrb[46].mxu0  ;;  %10586 = vmatpush1.bf16.msra.mxu0 %v18536_v32  ;;  %v7389_v13 = vpop.f32.mrb[46].mxu1 }
 0x2d1   : > { %20311 = vst [vmem:[#allocation6_spill] sm:$0xff] %v18792_v38  ;;  %v6399_v31 = vmax.f32 %v18774_v16, 0.0  ;;  %v7430_v48 = vmax.f32 %v7414_v25, 0.0  ;;  %v7417_v38 = vadd.f32 %v7387_v11, %v20294_v62  ;;  %v7422_v19 = vadd.f32 %v7346_v10, %v17579_v56  ;;  %10629 = vmatpush1.bf16.msra.mxu1 %v18540_v22  ;;  %v7348_v57 = vpop.f32.mrb[47].mxu0  ;;  %10669 = vmatprep.subr.bf16.mxu0 %v18542_v46  ;;  %v7391_v16 = vpop.f32.mrb[47].mxu1 }
 0x2d2   : > { %v7432_v29 = vmax.f32 %v7416_v30, 0.0  ;;  %v7431_v27 = vmax.f32 %v7415_v40, 0.0  ;;  %v7424_v39 = vadd.f32 %v7389_v13, %v17579_v56  ;;  %v7423_v33 = vadd.f32 %v7348_v57, %v17579_v56  ;;  %10712 = vmatprep.subr.bf16.mxu1 %v18546_v12  ;;  %v15363_v30 = vld [vmem:[%s16545_s24 + $0x608] sm:$0xff] }
 0x2d3   : > { %v20313_v25 = vmax.f32 %v18705_v42, 0.0  ;;  %v7433_v10 = vmax.f32 %v7417_v38, 0.0  ;;  %v7438_v36 = vmax.f32 %v7422_v19, 0.0  ;;  %v7425_v34 = vadd.f32 %v7391_v16, %v17579_v56  ;;  %15355 = vmatmul.mubr.msk.bf16.vlgmr.msra.gmra.mrb[64].mxu0 %vm329_vm0, %v18799_v2  ;;  %v15367_v40 = vld [vmem:[%s16545_s24 + $0x628] sm:$0xff] }
 0x2d4   : > { %v18824_v50 = vmax.f32 %v6392_v61, %v7432_v29  ;;  %v18826_v13 = vmax.f32 %v6391_v23, %v7431_v27  ;;  %v7440_v57 = vmax.f32 %v7424_v39, 0.0  ;;  %v7439_v35 = vmax.f32 %v7423_v33, 0.0  ;;  %15356 = vmatmul.mubr.msk.bf16.vlgmr.msra.gmra.mrb[64].mxu1 %vm329_vm0, %v18799_v2  ;;  %10670 = vmatpush1.bf16.msra.mxu0 %v18554_v1  ;;  %v15364_v29 = vld [vmem:[%s16545_s24 + $0x610] sm:$0xff] }
 0x2d5   : > { %v18817_v11 = vmax.f32 %v20313_v25, %v7430_v48  ;;  %v6401_v42 = vmax.f32 %v6385_v60, 0.0  ;;  %v18831_v19 = vmax.f32 %v6393_v54, %v7433_v10  ;;  %v18833_v38 = vmax.f32 %v6398_v59, %v7438_v36  ;;  %10713 = vmatpush1.bf16.msra.mxu1 %v18558_v21  ;;  %10671 = vmatprep.subr.bf16.mxu0 %v18560_v18  ;;  %v15370_v54 = vld [vmem:[%s16545_s24 + $0x640] sm:$0xff]  ;;  %v15371_v59 = vld [vmem:[%s16545_s24 + $0x648] sm:$0xff]  ;;  %v15368_v27 = vld [vmem:[%s16545_s24 + $0x630] sm:$0xff] }
 0x2d6   : > { %v7441_v61 = vmax.f32 %v7425_v34, 0.0  ;;  %v18837_v23 = vmax.f32 %v6400_v41, %v7440_v57  ;;  %v18839_v33 = vmax.f32 %v6399_v31, %v7439_v35  ;;  %10714 = vmatprep.subr.bf16.mxu1 %v18563_v4  ;;  %10701 = vmatprep.mubr.bf16.mxu0 %v20042_v17  ;;  %v18843_v39 = vcombine.high %v15363_v30, %v15367_v40  ;;  %v15374_v36 = vld [vmem:[%s16545_s24 + $0x660] sm:$0xff]  ;;  %v15375_v41 = vld [vmem:[%s16545_s24 + $0x668] sm:$0xff]  ;;  %v15376_v57 = vld [vmem:[%s16545_s24 + $0x670] sm:$0xff] }
 0x2d7   : > { %10744 = vmatprep.mubr.bf16.mxu1 %v20042_v17  ;;  %v18855_v35 = vcombine.low %v18681_v5, %v18684_v37  ;;  %v18859_v60 = vcombine.low %v15363_v30, %v15367_v40  ;;  %v18861_v31 = vcombine.high %v15370_v54, %v15374_v36  ;;  %v18864_v48 = vcombine.high %v15371_v59, %v15375_v41  ;;  %v15365_v5 = vld [vmem:[%s16545_s24 + $0x618] sm:$0xff]  ;;  %v15372_v40 = vld [vmem:[%s16545_s24 + $0x650] sm:$0xff] }
 0x2d8   : > { %v18847_v34 = vmax.f32 %v6401_v42, %v7441_v61  ;;  %10672 = vmatpush1.bf16.msra.mxu0 %v18571_v55  ;;  %v15369_v37 = vld [vmem:[%s16545_s24 + $0x638] sm:$0xff]  ;;  %v18875_v16 = vcombine.low %v15370_v54, %v15374_v36  ;;  %v18879_v25 = vcombine.low %v15371_v59, %v15375_v41  ;;  %v18881_v10 = vcombine.high %v15364_v29, %v15368_v27  ;;  %v18893_v42 = vld [vmem:[%s19815_s0 + $0x20] sm:$0xff]  }
 0x2d9   : > { %10715 = vmatpush1.bf16.msra.mxu1 %v18575_v6  ;;  %10881 = vmatprep.subr.bf16.mxu0 %v18714_v14  ;;  %v18885_v30 = vcombine.high %v15365_v5, %v15369_v37  ;;  %v15373_v61 = vld [vmem:[%s16545_s24 + $0x658] sm:$0xff]  ;;  %v18898_v36 = vcombine.low %v15364_v29, %v15368_v27  ;;  %v18902_v59 = vcombine.low %v15365_v5, %v15369_v37  ;;  %v20315_v5 = vld [vmem:[#allocation31_spill] sm:$0xff]  ;;  %v20316_v37 = vld [vmem:[#allocation32_spill] sm:$0xff] }
 0x2da   : > { %20314 = vst [vmem:[#allocation7_spill] sm:$0xff] %v18847_v34  ;;  %10924 = vmatprep.subr.bf16.mxu1 %v18843_v39  ;;  %v15377_v54 = vld [vmem:[%s16545_s24 + $0x678] sm:$0xff]  ;;  %v18904_v41 = vcombine.high %v15372_v40, %v15376_v57  ;;  %v18914_v29 = vcombine.low %v15372_v40, %v15376_v57  ;;  %v20318_v57 = vld [vmem:[#allocation34_spill] sm:$0xff] }
 0x2db   : > { %15357 = vmatmul.mubr.msk.bf16.vlgmr.msra.gmra.mrb[68].mxu0 %vm329_vm0, %v18799_v2  ;;  %v18907_v34 = vcombine.high %v15373_v61, %v15377_v54  ;;  %v18918_v27 = vcombine.low %v15373_v61, %v15377_v54  ;;  %v20317_v40 = vld [vmem:[#allocation33_spill] sm:$0xff]  ;;  %v20320_v54 = vld [vmem:[#allocation22_spill] sm:$0xff] }
 0x2dc   : > { %15358 = vmatmul.mubr.msk.bf16.vlgmr.msra.gmra.mrb[68].mxu1 %vm329_vm0, %v18799_v2  ;;  %10882 = vmatpush1.bf16.msra.mxu0 %v18855_v35  ;;  %v20319_v61 = vld [vmem:[#allocation13_spill] sm:$0xff] }
 0x2dd   : > { %10925 = vmatpush1.bf16.msra.mxu1 %v18859_v60  ;;  %10883 = vmatprep.subr.bf16.mxu0 %v18861_v31 }
 0x2de   : > { %10926 = vmatprep.subr.bf16.mxu1 %v18864_v48  ;;  %10913 = vmatprep.mubr.bf16.mxu0 %v20042_v17 }
 0x2df   : > { %10956 = vmatprep.mubr.bf16.mxu1 %v20042_v17 }
 0x2e0   : > { %10884 = vmatpush1.bf16.msra.mxu0 %v18875_v16 }
 0x2e1   : > { %10927 = vmatpush1.bf16.msra.mxu1 %v18879_v25  ;;  %10967 = vmatprep.subr.bf16.mxu0 %v18881_v10 }
 0x2e2   : > { %11010 = vmatprep.subr.bf16.mxu1 %v18885_v30 }
 0x2e3   : > { %15395 = vmatmul.mubr.msk.bf16.vlgmr.msra.gmra.mrb[64].mxu0 %vm329_vm0, %v18893_v42 }
 0x2e4   : > { %15396 = vmatmul.mubr.msk.bf16.vlgmr.msra.gmra.mrb[64].mxu1 %vm329_vm0, %v18893_v42  ;;  %10968 = vmatpush1.bf16.msra.mxu0 %v18898_v36 }
 0x2e5   : > { %11011 = vmatpush1.bf16.msra.mxu1 %v18902_v59  ;;  %10969 = vmatprep.subr.bf16.mxu0 %v18904_v41 }
 0x2e6   : > { %11012 = vmatprep.subr.bf16.mxu1 %v18907_v34  ;;  %10999 = vmatprep.mubr.bf16.mxu0 %v20042_v17 }
 0x2e7   : > { %11042 = vmatprep.mubr.bf16.mxu1 %v20042_v17 }
 0x2e8   : > { %10970 = vmatpush1.bf16.msra.mxu0 %v18914_v29 }
 0x2e9   : > { %11013 = vmatpush1.bf16.msra.mxu1 %v18918_v27  ;;  %11101 = vmatprep.subr.bf16.mxu0 %v18246_v9 }
 0x2ea   : > { %11144 = vmatprep.subr.bf16.mxu1 %v18273_v63 }
 0x2eb   : > { %15397 = vmatmul.mubr.msk.bf16.vlgmr.msra.gmra.mrb[68].mxu0 %vm329_vm0, %v18893_v42 }
 0x2ec   : > { %15398 = vmatmul.mubr.msk.bf16.vlgmr.msra.gmra.mrb[68].mxu1 %vm329_vm0, %v18893_v42  ;;  %11102 = vmatpush1.bf16.msra.mxu0 %v18289_v0 }
 0x2ed   : > { %11145 = vmatpush1.bf16.msra.mxu1 %v18294_v26  ;;  %11103 = vmatprep.subr.bf16.mxu0 %v18296_v8 }
 0x2ee   : > { %11146 = vmatprep.subr.bf16.mxu1 %v18300_v52  ;;  %11133 = vmatprep.mubr.bf16.mxu0 %v20042_v17 }
 0x2ef   : > { %11176 = vmatprep.mubr.bf16.mxu1 %v20042_v17 }
 0x2f0   : > { %11104 = vmatpush1.bf16.msra.mxu0 %v18317_v51 }
 0x2f1   : > { %11147 = vmatpush1.bf16.msra.mxu1 %v18321_v49  ;;  %11187 = vmatprep.subr.bf16.mxu0 %v18323_v47 }
 0x2f2   : > { %11230 = vmatprep.subr.bf16.mxu1 %v18327_v45  ;;  %v20329_v45 = vld [vmem:[#allocation45_spill] sm:$0xff] }
 0x2f3   : > { %15399 = vmatmul.mubr.msk.bf16.vlgmr.msra.gmra.mrb[72].mxu0 %vm329_vm0, %v18595_v43 }
 0x2f4   : > { %15400 = vmatmul.mubr.msk.bf16.vlgmr.msra.gmra.mrb[72].mxu1 %vm329_vm0, %v18595_v43  ;;  %11188 = vmatpush1.bf16.msra.mxu0 %v18335_v53  ;;  %v20324_v53 = vld [vmem:[#allocation3_spill] sm:$0xff] }
 0x2f5   : > { %11231 = vmatpush1.bf16.msra.mxu1 %v18339_v3  ;;  %11189 = vmatprep.subr.bf16.mxu0 %v20315_v5  ;;  %v20321_v5 = vld [vmem:[#allocation24_spill] sm:$0xff]  ;;  %v20323_v3 = vld [vmem:[#allocation35_spill] sm:$0xff] }
 0x2f6   : > { %11232 = vmatprep.subr.bf16.mxu1 %v20316_v37  ;;  %11219 = vmatprep.mubr.bf16.mxu0 %v20042_v17  ;;  %v20322_v37 = vld [vmem:[#allocation25_spill] sm:$0xff] }
 0x2f7   : > { %11262 = vmatprep.mubr.bf16.mxu1 %v20042_v17 }
 0x2f8   : > { %11190 = vmatpush1.bf16.msra.mxu0 %v20317_v40  ;;  %v20328_v40 = vld [vmem:[#allocation55_spill] sm:$0xff] }
 0x2f9   : > { %11233 = vmatpush1.bf16.msra.mxu1 %v20318_v57  ;;  %11273 = vmatprep.subr.bf16.mxu0 %v20319_v61  ;;  %v20325_v61 = vld [vmem:[#allocation38_spill] sm:$0xff]  ;;  %v20327_v57 = vld [vmem:[#allocation39_spill] sm:$0xff] }
 0x2fa   : > { %11316 = vmatprep.subr.bf16.mxu1 %v20320_v54  ;;  %v20326_v54 = vld [vmem:[#allocation36_spill] sm:$0xff] }
 0x2fb   : > { %15401 = vmatmul.mubr.msk.bf16.vlgmr.msra.gmra.mrb[76].mxu0 %vm329_vm0, %v18595_v43 }
 0x2fc   : > { %15402 = vmatmul.mubr.msk.bf16.vlgmr.msra.gmra.mrb[76].mxu1 %vm329_vm0, %v18595_v43  ;;  %11274 = vmatpush1.bf16.msra.mxu0 %v20321_v5  ;;  %v20332_v5 = vld [vmem:[#allocation57_spill] sm:$0xff] }
 0x2fd   : > { %11317 = vmatpush1.bf16.msra.mxu1 %v20322_v37  ;;  %11275 = vmatprep.subr.bf16.mxu0 %v20323_v3  ;;  %v20330_v3 = vld [vmem:[#allocation56_spill] sm:$0xff]  ;;  %v20333_v37 = vld [vmem:[#allocation58_spill] sm:$0xff] }
 0x2fe   : > { %11318 = vmatprep.subr.bf16.mxu1 %v20324_v53  ;;  %11305 = vmatprep.mubr.bf16.mxu0 %v20042_v17  ;;  %v20331_v53 = vld [vmem:[#allocation37_spill] sm:$0xff] }
 0x2ff   : > { %11348 = vmatprep.mubr.bf16.mxu1 %v20042_v17 }
 0x300   : > { %11276 = vmatpush1.bf16.msra.mxu0 %v20325_v61 }
 0x301   : > { %11319 = vmatpush1.bf16.msra.mxu1 %v20326_v54  ;;  %11359 = vmatprep.subr.bf16.mxu0 %v20327_v57  ;;  %v20334_v57 = vld [vmem:[#allocation59_spill] sm:$0xff] }
 0x302   : > { %11402 = vmatprep.subr.bf16.mxu1 %v20328_v40  ;;  %v20335_v40 = vld [vmem:[#allocation60_spill] sm:$0xff] }
 0x303   : > { %15403 = vmatmul.mubr.msk.bf16.vlgmr.msra.gmra.mrb[72].mxu0 %vm329_vm0, %v20329_v45 }
 0x304   : > { %15404 = vmatmul.mubr.msk.bf16.vlgmr.msra.gmra.mrb[72].mxu1 %vm329_vm0, %v20329_v45  ;;  %11360 = vmatpush1.bf16.msra.mxu0 %v20330_v3 }
 0x305   : > { %11403 = vmatpush1.bf16.msra.mxu1 %v20331_v53  ;;  %11361 = vmatprep.subr.bf16.mxu0 %v20332_v5 }
 0x306   : > { %11404 = vmatprep.subr.bf16.mxu1 %v20333_v37  ;;  %11391 = vmatprep.mubr.bf16.mxu0 %v20042_v17 }
 0x307   : > { %11434 = vmatprep.mubr.bf16.mxu1 %v20042_v17 }
 0x308   : > { %11362 = vmatpush1.bf16.msra.mxu0 %v20334_v57 }
 0x309   : > { %11405 = vmatpush1.bf16.msra.mxu1 %v20335_v40  ;;  %11445 = vmatprep.subr.bf16.mxu0 %v20298_v15 }
 0x30a   : > { %11488 = vmatprep.subr.bf16.mxu1 %v20299_v28 }
 0x30b   : > { %15405 = vmatmul.mubr.msk.bf16.vlgmr.msra.gmra.mrb[76].mxu0 %vm329_vm0, %v20329_v45 }
 0x30c   : > { %15406 = vmatmul.mubr.msk.bf16.vlgmr.msra.gmra.mrb[76].mxu1 %vm329_vm0, %v20329_v45  ;;  %11446 = vmatpush1.bf16.msra.mxu0 %v18516_v20 }
 0x30d   : > { %11489 = vmatpush1.bf16.msra.mxu1 %v20306_v44  ;;  %11447 = vmatprep.subr.bf16.mxu0 %v20307_v58 }
 0x30e   : > { %11490 = vmatprep.subr.bf16.mxu1 %v20310_v24  ;;  %11477 = vmatprep.mubr.bf16.mxu0 %v20042_v17 }
 0x30f   : > { %11520 = vmatprep.mubr.bf16.mxu1 %v20042_v17 }
 0x310   : > { %11448 = vmatpush1.bf16.msra.mxu0 %v18536_v32 }
 0x311   : > { %11491 = vmatpush1.bf16.msra.mxu1 %v18540_v22  ;;  %11531 = vmatprep.subr.bf16.mxu0 %v18542_v46 }
 0x312   : > { %11574 = vmatprep.subr.bf16.mxu1 %v18546_v12 }
 0x313   : > { %15407 = vmatmul.mubr.msk.bf16.vlgmr.msra.gmra.mrb[72].mxu0 %vm329_vm0, %v18661_v7 }
 0x314   : > { %15408 = vmatmul.mubr.msk.bf16.vlgmr.msra.gmra.mrb[72].mxu1 %vm329_vm0, %v18661_v7  ;;  %11532 = vmatpush1.bf16.msra.mxu0 %v18554_v1 }
 0x315   : > { %11575 = vmatpush1.bf16.msra.mxu1 %v18558_v21  ;;  %11533 = vmatprep.subr.bf16.mxu0 %v18560_v18 }
 0x316   : > { %v8312_v61 = vpop.f32.mrb[48].mxu0  ;;  %11576 = vmatprep.subr.bf16.mxu1 %v18563_v4  ;;  %11563 = vmatprep.mubr.bf16.mxu0 %v20042_v17 }
 0x317   : > { %v8466_v54 = vadd.f32 %v8312_v61, %v20294_v62  ;;  %v8355_v3 = vpop.f32.mrb[48].mxu1  ;;  %v8314_v53 = vpop.f32.mrb[49].mxu0  ;;  %11606 = vmatprep.mubr.bf16.mxu1 %v20042_v17 }
 0x318   : > { %v8468_v5 = vadd.f32 %v8355_v3, %v20294_v62  ;;  %v8467_v37 = vadd.f32 %v8314_v53, %v20294_v62  ;;  %v8357_v57 = vpop.f32.mrb[49].mxu1  ;;  %v8316_v40 = vpop.f32.mrb[50].mxu0  ;;  %11534 = vmatpush1.bf16.msra.mxu0 %v18571_v55 }
 0x319   : > { %v8482_v45 = vmax.f32 %v8466_v54, 0.0  ;;  %v8469_v47 = vadd.f32 %v8357_v57, %v20294_v62  ;;  %v8474_v49 = vadd.f32 %v8316_v40, %v17579_v56  ;;  %v8359_v51 = vpop.f32.mrb[50].mxu1  ;;  %11577 = vmatpush1.bf16.msra.mxu1 %v18575_v6  ;;  %v8318_v61 = vpop.f32.mrb[51].mxu0  ;;  %11633 = vmatprep.subr.bf16.mxu0 %v18714_v14  ;;  %v20336_v54 = vld [vmem:[#allocation47_spill] sm:$0xff]  ;;  %v20338_v14 = vld [vmem:[#allocation48_spill] sm:$0xff] }
 0x31a   : > { %v8484_v52 = vmax.f32 %v8468_v5, 0.0  ;;  %v8483_v8 = vmax.f32 %v8467_v37, 0.0  ;;  %v8476_v3 = vadd.f32 %v8359_v51, %v17579_v56  ;;  %v8475_v53 = vadd.f32 %v8318_v61, %v17579_v56  ;;  %v8361_v26 = vpop.f32.mrb[51].mxu1  ;;  %11676 = vmatprep.subr.bf16.mxu1 %v18843_v39  ;;  %v20340_v37 = vld [vmem:[#allocation49_spill] sm:$0xff] }
 0x31b   : > { %v19019_v0 = vmax.f32 %v20336_v54, %v8482_v45  ;;  %v8485_v57 = vmax.f32 %v8469_v47, 0.0  ;;  %v8490_v40 = vmax.f32 %v8474_v49, 0.0  ;;  %v8477_v63 = vadd.f32 %v8361_v26, %v17579_v56  ;;  %15409 = vmatmul.mubr.msk.bf16.vlgmr.msra.gmra.mrb[76].mxu0 %vm329_vm0, %v18661_v7  ;;  %v20342_v47 = vld [vmem:[#allocation50_spill] sm:$0xff]  ;;  %v20344_v26 = vld [vmem:[#allocation51_spill] sm:$0xff] }
 0x31c   : > { %v19025_v5 = vmax.f32 %v20338_v14, %v8484_v52  ;;  %v19028_v51 = vmax.f32 %v20340_v37, %v8483_v8  ;;  %v8492_v61 = vmax.f32 %v8476_v3, 0.0  ;;  %v8491_v9 = vmax.f32 %v8475_v53, 0.0  ;;  %15410 = vmatmul.mubr.msk.bf16.vlgmr.msra.gmra.mrb[76].mxu1 %vm329_vm0, %v18661_v7  ;;  %11634 = vmatpush1.bf16.msra.mxu0 %v18855_v35  ;;  %v20346_v8 = vld [vmem:[#allocation15_spill] sm:$0xff]  ;;  %v20348_v14 = vld [vmem:[#allocation54_spill] sm:$0xff] }
 0x31d   : > { %20337 = vst [vmem:[#allocation4_spill] sm:$0xff] %v19019_v0  ;;  %v19034_v49 = vmax.f32 %v20342_v47, %v8485_v57  ;;  %v19037_v45 = vmax.f32 %v20344_v26, %v8490_v40  ;;  %v8493_v54 = vmax.f32 %v8477_v63, 0.0  ;;  %11677 = vmatpush1.bf16.msra.mxu1 %v18859_v60  ;;  %11635 = vmatprep.subr.bf16.mxu0 %v18861_v31  ;;  %v20350_v57 = vld [vmem:[#allocation6_spill] sm:$0xff] }
 0x31e   : > { %20339 = vst [vmem:[#allocation5_spill] sm:$0xff] %v19025_v5  ;;  %20341 = vst [vmem:[#allocation13_spill] sm:$0xff] %v19028_v51  ;;  %v19042_v52 = vmax.f32 %v20346_v8, %v8492_v61  ;;  %v19045_v3 = vmax.f32 %v20348_v14, %v8491_v9  ;;  %v8398_v53 = vpop.f32.mrb[52].mxu0  ;;  %11678 = vmatprep.subr.bf16.mxu1 %v18864_v48  ;;  %11665 = vmatprep.mubr.bf16.mxu0 %v20042_v17 }
 0x31f   : > { %20343 = vst [vmem:[#allocation22_spill] sm:$0xff] %v19034_v49  ;;  %20345 = vst [vmem:[#allocation24_spill] sm:$0xff] %v19037_v45  ;;  %v19050_v37 = vmax.f32 %v20350_v57, %v8493_v54  ;;  %v8470_v63 = vadd.f32 %v8398_v53, %v20294_v62  ;;  %v8441_v40 = vpop.f32.mrb[52].mxu1  ;;  %v8400_v47 = vpop.f32.mrb[53].mxu0  ;;  %11708 = vmatprep.mubr.bf16.mxu1 %v20042_v17 }
 0x320   : > { %20347 = vst [vmem:[#allocation25_spill] sm:$0xff] %v19042_v52  ;;  %20349 = vst [vmem:[#allocation35_spill] sm:$0xff] %v19045_v3  ;;  %v8472_v61 = vadd.f32 %v8441_v40, %v20294_v62  ;;  %v8471_v26 = vadd.f32 %v8400_v47, %v20294_v62  ;;  %v8443_v9 = vpop.f32.mrb[53].mxu1  ;;  %v8402_v8 = vpop.f32.mrb[54].mxu0  ;;  %11636 = vmatpush1.bf16.msra.mxu0 %v18875_v16 }
 0x321   : > { %20351 = vst [vmem:[#allocation3_spill] sm:$0xff] %v19050_v37  ;;  %v8486_v14 = vmax.f32 %v8470_v63, 0.0  ;;  %v8473_v54 = vadd.f32 %v8443_v9, %v20294_v62  ;;  %v8478_v57 = vadd.f32 %v8402_v8, %v17579_v56  ;;  %v8445_v53 = vpop.f32.mrb[54].mxu1  ;;  %11679 = vmatpush1.bf16.msra.mxu1 %v18879_v25  ;;  %v8404_v37 = vpop.f32.mrb[55].mxu0  ;;  %11719 = vmatprep.subr.bf16.mxu0 %v18881_v10  ;;  %v15416_v63 = vld [vmem:[%s16545_s24 + $0x680] sm:$0xff] }
 0x322   : > { %v8488_v40 = vmax.f32 %v8472_v61, 0.0  ;;  %v8487_v47 = vmax.f32 %v8471_v26, 0.0  ;;  %v8480_v3 = vadd.f32 %v8445_v53, %v17579_v56  ;;  %v8479_v52 = vadd.f32 %v8404_v37, %v17579_v56  ;;  %v8447_v45 = vpop.f32.mrb[55].mxu1  ;;  %11762 = vmatprep.subr.bf16.mxu1 %v18885_v30  ;;  %v15420_v9 = vld [vmem:[%s16545_s24 + $0x6a0] sm:$0xff]  ;;  %v15417_v61 = vld [vmem:[%s16545_s24 + $0x688] sm:$0xff] }
 0x323   : > { %v19067_v8 = vmax.f32 %v18817_v11, %v8486_v14  ;;  %v8489_v49 = vmax.f32 %v8473_v54, 0.0  ;;  %v8494_v51 = vmax.f32 %v8478_v57, 0.0  ;;  %v8481_v5 = vadd.f32 %v8447_v45, %v17579_v56  ;;  %15411 = vmatmul.mubr.msk.bf16.vlgmr.msra.gmra.mrb[72].mxu0 %vm329_vm0, %v18799_v2  ;;  %v15421_v26 = vld [vmem:[%s16545_s24 + $0x6a8] sm:$0xff] }
 0x324   : > { %v19075_v53 = vmax.f32 %v18824_v50, %v8488_v40  ;;  %v19078_v37 = vmax.f32 %v18826_v13, %v8487_v47  ;;  %v8496_v0 = vmax.f32 %v8480_v3, 0.0  ;;  %v8495_v11 = vmax.f32 %v8479_v52, 0.0  ;;  %15412 = vmatmul.mubr.msk.bf16.vlgmr.msra.gmra.mrb[72].mxu1 %vm329_vm0, %v18799_v2  ;;  %11720 = vmatpush1.bf16.msra.mxu0 %v18898_v36  ;;  %v15418_v47 = vld [vmem:[%s16545_s24 + $0x690] sm:$0xff] }
 0x325   : > { %v19084_v45 = vmax.f32 %v18831_v19, %v8489_v49  ;;  %v19087_v50 = vmax.f32 %v18833_v38, %v8494_v51  ;;  %v8497_v14 = vmax.f32 %v8481_v5, 0.0  ;;  %11763 = vmatpush1.bf16.msra.mxu1 %v18902_v59  ;;  %11721 = vmatprep.subr.bf16.mxu0 %v18904_v41  ;;  %v19091_v13 = vcombine.high %v15416_v63, %v15420_v9  ;;  %v15424_v38 = vld [vmem:[%s16545_s24 + $0x6c0] sm:$0xff]  ;;  %v20357_v51 = vld [vmem:[#allocation7_spill] sm:$0xff] }
 0x326   : > { %v19094_v52 = vmax.f32 %v18837_v23, %v8496_v0  ;;  %v19097_v3 = vmax.f32 %v18839_v33, %v8495_v11  ;;  %11764 = vmatprep.subr.bf16.mxu1 %v18907_v34  ;;  %11751 = vmatprep.mubr.bf16.mxu0 %v20042_v17  ;;  %v19101_v19 = vcombine.high %v15417_v61, %v15421_v26  ;;  %v15428_v5 = vld [vmem:[%s16545_s24 + $0x6e0] sm:$0xff]  ;;  %v15425_v0 = vld [vmem:[%s16545_s24 + $0x6c8] sm:$0xff]  ;;  %v15422_v11 = vld [vmem:[%s16545_s24 + $0x6b0] sm:$0xff] }
 0x327   : > { %20352 = vst [vmem:[#allocation38_spill] sm:$0xff] %v19087_v50  ;;  %20353 = vst [vmem:[#allocation36_spill] sm:$0xff] %v19091_v13  ;;  %v19106_v49 = vmax.f32 %v20357_v51, %v8497_v14  ;;  %11794 = vmatprep.mubr.bf16.mxu1 %v20042_v17  ;;  %v15429_v23 = vld [vmem:[%s16545_s24 + $0x6e8] sm:$0xff]  ;;  %v19112_v33 = vcombine.low %v15416_v63, %v15420_v9  ;;  %v19116_v54 = vcombine.low %v15417_v61, %v15421_v26  ;;  %v15419_v63 = vld [vmem:[%s16545_s24 + $0x698] sm:$0xff] }
 0x328   : > { %20354 = vst [vmem:[#allocation39_spill] sm:$0xff] %v19094_v52  ;;  %20355 = vst [vmem:[#allocation55_spill] sm:$0xff] %v19097_v3  ;;  %11722 = vmatpush1.bf16.msra.mxu0 %v18914_v29  ;;  %v19118_v57 = vcombine.high %v15424_v38, %v15428_v5  ;;  %v19121_v40 = vcombine.high %v15425_v0, %v15429_v23  ;;  %v15423_v9 = vld [vmem:[%s16545_s24 + $0x6b8] sm:$0xff]  ;;  %v19132_v61 = vcombine.low %v15424_v38, %v15428_v5  ;;  %v15430_v3 = vld [vmem:[%s16545_s24 + $0x6f0] sm:$0xff] }
 0x329   : > { %20356 = vst [vmem:[#allocation56_spill] sm:$0xff] %v19101_v19  ;;  %20358 = vst [vmem:[#allocation37_spill] sm:$0xff] %v19106_v49  ;;  %11765 = vmatpush1.bf16.msra.mxu1 %v18918_v27  ;;  %11921 = vmatprep.subr.bf16.mxu0 %v19091_v13  ;;  %v19136_v26 = vcombine.low %v15425_v0, %v15429_v23  ;;  %v19138_v14 = vcombine.high %v15418_v47, %v15422_v11  ;;  %v15426_v49 = vld [vmem:[%s16545_s24 + $0x6d0] sm:$0xff]  ;;  %v15427_v38 = vld [vmem:[%s16545_s24 + $0x6d8] sm:$0xff] }
 0x32a   : > { %20359 = vst [vmem:[#allocation57_spill] sm:$0xff] %v19118_v57  ;;  %11964 = vmatprep.subr.bf16.mxu1 %v19101_v19  ;;  %v19142_v51 = vcombine.high %v15419_v63, %v15423_v9  ;;  %v15431_v5 = vld [vmem:[%s16545_s24 + $0x6f8] sm:$0xff]  ;;  %v19150_v52 = vcombine.low %v15418_v47, %v15422_v11  ;;  %v19154_v0 = vcombine.low %v15419_v63, %v15423_v9  ;;  %v20363_v9 = vld [vmem:[#allocation18_spill] sm:$0xff] }
 0x32b   : > { %15413 = vmatmul.mubr.msk.bf16.vlgmr.msra.gmra.mrb[76].mxu0 %vm329_vm0, %v18799_v2  ;;  %v19156_v23 = vcombine.high %v15426_v49, %v15430_v3  ;;  %v19159_v50 = vcombine.high %v15427_v38, %v15431_v5  ;;  %v19166_v47 = vcombine.low %v15426_v49, %v15430_v3  ;;  %v19170_v11 = vcombine.low %v15427_v38, %v15431_v5  ;;  %v20360_v3 = vld [vmem:[#allocation2_spill] sm:$0xff]  ;;  %v20361_v49 = vld [vmem:[#allocation16_spill] sm:$0xff]  ;;  %v20362_v63 = vld [vmem:[#allocation17_spill] sm:$0xff] }
 0x32c   : > { %15414 = vmatmul.mubr.msk.bf16.vlgmr.msra.gmra.mrb[76].mxu1 %vm329_vm0, %v18799_v2  ;;  %11922 = vmatpush1.bf16.msra.mxu0 %v19112_v33  ;;  %v20364_v38 = vld [vmem:[#allocation19_spill] sm:$0xff]  ;;  %v20365_v5 = vld [vmem:[#allocation20_spill] sm:$0xff] }
 0x32d   : > { %11965 = vmatpush1.bf16.msra.mxu1 %v19116_v54  ;;  %11923 = vmatprep.subr.bf16.mxu0 %v19118_v57 }
 0x32e   : > { %11966 = vmatprep.subr.bf16.mxu1 %v19121_v40  ;;  %11953 = vmatprep.mubr.bf16.mxu0 %v20042_v17 }
 0x32f   : > { %11996 = vmatprep.mubr.bf16.mxu1 %v20042_v17 }
 0x330   : > { %11924 = vmatpush1.bf16.msra.mxu0 %v19132_v61 }
 0x331   : > { %11967 = vmatpush1.bf16.msra.mxu1 %v19136_v26  ;;  %12007 = vmatprep.subr.bf16.mxu0 %v19138_v14 }
 0x332   : > { %12050 = vmatprep.subr.bf16.mxu1 %v19142_v51 }
 0x333   : > { %15448 = vmatmul.mubr.msk.bf16.vlgmr.msra.gmra.mrb[72].mxu0 %vm329_vm0, %v18893_v42 }
 0x334   : > { %15449 = vmatmul.mubr.msk.bf16.vlgmr.msra.gmra.mrb[72].mxu1 %vm329_vm0, %v18893_v42  ;;  %12008 = vmatpush1.bf16.msra.mxu0 %v19150_v52 }
 0x335   : > { %12051 = vmatpush1.bf16.msra.mxu1 %v19154_v0  ;;  %12009 = vmatprep.subr.bf16.mxu0 %v19156_v23 }
 0x336   : > { %12052 = vmatprep.subr.bf16.mxu1 %v19159_v50  ;;  %12039 = vmatprep.mubr.bf16.mxu0 %v20042_v17 }
 0x337   : > { %12082 = vmatprep.mubr.bf16.mxu1 %v20042_v17 }
 0x338   : > { %12010 = vmatpush1.bf16.msra.mxu0 %v19166_v47 }
 0x339   : > { %12053 = vmatpush1.bf16.msra.mxu1 %v19170_v11  ;;  %12157 = vmatprep.subr.bf16.mxu0 %v20298_v15 }
 0x33a   : > { %12200 = vmatprep.subr.bf16.mxu1 %v20299_v28 }
 0x33b   : > { %15450 = vmatmul.mubr.msk.bf16.vlgmr.msra.gmra.mrb[76].mxu0 %vm329_vm0, %v18893_v42 }
 0x33c   : > { %15451 = vmatmul.mubr.msk.bf16.vlgmr.msra.gmra.mrb[76].mxu1 %vm329_vm0, %v18893_v42  ;;  %12158 = vmatpush1.bf16.msra.mxu0 %v18516_v20 }
 0x33d   : > { %12201 = vmatpush1.bf16.msra.mxu1 %v20306_v44  ;;  %12159 = vmatprep.subr.bf16.mxu0 %v20307_v58 }
 0x33e   : > { %12202 = vmatprep.subr.bf16.mxu1 %v20310_v24  ;;  %12189 = vmatprep.mubr.bf16.mxu0 %v20042_v17 }
 0x33f   : > { %12232 = vmatprep.mubr.bf16.mxu1 %v20042_v17 }
 0x340   : > { %12160 = vmatpush1.bf16.msra.mxu0 %v18536_v32 }
 0x341   : > { %12203 = vmatpush1.bf16.msra.mxu1 %v18540_v22  ;;  %12243 = vmatprep.subr.bf16.mxu0 %v18542_v46 }
 0x342   : > { %12286 = vmatprep.subr.bf16.mxu1 %v18546_v12 }
 0x343   : > { %15452 = vmatmul.mubr.msk.bf16.vlgmr.msra.gmra.mrb[80].mxu0 %vm329_vm0, %v18595_v43 }
 0x344   : > { %15453 = vmatmul.mubr.msk.bf16.vlgmr.msra.gmra.mrb[80].mxu1 %vm329_vm0, %v18595_v43  ;;  %12244 = vmatpush1.bf16.msra.mxu0 %v18554_v1  ;;  %v19210_v43 = vld [vmem:[%s19815_s0 + $0x8] sm:$0xff]  }
 0x345   : > { %12287 = vmatpush1.bf16.msra.mxu1 %v18558_v21  ;;  %12245 = vmatprep.subr.bf16.mxu0 %v18560_v18 }
 0x346   : > { %12288 = vmatprep.subr.bf16.mxu1 %v18563_v4  ;;  %12275 = vmatprep.mubr.bf16.mxu0 %v20042_v17  ;;  %v20370_v4 = vld [vmem:[#allocation45_spill] sm:$0xff] }
 0x347   : > { %12318 = vmatprep.mubr.bf16.mxu1 %v20042_v17 }
 0x348   : > { %12246 = vmatpush1.bf16.msra.mxu0 %v18571_v55  ;;  %v20369_v55 = vld [vmem:[#allocation52_spill] sm:$0xff] }
 0x349   : > { %12289 = vmatpush1.bf16.msra.mxu1 %v18575_v6  ;;  %12329 = vmatprep.subr.bf16.mxu0 %v20360_v3  ;;  %v20366_v3 = vld [vmem:[#allocation26_spill] sm:$0xff]  ;;  %v20368_v6 = vld [vmem:[#allocation28_spill] sm:$0xff] }
 0x34a   : > { %12372 = vmatprep.subr.bf16.mxu1 %v20361_v49  ;;  %v20367_v49 = vld [vmem:[#allocation27_spill] sm:$0xff] }
 0x34b   : > { %15454 = vmatmul.mubr.msk.bf16.vlgmr.msra.gmra.mrb[84].mxu0 %vm329_vm0, %v19210_v43 }
 0x34c   : > { %15455 = vmatmul.mubr.msk.bf16.vlgmr.msra.gmra.mrb[84].mxu1 %vm329_vm0, %v19210_v43  ;;  %12330 = vmatpush1.bf16.msra.mxu0 %v20362_v63  ;;  %v20371_v63 = vld [vmem:[#allocation29_spill] sm:$0xff] }
 0x34d   : > { %12373 = vmatpush1.bf16.msra.mxu1 %v20363_v9  ;;  %12331 = vmatprep.subr.bf16.mxu0 %v20364_v38  ;;  %v20372_v9 = vld [vmem:[#allocation30_spill] sm:$0xff]  ;;  %v20373_v38 = vld [vmem:[#allocation31_spill] sm:$0xff] }
 0x34e   : > { %12374 = vmatprep.subr.bf16.mxu1 %v20365_v5  ;;  %12361 = vmatprep.mubr.bf16.mxu0 %v20042_v17  ;;  %v20374_v5 = vld [vmem:[#allocation32_spill] sm:$0xff] }
 0x34f   : > { %12404 = vmatprep.mubr.bf16.mxu1 %v20042_v17 }
 0x350   : > { %12332 = vmatpush1.bf16.msra.mxu0 %v20366_v3  ;;  %v20377_v3 = vld [vmem:[#allocation46_spill] sm:$0xff] }
 0x351   : > { %12375 = vmatpush1.bf16.msra.mxu1 %v20367_v49  ;;  %12415 = vmatprep.subr.bf16.mxu0 %v20368_v6  ;;  %v20375_v6 = vld [vmem:[#allocation33_spill] sm:$0xff] }
 0x352   : > { %12458 = vmatprep.subr.bf16.mxu1 %v20369_v55  ;;  %v20376_v55 = vld [vmem:[#allocation34_spill] sm:$0xff] }
 0x353   : > { %15456 = vmatmul.mubr.msk.bf16.vlgmr.msra.gmra.mrb[80].mxu0 %vm329_vm0, %v20370_v4 }
 0x354   : > { %15457 = vmatmul.mubr.msk.bf16.vlgmr.msra.gmra.mrb[80].mxu1 %vm329_vm0, %v20370_v4  ;;  %12416 = vmatpush1.bf16.msra.mxu0 %v20371_v63 }
 0x355   : > { %12459 = vmatpush1.bf16.msra.mxu1 %v20372_v9  ;;  %12417 = vmatprep.subr.bf16.mxu0 %v20373_v38 }
 0x356   : > { %12460 = vmatprep.subr.bf16.mxu1 %v20374_v5  ;;  %12447 = vmatprep.mubr.bf16.mxu0 %v20042_v17 }
 0x357   : > { %12490 = vmatprep.mubr.bf16.mxu1 %v20042_v17 }
 0x358   : > { %12418 = vmatpush1.bf16.msra.mxu0 %v20375_v6 }
 0x359   : > { %12461 = vmatpush1.bf16.msra.mxu1 %v20376_v55  ;;  %12501 = vmatprep.subr.bf16.mxu0 %v20377_v3 }
 0x35a   : > { %12544 = vmatprep.subr.bf16.mxu1 %v18843_v39 }
 0x35b   : > { %15458 = vmatmul.mubr.msk.bf16.vlgmr.msra.gmra.mrb[84].mxu0 %vm329_vm0, %v20370_v4 }
 0x35c   : > { %15459 = vmatmul.mubr.msk.bf16.vlgmr.msra.gmra.mrb[84].mxu1 %vm329_vm0, %v20370_v4  ;;  %12502 = vmatpush1.bf16.msra.mxu0 %v18855_v35 }
 0x35d   : > { %12545 = vmatpush1.bf16.msra.mxu1 %v18859_v60  ;;  %12503 = vmatprep.subr.bf16.mxu0 %v18861_v31 }
 0x35e   : > { %12546 = vmatprep.subr.bf16.mxu1 %v18864_v48  ;;  %12533 = vmatprep.mubr.bf16.mxu0 %v20042_v17 }
 0x35f   : > { %12576 = vmatprep.mubr.bf16.mxu1 %v20042_v17 }
 0x360   : > { %12504 = vmatpush1.bf16.msra.mxu0 %v18875_v16 }
 0x361   : > { %12547 = vmatpush1.bf16.msra.mxu1 %v18879_v25  ;;  %12587 = vmatprep.subr.bf16.mxu0 %v18881_v10 }
 0x362   : > { %12630 = vmatprep.subr.bf16.mxu1 %v18885_v30 }
 0x363   : > { %15460 = vmatmul.mubr.msk.bf16.vlgmr.msra.gmra.mrb[80].mxu0 %vm329_vm0, %v18661_v7 }
 0x364   : > { %15461 = vmatmul.mubr.msk.bf16.vlgmr.msra.gmra.mrb[80].mxu1 %vm329_vm0, %v18661_v7  ;;  %12588 = vmatpush1.bf16.msra.mxu0 %v18898_v36 }
 0x365   : > { %12631 = vmatpush1.bf16.msra.mxu1 %v18902_v59  ;;  %12589 = vmatprep.subr.bf16.mxu0 %v18904_v41 }
 0x366   : > { %v9368_v4 = vpop.f32.mrb[56].mxu0  ;;  %12632 = vmatprep.subr.bf16.mxu1 %v18907_v34  ;;  %12619 = vmatprep.mubr.bf16.mxu0 %v20042_v17 }
 0x367   : > { %v9522_v49 = vadd.f32 %v9368_v4, %v20294_v62  ;;  %v9411_v63 = vpop.f32.mrb[56].mxu1  ;;  %v9370_v9 = vpop.f32.mrb[57].mxu0  ;;  %12662 = vmatprep.mubr.bf16.mxu1 %v20042_v17 }
 0x368   : > { %v9524_v38 = vadd.f32 %v9411_v63, %v20294_v62  ;;  %v9523_v5 = vadd.f32 %v9370_v9, %v20294_v62  ;;  %v9413_v6 = vpop.f32.mrb[57].mxu1  ;;  %v9372_v55 = vpop.f32.mrb[58].mxu0  ;;  %12590 = vmatpush1.bf16.msra.mxu0 %v18914_v29 }
 0x369   : > { %v9538_v18 = vmax.f32 %v9522_v49, 0.0  ;;  %v9525_v21 = vadd.f32 %v9413_v6, %v20294_v62  ;;  %v9530_v1 = vadd.f32 %v9372_v55, %v17579_v56  ;;  %v9415_v12 = vpop.f32.mrb[58].mxu1  ;;  %12633 = vmatpush1.bf16.msra.mxu1 %v18918_v27  ;;  %v9374_v4 = vpop.f32.mrb[59].mxu0  ;;  %12689 = vmatprep.subr.bf16.mxu0 %v19091_v13  ;;  %v20378_v49 = vld [vmem:[#allocation4_spill] sm:$0xff]  ;;  %v20380_v13 = vld [vmem:[#allocation13_spill] sm:$0xff] }
 0x36a   : > { %v9540_v46 = vmax.f32 %v9524_v38, 0.0  ;;  %v9539_v22 = vmax.f32 %v9523_v5, 0.0  ;;  %v9532_v63 = vadd.f32 %v9415_v12, %v17579_v56  ;;  %v9531_v9 = vadd.f32 %v9374_v4, %v17579_v56  ;;  %v9417_v32 = vpop.f32.mrb[59].mxu1  ;;  %12732 = vmatprep.subr.bf16.mxu1 %v19101_v19  ;;  %v20379_v38 = vld [vmem:[#allocation5_spill] sm:$0xff] }
 0x36b   : > { %v9554_v24 = vmax.f32 %v20378_v49, %v9538_v18  ;;  %v9541_v6 = vmax.f32 %v9525_v21, 0.0  ;;  %v9546_v55 = vmax.f32 %v9530_v1, 0.0  ;;  %v9533_v58 = vadd.f32 %v9417_v32, %v17579_v56  ;;  %15462 = vmatmul.mubr.msk.bf16.vlgmr.msra.gmra.mrb[84].mxu0 %vm329_vm0, %v18661_v7  ;;  %v20381_v18 = vld [vmem:[#allocation22_spill] sm:$0xff]  ;;  %v20382_v49 = vld [vmem:[#allocation24_spill] sm:$0xff] }
 0x36c   : > { %v9556_v5 = vmax.f32 %v20379_v38, %v9540_v46  ;;  %v9555_v12 = vmax.f32 %v20380_v13, %v9539_v22  ;;  %v9548_v44 = vmax.f32 %v9532_v63, 0.0  ;;  %v9547_v4 = vmax.f32 %v9531_v9, 0.0  ;;  %15463 = vmatmul.mubr.msk.bf16.vlgmr.msra.gmra.mrb[84].mxu1 %vm329_vm0, %v18661_v7  ;;  %12690 = vmatpush1.bf16.msra.mxu0 %v19112_v33  ;;  %v19289_v46 = vld [vmem:[%s16545_s24 + $0x700] sm:$0xff]  ;;  %v20383_v13 = vld [vmem:[#allocation25_spill] sm:$0xff]  ;;  %v20384_v7 = vld [vmem:[#allocation35_spill] sm:$0xff] }
 0x36d   : > { %v9557_v21 = vmax.f32 %v20381_v18, %v9541_v6  ;;  %v9562_v1 = vmax.f32 %v20382_v49, %v9546_v55  ;;  %v9549_v19 = vmax.f32 %v9533_v58, 0.0  ;;  %12733 = vmatpush1.bf16.msra.mxu1 %v19116_v54  ;;  %12691 = vmatprep.subr.bf16.mxu0 %v19118_v57  ;;  %v19292_v32 = vld [vmem:[%s16545_s24 + $0x720] sm:$0xff]  ;;  %v20385_v6 = vld [vmem:[#allocation3_spill] sm:$0xff] }
 0x36e   : > { %v15585_v22 = vpack.c.bf16 %v9555_v12, %v9554_v24  ;;  %v9564_v63 = vmax.f32 %v20383_v13, %v9548_v44  ;;  %v9563_v9 = vmax.f32 %v20384_v7, %v9547_v4  ;;  %v9454_v38 = vpop.f32.mrb[60].mxu0  ;;  %12734 = vmatprep.subr.bf16.mxu1 %v19121_v40  ;;  %12721 = vmatprep.mubr.bf16.mxu0 %v20042_v17 }
 0x36f   : > { %v15586_v58 = vpack.c.bf16 %v9557_v21, %v9556_v5  ;;  %v9565_v55 = vmax.f32 %v20385_v6, %v9549_v19  ;;  %v9526_v18 = vadd.f32 %v9454_v38, %v20294_v62  ;;  %v9497_v49 = vpop.f32.mrb[60].mxu1  ;;  %v9456_v57 = vpop.f32.mrb[61].mxu0  ;;  %12764 = vmatprep.mubr.bf16.mxu1 %v20042_v17  ;;  %v19307_v19 = vcombine.high %v19289_v46, %v19292_v32 }
 0x370   : > { %15197 = vst [vmem:[%s18221_s28 + $0x40] sm:$0xff] %v15585_v22  ;;  %v15589_v24 = vpack.c.bf16 %v9563_v9, %v9562_v1  ;;  %v9528_v44 = vadd.f32 %v9497_v49, %v20294_v62  ;;  %v9527_v12 = vadd.f32 %v9456_v57, %v20294_v62  ;;  %v9499_v4 = vpop.f32.mrb[61].mxu1  ;;  %v9458_v13 = vpop.f32.mrb[62].mxu0  ;;  %12692 = vmatpush1.bf16.msra.mxu0 %v19132_v61 }
 0x371   : > { %15198 = vst [vmem:[%s18221_s28 + $0x48] sm:$0xff] %v15586_v58  ;;  %v15590_v5 = vpack.c.bf16 %v9565_v55, %v9564_v63  ;;  %v9542_v21 = vmax.f32 %v9526_v18, 0.0  ;;  %v9529_v1 = vadd.f32 %v9499_v4, %v20294_v62  ;;  %v9534_v22 = vadd.f32 %v9458_v13, %v17579_v56  ;;  %v9501_v7 = vpop.f32.mrb[62].mxu1  ;;  %12735 = vmatpush1.bf16.msra.mxu1 %v19136_v26  ;;  %v9460_v57 = vpop.f32.mrb[63].mxu0  ;;  %v15470_v55 = vld [vmem:[%s16545_s24 + $0x708] sm:$0xff] }
 0x372   : > { %12775 = vmatprep.subr.bf16.mxu0 %v19138_v14  ;;  %15201 = vst [vmem:[%s18221_s28 + $0x60] sm:$0xff] %v15589_v24  ;;  %v9544_v9 = vmax.f32 %v9528_v44, 0.0  ;;  %v9543_v38 = vmax.f32 %v9527_v12, 0.0  ;;  %v9536_v58 = vadd.f32 %v9501_v7, %v17579_v56  ;;  %v9535_v63 = vadd.f32 %v9460_v57, %v17579_v56  ;;  %v9503_v6 = vpop.f32.mrb[63].mxu1  ;;  %12818 = vmatprep.subr.bf16.mxu1 %v19142_v51  ;;  %v15474_v18 = vld [vmem:[%s16545_s24 + $0x728] sm:$0xff] }
 0x373   : > { %15202 = vst [vmem:[%s18221_s28 + $0x68] sm:$0xff] %v15590_v5  ;;  %v9558_v49 = vmax.f32 %v19067_v8, %v9542_v21  ;;  %v9545_v4 = vmax.f32 %v9529_v1, 0.0  ;;  %v9550_v13 = vmax.f32 %v9534_v22, 0.0  ;;  %v9537_v62 = vadd.f32 %v9503_v6, %v17579_v56  ;;  %15464 = vmatmul.mubr.msk.bf16.vlgmr.msra.gmra.mrb[80].mxu0 %vm329_vm0, %v18799_v2  ;;  %v20386_v5 = vld [vmem:[#allocation38_spill] sm:$0xff]  ;;  %v20387_v22 = vld [vmem:[#allocation39_spill] sm:$0xff] }
 0x374   : > { %v9560_v24 = vmax.f32 %v19075_v53, %v9544_v9  ;;  %v9559_v44 = vmax.f32 %v19078_v37, %v9543_v38  ;;  %v9552_v12 = vmax.f32 %v9536_v58, 0.0  ;;  %v9551_v7 = vmax.f32 %v9535_v63, 0.0  ;;  %15465 = vmatmul.mubr.msk.bf16.vlgmr.msra.gmra.mrb[80].mxu1 %vm329_vm0, %v18799_v2  ;;  %12776 = vmatpush1.bf16.msra.mxu0 %v19150_v52  ;;  %v20388_v9 = vld [vmem:[#allocation55_spill] sm:$0xff]  ;;  %v15481_v58 = vld [vmem:[%s16545_s24 + $0x760] sm:$0xff]  ;;  %v20389_v63 = vld [vmem:[#allocation37_spill] sm:$0xff] }
 0x375   : > { %v9561_v8 = vmax.f32 %v19084_v45, %v9545_v4  ;;  %v9566_v21 = vmax.f32 %v20386_v5, %v9550_v13  ;;  %v9553_v1 = vmax.f32 %v9537_v62, 0.0  ;;  %12819 = vmatpush1.bf16.msra.mxu1 %v19154_v0  ;;  %12777 = vmatprep.subr.bf16.mxu0 %v19156_v23  ;;  %v19334_v53 = vcombine.high %v15470_v55, %v15474_v18  ;;  %v15477_v45 = vld [vmem:[%s16545_s24 + $0x740] sm:$0xff]  ;;  %v15478_v4 = vld [vmem:[%s16545_s24 + $0x748] sm:$0xff]  ;;  %v15471_v5 = vld [vmem:[%s16545_s24 + $0x710] sm:$0xff] }
 0x376   : > { %v15587_v37 = vpack.c.bf16 %v9559_v44, %v9558_v49  ;;  %v9568_v57 = vmax.f32 %v20387_v22, %v9552_v12  ;;  %v9567_v38 = vmax.f32 %v20388_v9, %v9551_v7  ;;  %12820 = vmatprep.subr.bf16.mxu1 %v19159_v50  ;;  %12807 = vmatprep.mubr.bf16.mxu0 %v20042_v17  ;;  %v15482_v49 = vld [vmem:[%s16545_s24 + $0x768] sm:$0xff]  ;;  %v15479_v22 = vld [vmem:[%s16545_s24 + $0x750] sm:$0xff]  ;;  %v15480_v9 = vld [vmem:[%s16545_s24 + $0x758] sm:$0xff] }
 0x377   : > { %v15588_v62 = vpack.c.bf16 %v9561_v8, %v9560_v24  ;;  %v9569_v6 = vmax.f32 %v20389_v63, %v9553_v1  ;;  %12850 = vmatprep.mubr.bf16.mxu1 %v20042_v17  ;;  %v19350_v44 = vcombine.low %v19289_v46, %v19292_v32  ;;  %v19355_v12 = vcombine.low %v15470_v55, %v15474_v18  ;;  %v15472_v46 = vld [vmem:[%s16545_s24 + $0x718] sm:$0xff] }
 0x378   : > { %15199 = vst [vmem:[%s18221_s28 + $0x50] sm:$0xff] %v15587_v37  ;;  %v15591_v13 = vpack.c.bf16 %v9567_v38, %v9566_v21  ;;  %12778 = vmatpush1.bf16.msra.mxu0 %v19166_v47  ;;  %v19357_v7 = vcombine.high %v15477_v45, %v15481_v58  ;;  %v19361_v8 = vcombine.high %v15478_v4, %v15482_v49  ;;  %v15475_v21 = vld [vmem:[%s16545_s24 + $0x730] sm:$0xff]  ;;  %v15476_v32 = vld [vmem:[%s16545_s24 + $0x738] sm:$0xff] }
 0x379   : > { %15200 = vst [vmem:[%s18221_s28 + $0x58] sm:$0xff] %v15588_v62  ;;  %v15592_v24 = vpack.c.bf16 %v9569_v6, %v9568_v57  ;;  %12821 = vmatpush1.bf16.msra.mxu1 %v19170_v11  ;;  %12977 = vmatprep.subr.bf16.mxu0 %v19307_v19  ;;  %v19373_v55 = vld [vmem:[%s19815_s0 + $0x18] sm:$0xff]   ;;  %v19378_v18 = vcombine.low %v15477_v45, %v15481_v58  ;;  %v15483_v57 = vld [vmem:[%s16545_s24 + $0x770] sm:$0xff] }
 0x37a   : > { %15203 = vst [vmem:[%s18221_s28 + $0x70] sm:$0xff] %v15591_v13  ;;  %13020 = vmatprep.subr.bf16.mxu1 %v19334_v53  ;;  %v19384_v1 = vcombine.high %v15471_v5, %v15475_v21  ;;  %v19388_v37 = vcombine.high %v15472_v46, %v15476_v32  ;;  %v15484_v38 = vld [vmem:[%s16545_s24 + $0x778] sm:$0xff]  ;;  %v19396_v45 = vcombine.low %v15471_v5, %v15475_v21  ;;  %v15527_v13 = vld [vmem:[%s16545_s24 + $0x7a8] sm:$0xff] }
 0x37b   : > { %15204 = vst [vmem:[%s18221_s28 + $0x78] sm:$0xff] %v15592_v24  ;;  %15466 = vmatmul.mubr.msk.bf16.vlgmr.msra.gmra.mrb[84].mxu0 %vm329_vm0, %v18799_v2  ;;  %v19382_v2 = vcombine.low %v15478_v4, %v15482_v49  ;;  %v19400_v58 = vcombine.low %v15472_v46, %v15476_v32  ;;  %v19402_v62 = vcombine.high %v15479_v22, %v15483_v57  ;;  %v15523_v49 = vld [vmem:[%s16545_s24 + $0x788] sm:$0xff] }
 0x37c   : > { %15467 = vmatmul.mubr.msk.bf16.vlgmr.msra.gmra.mrb[84].mxu1 %vm329_vm0, %v19373_v55  ;;  %12978 = vmatpush1.bf16.msra.mxu0 %v19350_v44  ;;  %v19405_v63 = vcombine.high %v15480_v9, %v15484_v38  ;;  %v19412_v6 = vcombine.low %v15479_v22, %v15483_v57  ;;  %v19416_v4 = vcombine.low %v15480_v9, %v15484_v38  ;;  %v15535_v5 = vld [vmem:[%s16545_s24 + $0x7e8] sm:$0xff]  ;;  %v15529_v22 = vld [vmem:[%s16545_s24 + $0x7b8] sm:$0xff] }
 0x37d   : > { %13021 = vmatpush1.bf16.msra.mxu1 %v19355_v12  ;;  %12979 = vmatprep.subr.bf16.mxu0 %v19357_v7  ;;  %v15541_v24 = vcombine.high %v15523_v49, %v15527_v13  ;;  %v15540_v46 = vcombine.low %v15523_v49, %v15527_v13 }
 0x37e   : > { %13022 = vmatprep.subr.bf16.mxu1 %v19361_v8  ;;  %13009 = vmatprep.mubr.bf16.mxu0 %v20042_v17 }
 0x37f   : > { %13052 = vmatprep.mubr.bf16.mxu1 %v20042_v17 }
 0x380   : > { %12980 = vmatpush1.bf16.msra.mxu0 %v19378_v18 }
 0x381   : > { %13023 = vmatpush1.bf16.msra.mxu1 %v19382_v2  ;;  %13063 = vmatprep.subr.bf16.mxu0 %v19384_v1 }
 0x382   : > { %13106 = vmatprep.subr.bf16.mxu1 %v19388_v37 }
 0x383   : > { %15501 = vmatmul.mubr.msk.bf16.vlgmr.msra.gmra.mrb[80].mxu0 %vm329_vm0, %v18893_v42 }
 0x384   : > { %15502 = vmatmul.mubr.msk.bf16.vlgmr.msra.gmra.mrb[80].mxu1 %vm329_vm0, %v18893_v42  ;;  %13064 = vmatpush1.bf16.msra.mxu0 %v19396_v45 }
 0x385   : > { %13107 = vmatpush1.bf16.msra.mxu1 %v19400_v58  ;;  %13065 = vmatprep.subr.bf16.mxu0 %v19402_v62 }
 0x386   : > { %13108 = vmatprep.subr.bf16.mxu1 %v19405_v63  ;;  %13095 = vmatprep.mubr.bf16.mxu0 %v20042_v17 }
 0x387   : > { %13138 = vmatprep.mubr.bf16.mxu1 %v20042_v17 }
 0x388   : > { %13066 = vmatpush1.bf16.msra.mxu0 %v19412_v6 }
 0x389   : > { %13109 = vmatpush1.bf16.msra.mxu1 %v19416_v4  ;;  %13213 = vmatprep.subr.bf16.mxu0 %v20377_v3 }
 0x38a   : > { %13256 = vmatprep.subr.bf16.mxu1 %v18843_v39  ;;  %v20390_v39 = vld [vmem:[#allocation8_spill] sm:$0xff] }
 0x38b   : > { %15503 = vmatmul.mubr.msk.bf16.vlgmr.msra.gmra.mrb[84].mxu0 %vm329_vm0, %v18893_v42 }
 0x38c   : > { %15504 = vmatmul.mubr.msk.bf16.vlgmr.msra.gmra.mrb[84].mxu1 %vm329_vm0, %v18893_v42  ;;  %13214 = vmatpush1.bf16.msra.mxu0 %v18855_v35  ;;  %v20392_v35 = vld [vmem:[#allocation10_spill] sm:$0xff]  ;;  %v20402_v42 = vld [vmem:[#allocation44_spill] sm:$0xff] }
 0x38d   : > { %13257 = vmatpush1.bf16.msra.mxu1 %v18859_v60  ;;  %13215 = vmatprep.subr.bf16.mxu0 %v18861_v31  ;;  %v20395_v60 = vld [vmem:[#allocation14_spill] sm:$0xff]  ;;  %v20396_v31 = vld [vmem:[#allocation21_spill] sm:$0xff] }
 0x38e   : > { %13258 = vmatprep.subr.bf16.mxu1 %v18864_v48  ;;  %13245 = vmatprep.mubr.bf16.mxu0 %v20042_v17  ;;  %v20397_v48 = vld [vmem:[#allocation23_spill] sm:$0xff] }
 0x38f   : > { %13288 = vmatprep.mubr.bf16.mxu1 %v20042_v17 }
 0x390   : > { %13216 = vmatpush1.bf16.msra.mxu0 %v18875_v16  ;;  %v20398_v16 = vld [vmem:[#allocation40_spill] sm:$0xff] }
 0x391   : > { %13259 = vmatpush1.bf16.msra.mxu1 %v18879_v25  ;;  %13299 = vmatprep.subr.bf16.mxu0 %v18881_v10  ;;  %v20399_v25 = vld [vmem:[#allocation41_spill] sm:$0xff]  ;;  %v20400_v10 = vld [vmem:[#allocation42_spill] sm:$0xff] }
 0x392   : > { %13342 = vmatprep.subr.bf16.mxu1 %v18885_v30  ;;  %v20401_v30 = vld [vmem:[#allocation43_spill] sm:$0xff] }
 0x393   : > { %15505 = vmatmul.mubr.msk.bf16.vlgmr.msra.gmra.mrb[88].mxu0 %vm329_vm0, %v19210_v43 }
 0x394   : > { %15506 = vmatmul.mubr.msk.bf16.vlgmr.msra.gmra.mrb[88].mxu1 %vm329_vm0, %v19210_v43  ;;  %13300 = vmatpush1.bf16.msra.mxu0 %v18898_v36  ;;  %v20403_v36 = vld [vmem:[#allocation36_spill] sm:$0xff] }
 0x395   : > { %13343 = vmatpush1.bf16.msra.mxu1 %v18902_v59  ;;  %13301 = vmatprep.subr.bf16.mxu0 %v18904_v41  ;;  %v20404_v59 = vld [vmem:[#allocation56_spill] sm:$0xff]  ;;  %v20405_v41 = vld [vmem:[#allocation57_spill] sm:$0xff] }
 0x396   : > { %13344 = vmatprep.subr.bf16.mxu1 %v18907_v34  ;;  %13331 = vmatprep.mubr.bf16.mxu0 %v20042_v17  ;;  %v20391_v34 = vld [vmem:[#allocation9_spill] sm:$0xff] }
 0x397   : > { %13374 = vmatprep.mubr.bf16.mxu1 %v20042_v17 }
 0x398   : > { %13302 = vmatpush1.bf16.msra.mxu0 %v18914_v29  ;;  %v16440_v29 = vld [vmem:[%s19815_s0 + $0x10] sm:$0xff]  }
 0x399   : > { %13345 = vmatpush1.bf16.msra.mxu1 %v18918_v27  ;;  %13385 = vmatprep.subr.bf16.mxu0 %v20298_v15  ;;  %v20393_v15 = vld [vmem:[#allocation11_spill] sm:$0xff] }
 0x39a   : > { %13428 = vmatprep.subr.bf16.mxu1 %v20299_v28  ;;  %v20394_v28 = vld [vmem:[#allocation12_spill] sm:$0xff] }
 0x39b   : > { %15507 = vmatmul.mubr.msk.bf16.vlgmr.msra.gmra.mrb[92].mxu0 %vm329_vm0, %v19210_v43 }
 0x39c   : > { %15508 = vmatmul.mubr.msk.bf16.vlgmr.msra.gmra.mrb[92].mxu1 %vm329_vm0, %v19210_v43  ;;  %13386 = vmatpush1.bf16.msra.mxu0 %v18516_v20  ;;  %v16439_v20 = vld [vmem:[%s19815_s0] sm:$0xff]  }
 0x39d   : > { %13429 = vmatpush1.bf16.msra.mxu1 %v20390_v39  ;;  %13387 = vmatprep.subr.bf16.mxu0 %v20391_v34 }
 0x39e   : > { %13430 = vmatprep.subr.bf16.mxu1 %v20392_v35  ;;  %13417 = vmatprep.mubr.bf16.mxu0 %v20042_v17  ;;  %v16441_v35 = vld [vmem:[%s19815_s0 + $0x20] sm:$0xff]  }
 0x39f   : > { %13460 = vmatprep.mubr.bf16.mxu1 %v20042_v17 }
 0x3a0   : > { %13388 = vmatpush1.bf16.msra.mxu0 %v20393_v15 }
 0x3a1   : > { %13431 = vmatpush1.bf16.msra.mxu1 %v20394_v28  ;;  %13471 = vmatprep.subr.bf16.mxu0 %v20395_v60  ;;  %v20406_v60 = vld [vmem:[#allocation53_spill] sm:$0xff] }
 0x3a2   : > { %13514 = vmatprep.subr.bf16.mxu1 %v20396_v31 }
 0x3a3   : > { %15509 = vmatmul.mubr.msk.bf16.vlgmr.msra.gmra.mrb[88].mxu0 %vm329_vm0, %v16439_v20 }
 0x3a4   : > { %15510 = vmatmul.mubr.msk.bf16.vlgmr.msra.gmra.mrb[88].mxu1 %vm329_vm0, %v16439_v20  ;;  %13472 = vmatpush1.bf16.msra.mxu0 %v20397_v48 }
 0x3a5   : > { %13515 = vmatpush1.bf16.msra.mxu1 %v20398_v16  ;;  %13473 = vmatprep.subr.bf16.mxu0 %v20399_v25 }
 0x3a6   : > { %13516 = vmatprep.subr.bf16.mxu1 %v20400_v10  ;;  %13503 = vmatprep.mubr.bf16.mxu0 %v20042_v17 }
 0x3a7   : > { %13546 = vmatprep.mubr.bf16.mxu1 %v20042_v17 }
 0x3a8   : > { %13474 = vmatpush1.bf16.msra.mxu0 %v20401_v30 }
 0x3a9   : > { %13517 = vmatpush1.bf16.msra.mxu1 %v20402_v42  ;;  %13557 = vmatprep.subr.bf16.mxu0 %v20403_v36 }
 0x3aa   : > { %13600 = vmatprep.subr.bf16.mxu1 %v20404_v59 }
 0x3ab   : > { %15511 = vmatmul.mubr.msk.bf16.vlgmr.msra.gmra.mrb[92].mxu0 %vm329_vm0, %v16439_v20 }
 0x3ac   : > { %15512 = vmatmul.mubr.msk.bf16.vlgmr.msra.gmra.mrb[92].mxu1 %vm329_vm0, %v16439_v20  ;;  %13558 = vmatpush1.bf16.msra.mxu0 %v19112_v33 }
 0x3ad   : > { %13601 = vmatpush1.bf16.msra.mxu1 %v19116_v54  ;;  %13559 = vmatprep.subr.bf16.mxu0 %v20405_v41 }
 0x3ae   : > { %13602 = vmatprep.subr.bf16.mxu1 %v19121_v40  ;;  %13589 = vmatprep.mubr.bf16.mxu0 %v20042_v17 }
 0x3af   : > { %13632 = vmatprep.mubr.bf16.mxu1 %v20042_v17 }
 0x3b0   : > { %13560 = vmatpush1.bf16.msra.mxu0 %v19132_v61 }
 0x3b1   : > { %13603 = vmatpush1.bf16.msra.mxu1 %v19136_v26  ;;  %13643 = vmatprep.subr.bf16.mxu0 %v19138_v14 }
 0x3b2   : > { %13686 = vmatprep.subr.bf16.mxu1 %v19142_v51 }
 0x3b3   : > { %15513 = vmatmul.mubr.msk.bf16.vlgmr.msra.gmra.mrb[88].mxu0 %vm329_vm0, %v16440_v29 }
 0x3b4   : > { %15514 = vmatmul.mubr.msk.bf16.vlgmr.msra.gmra.mrb[88].mxu1 %vm329_vm0, %v16440_v29  ;;  %13644 = vmatpush1.bf16.msra.mxu0 %v19150_v52 }
 0x3b5   : > { %13687 = vmatpush1.bf16.msra.mxu1 %v19154_v0  ;;  %13645 = vmatprep.subr.bf16.mxu0 %v19156_v23 }
 0x3b6   : > { %v19502_v27 = vpop.f32.mrb[64].mxu0  ;;  %13688 = vmatprep.subr.bf16.mxu1 %v19159_v50  ;;  %13675 = vmatprep.mubr.bf16.mxu0 %v20042_v17 }
 0x3b7   : > { %v19506_v33 = vpop.f32.mrb[64].mxu1  ;;  %v19508_v54 = vpop.f32.mrb[65].mxu0  ;;  %13718 = vmatprep.mubr.bf16.mxu1 %v20042_v17  ;;  %v11069_v31 = vadd.f32 %v19502_v27, %v20406_v60 }
 0x3b8   : > { %v19511_v40 = vpop.f32.mrb[65].mxu1  ;;  %v19513_v61 = vpop.f32.mrb[66].mxu0  ;;  %13646 = vmatpush1.bf16.msra.mxu0 %v19166_v47  ;;  %v11071_v20 = vadd.f32 %v19506_v33, %v20406_v60  ;;  %v11070_v48 = vadd.f32 %v19508_v54, %v20406_v60 }
 0x3b9   : > { %v19516_v52 = vpop.f32.mrb[66].mxu1  ;;  %13689 = vmatpush1.bf16.msra.mxu1 %v19170_v11  ;;  %v19519_v26 = vpop.f32.mrb[67].mxu0  ;;  %13745 = vmatprep.subr.bf16.mxu0 %v19307_v19  ;;  %v15522_v19 = vld [vmem:[%s16545_s24 + $0x780] sm:$0xff]  ;;  %v11072_v16 = vadd.f32 %v19511_v40, %v20406_v60  ;;  %v11085_v36 = vmax.f32 %v11069_v31, 0.0 }
 0x3ba   : > { %v19522_v50 = vpop.f32.mrb[67].mxu1  ;;  %13788 = vmatprep.subr.bf16.mxu1 %v19334_v53  ;;  %v15526_v53 = vld [vmem:[%s16545_s24 + $0x7a0] sm:$0xff]  ;;  %v11079_v25 = vadd.f32 %v19516_v52, %v17579_v56  ;;  %v11078_v10 = vadd.f32 %v19519_v26, %v17579_v56  ;;  %v11087_v59 = vmax.f32 %v11071_v20, 0.0  ;;  %v11086_v41 = vmax.f32 %v11070_v48, 0.0 }
 0x3bb   : > { %15515 = vmatmul.mubr.msk.bf16.vlgmr.msra.gmra.mrb[92].mxu0 %vm329_vm0, %v16440_v29  ;;  %v15538_v21 = vcombine.low %v15522_v19, %v15526_v53  ;;  %v11080_v30 = vadd.f32 %v19522_v50, %v17579_v56 }
 0x3bc   : > { %15516 = vmatmul.mubr.msk.bf16.vlgmr.msra.gmra.mrb[92].mxu1 %vm329_vm0, %v16440_v29  ;;  %13746 = vmatpush1.bf16.msra.mxu0 %v19350_v44  ;;  %v15539_v44 = vcombine.high %v15522_v19, %v15526_v53  ;;  %v11088_v29 = vmax.f32 %v11072_v16, 0.0  ;;  %v11095_v33 = vmax.f32 %v11079_v25, 0.0  ;;  %v11094_v54 = vmax.f32 %v11078_v10, 0.0 }
 0x3bd   : > { %13789 = vmatpush1.bf16.msra.mxu1 %v19355_v12  ;;  %13747 = vmatprep.subr.bf16.mxu0 %v19357_v7  ;;  %v15530_v12 = vld [vmem:[%s16545_s24 + $0x7c0] sm:$0xff]  ;;  %v11096_v40 = vmax.f32 %v11080_v30, 0.0 }
 0x3be   : > { %v19530_v14 = vpop.f32.mrb[68].mxu0  ;;  %13790 = vmatprep.subr.bf16.mxu1 %v19361_v8  ;;  %13777 = vmatprep.mubr.bf16.mxu0 %v20042_v17  ;;  %v15534_v7 = vld [vmem:[%s16545_s24 + $0x7e0] sm:$0xff]  ;;  %v15531_v8 = vld [vmem:[%s16545_s24 + $0x7c8] sm:$0xff] }
 0x3bf   : > { %v19534_v51 = vpop.f32.mrb[68].mxu1  ;;  %v19536_v0 = vpop.f32.mrb[69].mxu0  ;;  %13820 = vmatprep.mubr.bf16.mxu1 %v20042_v17  ;;  %v15547_v32 = vcombine.high %v15530_v12, %v15534_v7  ;;  %v15546_v57 = vcombine.low %v15530_v12, %v15534_v7  ;;  %v15548_v9 = vcombine.low %v15531_v8, %v15535_v5  ;;  %v19614_v42 = vadd.f32 %v19530_v14, %v20406_v60 }
 0x3c0   : > { %v19539_v23 = vpop.f32.mrb[69].mxu1  ;;  %v19541_v47 = vpop.f32.mrb[70].mxu0  ;;  %13748 = vmatpush1.bf16.msra.mxu0 %v19378_v18  ;;  %v15549_v18 = vcombine.high %v15531_v8, %v15535_v5  ;;  %v19619_v26 = vadd.f32 %v19534_v51, %v20406_v60  ;;  %v19623_v50 = vadd.f32 %v19536_v0, %v20406_v60 }
 0x3c1   : > { %v19544_v11 = vpop.f32.mrb[70].mxu1  ;;  %13791 = vmatpush1.bf16.msra.mxu1 %v19382_v2  ;;  %v19547_v43 = vpop.f32.mrb[71].mxu0  ;;  %13831 = vmatprep.subr.bf16.mxu0 %v19384_v1  ;;  %v15524_v2 = vld [vmem:[%s16545_s24 + $0x790] sm:$0xff]  ;;  %v11089_v52 = vmax.f32 %v19614_v42, 0.0  ;;  %v19628_v49 = vadd.f32 %v19539_v23, %v20406_v60  ;;  %v19632_v13 = vadd.f32 %v19541_v47, %v17579_v56 }
 0x3c2   : > { %v19550_v3 = vpop.f32.mrb[71].mxu1  ;;  %13874 = vmatprep.subr.bf16.mxu1 %v19388_v37  ;;  %v15528_v1 = vld [vmem:[%s16545_s24 + $0x7b0] sm:$0xff]  ;;  %v15525_v37 = vld [vmem:[%s16545_s24 + $0x798] sm:$0xff]  ;;  %v19638_v0 = vadd.f32 %v19544_v11, %v17579_v56 }
 0x3c3   : > { %15517 = vmatmul.mubr.msk.bf16.vlgmr.msra.gmra.mrb[88].mxu0 %vm329_vm0, %v19373_v55  ;;  %v15543_v38 = vcombine.high %v15524_v2, %v15528_v1 }
 0x3c4   : > { %15518 = vmatmul.mubr.msk.bf16.vlgmr.msra.gmra.mrb[88].mxu1 %vm329_vm0, %v19373_v55  ;;  %13832 = vmatpush1.bf16.msra.mxu0 %v19396_v45  ;;  %v15545_v45 = vcombine.high %v15525_v37, %v15529_v22  ;;  %v11099_v16 = vmax.f32 %v19638_v0, 0.0 }
 0x3c5   : > { %13875 = vmatpush1.bf16.msra.mxu1 %v19400_v58  ;;  %13833 = vmatprep.subr.bf16.mxu0 %v19402_v62  ;;  %v15532_v58 = vld [vmem:[%s16545_s24 + $0x7d0] sm:$0xff] }
 0x3c6   : > { %13876 = vmatprep.subr.bf16.mxu1 %v19405_v63  ;;  %13863 = vmatprep.mubr.bf16.mxu0 %v20042_v17  ;;  %v15536_v62 = vld [vmem:[%s16545_s24 + $0x7f0] sm:$0xff]  ;;  %v15533_v63 = vld [vmem:[%s16545_s24 + $0x7d8] sm:$0xff] }
 0x3c7   : > { %13906 = vmatprep.mubr.bf16.mxu1 %v20042_v17  ;;  %v15551_v39 = vcombine.high %v15532_v58, %v15536_v62  ;;  %v15550_v15 = vcombine.low %v15532_v58, %v15536_v62  ;;  %v11082_v58 = vadd.f32 %v19547_v43, %v17579_v56 }
 0x3c8   : > { %13834 = vmatpush1.bf16.msra.mxu0 %v19412_v6  ;;  %v15537_v6 = vld [vmem:[%s16545_s24 + $0x7f8] sm:$0xff] }
 0x3c9   : > { %13877 = vmatpush1.bf16.msra.mxu1 %v19416_v4  ;;  %14033 = vmatprep.subr.bf16.mxu0 %v15539_v44  ;;  %v15542_v4 = vcombine.low %v15524_v2, %v15528_v1  ;;  %v15553_v34 = vcombine.high %v15533_v63, %v15537_v6  ;;  %v15552_v28 = vcombine.low %v15533_v63, %v15537_v6 }
 0x3ca   : > { %14076 = vmatprep.subr.bf16.mxu1 %v15541_v24 }
 0x3cb   : > { %15519 = vmatmul.mubr.msk.bf16.vlgmr.msra.gmra.mrb[92].mxu0 %vm329_vm0, %v19373_v55 }
 0x3cc   : > { %15520 = vmatmul.mubr.msk.bf16.vlgmr.msra.gmra.mrb[92].mxu1 %vm329_vm0, %v19373_v55  ;;  %14034 = vmatpush1.bf16.msra.mxu0 %v15538_v21  ;;  %v15544_v55 = vcombine.low %v15525_v37, %v15529_v22 }
 0x3cd   : > { %14077 = vmatpush1.bf16.msra.mxu1 %v15540_v46  ;;  %14035 = vmatprep.subr.bf16.mxu0 %v15547_v32 }
 0x3ce   : > { %14078 = vmatprep.subr.bf16.mxu1 %v15549_v18  ;;  %14065 = vmatprep.mubr.bf16.mxu0 %v20042_v17 }
 0x3cf   : > { %14108 = vmatprep.mubr.bf16.mxu1 %v20042_v17 }
 0x3d0   : > { %14036 = vmatpush1.bf16.msra.mxu0 %v15546_v57 }
 0x3d1   : > { %14079 = vmatpush1.bf16.msra.mxu1 %v15548_v9  ;;  %14119 = vmatprep.subr.bf16.mxu0 %v15543_v38 }
 0x3d2   : > { %14162 = vmatprep.subr.bf16.mxu1 %v15545_v45 }
 0x3d3   : > { %15554 = vmatmul.mubr.msk.bf16.vlgmr.msra.gmra.mrb[88].mxu0 %vm329_vm0, %v16441_v35 }
 0x3d4   : > { %15555 = vmatmul.mubr.msk.bf16.vlgmr.msra.gmra.mrb[88].mxu1 %vm329_vm0, %v16441_v35  ;;  %14120 = vmatpush1.bf16.msra.mxu0 %v15542_v4  ;;  %v11091_v4 = vmax.f32 %v19619_v26, 0.0 }
 0x3d5   : > { %14163 = vmatpush1.bf16.msra.mxu1 %v15544_v55  ;;  %14121 = vmatprep.subr.bf16.mxu0 %v15551_v39  ;;  %v11090_v55 = vmax.f32 %v19623_v50, 0.0 }
 0x3d6   : > { %14164 = vmatprep.subr.bf16.mxu1 %v15553_v34  ;;  %14151 = vmatprep.mubr.bf16.mxu0 %v20042_v17 }
 0x3d7   : > { %14194 = vmatprep.mubr.bf16.mxu1 %v20042_v17  ;;  %v11077_v17 = vadd.f32 %v19513_v61, %v17579_v56 }
 0x3d8   : > { %14122 = vmatpush1.bf16.msra.mxu0 %v15550_v15  ;;  %v11092_v15 = vmax.f32 %v19628_v49, 0.0 }
 0x3d9   : > { %14165 = vmatpush1.bf16.msra.mxu1 %v15552_v28  ;;  %v11093_v27 = vmax.f32 %v11077_v17, 0.0  ;;  %v11097_v28 = vmax.f32 %v19632_v13, 0.0  ;;  %v11084_v17 = vadd.f32 %v19550_v3, %v17579_v56 }
 0x3db   : > { %15556 = vmatmul.mubr.msk.bf16.vlgmr.msra.gmra.mrb[92].mxu0 %vm329_vm0, %v16441_v35 }
 0x3dc   : > { %15557 = vmatmul.mubr.msk.bf16.vlgmr.msra.gmra.mrb[92].mxu1 %vm329_vm0, %v16441_v35 }
 0x406   : > { %v11955_v61 = vpop.f32.mrb[72].mxu0 }
 0x407   : > { %v12109_v14 = vadd.f32 %v11955_v61, %v20406_v60  ;;  %v11998_v19 = vpop.f32.mrb[72].mxu1  ;;  %v11957_v53 = vpop.f32.mrb[73].mxu0 }
 0x408   : > { %v12111_v44 = vadd.f32 %v11998_v19, %v20406_v60  ;;  %v12110_v51 = vadd.f32 %v11957_v53, %v20406_v60  ;;  %v12000_v24 = vpop.f32.mrb[73].mxu1  ;;  %v11959_v12 = vpop.f32.mrb[74].mxu0 }
 0x409   : > { %v12125_v7 = vmax.f32 %v12109_v14, 0.0  ;;  %v12112_v8 = vadd.f32 %v12000_v24, %v20406_v60  ;;  %v12117_v23 = vadd.f32 %v11959_v12, %v17579_v56  ;;  %v12002_v5 = vpop.f32.mrb[74].mxu1  ;;  %v11961_v21 = vpop.f32.mrb[75].mxu0  ;;  %v11100_v12 = vmax.f32 %v11084_v17, 0.0 }
 0x40a   : > { %v12127_v46 = vmax.f32 %v12111_v44, 0.0  ;;  %v12126_v47 = vmax.f32 %v12110_v51, 0.0  ;;  %v12119_v32 = vadd.f32 %v12002_v5, %v17579_v56  ;;  %v12118_v18 = vadd.f32 %v11961_v21, %v17579_v56  ;;  %v12004_v2 = vpop.f32.mrb[75].mxu1 }
 0x40b   : > { %v19644_v1 = vmax.f32 %v11085_v36, %v12125_v7  ;;  %v12128_v37 = vmax.f32 %v12112_v8, 0.0  ;;  %v12133_v22 = vmax.f32 %v12117_v23, 0.0  ;;  %v12120_v11 = vadd.f32 %v12004_v2, %v17579_v56 }
 0x40c   : > { %v19647_v57 = vmax.f32 %v11087_v59, %v12127_v46  ;;  %v19649_v9 = vmax.f32 %v11086_v41, %v12126_v47  ;;  %v12135_v38 = vmax.f32 %v12119_v32, 0.0  ;;  %v12134_v45 = vmax.f32 %v12118_v18, 0.0 }
 0x40d   : > { %v19653_v62 = vmax.f32 %v11088_v29, %v12128_v37  ;;  %v19655_v63 = vmax.f32 %v11093_v27, %v12133_v22  ;;  %v12136_v6 = vmax.f32 %v12120_v11, 0.0  ;;  %v11098_v59 = vmax.f32 %v11082_v58, 0.0 }
 0x40e   : > { %v19659_v39 = vmax.f32 %v11095_v33, %v12135_v38  ;;  %v19661_v34 = vmax.f32 %v11094_v54, %v12134_v45  ;;  %v12041_v35 = vpop.f32.mrb[76].mxu0 }
 0x40f   : > { %v19665_v31 = vmax.f32 %v11096_v40, %v12136_v6  ;;  %v12113_v43 = vadd.f32 %v12041_v35, %v20406_v60  ;;  %v12084_v20 = vpop.f32.mrb[76].mxu1  ;;  %v12043_v48 = vpop.f32.mrb[77].mxu0 }
 0x410   : > { %v12115_v25 = vadd.f32 %v12084_v20, %v20406_v60  ;;  %v12114_v10 = vadd.f32 %v12043_v48, %v20406_v60  ;;  %v12086_v30 = vpop.f32.mrb[77].mxu1  ;;  %v12045_v36 = vpop.f32.mrb[78].mxu0 }
 0x411   : > { %v12129_v41 = vmax.f32 %v12113_v43, 0.0  ;;  %v12116_v29 = vadd.f32 %v12086_v30, %v20406_v60  ;;  %v12121_v27 = vadd.f32 %v12045_v36, %v17579_v56  ;;  %v12088_v33 = vpop.f32.mrb[78].mxu1  ;;  %v12047_v54 = vpop.f32.mrb[79].mxu0 }
 0x412   : > { %v12131_v40 = vmax.f32 %v12115_v25, 0.0  ;;  %v12130_v61 = vmax.f32 %v12114_v10, 0.0  ;;  %v12123_v26 = vadd.f32 %v12088_v33, %v17579_v56  ;;  %v12122_v3 = vadd.f32 %v12047_v54, %v17579_v56  ;;  %v12090_v50 = vpop.f32.mrb[79].mxu1 }
 0x413   : > { %v19679_v14 = vmax.f32 %v11089_v52, %v12129_v41  ;;  %v12132_v19 = vmax.f32 %v12116_v29, 0.0  ;;  %v12137_v53 = vmax.f32 %v12121_v27, 0.0  ;;  %v12124_v49 = vadd.f32 %v12090_v50, %v17579_v56 }
 0x414   : > { %v19682_v13 = vmax.f32 %v11091_v4, %v12131_v40  ;;  %v19684_v44 = vmax.f32 %v11090_v55, %v12130_v61  ;;  %v12139_v51 = vmax.f32 %v12123_v26, 0.0  ;;  %v12138_v24 = vmax.f32 %v12122_v3, 0.0 }
 0x415   : > { %v19686_v0 = vmax.f32 %v11092_v15, %v12132_v19  ;;  %v19688_v7 = vmax.f32 %v11097_v28, %v12137_v53  ;;  %v12140_v8 = vmax.f32 %v12124_v49, 0.0 }
 0x416   : > { %v19690_v23 = vmax.f32 %v11099_v16, %v12139_v51  ;;  %v19692_v42 = vmax.f32 %v11098_v59, %v12138_v24 }
 0x417   : > { %v19694_v52 = vmax.f32 %v11100_v12, %v12140_v8 }
 0x456   : > { %v13011_v5 = vpop.f32.mrb[80].mxu0 }
 0x457   : > { %v13165_v21 = vadd.f32 %v13011_v5, %v20406_v60  ;;  %v13054_v46 = vpop.f32.mrb[80].mxu1  ;;  %v13013_v47 = vpop.f32.mrb[81].mxu0 }
 0x458   : > { %v13167_v32 = vadd.f32 %v13054_v46, %v20406_v60  ;;  %v13166_v18 = vadd.f32 %v13013_v47, %v20406_v60  ;;  %v13056_v2 = vpop.f32.mrb[81].mxu1  ;;  %v13015_v37 = vpop.f32.mrb[82].mxu0 }
 0x459   : > { %v13181_v22 = vmax.f32 %v13165_v21, 0.0  ;;  %v13168_v11 = vadd.f32 %v13056_v2, %v20406_v60  ;;  %v13173_v38 = vadd.f32 %v13015_v37, %v17579_v56  ;;  %v13058_v45 = vpop.f32.mrb[82].mxu1  ;;  %v13017_v58 = vpop.f32.mrb[83].mxu0 }
 0x45a   : > { %v13183_v6 = vmax.f32 %v13167_v32, 0.0  ;;  %v13182_v4 = vmax.f32 %v13166_v18, 0.0  ;;  %v13175_v55 = vadd.f32 %v13058_v45, %v17579_v56  ;;  %v13174_v35 = vadd.f32 %v13017_v58, %v17579_v56  ;;  %v13060_v15 = vpop.f32.mrb[83].mxu1 }
 0x45b   : > { %v19704_v28 = vmax.f32 %v19644_v1, %v13181_v22  ;;  %v13184_v43 = vmax.f32 %v13168_v11, 0.0  ;;  %v13189_v20 = vmax.f32 %v13173_v38, 0.0  ;;  %v13176_v48 = vadd.f32 %v13060_v15, %v17579_v56 }
 0x45c   : > { %v19708_v16 = vmax.f32 %v19647_v57, %v13183_v6  ;;  %v19711_v17 = vmax.f32 %v19649_v9, %v13182_v4  ;;  %v13191_v25 = vmax.f32 %v13175_v55, 0.0  ;;  %v13190_v10 = vmax.f32 %v13174_v35, 0.0 }
 0x45d   : > { %v19714_v30 = vmax.f32 %v19653_v62, %v13184_v43  ;;  %v19717_v36 = vmax.f32 %v19655_v63, %v13189_v20  ;;  %v13192_v1 = vmax.f32 %v13176_v48, 0.0 }
 0x45e   : > { %v19720_v59 = vmax.f32 %v19659_v39, %v13191_v25  ;;  %v19723_v41 = vmax.f32 %v19661_v34, %v13190_v10  ;;  %v13097_v57 = vpop.f32.mrb[84].mxu0 }
 0x45f   : > { %v19726_v29 = vmax.f32 %v19665_v31, %v13192_v1  ;;  %v13169_v9 = vadd.f32 %v13097_v57, %v20406_v60  ;;  %v13140_v27 = vpop.f32.mrb[84].mxu1  ;;  %v13099_v33 = vpop.f32.mrb[85].mxu0 }
 0x460   : > { %v13171_v62 = vadd.f32 %v13140_v27, %v20406_v60  ;;  %v13170_v63 = vadd.f32 %v13099_v33, %v20406_v60  ;;  %v13142_v54 = vpop.f32.mrb[85].mxu1  ;;  %v13101_v40 = vpop.f32.mrb[86].mxu0 }
 0x461   : > { %v13185_v61 = vmax.f32 %v13169_v9, 0.0  ;;  %v13172_v39 = vadd.f32 %v13142_v54, %v20406_v60  ;;  %v13177_v34 = vadd.f32 %v13101_v40, %v17579_v56  ;;  %v13144_v26 = vpop.f32.mrb[86].mxu1  ;;  %v13103_v3 = vpop.f32.mrb[87].mxu0 }
 0x462   : > { %v13187_v50 = vmax.f32 %v13171_v62, 0.0  ;;  %v13186_v31 = vmax.f32 %v13170_v63, 0.0  ;;  %v13179_v19 = vadd.f32 %v13144_v26, %v17579_v56  ;;  %v13178_v53 = vadd.f32 %v13103_v3, %v17579_v56  ;;  %v13146_v49 = vpop.f32.mrb[87].mxu1 }
 0x463   : > { %v19736_v51 = vmax.f32 %v19679_v14, %v13185_v61  ;;  %v13188_v24 = vmax.f32 %v13172_v39, 0.0  ;;  %v13193_v12 = vmax.f32 %v13177_v34, 0.0  ;;  %v13180_v8 = vadd.f32 %v13146_v49, %v17579_v56 }
 0x464   : > { %v19740_v5 = vmax.f32 %v19682_v13, %v13187_v50  ;;  %v19743_v21 = vmax.f32 %v19684_v44, %v13186_v31  ;;  %v13195_v46 = vmax.f32 %v13179_v19, 0.0  ;;  %v13194_v47 = vmax.f32 %v13178_v53, 0.0 }
 0x465   : > { %v19746_v32 = vmax.f32 %v19686_v0, %v13188_v24  ;;  %v19749_v18 = vmax.f32 %v19688_v7, %v13193_v12  ;;  %v13196_v14 = vmax.f32 %v13180_v8, 0.0 }
 0x466   : > { %v19752_v2 = vmax.f32 %v19690_v23, %v13195_v46  ;;  %v19755_v37 = vmax.f32 %v19692_v42, %v13194_v47 }
 0x467   : > { %v19758_v13 = vmax.f32 %v19694_v52, %v13196_v14 }
 0x4a6   : > { %v14067_v44 = vpop.f32.mrb[88].mxu0 }
 0x4a7   : > { %v14221_v22 = vadd.f32 %v14067_v44, %v20406_v60  ;;  %v14110_v11 = vpop.f32.mrb[88].mxu1  ;;  %v14069_v38 = vpop.f32.mrb[89].mxu0 }
 0x4a8   : > { %v14223_v0 = vadd.f32 %v14110_v11, %v20406_v60  ;;  %v14222_v7 = vadd.f32 %v14069_v38, %v20406_v60  ;;  %v14112_v45 = vpop.f32.mrb[89].mxu1  ;;  %v14071_v58 = vpop.f32.mrb[90].mxu0 }
 0x4a9   : > { %v14237_v6 = vmax.f32 %v14221_v22, 0.0  ;;  %v14224_v23 = vadd.f32 %v14112_v45, %v20406_v60  ;;  %v14229_v42 = vadd.f32 %v14071_v58, %v17579_v56  ;;  %v14114_v4 = vpop.f32.mrb[90].mxu1  ;;  %v14073_v55 = vpop.f32.mrb[91].mxu0 }
 0x4aa   : > { %v14239_v52 = vmax.f32 %v14223_v0, 0.0  ;;  %v14238_v35 = vmax.f32 %v14222_v7, 0.0  ;;  %v14231_v15 = vadd.f32 %v14114_v4, %v17579_v56  ;;  %v14230_v43 = vadd.f32 %v14073_v55, %v17579_v56  ;;  %v14116_v20 = vpop.f32.mrb[91].mxu1 }
 0x4ab   : > { %v14253_v48 = vmax.f32 %v19704_v28, %v14237_v6  ;;  %v14240_v25 = vmax.f32 %v14224_v23, 0.0  ;;  %v14245_v10 = vmax.f32 %v14229_v42, 0.0  ;;  %v14232_v1 = vadd.f32 %v14116_v20, %v17579_v56 }
 0x4ac   : > { %v14255_v57 = vmax.f32 %v19708_v16, %v14239_v52  ;;  %v14254_v9 = vmax.f32 %v19711_v17, %v14238_v35  ;;  %v14247_v27 = vmax.f32 %v14231_v15, 0.0  ;;  %v14246_v33 = vmax.f32 %v14230_v43, 0.0 }
 0x4ad   : > { %v14256_v62 = vmax.f32 %v19714_v30, %v14240_v25  ;;  %v14261_v63 = vmax.f32 %v19717_v36, %v14245_v10  ;;  %v14248_v54 = vmax.f32 %v14232_v1, 0.0 }
 0x4ae   : > { %v15593_v40 = vpack.c.bf16 %v14254_v9, %v14253_v48  ;;  %v14263_v28 = vmax.f32 %v19720_v59, %v14247_v27  ;;  %v14262_v61 = vmax.f32 %v19723_v41, %v14246_v33  ;;  %v14153_v39 = vpop.f32.mrb[92].mxu0 }
 0x4af   : > { %v15594_v34 = vpack.c.bf16 %v14256_v62, %v14255_v57  ;;  %v14264_v16 = vmax.f32 %v19726_v29, %v14248_v54  ;;  %v14225_v26 = vadd.f32 %v14153_v39, %v20406_v60  ;;  %v14196_v17 = vpop.f32.mrb[92].mxu1  ;;  %v14155_v3 = vpop.f32.mrb[93].mxu0 }
 0x4b0   : > { %15566 = vst [vmem:[%s18221_s28 + $0x80] sm:$0xff] %v15593_v40  ;;  %v15597_v30 = vpack.c.bf16 %v14262_v61, %v14261_v63  ;;  %v14227_v36 = vadd.f32 %v14196_v17, %v20406_v60  ;;  %v14226_v50 = vadd.f32 %v14155_v3, %v20406_v60  ;;  %v14198_v31 = vpop.f32.mrb[93].mxu1  ;;  %v14157_v59 = vpop.f32.mrb[94].mxu0 }
 0x4b1   : > { %15567 = vst [vmem:[%s18221_s28 + $0x88] sm:$0xff] %v15594_v34  ;;  %v15598_v41 = vpack.c.bf16 %v14264_v16, %v14263_v28  ;;  %v14241_v19 = vmax.f32 %v14225_v26, 0.0  ;;  %v14228_v53 = vadd.f32 %v14198_v31, %v20406_v60  ;;  %v14233_v29 = vadd.f32 %v14157_v59, %v17579_v56  ;;  %v14200_v49 = vpop.f32.mrb[94].mxu1  ;;  %v14159_v24 = vpop.f32.mrb[95].mxu0 }
 0x4b2   : > { %15570 = vst [vmem:[%s18221_s28 + $0xa0] sm:$0xff] %v15597_v30  ;;  %v14243_v12 = vmax.f32 %v14227_v36, 0.0  ;;  %v14242_v8 = vmax.f32 %v14226_v50, 0.0  ;;  %v14235_v46 = vadd.f32 %v14200_v49, %v17579_v56  ;;  %v14234_v47 = vadd.f32 %v14159_v24, %v17579_v56  ;;  %v14202_v14 = vpop.f32.mrb[95].mxu1 }
 0x4b3   : > { %15571 = vst [vmem:[%s18221_s28 + $0xa8] sm:$0xff] %v15598_v41  ;;  %v14257_v44 = vmax.f32 %v19736_v51, %v14241_v19  ;;  %v14244_v22 = vmax.f32 %v14228_v53, 0.0  ;;  %v14249_v11 = vmax.f32 %v14233_v29, 0.0  ;;  %v14236_v60 = vadd.f32 %v14202_v14, %v17579_v56 }
 0x4b4   : > { %v14259_v38 = vmax.f32 %v19740_v5, %v14243_v12  ;;  %v14258_v0 = vmax.f32 %v19743_v21, %v14242_v8  ;;  %v14251_v7 = vmax.f32 %v14235_v46, 0.0  ;;  %v14250_v45 = vmax.f32 %v14234_v47, 0.0 }
 0x4b5   : > { %v14260_v58 = vmax.f32 %v19746_v32, %v14244_v22  ;;  %v14265_v6 = vmax.f32 %v19749_v18, %v14249_v11  ;;  %v14252_v23 = vmax.f32 %v14236_v60, 0.0 }
 0x4b6   : > { %v15595_v51 = vpack.c.bf16 %v14258_v0, %v14257_v44  ;;  %v14267_v42 = vmax.f32 %v19752_v2, %v14251_v7  ;;  %v14266_v4 = vmax.f32 %v19755_v37, %v14250_v45 }
 0x4b7   : > { %v15596_v55 = vpack.c.bf16 %v14260_v58, %v14259_v38  ;;  %v14268_v56 = vmax.f32 %v19758_v13, %v14252_v23 }
 0x4b8   : > { %15568 = vst [vmem:[%s18221_s28 + $0x90] sm:$0xff] %v15595_v51  ;;  %v15599_v5 = vpack.c.bf16 %v14266_v4, %v14265_v6 }
 0x4b9   : > { %15569 = vst [vmem:[%s18221_s28 + $0x98] sm:$0xff] %v15596_v55  ;;  %v15600_v21 = vpack.c.bf16 %v14268_v56, %v14267_v42 }
 0x4ba   : > { %15572 = vst [vmem:[%s18221_s28 + $0xb0] sm:$0xff] %v15599_v5 }
 0x4bb   : > { %15573 = vst [vmem:[%s18221_s28 + $0xb8] sm:$0xff] %v15600_v21 }
 0x4bc PF: > { %s13_s16 = sadd.s32 1, %s16480_s16   ;;  %s20407_s12 = smov %s16472_s14 }
 0x4bd   : > { %p10_p7 = scmp.ge.s32.totalorder %s13_s16, 10   ;;  %s20408_s13 = smov %s16476_s15 }
 0x4be   : > { %s20409_s14 = smov %s20412_s17  ;;  %s20410_s15 = smov %s20416_s18 }
 0x4bf   :  { %12 = sbr.rel (!%p10_p7) target bundleno = 3 (0x3), region = 84 }

</bundles_post_ra>
